<compile_context>
chip_gen: v6e
topology: v6e:2x2x1
jax: 0.10.0
libtpu: 0.0.40
codegen_flags: <defaults>
</compile_context>

<pallas_src>
import functools

import numpy as np

import jax
import jax.numpy as jnp
from jax import lax
from jax.experimental import pallas as pl
from jax.experimental.pallas import tpu as pltpu


LANE = 128                       # padded channel width (lane-dense activations)
_VMEM_LIMIT = 32 * 1024 * 1024   # explicit scoped-VMEM limit (safe on v5e/v6e/v7x)


def _round_up(x, m):
    return ((x + m - 1) // m) * m


# ---------------------------------------------------------------------------
# Kernel 1: initial Linear  ->  out = (x @ w) + b   (bf16 MXU, f32 accumulate)
# The NCHW->(h, w, c)-padded output permutation is folded into w/b at prep
# time, so the kernel output is directly the flattened NHWC(C padded to 128)
# layout the first deconv layer consumes.
# ---------------------------------------------------------------------------
def _linear_kernel(x_ref, w_ref, b_ref, o_ref):
    y = jnp.dot(x_ref[...], w_ref[...], preferred_element_type=jnp.float32)
    y = y + b_ref[...]
    o_ref[...] = y.astype(o_ref.dtype)


def linear_call(x, w_p, b_p, *, tm_max=512):
    """x: (M, K) f32; w_p: (Kp, N) bf16 prepped; b_p: (1, N) f32 -> (M, N) bf16."""
    m, k = x.shape
    kp, n = w_p.shape
    mp = _round_up(m, 8)
    tm = min(tm_max, mp)
    mp = _round_up(mp, tm)
    x_p = jnp.zeros((mp, kp), jnp.bfloat16).at[:m, :k].set(x.astype(jnp.bfloat16))
    out = pl.pallas_call(
        _linear_kernel,
        out_shape=jax.ShapeDtypeStruct((mp, n), jnp.bfloat16),
        grid_spec=pltpu.PrefetchScalarGridSpec(
            num_scalar_prefetch=0,
            grid=(mp // tm,),
            in_specs=[
                pl.BlockSpec((tm, kp), lambda i: (i, 0)),   # activation row tiles
                pl.BlockSpec((kp, n), lambda i: (0, 0)),    # weights (VMEM resident)
                pl.BlockSpec((1, n), lambda i: (0, 0)),     # bias
            ],
            out_specs=pl.BlockSpec((tm, n), lambda i: (i, 0)),
        ),
        compiler_params=pltpu.CompilerParams(
            dimension_semantics=("parallel",),
            vmem_limit_bytes=_VMEM_LIMIT),
    )(x_p, w_p, b_p)
    return out[:m]


# ---------------------------------------------------------------------------
# Kernel 2: fused conv as K*K shifted matmuls + BN/bias + activation.
#
# The input is one image's padded (and, for deconv, zero-dilated) activation,
# flattened to rows (hd*wd + extra zero rows, LANE).  For tap (kh, kw) the rows
# needed by ALL output positions form ONE contiguous slice starting at
# kh*wd + kw, so each tap is a single unaligned-but-contiguous load + matmul
# accumulated into a VMEM f32 scratch.  Output row r maps to (oh, j) =
# (r // wd, r % wd); columns j >= OW are wrap-around garbage and are stripped
# by the wrapper (they never contaminate valid outputs).
# ---------------------------------------------------------------------------
def _conv_tap_kernel(x_ref, w_ref, s_ref, t_ref, o_ref, acc_ref, *,
                     ksize, wd, act, pmin, pmax):
    nr = acc_ref.shape[0]
    acc_ref[...] = jnp.zeros_like(acc_ref)
    for kh in range(ksize):
        for kw in range(ksize):
            xs = x_ref[0, pl.ds(kh * wd + kw, nr), :]          # (nr, LANE) bf16
            acc_ref[...] += jnp.dot(xs, w_ref[kh * ksize + kw],
                                    preferred_element_type=jnp.float32)
    y = acc_ref[...] * s_ref[...] + t_ref[...]                  # folded bias / BN (f32)
    if act == "relu":
        y = jnp.maximum(y, 0.0)
    elif act == "sigmoid_rescale":                              # SigmoidRescale
        y = pmin + (pmax - pmin) * pl.reciprocal(1.0 + jnp.exp(-y), approx=True)
    o_ref[0, :, :] = y.astype(o_ref.dtype)


def conv_call(x_rows, layer):
    """x_rows: (B, rin, LANE) bf16 flattened padded input -> (B, ro, LANE) bf16."""
    b = x_rows.shape[0]
    rin, ro, ksize = layer["rin"], layer["ro"], layer["ksize"]
    kernel = functools.partial(
        _conv_tap_kernel, ksize=ksize, wd=layer["wd"],
        act=layer["act"], pmin=layer["pmin"], pmax=layer["pmax"])
    return pl.pallas_call(
        kernel,
        out_shape=jax.ShapeDtypeStruct((b, ro, LANE), jnp.bfloat16),
        grid_spec=pltpu.PrefetchScalarGridSpec(
            num_scalar_prefetch=0,
            grid=(b,),                                          # >= 2 -> v7x megacore
            in_specs=[
                pl.BlockSpec((1, rin, LANE), lambda i: (i, 0, 0)),     # activations
                pl.BlockSpec((ksize * ksize, LANE, LANE), lambda i: (0, 0, 0)),  # taps
                pl.BlockSpec((1, LANE), lambda i: (0, 0)),             # BN scale
                pl.BlockSpec((1, LANE), lambda i: (0, 0)),             # BN/bias shift
            ],
            out_specs=pl.BlockSpec((1, ro, LANE), lambda i: (i, 0, 0)),
            scratch_shapes=[pltpu.VMEM((ro, LANE), jnp.float32)],      # f32 accumulator
        ),
        compiler_params=pltpu.CompilerParams(
            dimension_semantics=("parallel",),
            vmem_limit_bytes=_VMEM_LIMIT),
    )(x_rows, layer["wk"], layer["scale"], layer["shift"])


# ---------------------------------------------------------------------------
# One-time parameter preparation (hoisted out of the forward pass).
# ---------------------------------------------------------------------------
def prepare_decoder(params, cfg, eps=1e-5):
    c0, h0, w0 = cfg["full_input_shape"]
    square_dim = cfg["square_dim"]
    assert c0 <= LANE, "TODO(synk): tile channels > 128"
    prep = {}

    # initial Linear: fold NCHW->(h, w, c)-padded permutation into W / b
    w1_t, b1 = params["w1_t"], params["b1"]                   # (D, c0*h0*w0), (c0*h0*w0,)
    d = w1_t.shape[0]
    kp = _round_up(d, 128)
    w_hw_c = w1_t.reshape(d, c0, h0 * w0).transpose(0, 2, 1)  # (D, h0*w0, c0)
    w1p = jnp.zeros((kp, h0 * w0, LANE), jnp.float32)
    w1p = w1p.at[:d, :, :c0].set(w_hw_c).reshape(kp, h0 * w0 * LANE)
    b1p = jnp.zeros((1, h0 * w0, LANE), jnp.float32)
    b1p = b1p.at[0, :, :c0].set(b1.reshape(c0, h0 * w0).T).reshape(1, h0 * w0 * LANE)
    prep["lin"] = dict(w=w1p.astype(jnp.bfloat16), b=b1p)

    # ConvTranspose2d + BatchNorm2d + ReLU blocks
    layers = []
    ih, iw = h0, w0
    for lp in params["deconv"]:
        ksz, s, p = lp["ksize"], lp["stride"], lp["padding"]
        cin, cout = lp["w"].shape[0], lp["w"].shape[1]
        assert cin <= LANE and cout <= LANE, "TODO(synk): tile channels > 128"
        pp = ksz - 1 - p
        hd = (ih - 1) * s + 1 + 2 * pp
        wd = (iw - 1) * s + 1 + 2 * pp
        oh, ow = hd - ksz + 1, wd - ksz + 1
        ro = _round_up(oh * wd, 8)
        rin = _round_up((ksz - 1) * wd + (ksz - 1) + ro, 8)
        # conv-of-dilated-input form: flip spatial taps, lay out as (K*K, Cp, Np)
        wf = jnp.transpose(lp["w"][:, :, ::-1, ::-1], (2, 3, 0, 1))   # (K,K,cin,cout)
        wk = jnp.zeros((ksz * ksz, LANE, LANE), jnp.float32)
        wk = wk.at[:, :cin, :cout].set(wf.reshape(ksz * ksz, cin, cout))
        inv = lp["gamma"] / jnp.sqrt(lp["rvar"] + eps)
        scale = jnp.ones((1, LANE), jnp.float32).at[0, :cout].set(inv)
        shift = jnp.zeros((1, LANE), jnp.float32).at[0, :cout].set(
            (lp["b"] - lp["rmean"]) * inv + lp["beta"])
        layers.append(dict(wk=wk.astype(jnp.bfloat16), scale=scale, shift=shift,
                           ksize=ksz, stride=s, pp=pp, hd=hd, wd=wd, oh=oh, ow=ow,
                           rin=rin, ro=ro, act="relu", pmin=0.0, pmax=1.0))
        ih, iw = oh, ow
    prep["deconv"] = layers

    # mean head: Conv2d(k=3, pad=1) + SigmoidRescale (after nearest upsample)
    wm, bm = params["wm"], params["bm"]
    cout, cin, ksz, _ = wm.shape
    pp = 1
    hd = square_dim + 2 * pp
    wd = square_dim + 2 * pp
    oh = ow = square_dim
    ro = _round_up(oh * wd, 8)
    rin = _round_up((ksz - 1) * wd + (ksz - 1) + ro, 8)
    wc = jnp.transpose(wm, (2, 3, 1, 0))                              # (K,K,cin,cout)
    wk = jnp.zeros((ksz * ksz, LANE, LANE), jnp.float32)
    wk = wk.at[:, :cin, :cout].set(wc.reshape(ksz * ksz, cin, cout))
    prep["head"] = dict(
        wk=wk.astype(jnp.bfloat16),
        scale=jnp.ones((1, LANE), jnp.float32),
        shift=jnp.zeros((1, LANE), jnp.float32).at[0, :cout].set(bm),
        ksize=ksz, stride=1, pp=pp, hd=hd, wd=wd, oh=oh, ow=ow,
        rin=rin, ro=ro, act="sigmoid_rescale",
        pmin=float(cfg["pixel_min"]), pmax=float(cfg["pixel_max"]), cout=cout)
    return prep


# ---------------------------------------------------------------------------
# Forward pass (wrapper glue is pure data movement on small bf16 arrays)
# ---------------------------------------------------------------------------
def _flat_to_nhwc(xf, oh, ow, wd):
    b = xf.shape[0]
    return xf[:, :oh * wd, :].reshape(b, oh, wd, LANE)[:, :, :ow, :]


def _nhwc_to_conv_rows(x, stride, pp, rin):
    """Interior (stride-1) + edge (pp) zero padding, flattened to (B, rin, LANE)."""
    b = x.shape[0]
    xd = lax.pad(x, jnp.array(0, x.dtype),
                 ((0, 0, 0), (pp, pp, stride - 1), (pp, pp, stride - 1), (0, 0, 0)))
    hd, wd = xd.shape[1], xd.shape[2]
    xf = xd.reshape(b, hd * wd, LANE)
    return jnp.pad(xf, ((0, 0), (0, rin - hd * wd), (0, 0)))


def pixel_decoder_forward(z, prep, cfg):
    """PixelDecoder.forward (learn_scale=False, no action conditioning).
    Returns (mean_pixels, std_pixels) in NCHW — the decoded Normal's parameters."""
    b = z.shape[0]
    _, h0, w0 = cfg["full_input_shape"]
    # initial Linear (permutation + channel padding folded into the weights)
    flat = linear_call(z, prep["lin"]["w"], prep["lin"]["b"])      # (B, h0*w0*128) bf16
    x = flat.reshape(b, h0 * w0, LANE)                             # row = h*w0 + w
    oh, ow, wd = h0, w0, w0
    # decoder stack: ConvTranspose2d + BN + ReLU blocks (one fused kernel each)
    for layer in prep["deconv"]:
        x_nhwc = _flat_to_nhwc(x, oh, ow, wd)
        x_rows = _nhwc_to_conv_rows(x_nhwc, layer["stride"], layer["pp"], layer["rin"])
        x = conv_call(x_rows, layer)
        oh, ow, wd = layer["oh"], layer["ow"], layer["wd"]
    # nn.Upsample((S, S), mode='nearest'): index gather in the wrapper
    s_dim = cfg["square_dim"]
    x_nhwc = _flat_to_nhwc(x, oh, ow, wd)
    ridx = (np.arange(s_dim) * oh) // s_dim
    cidx = (np.arange(s_dim) * ow) // s_dim
    x_up = x_nhwc[:, ridx][:, :, cidx]                             # (B, S, S, 128)
    # mean head: Conv2d(k=3, pad=1) + SigmoidRescale (one fused kernel)
    head = prep["head"]
    x_rows = _nhwc_to_conv_rows(x_up, 1, head["pp"], head["rin"])
    y = conv_call(x_rows, head)
    mean = _flat_to_nhwc(y, head["oh"], head["ow"], head["wd"])[..., :head["cout"]]
    mean = mean.transpose(0, 3, 1, 2).astype(jnp.float32)          # NHWC -> NCHW
    # learn_scale=False -> constant stddev tensor
    std = jnp.full(mean.shape, cfg["constant_stddev"], mean.dtype)
    return mean, std


# ---------------------------------------------------------------------------
# Pure-JAX reference (lax.conv_general_dilated) mirroring the kernel's bf16
# MXU inputs + f32 accumulation so the comparison is tight.
# ---------------------------------------------------------------------------
def _ref_forward(z, params, cfg):
    bf = jnp.bfloat16
    b = z.shape[0]
    c0, h0, w0 = cfg["full_input_shape"]
    h = jnp.dot(z.astype(bf), params["w1_t"].astype(bf),
                preferred_element_type=jnp.float32) + params["b1"]
    x = h.reshape(b, c0, h0, w0)                                   # NCHW
    for lp in params["deconv"]:
        ksize, stride, padding = lp["ksize"], lp["stride"], lp["padding"]
        wf = jnp.transpose(lp["w"][:, :, ::-1, ::-1], (1, 0, 2, 3))  # (cout,cin,k,k)
        y = lax.conv_general_dilated(
            x.astype(bf), wf.astype(bf), window_strides=(1, 1),
            padding=[(ksize - 1 - padding,) * 2] * 2,
            lhs_dilation=(stride, stride),
            dimension_numbers=("NCHW", "OIHW", "NCHW"),
            preferred_element_type=jnp.float32)
        y = y + lp["b"][None, :, None, None]
        inv = lp["gamma"] / jnp.sqrt(lp["rvar"] + 1e-5)
        y = (y - lp["rmean"][None, :, None, None]) * inv[None, :, None, None] \
            + lp["beta"][None, :, None, None]
        x = jnp.maximum(y, 0.0)
    hw = cfg["square_dim"]
    rows = (jnp.arange(hw) * x.shape[2]) // hw
    x = jnp.take(jnp.take(x, rows, axis=2), rows, axis=3)
    y = lax.conv_general_dilated(
        x.astype(bf), params["wm"].astype(bf), window_strides=(1, 1),
        padding=[(1, 1), (1, 1)], dimension_numbers=("NCHW", "OIHW", "NCHW"),
        preferred_element_type=jnp.float32)
    y = y + params["bm"][None, :, None, None]
    mean = cfg["pixel_min"] + (cfg["pixel_max"] - cfg["pixel_min"]) / (1.0 + jnp.exp(-y))
    return mean


if __name__ == "__main__":
    key = jax.random.PRNGKey(0)

    # --- small but module-consistent configuration --------------------------
    obs_channels, square_dim = 3, 16
    encoder_arch = [
        {"out_dim": 32, "kernel_size": 3, "stride": 2},
        {"out_dim": 64, "kernel_size": 3, "stride": 2},
    ]
    representation_dim = 128
    batch = 4
    pixel_min, pixel_max = 0.0, 1.0
    constant_stddev = 0.1

    # compute_decoder_input_shape_from_encoder (mocked Conv2d output shapes)
    hcur = square_dim
    for spec in encoder_arch:
        hcur = (hcur - spec["kernel_size"]) // spec["stride"] + 1
    full_input_shape = (encoder_arch[-1]["out_dim"], hcur, hcur)     # (64, 3, 3)
    flattened_input_dim = full_input_shape[0] * hcur * hcur          # 576

    reversed_arch = list(reversed(encoder_arch))
    cfg = dict(full_input_shape=full_input_shape, square_dim=square_dim,
               pixel_min=pixel_min, pixel_max=pixel_max,
               constant_stddev=constant_stddev)

    # --- deterministic parameters -------------------------------------------
    keys = iter(jax.random.split(key, 32))

    def nrm(shape, scl):
        return jax.random.normal(next(keys), shape, dtype=jnp.float32) * scl

    params = {}
    params["w1_t"] = nrm((representation_dim, flattened_input_dim),
                         1.0 / jnp.sqrt(representation_dim))
    params["b1"] = nrm((flattened_input_dim,), 0.05)

    layer_io = [(reversed_arch[i], reversed_arch[i + 1]["out_dim"])
                for i in range(len(reversed_arch) - 1)]
    layer_io.append((reversed_arch[-1], reversed_arch[-1]["out_dim"]))
    deconv = []
    for spec, cout in layer_io:
        cin, ksize, stride = spec["out_dim"], spec["kernel_size"], spec["stride"]
        pad = spec.get("padding", 0)
        fan_in = cin * ksize * ksize
        deconv.append(dict(
            w=nrm((cin, cout, ksize, ksize), 1.0 / jnp.sqrt(fan_in)),
            b=nrm((cout,), 0.05),
            gamma=1.0 + nrm((cout,), 0.1),
            beta=nrm((cout,), 0.1),
            rmean=nrm((cout,), 0.1),
            rvar=1.0 + 0.5 / (1.0 + jnp.exp(-nrm((cout,), 1.0))),
            ksize=ksize, stride=stride, padding=pad,
        ))
    params["deconv"] = deconv

    last_cout = reversed_arch[-1]["out_dim"]
    params["wm"] = nrm((obs_channels, last_cout, 3, 3), 1.0 / jnp.sqrt(last_cout * 9))
    params["bm"] = nrm((obs_channels,), 0.05)

    # z = mean of the encoded distribution (sample=False -> get_vector -> .mean)
    z = jax.random.normal(next(keys), (batch, representation_dim), dtype=jnp.float32)

    # one-time weight prep (hoisted out of the forward pass), then jitted forward
    prep = prepare_decoder(params, cfg)
    fwd = jax.jit(lambda zz: pixel_decoder_forward(zz, prep, cfg))

    mean_pix, std_pix = fwd(z)
    mean_pix = jax.block_until_ready(mean_pix)
    std_pix = jax.block_until_ready(std_pix)

    ref_mean = _ref_forward(z, params, cfg)

    assert mean_pix.shape == (batch, obs_channels, square_dim, square_dim)
    assert std_pix.shape == mean_pix.shape
    assert bool(jnp.all(std_pix == constant_stddev))
    # bf16 output store + approx reciprocal leave a tiny slack around the range
    assert bool(jnp.all(mean_pix >= pixel_min - 1e-2))
    assert bool(jnp.all(mean_pix <= pixel_max + 1e-2))
    err = float(jnp.max(jnp.abs(mean_pix - ref_mean)))
    assert err < 2e-2, f"mismatch vs reference: max abs err {err}"

    print("KERNEL_OK")
</pallas_src>

<mosaic_0001>
module attributes {stable_mosaic.version = 11 : i64} {
  func.func @_linear_kernel(%arg0: i32, %arg1: memref<8x128xbf16, #tpu.memory_space<vmem>>, %arg2: memref<128x1152xbf16, #tpu.memory_space<vmem>>, %arg3: memref<1x1152xf32, #tpu.memory_space<vmem>>, %arg4: memref<8x1152xbf16, #tpu.memory_space<vmem>>) attributes {dimension_semantics = [#tpu.dimension_semantics<parallel>], iteration_bounds = array<i64: 1>, scalar_prefetch = 0 : i64, scratch_operands = 0 : i64, tpu.core_type = #tpu.core_type<tc>, window_params = [{transform_indices = @transform_0, window_bounds = array<i64: 8, 128>}, {pipeline_mode = #tpu.pipeline_mode<synchronous>, transform_indices = @transform_1, window_bounds = array<i64: 128, 1152>}, {pipeline_mode = #tpu.pipeline_mode<synchronous>, transform_indices = @transform_2, window_bounds = array<i64: 1, 1152>}, {transform_indices = @transform_3, window_bounds = array<i64: 8, 1152>}]} {
    %c0 = arith.constant 0 : index
    %c0_0 = arith.constant 0 : index
    %0 = vector.load %arg1[%c0, %c0_0] : memref<8x128xbf16, #tpu.memory_space<vmem>>, vector<8x128xbf16>
    %c0_1 = arith.constant 0 : index
    %c0_2 = arith.constant 0 : index
    %1 = vector.load %arg2[%c0_1, %c0_2] : memref<128x1152xbf16, #tpu.memory_space<vmem>>, vector<128x1152xbf16>
    %cst = arith.constant dense<0.000000e+00> : vector<8x1152xf32>
    %2 = tpu.matmul %0, %1, %cst {dimension_numbers = #tpu.dot_dimension_numbers<[1], [0], [0], [1], [0, 0, 1, 1], [], []>} : vector<8x128xbf16>, vector<128x1152xbf16>, vector<8x1152xf32> -> vector<8x1152xf32>
    %c0_3 = arith.constant 0 : index
    %c0_4 = arith.constant 0 : index
    %3 = vector.load %arg3[%c0_3, %c0_4] : memref<1x1152xf32, #tpu.memory_space<vmem>>, vector<1x1152xf32>
    %4 = vector.broadcast %3 : vector<1x1152xf32> to vector<8x1152xf32>
    %5 = arith.addf %2, %4 : vector<8x1152xf32>
    %6 = arith.truncf %5 : vector<8x1152xf32> to vector<8x1152xbf16>
    %c0_5 = arith.constant 0 : index
    %c0_6 = arith.constant 0 : index
    %7 = vector.load %arg4[%c0_5, %c0_6] : memref<8x1152xbf16, #tpu.memory_space<vmem>>, vector<8x1152xbf16>
    tpu.vector_store %arg4[%c0_5, %c0_6], %6 {strides = array<i32>} : memref<8x1152xbf16, #tpu.memory_space<vmem>>, vector<8x1152xbf16>,
    return
  }
  func.func @transform_0(%arg0: i32) -> (i32, i32) {
    %c0_i32 = arith.constant 0 : i32
    %c0_i32_0 = arith.constant 0 : i32
    return %arg0, %c0_i32 : i32, i32
  }
  func.func @transform_1(%arg0: i32) -> (i32, i32) {
    %c0_i32 = arith.constant 0 : i32
    %c0_i32_0 = arith.constant 0 : i32
    %c0_i32_1 = arith.constant 0 : i32
    return %c0_i32, %c0_i32_0 : i32, i32
  }
  func.func @transform_2(%arg0: i32) -> (i32, i32) {
    %c0_i32 = arith.constant 0 : i32
    %c0_i32_0 = arith.constant 0 : i32
    %c0_i32_1 = arith.constant 0 : i32
    return %c0_i32, %c0_i32_0 : i32, i32
  }
  func.func @transform_3(%arg0: i32) -> (i32, i32) {
    %c0_i32 = arith.constant 0 : i32
    %c0_i32_0 = arith.constant 0 : i32
    return %arg0, %c0_i32 : i32, i32
  }
}

module attributes {stable_mosaic.version = 11 : i64} {
  func.func @_conv_tap_kernel(%arg0: i32, %arg1: memref<1x88x128xbf16, #tpu.memory_space<vmem>>, %arg2: memref<9x128x128xbf16, #tpu.memory_space<vmem>>, %arg3: memref<1x128xf32, #tpu.memory_space<vmem>>, %arg4: memref<1x128xf32, #tpu.memory_space<vmem>>, %arg5: memref<1x64x128xbf16, #tpu.memory_space<vmem>>, %arg6: memref<64x128xf32, #tpu.memory_space<vmem>>) attributes {dimension_semantics = [#tpu.dimension_semantics<parallel>], iteration_bounds = array<i64: 4>, scalar_prefetch = 0 : i64, scratch_operands = 1 : i64, tpu.core_type = #tpu.core_type<tc>, window_params = [{transform_indices = @transform_0, window_bounds = array<i64: 1, 88, 128>}, {pipeline_mode = #tpu.pipeline_mode<synchronous>, transform_indices = @transform_1, window_bounds = array<i64: 9, 128, 128>}, {pipeline_mode = #tpu.pipeline_mode<synchronous>, transform_indices = @transform_2, window_bounds = array<i64: 1, 128>}, {pipeline_mode = #tpu.pipeline_mode<synchronous>, transform_indices = @transform_3, window_bounds = array<i64: 1, 128>}, {transform_indices = @transform_4, window_bounds = array<i64: 1, 64, 128>}]} {
    %cst = arith.constant 0.000000e+00 : f32
    %0 = vector.broadcast %cst : f32 to vector<64x128xf32>
    %c0 = arith.constant 0 : index
    %c0_0 = arith.constant 0 : index
    %1 = vector.load %arg6[%c0, %c0_0] : memref<64x128xf32, #tpu.memory_space<vmem>>, vector<64x128xf32>
    tpu.vector_store %arg6[%c0, %c0_0], %0 {strides = array<i32>} : memref<64x128xf32, #tpu.memory_space<vmem>>, vector<64x128xf32>,
    %c0_1 = arith.constant 0 : index
    %c0_2 = arith.constant 0 : index
    %c0_3 = arith.constant 0 : index
    %2 = vector.load %arg1[%c0_1, %c0_2, %c0_3] : memref<1x88x128xbf16, #tpu.memory_space<vmem>>, vector<1x64x128xbf16>
    %3 = vector.shape_cast %2 : vector<1x64x128xbf16> to vector<64x128xbf16>
    %c0_4 = arith.constant 0 : index
    %c0_5 = arith.constant 0 : index
    %4 = vector.load %arg6[%c0_4, %c0_5] : memref<64x128xf32, #tpu.memory_space<vmem>>, vector<64x128xf32>
    %c0_6 = arith.constant 0 : index
    %c0_7 = arith.constant 0 : index
    %c0_8 = arith.constant 0 : index
    %5 = vector.load %arg2[%c0_6, %c0_7, %c0_8] : memref<9x128x128xbf16, #tpu.memory_space<vmem>>, vector<1x128x128xbf16>
    %6 = vector.shape_cast %5 : vector<1x128x128xbf16> to vector<128x128xbf16>
    %cst_9 = arith.constant dense<0.000000e+00> : vector<64x128xf32>
    %7 = tpu.matmul %3, %6, %cst_9 {dimension_numbers = #tpu.dot_dimension_numbers<[1], [0], [0], [1], [0, 0, 1, 1], [], []>} : vector<64x128xbf16>, vector<128x128xbf16>, vector<64x128xf32> -> vector<64x128xf32>
    %8 = arith.addf %4, %7 : vector<64x128xf32>
    %c0_10 = arith.constant 0 : index
    %c0_11 = arith.constant 0 : index
    %9 = vector.load %arg6[%c0_10, %c0_11] : memref<64x128xf32, #tpu.memory_space<vmem>>, vector<64x128xf32>
    tpu.vector_store %arg6[%c0_10, %c0_11], %8 {strides = array<i32>} : memref<64x128xf32, #tpu.memory_space<vmem>>, vector<64x128xf32>,
    %c0_12 = arith.constant 0 : index
    %c1 = arith.constant 1 : index
    %c0_13 = arith.constant 0 : index
    %10 = vector.load %arg1[%c0_12, %c1, %c0_13] : memref<1x88x128xbf16, #tpu.memory_space<vmem>>, vector<1x64x128xbf16>
    %11 = vector.shape_cast %10 : vector<1x64x128xbf16> to vector<64x128xbf16>
    %c0_14 = arith.constant 0 : index
    %c0_15 = arith.constant 0 : index
    %12 = vector.load %arg6[%c0_14, %c0_15] : memref<64x128xf32, #tpu.memory_space<vmem>>, vector<64x128xf32>
    %c1_16 = arith.constant 1 : index
    %c0_17 = arith.constant 0 : index
    %c0_18 = arith.constant 0 : index
    %13 = vector.load %arg2[%c1_16, %c0_17, %c0_18] : memref<9x128x128xbf16, #tpu.memory_space<vmem>>, vector<1x128x128xbf16>
    %14 = vector.shape_cast %13 : vector<1x128x128xbf16> to vector<128x128xbf16>
    %cst_19 = arith.constant dense<0.000000e+00> : vector<64x128xf32>
    %15 = tpu.matmul %11, %14, %cst_19 {dimension_numbers = #tpu.dot_dimension_numbers<[1], [0], [0], [1], [0, 0, 1, 1], [], []>} : vector<64x128xbf16>, vector<128x128xbf16>, vector<64x128xf32> -> vector<64x128xf32>
    %16 = arith.addf %12, %15 : vector<64x128xf32>
    %c0_20 = arith.constant 0 : index
    %c0_21 = arith.constant 0 : index
    %17 = vector.load %arg6[%c0_20, %c0_21] : memref<64x128xf32, #tpu.memory_space<vmem>>, vector<64x128xf32>
    tpu.vector_store %arg6[%c0_20, %c0_21], %16 {strides = array<i32>} : memref<64x128xf32, #tpu.memory_space<vmem>>, vector<64x128xf32>,
    %c0_22 = arith.constant 0 : index
    %c2 = arith.constant 2 : index
    %c0_23 = arith.constant 0 : index
    %18 = vector.load %arg1[%c0_22, %c2, %c0_23] : memref<1x88x128xbf16, #tpu.memory_space<vmem>>, vector<1x64x128xbf16>
    %19 = vector.shape_cast %18 : vector<1x64x128xbf16> to vector<64x128xbf16>
    %c0_24 = arith.constant 0 : index
    %c0_25 = arith.constant 0 : index
    %20 = vector.load %arg6[%c0_24, %c0_25] : memref<64x128xf32, #tpu.memory_space<vmem>>, vector<64x128xf32>
    %c2_26 = arith.constant 2 : index
    %c0_27 = arith.constant 0 : index
    %c0_28 = arith.constant 0 : index
    %21 = vector.load %arg2[%c2_26, %c0_27, %c0_28] : memref<9x128x128xbf16, #tpu.memory_space<vmem>>, vector<1x128x128xbf16>
    %22 = vector.shape_cast %21 : vector<1x128x128xbf16> to vector<128x128xbf16>
    %cst_29 = arith.constant dense<0.000000e+00> : vector<64x128xf32>
    %23 = tpu.matmul %19, %22, %cst_29 {dimension_numbers = #tpu.dot_dimension_numbers<[1], [0], [0], [1], [0, 0, 1, 1], [], []>} : vector<64x128xbf16>, vector<128x128xbf16>, vector<64x128xf32> -> vector<64x128xf32>
    %24 = arith.addf %20, %23 : vector<64x128xf32>
    %c0_30 = arith.constant 0 : index
    %c0_31 = arith.constant 0 : index
    %25 = vector.load %arg6[%c0_30, %c0_31] : memref<64x128xf32, #tpu.memory_space<vmem>>, vector<64x128xf32>
    tpu.vector_store %arg6[%c0_30, %c0_31], %24 {strides = array<i32>} : memref<64x128xf32, #tpu.memory_space<vmem>>, vector<64x128xf32>,
    %c0_32 = arith.constant 0 : index
    %c9 = arith.constant 9 : index
    %c0_33 = arith.constant 0 : index
    %26 = vector.load %arg1[%c0_32, %c9, %c0_33] : memref<1x88x128xbf16, #tpu.memory_space<vmem>>, vector<1x64x128xbf16>
    %27 = vector.shape_cast %26 : vector<1x64x128xbf16> to vector<64x128xbf16>
    %c0_34 = arith.constant 0 : index
    %c0_35 = arith.constant 0 : index
    %28 = vector.load %arg6[%c0_34, %c0_35] : memref<64x128xf32, #tpu.memory_space<vmem>>, vector<64x128xf32>
    %c3 = arith.constant 3 : index
    %c0_36 = arith.constant 0 : index
    %c0_37 = arith.constant 0 : index
    %29 = vector.load %arg2[%c3, %c0_36, %c0_37] : memref<9x128x128xbf16, #tpu.memory_space<vmem>>, vector<1x128x128xbf16>
    %30 = vector.shape_cast %29 : vector<1x128x128xbf16> to vector<128x128xbf16>
    %cst_38 = arith.constant dense<0.000000e+00> : vector<64x128xf32>
    %31 = tpu.matmul %27, %30, %cst_38 {dimension_numbers = #tpu.dot_dimension_numbers<[1], [0], [0], [1], [0, 0, 1, 1], [], []>} : vector<64x128xbf16>, vector<128x128xbf16>, vector<64x128xf32> -> vector<64x128xf32>
    %32 = arith.addf %28, %31 : vector<64x128xf32>
    %c0_39 = arith.constant 0 : index
    %c0_40 = arith.constant 0 : index
    %33 = vector.load %arg6[%c0_39, %c0_40] : memref<64x128xf32, #tpu.memory_space<vmem>>, vector<64x128xf32>
    tpu.vector_store %arg6[%c0_39, %c0_40], %32 {strides = array<i32>} : memref<64x128xf32, #tpu.memory_space<vmem>>, vector<64x128xf32>,
    %c0_41 = arith.constant 0 : index
    %c10 = arith.constant 10 : index
    %c0_42 = arith.constant 0 : index
    %34 = vector.load %arg1[%c0_41, %c10, %c0_42] : memref<1x88x128xbf16, #tpu.memory_space<vmem>>, vector<1x64x128xbf16>
    %35 = vector.shape_cast %34 : vector<1x64x128xbf16> to vector<64x128xbf16>
    %c0_43 = arith.constant 0 : index
    %c0_44 = arith.constant 0 : index
    %36 = vector.load %arg6[%c0_43, %c0_44] : memref<64x128xf32, #tpu.memory_space<vmem>>, vector<64x128xf32>
    %c4 = arith.constant 4 : index
    %c0_45 = arith.constant 0 : index
    %c0_46 = arith.constant 0 : index
    %37 = vector.load %arg2[%c4, %c0_45, %c0_46] : memref<9x128x128xbf16, #tpu.memory_space<vmem>>, vector<1x128x128xbf16>
    %38 = vector.shape_cast %37 : vector<1x128x128xbf16> to vector<128x128xbf16>
    %cst_47 = arith.constant dense<0.000000e+00> : vector<64x128xf32>
    %39 = tpu.matmul %35, %38, %cst_47 {dimension_numbers = #tpu.dot_dimension_numbers<[1], [0], [0], [1], [0, 0, 1, 1], [], []>} : vector<64x128xbf16>, vector<128x128xbf16>, vector<64x128xf32> -> vector<64x128xf32>
    %40 = arith.addf %36, %39 : vector<64x128xf32>
    %c0_48 = arith.constant 0 : index
    %c0_49 = arith.constant 0 : index
    %41 = vector.load %arg6[%c0_48, %c0_49] : memref<64x128xf32, #tpu.memory_space<vmem>>, vector<64x128xf32>
    tpu.vector_store %arg6[%c0_48, %c0_49], %40 {strides = array<i32>} : memref<64x128xf32, #tpu.memory_space<vmem>>, vector<64x128xf32>,
    %c0_50 = arith.constant 0 : index
    %c11 = arith.constant 11 : index
    %c0_51 = arith.constant 0 : index
    %42 = vector.load %arg1[%c0_50, %c11, %c0_51] : memref<1x88x128xbf16, #tpu.memory_space<vmem>>, vector<1x64x128xbf16>
    %43 = vector.shape_cast %42 : vector<1x64x128xbf16> to vector<64x128xbf16>
    %c0_52 = arith.constant 0 : index
    %c0_53 = arith.constant 0 : index
    %44 = vector.load %arg6[%c0_52, %c0_53] : memref<64x128xf32, #tpu.memory_space<vmem>>, vector<64x128xf32>
    %c5 = arith.constant 5 : index
    %c0_54 = arith.constant 0 : index
    %c0_55 = arith.constant 0 : index
    %45 = vector.load %arg2[%c5, %c0_54, %c0_55] : memref<9x128x128xbf16, #tpu.memory_space<vmem>>, vector<1x128x128xbf16>
    %46 = vector.shape_cast %45 : vector<1x128x128xbf16> to vector<128x128xbf16>
    %cst_56 = arith.constant dense<0.000000e+00> : vector<64x128xf32>
    %47 = tpu.matmul %43, %46, %cst_56 {dimension_numbers = #tpu.dot_dimension_numbers<[1], [0], [0], [1], [0, 0, 1, 1], [], []>} : vector<64x128xbf16>, vector<128x128xbf16>, vector<64x128xf32> -> vector<64x128xf32>
    %48 = arith.addf %44, %47 : vector<64x128xf32>
    %c0_57 = arith.constant 0 : index
    %c0_58 = arith.constant 0 : index
    %49 = vector.load %arg6[%c0_57, %c0_58] : memref<64x128xf32, #tpu.memory_space<vmem>>, vector<64x128xf32>
    tpu.vector_store %arg6[%c0_57, %c0_58], %48 {strides = array<i32>} : memref<64x128xf32, #tpu.memory_space<vmem>>, vector<64x128xf32>,
    %c0_59 = arith.constant 0 : index
    %c18 = arith.constant 18 : index
    %c0_60 = arith.constant 0 : index
    %50 = vector.load %arg1[%c0_59, %c18, %c0_60] : memref<1x88x128xbf16, #tpu.memory_space<vmem>>, vector<1x64x128xbf16>
    %51 = vector.shape_cast %50 : vector<1x64x128xbf16> to vector<64x128xbf16>
    %c0_61 = arith.constant 0 : index
    %c0_62 = arith.constant 0 : index
    %52 = vector.load %arg6[%c0_61, %c0_62] : memref<64x128xf32, #tpu.memory_space<vmem>>, vector<64x128xf32>
    %c6 = arith.constant 6 : index
    %c0_63 = arith.constant 0 : index
    %c0_64 = arith.constant 0 : index
    %53 = vector.load %arg2[%c6, %c0_63, %c0_64] : memref<9x128x128xbf16, #tpu.memory_space<vmem>>, vector<1x128x128xbf16>
    %54 = vector.shape_cast %53 : vector<1x128x128xbf16> to vector<128x128xbf16>
    %cst_65 = arith.constant dense<0.000000e+00> : vector<64x128xf32>
    %55 = tpu.matmul %51, %54, %cst_65 {dimension_numbers = #tpu.dot_dimension_numbers<[1], [0], [0], [1], [0, 0, 1, 1], [], []>} : vector<64x128xbf16>, vector<128x128xbf16>, vector<64x128xf32> -> vector<64x128xf32>
    %56 = arith.addf %52, %55 : vector<64x128xf32>
    %c0_66 = arith.constant 0 : index
    %c0_67 = arith.constant 0 : index
    %57 = vector.load %arg6[%c0_66, %c0_67] : memref<64x128xf32, #tpu.memory_space<vmem>>, vector<64x128xf32>
    tpu.vector_store %arg6[%c0_66, %c0_67], %56 {strides = array<i32>} : memref<64x128xf32, #tpu.memory_space<vmem>>, vector<64x128xf32>,
    %c0_68 = arith.constant 0 : index
    %c19 = arith.constant 19 : index
    %c0_69 = arith.constant 0 : index
    %58 = vector.load %arg1[%c0_68, %c19, %c0_69] : memref<1x88x128xbf16, #tpu.memory_space<vmem>>, vector<1x64x128xbf16>
    %59 = vector.shape_cast %58 : vector<1x64x128xbf16> to vector<64x128xbf16>
    %c0_70 = arith.constant 0 : index
    %c0_71 = arith.constant 0 : index
    %60 = vector.load %arg6[%c0_70, %c0_71] : memref<64x128xf32, #tpu.memory_space<vmem>>, vector<64x128xf32>
    %c7 = arith.constant 7 : index
    %c0_72 = arith.constant 0 : index
    %c0_73 = arith.constant 0 : index
    %61 = vector.load %arg2[%c7, %c0_72, %c0_73] : memref<9x128x128xbf16, #tpu.memory_space<vmem>>, vector<1x128x128xbf16>
    %62 = vector.shape_cast %61 : vector<1x128x128xbf16> to vector<128x128xbf16>
    %cst_74 = arith.constant dense<0.000000e+00> : vector<64x128xf32>
    %63 = tpu.matmul %59, %62, %cst_74 {dimension_numbers = #tpu.dot_dimension_numbers<[1], [0], [0], [1], [0, 0, 1, 1], [], []>} : vector<64x128xbf16>, vector<128x128xbf16>, vector<64x128xf32> -> vector<64x128xf32>
    %64 = arith.addf %60, %63 : vector<64x128xf32>
    %c0_75 = arith.constant 0 : index
    %c0_76 = arith.constant 0 : index
    %65 = vector.load %arg6[%c0_75, %c0_76] : memref<64x128xf32, #tpu.memory_space<vmem>>, vector<64x128xf32>
    tpu.vector_store %arg6[%c0_75, %c0_76], %64 {strides = array<i32>} : memref<64x128xf32, #tpu.memory_space<vmem>>, vector<64x128xf32>,
    %c0_77 = arith.constant 0 : index
    %c20 = arith.constant 20 : index
    %c0_78 = arith.constant 0 : index
    %66 = vector.load %arg1[%c0_77, %c20, %c0_78] : memref<1x88x128xbf16, #tpu.memory_space<vmem>>, vector<1x64x128xbf16>
    %67 = vector.shape_cast %66 : vector<1x64x128xbf16> to vector<64x128xbf16>
    %c0_79 = arith.constant 0 : index
    %c0_80 = arith.constant 0 : index
    %68 = vector.load %arg6[%c0_79, %c0_80] : memref<64x128xf32, #tpu.memory_space<vmem>>, vector<64x128xf32>
    %c8 = arith.constant 8 : index
    %c0_81 = arith.constant 0 : index
    %c0_82 = arith.constant 0 : index
    %69 = vector.load %arg2[%c8, %c0_81, %c0_82] : memref<9x128x128xbf16, #tpu.memory_space<vmem>>, vector<1x128x128xbf16>
    %70 = vector.shape_cast %69 : vector<1x128x128xbf16> to vector<128x128xbf16>
    %cst_83 = arith.constant dense<0.000000e+00> : vector<64x128xf32>
    %71 = tpu.matmul %67, %70, %cst_83 {dimension_numbers = #tpu.dot_dimension_numbers<[1], [0], [0], [1], [0, 0, 1, 1], [], []>} : vector<64x128xbf16>, vector<128x128xbf16>, vector<64x128xf32> -> vector<64x128xf32>
    %72 = arith.addf %68, %71 : vector<64x128xf32>
    %c0_84 = arith.constant 0 : index
    %c0_85 = arith.constant 0 : index
    %73 = vector.load %arg6[%c0_84, %c0_85] : memref<64x128xf32, #tpu.memory_space<vmem>>, vector<64x128xf32>
    tpu.vector_store %arg6[%c0_84, %c0_85], %72 {strides = array<i32>} : memref<64x128xf32, #tpu.memory_space<vmem>>, vector<64x128xf32>,
    %c0_86 = arith.constant 0 : index
    %c0_87 = arith.constant 0 : index
    %74 = vector.load %arg6[%c0_86, %c0_87] : memref<64x128xf32, #tpu.memory_space<vmem>>, vector<64x128xf32>
    %c0_88 = arith.constant 0 : index
    %c0_89 = arith.constant 0 : index
    %75 = vector.load %arg3[%c0_88, %c0_89] : memref<1x128xf32, #tpu.memory_space<vmem>>, vector<1x128xf32>
    %76 = vector.broadcast %75 : vector<1x128xf32> to vector<64x128xf32>
    %77 = arith.mulf %74, %76 : vector<64x128xf32>
    %c0_90 = arith.constant 0 : index
    %c0_91 = arith.constant 0 : index
    %78 = vector.load %arg4[%c0_90, %c0_91] : memref<1x128xf32, #tpu.memory_space<vmem>>, vector<1x128xf32>
    %79 = vector.broadcast %78 : vector<1x128xf32> to vector<64x128xf32>
    %80 = arith.addf %77, %79 : vector<64x128xf32>
    %cst_92 = arith.constant 0.000000e+00 : f32
    %81 = vector.broadcast %cst_92 : f32 to vector<64x128xf32>
    %82 = arith.maximumf %80, %81 : vector<64x128xf32>
    %83 = arith.truncf %82 : vector<64x128xf32> to vector<64x128xbf16>
    %c0_93 = arith.constant 0 : index
    %c0_94 = arith.constant 0 : index
    %c0_95 = arith.constant 0 : index
    %84 = vector.load %arg5[%c0_93, %c0_94, %c0_95] : memref<1x64x128xbf16, #tpu.memory_space<vmem>>, vector<1x64x128xbf16>
    %85 = vector.shape_cast %84 : vector<1x64x128xbf16> to vector<64x128xbf16>
    %86 = vector.shape_cast %83 : vector<64x128xbf16> to vector<1x64x128xbf16>
    tpu.vector_store %arg5[%c0_93, %c0_94, %c0_95], %86 {strides = array<i32>} : memref<1x64x128xbf16, #tpu.memory_space<vmem>>, vector<1x64x128xbf16>,
    return
  }
  func.func @transform_0(%arg0: i32) -> (i32, i32, i32) {
    %c0_i32 = arith.constant 0 : i32
    %c0_i32_0 = arith.constant 0 : i32
    %c0_i32_1 = arith.constant 0 : i32
    return %arg0, %c0_i32, %c0_i32_0 : i32, i32, i32
  }
  func.func @transform_1(%arg0: i32) -> (i32, i32, i32) {
    %c0_i32 = arith.constant 0 : i32
    %c0_i32_0 = arith.constant 0 : i32
    %c0_i32_1 = arith.constant 0 : i32
    %c0_i32_2 = arith.constant 0 : i32
    return %c0_i32, %c0_i32_0, %c0_i32_1 : i32, i32, i32
  }
  func.func @transform_2(%arg0: i32) -> (i32, i32) {
    %c0_i32 = arith.constant 0 : i32
    %c0_i32_0 = arith.constant 0 : i32
    %c0_i32_1 = arith.constant 0 : i32
    return %c0_i32, %c0_i32_0 : i32, i32
  }
  func.func @transform_3(%arg0: i32) -> (i32, i32) {
    %c0_i32 = arith.constant 0 : i32
    %c0_i32_0 = arith.constant 0 : i32
    %c0_i32_1 = arith.constant 0 : i32
    return %c0_i32, %c0_i32_0 : i32, i32
  }
  func.func @transform_4(%arg0: i32) -> (i32, i32, i32) {
    %c0_i32 = arith.constant 0 : i32
    %c0_i32_0 = arith.constant 0 : i32
    %c0_i32_1 = arith.constant 0 : i32
    return %arg0, %c0_i32, %c0_i32_0 : i32, i32, i32
  }
}

module attributes {stable_mosaic.version = 11 : i64} {
  func.func @_conv_tap_kernel(%arg0: i32, %arg1: memref<1x296x128xbf16, #tpu.memory_space<vmem>>, %arg2: memref<9x128x128xbf16, #tpu.memory_space<vmem>>, %arg3: memref<1x128xf32, #tpu.memory_space<vmem>>, %arg4: memref<1x128xf32, #tpu.memory_space<vmem>>, %arg5: memref<1x256x128xbf16, #tpu.memory_space<vmem>>, %arg6: memref<256x128xf32, #tpu.memory_space<vmem>>) attributes {dimension_semantics = [#tpu.dimension_semantics<parallel>], iteration_bounds = array<i64: 4>, scalar_prefetch = 0 : i64, scratch_operands = 1 : i64, tpu.core_type = #tpu.core_type<tc>, window_params = [{transform_indices = @transform_0, window_bounds = array<i64: 1, 296, 128>}, {pipeline_mode = #tpu.pipeline_mode<synchronous>, transform_indices = @transform_1, window_bounds = array<i64: 9, 128, 128>}, {pipeline_mode = #tpu.pipeline_mode<synchronous>, transform_indices = @transform_2, window_bounds = array<i64: 1, 128>}, {pipeline_mode = #tpu.pipeline_mode<synchronous>, transform_indices = @transform_3, window_bounds = array<i64: 1, 128>}, {transform_indices = @transform_4, window_bounds = array<i64: 1, 256, 128>}]} {
    %cst = arith.constant 0.000000e+00 : f32
    %0 = vector.broadcast %cst : f32 to vector<256x128xf32>
    %c0 = arith.constant 0 : index
    %c0_0 = arith.constant 0 : index
    %1 = vector.load %arg6[%c0, %c0_0] : memref<256x128xf32, #tpu.memory_space<vmem>>, vector<256x128xf32>
    tpu.vector_store %arg6[%c0, %c0_0], %0 {strides = array<i32>} : memref<256x128xf32, #tpu.memory_space<vmem>>, vector<256x128xf32>,
    %c0_1 = arith.constant 0 : index
    %c0_2 = arith.constant 0 : index
    %c0_3 = arith.constant 0 : index
    %2 = vector.load %arg1[%c0_1, %c0_2, %c0_3] : memref<1x296x128xbf16, #tpu.memory_space<vmem>>, vector<1x256x128xbf16>
    %3 = vector.shape_cast %2 : vector<1x256x128xbf16> to vector<256x128xbf16>
    %c0_4 = arith.constant 0 : index
    %c0_5 = arith.constant 0 : index
    %4 = vector.load %arg6[%c0_4, %c0_5] : memref<256x128xf32, #tpu.memory_space<vmem>>, vector<256x128xf32>
    %c0_6 = arith.constant 0 : index
    %c0_7 = arith.constant 0 : index
    %c0_8 = arith.constant 0 : index
    %5 = vector.load %arg2[%c0_6, %c0_7, %c0_8] : memref<9x128x128xbf16, #tpu.memory_space<vmem>>, vector<1x128x128xbf16>
    %6 = vector.shape_cast %5 : vector<1x128x128xbf16> to vector<128x128xbf16>
    %cst_9 = arith.constant dense<0.000000e+00> : vector<256x128xf32>
    %7 = tpu.matmul %3, %6, %cst_9 {dimension_numbers = #tpu.dot_dimension_numbers<[1], [0], [0], [1], [0, 0, 1, 1], [], []>} : vector<256x128xbf16>, vector<128x128xbf16>, vector<256x128xf32> -> vector<256x128xf32>
    %8 = arith.addf %4, %7 : vector<256x128xf32>
    %c0_10 = arith.constant 0 : index
    %c0_11 = arith.constant 0 : index
    %9 = vector.load %arg6[%c0_10, %c0_11] : memref<256x128xf32, #tpu.memory_space<vmem>>, vector<256x128xf32>
    tpu.vector_store %arg6[%c0_10, %c0_11], %8 {strides = array<i32>} : memref<256x128xf32, #tpu.memory_space<vmem>>, vector<256x128xf32>,
    %c0_12 = arith.constant 0 : index
    %c1 = arith.constant 1 : index
    %c0_13 = arith.constant 0 : index
    %10 = vector.load %arg1[%c0_12, %c1, %c0_13] : memref<1x296x128xbf16, #tpu.memory_space<vmem>>, vector<1x256x128xbf16>
    %11 = vector.shape_cast %10 : vector<1x256x128xbf16> to vector<256x128xbf16>
    %c0_14 = arith.constant 0 : index
    %c0_15 = arith.constant 0 : index
    %12 = vector.load %arg6[%c0_14, %c0_15] : memref<256x128xf32, #tpu.memory_space<vmem>>, vector<256x128xf32>
    %c1_16 = arith.constant 1 : index
    %c0_17 = arith.constant 0 : index
    %c0_18 = arith.constant 0 : index
    %13 = vector.load %arg2[%c1_16, %c0_17, %c0_18] : memref<9x128x128xbf16, #tpu.memory_space<vmem>>, vector<1x128x128xbf16>
    %14 = vector.shape_cast %13 : vector<1x128x128xbf16> to vector<128x128xbf16>
    %cst_19 = arith.constant dense<0.000000e+00> : vector<256x128xf32>
    %15 = tpu.matmul %11, %14, %cst_19 {dimension_numbers = #tpu.dot_dimension_numbers<[1], [0], [0], [1], [0, 0, 1, 1], [], []>} : vector<256x128xbf16>, vector<128x128xbf16>, vector<256x128xf32> -> vector<256x128xf32>
    %16 = arith.addf %12, %15 : vector<256x128xf32>
    %c0_20 = arith.constant 0 : index
    %c0_21 = arith.constant 0 : index
    %17 = vector.load %arg6[%c0_20, %c0_21] : memref<256x128xf32, #tpu.memory_space<vmem>>, vector<256x128xf32>
    tpu.vector_store %arg6[%c0_20, %c0_21], %16 {strides = array<i32>} : memref<256x128xf32, #tpu.memory_space<vmem>>, vector<256x128xf32>,
    %c0_22 = arith.constant 0 : index
    %c2 = arith.constant 2 : index
    %c0_23 = arith.constant 0 : index
    %18 = vector.load %arg1[%c0_22, %c2, %c0_23] : memref<1x296x128xbf16, #tpu.memory_space<vmem>>, vector<1x256x128xbf16>
    %19 = vector.shape_cast %18 : vector<1x256x128xbf16> to vector<256x128xbf16>
    %c0_24 = arith.constant 0 : index
    %c0_25 = arith.constant 0 : index
    %20 = vector.load %arg6[%c0_24, %c0_25] : memref<256x128xf32, #tpu.memory_space<vmem>>, vector<256x128xf32>
    %c2_26 = arith.constant 2 : index
    %c0_27 = arith.constant 0 : index
    %c0_28 = arith.constant 0 : index
    %21 = vector.load %arg2[%c2_26, %c0_27, %c0_28] : memref<9x128x128xbf16, #tpu.memory_space<vmem>>, vector<1x128x128xbf16>
    %22 = vector.shape_cast %21 : vector<1x128x128xbf16> to vector<128x128xbf16>
    %cst_29 = arith.constant dense<0.000000e+00> : vector<256x128xf32>
    %23 = tpu.matmul %19, %22, %cst_29 {dimension_numbers = #tpu.dot_dimension_numbers<[1], [0], [0], [1], [0, 0, 1, 1], [], []>} : vector<256x128xbf16>, vector<128x128xbf16>, vector<256x128xf32> -> vector<256x128xf32>
    %24 = arith.addf %20, %23 : vector<256x128xf32>
    %c0_30 = arith.constant 0 : index
    %c0_31 = arith.constant 0 : index
    %25 = vector.load %arg6[%c0_30, %c0_31] : memref<256x128xf32, #tpu.memory_space<vmem>>, vector<256x128xf32>
    tpu.vector_store %arg6[%c0_30, %c0_31], %24 {strides = array<i32>} : memref<256x128xf32, #tpu.memory_space<vmem>>, vector<256x128xf32>,
    %c0_32 = arith.constant 0 : index
    %c17 = arith.constant 17 : index
    %c0_33 = arith.constant 0 : index
    %26 = vector.load %arg1[%c0_32, %c17, %c0_33] : memref<1x296x128xbf16, #tpu.memory_space<vmem>>, vector<1x256x128xbf16>
    %27 = vector.shape_cast %26 : vector<1x256x128xbf16> to vector<256x128xbf16>
    %c0_34 = arith.constant 0 : index
    %c0_35 = arith.constant 0 : index
    %28 = vector.load %arg6[%c0_34, %c0_35] : memref<256x128xf32, #tpu.memory_space<vmem>>, vector<256x128xf32>
    %c3 = arith.constant 3 : index
    %c0_36 = arith.constant 0 : index
    %c0_37 = arith.constant 0 : index
    %29 = vector.load %arg2[%c3, %c0_36, %c0_37] : memref<9x128x128xbf16, #tpu.memory_space<vmem>>, vector<1x128x128xbf16>
    %30 = vector.shape_cast %29 : vector<1x128x128xbf16> to vector<128x128xbf16>
    %cst_38 = arith.constant dense<0.000000e+00> : vector<256x128xf32>
    %31 = tpu.matmul %27, %30, %cst_38 {dimension_numbers = #tpu.dot_dimension_numbers<[1], [0], [0], [1], [0, 0, 1, 1], [], []>} : vector<256x128xbf16>, vector<128x128xbf16>, vector<256x128xf32> -> vector<256x128xf32>
    %32 = arith.addf %28, %31 : vector<256x128xf32>
    %c0_39 = arith.constant 0 : index
    %c0_40 = arith.constant 0 : index
    %33 = vector.load %arg6[%c0_39, %c0_40] : memref<256x128xf32, #tpu.memory_space<vmem>>, vector<256x128xf32>
    tpu.vector_store %arg6[%c0_39, %c0_40], %32 {strides = array<i32>} : memref<256x128xf32, #tpu.memory_space<vmem>>, vector<256x128xf32>,
    %c0_41 = arith.constant 0 : index
    %c18 = arith.constant 18 : index
    %c0_42 = arith.constant 0 : index
    %34 = vector.load %arg1[%c0_41, %c18, %c0_42] : memref<1x296x128xbf16, #tpu.memory_space<vmem>>, vector<1x256x128xbf16>
    %35 = vector.shape_cast %34 : vector<1x256x128xbf16> to vector<256x128xbf16>
    %c0_43 = arith.constant 0 : index
    %c0_44 = arith.constant 0 : index
    %36 = vector.load %arg6[%c0_43, %c0_44] : memref<256x128xf32, #tpu.memory_space<vmem>>, vector<256x128xf32>
    %c4 = arith.constant 4 : index
    %c0_45 = arith.constant 0 : index
    %c0_46 = arith.constant 0 : index
    %37 = vector.load %arg2[%c4, %c0_45, %c0_46] : memref<9x128x128xbf16, #tpu.memory_space<vmem>>, vector<1x128x128xbf16>
    %38 = vector.shape_cast %37 : vector<1x128x128xbf16> to vector<128x128xbf16>
    %cst_47 = arith.constant dense<0.000000e+00> : vector<256x128xf32>
    %39 = tpu.matmul %35, %38, %cst_47 {dimension_numbers = #tpu.dot_dimension_numbers<[1], [0], [0], [1], [0, 0, 1, 1], [], []>} : vector<256x128xbf16>, vector<128x128xbf16>, vector<256x128xf32> -> vector<256x128xf32>
    %40 = arith.addf %36, %39 : vector<256x128xf32>
    %c0_48 = arith.constant 0 : index
    %c0_49 = arith.constant 0 : index
    %41 = vector.load %arg6[%c0_48, %c0_49] : memref<256x128xf32, #tpu.memory_space<vmem>>, vector<256x128xf32>
    tpu.vector_store %arg6[%c0_48, %c0_49], %40 {strides = array<i32>} : memref<256x128xf32, #tpu.memory_space<vmem>>, vector<256x128xf32>,
    %c0_50 = arith.constant 0 : index
    %c19 = arith.constant 19 : index
    %c0_51 = arith.constant 0 : index
    %42 = vector.load %arg1[%c0_50, %c19, %c0_51] : memref<1x296x128xbf16, #tpu.memory_space<vmem>>, vector<1x256x128xbf16>
    %43 = vector.shape_cast %42 : vector<1x256x128xbf16> to vector<256x128xbf16>
    %c0_52 = arith.constant 0 : index
    %c0_53 = arith.constant 0 : index
    %44 = vector.load %arg6[%c0_52, %c0_53] : memref<256x128xf32, #tpu.memory_space<vmem>>, vector<256x128xf32>
    %c5 = arith.constant 5 : index
    %c0_54 = arith.constant 0 : index
    %c0_55 = arith.constant 0 : index
    %45 = vector.load %arg2[%c5, %c0_54, %c0_55] : memref<9x128x128xbf16, #tpu.memory_space<vmem>>, vector<1x128x128xbf16>
    %46 = vector.shape_cast %45 : vector<1x128x128xbf16> to vector<128x128xbf16>
    %cst_56 = arith.constant dense<0.000000e+00> : vector<256x128xf32>
    %47 = tpu.matmul %43, %46, %cst_56 {dimension_numbers = #tpu.dot_dimension_numbers<[1], [0], [0], [1], [0, 0, 1, 1], [], []>} : vector<256x128xbf16>, vector<128x128xbf16>, vector<256x128xf32> -> vector<256x128xf32>
    %48 = arith.addf %44, %47 : vector<256x128xf32>
    %c0_57 = arith.constant 0 : index
    %c0_58 = arith.constant 0 : index
    %49 = vector.load %arg6[%c0_57, %c0_58] : memref<256x128xf32, #tpu.memory_space<vmem>>, vector<256x128xf32>
    tpu.vector_store %arg6[%c0_57, %c0_58], %48 {strides = array<i32>} : memref<256x128xf32, #tpu.memory_space<vmem>>, vector<256x128xf32>,
    %c0_59 = arith.constant 0 : index
    %c34 = arith.constant 34 : index
    %c0_60 = arith.constant 0 : index
    %50 = vector.load %arg1[%c0_59, %c34, %c0_60] : memref<1x296x128xbf16, #tpu.memory_space<vmem>>, vector<1x256x128xbf16>
    %51 = vector.shape_cast %50 : vector<1x256x128xbf16> to vector<256x128xbf16>
    %c0_61 = arith.constant 0 : index
    %c0_62 = arith.constant 0 : index
    %52 = vector.load %arg6[%c0_61, %c0_62] : memref<256x128xf32, #tpu.memory_space<vmem>>, vector<256x128xf32>
    %c6 = arith.constant 6 : index
    %c0_63 = arith.constant 0 : index
    %c0_64 = arith.constant 0 : index
    %53 = vector.load %arg2[%c6, %c0_63, %c0_64] : memref<9x128x128xbf16, #tpu.memory_space<vmem>>, vector<1x128x128xbf16>
    %54 = vector.shape_cast %53 : vector<1x128x128xbf16> to vector<128x128xbf16>
    %cst_65 = arith.constant dense<0.000000e+00> : vector<256x128xf32>
    %55 = tpu.matmul %51, %54, %cst_65 {dimension_numbers = #tpu.dot_dimension_numbers<[1], [0], [0], [1], [0, 0, 1, 1], [], []>} : vector<256x128xbf16>, vector<128x128xbf16>, vector<256x128xf32> -> vector<256x128xf32>
    %56 = arith.addf %52, %55 : vector<256x128xf32>
    %c0_66 = arith.constant 0 : index
    %c0_67 = arith.constant 0 : index
    %57 = vector.load %arg6[%c0_66, %c0_67] : memref<256x128xf32, #tpu.memory_space<vmem>>, vector<256x128xf32>
    tpu.vector_store %arg6[%c0_66, %c0_67], %56 {strides = array<i32>} : memref<256x128xf32, #tpu.memory_space<vmem>>, vector<256x128xf32>,
    %c0_68 = arith.constant 0 : index
    %c35 = arith.constant 35 : index
    %c0_69 = arith.constant 0 : index
    %58 = vector.load %arg1[%c0_68, %c35, %c0_69] : memref<1x296x128xbf16, #tpu.memory_space<vmem>>, vector<1x256x128xbf16>
    %59 = vector.shape_cast %58 : vector<1x256x128xbf16> to vector<256x128xbf16>
    %c0_70 = arith.constant 0 : index
    %c0_71 = arith.constant 0 : index
    %60 = vector.load %arg6[%c0_70, %c0_71] : memref<256x128xf32, #tpu.memory_space<vmem>>, vector<256x128xf32>
    %c7 = arith.constant 7 : index
    %c0_72 = arith.constant 0 : index
    %c0_73 = arith.constant 0 : index
    %61 = vector.load %arg2[%c7, %c0_72, %c0_73] : memref<9x128x128xbf16, #tpu.memory_space<vmem>>, vector<1x128x128xbf16>
    %62 = vector.shape_cast %61 : vector<1x128x128xbf16> to vector<128x128xbf16>
    %cst_74 = arith.constant dense<0.000000e+00> : vector<256x128xf32>
    %63 = tpu.matmul %59, %62, %cst_74 {dimension_numbers = #tpu.dot_dimension_numbers<[1], [0], [0], [1], [0, 0, 1, 1], [], []>} : vector<256x128xbf16>, vector<128x128xbf16>, vector<256x128xf32> -> vector<256x128xf32>
    %64 = arith.addf %60, %63 : vector<256x128xf32>
    %c0_75 = arith.constant 0 : index
    %c0_76 = arith.constant 0 : index
    %65 = vector.load %arg6[%c0_75, %c0_76] : memref<256x128xf32, #tpu.memory_space<vmem>>, vector<256x128xf32>
    tpu.vector_store %arg6[%c0_75, %c0_76], %64 {strides = array<i32>} : memref<256x128xf32, #tpu.memory_space<vmem>>, vector<256x128xf32>,
    %c0_77 = arith.constant 0 : index
    %c36 = arith.constant 36 : index
    %c0_78 = arith.constant 0 : index
    %66 = vector.load %arg1[%c0_77, %c36, %c0_78] : memref<1x296x128xbf16, #tpu.memory_space<vmem>>, vector<1x256x128xbf16>
    %67 = vector.shape_cast %66 : vector<1x256x128xbf16> to vector<256x128xbf16>
    %c0_79 = arith.constant 0 : index
    %c0_80 = arith.constant 0 : index
    %68 = vector.load %arg6[%c0_79, %c0_80] : memref<256x128xf32, #tpu.memory_space<vmem>>, vector<256x128xf32>
    %c8 = arith.constant 8 : index
    %c0_81 = arith.constant 0 : index
    %c0_82 = arith.constant 0 : index
    %69 = vector.load %arg2[%c8, %c0_81, %c0_82] : memref<9x128x128xbf16, #tpu.memory_space<vmem>>, vector<1x128x128xbf16>
    %70 = vector.shape_cast %69 : vector<1x128x128xbf16> to vector<128x128xbf16>
    %cst_83 = arith.constant dense<0.000000e+00> : vector<256x128xf32>
    %71 = tpu.matmul %67, %70, %cst_83 {dimension_numbers = #tpu.dot_dimension_numbers<[1], [0], [0], [1], [0, 0, 1, 1], [], []>} : vector<256x128xbf16>, vector<128x128xbf16>, vector<256x128xf32> -> vector<256x128xf32>
    %72 = arith.addf %68, %71 : vector<256x128xf32>
    %c0_84 = arith.constant 0 : index
    %c0_85 = arith.constant 0 : index
    %73 = vector.load %arg6[%c0_84, %c0_85] : memref<256x128xf32, #tpu.memory_space<vmem>>, vector<256x128xf32>
    tpu.vector_store %arg6[%c0_84, %c0_85], %72 {strides = array<i32>} : memref<256x128xf32, #tpu.memory_space<vmem>>, vector<256x128xf32>,
    %c0_86 = arith.constant 0 : index
    %c0_87 = arith.constant 0 : index
    %74 = vector.load %arg6[%c0_86, %c0_87] : memref<256x128xf32, #tpu.memory_space<vmem>>, vector<256x128xf32>
    %c0_88 = arith.constant 0 : index
    %c0_89 = arith.constant 0 : index
    %75 = vector.load %arg3[%c0_88, %c0_89] : memref<1x128xf32, #tpu.memory_space<vmem>>, vector<1x128xf32>
    %76 = vector.broadcast %75 : vector<1x128xf32> to vector<256x128xf32>
    %77 = arith.mulf %74, %76 : vector<256x128xf32>
    %c0_90 = arith.constant 0 : index
    %c0_91 = arith.constant 0 : index
    %78 = vector.load %arg4[%c0_90, %c0_91] : memref<1x128xf32, #tpu.memory_space<vmem>>, vector<1x128xf32>
    %79 = vector.broadcast %78 : vector<1x128xf32> to vector<256x128xf32>
    %80 = arith.addf %77, %79 : vector<256x128xf32>
    %cst_92 = arith.constant 0.000000e+00 : f32
    %81 = vector.broadcast %cst_92 : f32 to vector<256x128xf32>
    %82 = arith.maximumf %80, %81 : vector<256x128xf32>
    %83 = arith.truncf %82 : vector<256x128xf32> to vector<256x128xbf16>
    %c0_93 = arith.constant 0 : index
    %c0_94 = arith.constant 0 : index
    %c0_95 = arith.constant 0 : index
    %84 = vector.load %arg5[%c0_93, %c0_94, %c0_95] : memref<1x256x128xbf16, #tpu.memory_space<vmem>>, vector<1x256x128xbf16>
    %85 = vector.shape_cast %84 : vector<1x256x128xbf16> to vector<256x128xbf16>
    %86 = vector.shape_cast %83 : vector<256x128xbf16> to vector<1x256x128xbf16>
    tpu.vector_store %arg5[%c0_93, %c0_94, %c0_95], %86 {strides = array<i32>} : memref<1x256x128xbf16, #tpu.memory_space<vmem>>, vector<1x256x128xbf16>,
    return
  }
  func.func @transform_0(%arg0: i32) -> (i32, i32, i32) {
    %c0_i32 = arith.constant 0 : i32
    %c0_i32_0 = arith.constant 0 : i32
    %c0_i32_1 = arith.constant 0 : i32
    return %arg0, %c0_i32, %c0_i32_0 : i32, i32, i32
  }
  func.func @transform_1(%arg0: i32) -> (i32, i32, i32) {
    %c0_i32 = arith.constant 0 : i32
    %c0_i32_0 = arith.constant 0 : i32
    %c0_i32_1 = arith.constant 0 : i32
    %c0_i32_2 = arith.constant 0 : i32
    return %c0_i32, %c0_i32_0, %c0_i32_1 : i32, i32, i32
  }
  func.func @transform_2(%arg0: i32) -> (i32, i32) {
    %c0_i32 = arith.constant 0 : i32
    %c0_i32_0 = arith.constant 0 : i32
    %c0_i32_1 = arith.constant 0 : i32
    return %c0_i32, %c0_i32_0 : i32, i32
  }
  func.func @transform_3(%arg0: i32) -> (i32, i32) {
    %c0_i32 = arith.constant 0 : i32
    %c0_i32_0 = arith.constant 0 : i32
    %c0_i32_1 = arith.constant 0 : i32
    return %c0_i32, %c0_i32_0 : i32, i32
  }
  func.func @transform_4(%arg0: i32) -> (i32, i32, i32) {
    %c0_i32 = arith.constant 0 : i32
    %c0_i32_0 = arith.constant 0 : i32
    %c0_i32_1 = arith.constant 0 : i32
    return %arg0, %c0_i32, %c0_i32_0 : i32, i32, i32
  }
}

module attributes {stable_mosaic.version = 11 : i64} {
  func.func @_conv_tap_kernel(%arg0: i32, %arg1: memref<1x328x128xbf16, #tpu.memory_space<vmem>>, %arg2: memref<9x128x128xbf16, #tpu.memory_space<vmem>>, %arg3: memref<1x128xf32, #tpu.memory_space<vmem>>, %arg4: memref<1x128xf32, #tpu.memory_space<vmem>>, %arg5: memref<1x288x128xbf16, #tpu.memory_space<vmem>>, %arg6: memref<288x128xf32, #tpu.memory_space<vmem>>) attributes {dimension_semantics = [#tpu.dimension_semantics<parallel>], iteration_bounds = array<i64: 4>, scalar_prefetch = 0 : i64, scratch_operands = 1 : i64, tpu.core_type = #tpu.core_type<tc>, window_params = [{transform_indices = @transform_0, window_bounds = array<i64: 1, 328, 128>}, {pipeline_mode = #tpu.pipeline_mode<synchronous>, transform_indices = @transform_1, window_bounds = array<i64: 9, 128, 128>}, {pipeline_mode = #tpu.pipeline_mode<synchronous>, transform_indices = @transform_2, window_bounds = array<i64: 1, 128>}, {pipeline_mode = #tpu.pipeline_mode<synchronous>, transform_indices = @transform_3, window_bounds = array<i64: 1, 128>}, {transform_indices = @transform_4, window_bounds = array<i64: 1, 288, 128>}]} {
    %cst = arith.constant 0.000000e+00 : f32
    %0 = vector.broadcast %cst : f32 to vector<288x128xf32>
    %c0 = arith.constant 0 : index
    %c0_0 = arith.constant 0 : index
    %1 = vector.load %arg6[%c0, %c0_0] : memref<288x128xf32, #tpu.memory_space<vmem>>, vector<288x128xf32>
    tpu.vector_store %arg6[%c0, %c0_0], %0 {strides = array<i32>} : memref<288x128xf32, #tpu.memory_space<vmem>>, vector<288x128xf32>,
    %c0_1 = arith.constant 0 : index
    %c0_2 = arith.constant 0 : index
    %c0_3 = arith.constant 0 : index
    %2 = vector.load %arg1[%c0_1, %c0_2, %c0_3] : memref<1x328x128xbf16, #tpu.memory_space<vmem>>, vector<1x288x128xbf16>
    %3 = vector.shape_cast %2 : vector<1x288x128xbf16> to vector<288x128xbf16>
    %c0_4 = arith.constant 0 : index
    %c0_5 = arith.constant 0 : index
    %4 = vector.load %arg6[%c0_4, %c0_5] : memref<288x128xf32, #tpu.memory_space<vmem>>, vector<288x128xf32>
    %c0_6 = arith.constant 0 : index
    %c0_7 = arith.constant 0 : index
    %c0_8 = arith.constant 0 : index
    %5 = vector.load %arg2[%c0_6, %c0_7, %c0_8] : memref<9x128x128xbf16, #tpu.memory_space<vmem>>, vector<1x128x128xbf16>
    %6 = vector.shape_cast %5 : vector<1x128x128xbf16> to vector<128x128xbf16>
    %cst_9 = arith.constant dense<0.000000e+00> : vector<288x128xf32>
    %7 = tpu.matmul %3, %6, %cst_9 {dimension_numbers = #tpu.dot_dimension_numbers<[1], [0], [0], [1], [0, 0, 1, 1], [], []>} : vector<288x128xbf16>, vector<128x128xbf16>, vector<288x128xf32> -> vector<288x128xf32>
    %8 = arith.addf %4, %7 : vector<288x128xf32>
    %c0_10 = arith.constant 0 : index
    %c0_11 = arith.constant 0 : index
    %9 = vector.load %arg6[%c0_10, %c0_11] : memref<288x128xf32, #tpu.memory_space<vmem>>, vector<288x128xf32>
    tpu.vector_store %arg6[%c0_10, %c0_11], %8 {strides = array<i32>} : memref<288x128xf32, #tpu.memory_space<vmem>>, vector<288x128xf32>,
    %c0_12 = arith.constant 0 : index
    %c1 = arith.constant 1 : index
    %c0_13 = arith.constant 0 : index
    %10 = vector.load %arg1[%c0_12, %c1, %c0_13] : memref<1x328x128xbf16, #tpu.memory_space<vmem>>, vector<1x288x128xbf16>
    %11 = vector.shape_cast %10 : vector<1x288x128xbf16> to vector<288x128xbf16>
    %c0_14 = arith.constant 0 : index
    %c0_15 = arith.constant 0 : index
    %12 = vector.load %arg6[%c0_14, %c0_15] : memref<288x128xf32, #tpu.memory_space<vmem>>, vector<288x128xf32>
    %c1_16 = arith.constant 1 : index
    %c0_17 = arith.constant 0 : index
    %c0_18 = arith.constant 0 : index
    %13 = vector.load %arg2[%c1_16, %c0_17, %c0_18] : memref<9x128x128xbf16, #tpu.memory_space<vmem>>, vector<1x128x128xbf16>
    %14 = vector.shape_cast %13 : vector<1x128x128xbf16> to vector<128x128xbf16>
    %cst_19 = arith.constant dense<0.000000e+00> : vector<288x128xf32>
    %15 = tpu.matmul %11, %14, %cst_19 {dimension_numbers = #tpu.dot_dimension_numbers<[1], [0], [0], [1], [0, 0, 1, 1], [], []>} : vector<288x128xbf16>, vector<128x128xbf16>, vector<288x128xf32> -> vector<288x128xf32>
    %16 = arith.addf %12, %15 : vector<288x128xf32>
    %c0_20 = arith.constant 0 : index
    %c0_21 = arith.constant 0 : index
    %17 = vector.load %arg6[%c0_20, %c0_21] : memref<288x128xf32, #tpu.memory_space<vmem>>, vector<288x128xf32>
    tpu.vector_store %arg6[%c0_20, %c0_21], %16 {strides = array<i32>} : memref<288x128xf32, #tpu.memory_space<vmem>>, vector<288x128xf32>,
    %c0_22 = arith.constant 0 : index
    %c2 = arith.constant 2 : index
    %c0_23 = arith.constant 0 : index
    %18 = vector.load %arg1[%c0_22, %c2, %c0_23] : memref<1x328x128xbf16, #tpu.memory_space<vmem>>, vector<1x288x128xbf16>
    %19 = vector.shape_cast %18 : vector<1x288x128xbf16> to vector<288x128xbf16>
    %c0_24 = arith.constant 0 : index
    %c0_25 = arith.constant 0 : index
    %20 = vector.load %arg6[%c0_24, %c0_25] : memref<288x128xf32, #tpu.memory_space<vmem>>, vector<288x128xf32>
    %c2_26 = arith.constant 2 : index
    %c0_27 = arith.constant 0 : index
    %c0_28 = arith.constant 0 : index
    %21 = vector.load %arg2[%c2_26, %c0_27, %c0_28] : memref<9x128x128xbf16, #tpu.memory_space<vmem>>, vector<1x128x128xbf16>
    %22 = vector.shape_cast %21 : vector<1x128x128xbf16> to vector<128x128xbf16>
    %cst_29 = arith.constant dense<0.000000e+00> : vector<288x128xf32>
    %23 = tpu.matmul %19, %22, %cst_29 {dimension_numbers = #tpu.dot_dimension_numbers<[1], [0], [0], [1], [0, 0, 1, 1], [], []>} : vector<288x128xbf16>, vector<128x128xbf16>, vector<288x128xf32> -> vector<288x128xf32>
    %24 = arith.addf %20, %23 : vector<288x128xf32>
    %c0_30 = arith.constant 0 : index
    %c0_31 = arith.constant 0 : index
    %25 = vector.load %arg6[%c0_30, %c0_31] : memref<288x128xf32, #tpu.memory_space<vmem>>, vector<288x128xf32>
    tpu.vector_store %arg6[%c0_30, %c0_31], %24 {strides = array<i32>} : memref<288x128xf32, #tpu.memory_space<vmem>>, vector<288x128xf32>,
    %c0_32 = arith.constant 0 : index
    %c18 = arith.constant 18 : index
    %c0_33 = arith.constant 0 : index
    %26 = vector.load %arg1[%c0_32, %c18, %c0_33] : memref<1x328x128xbf16, #tpu.memory_space<vmem>>, vector<1x288x128xbf16>
    %27 = vector.shape_cast %26 : vector<1x288x128xbf16> to vector<288x128xbf16>
    %c0_34 = arith.constant 0 : index
    %c0_35 = arith.constant 0 : index
    %28 = vector.load %arg6[%c0_34, %c0_35] : memref<288x128xf32, #tpu.memory_space<vmem>>, vector<288x128xf32>
    %c3 = arith.constant 3 : index
    %c0_36 = arith.constant 0 : index
    %c0_37 = arith.constant 0 : index
    %29 = vector.load %arg2[%c3, %c0_36, %c0_37] : memref<9x128x128xbf16, #tpu.memory_space<vmem>>, vector<1x128x128xbf16>
    %30 = vector.shape_cast %29 : vector<1x128x128xbf16> to vector<128x128xbf16>
    %cst_38 = arith.constant dense<0.000000e+00> : vector<288x128xf32>
    %31 = tpu.matmul %27, %30, %cst_38 {dimension_numbers = #tpu.dot_dimension_numbers<[1], [0], [0], [1], [0, 0, 1, 1], [], []>} : vector<288x128xbf16>, vector<128x128xbf16>, vector<288x128xf32> -> vector<288x128xf32>
    %32 = arith.addf %28, %31 : vector<288x128xf32>
    %c0_39 = arith.constant 0 : index
    %c0_40 = arith.constant 0 : index
    %33 = vector.load %arg6[%c0_39, %c0_40] : memref<288x128xf32, #tpu.memory_space<vmem>>, vector<288x128xf32>
    tpu.vector_store %arg6[%c0_39, %c0_40], %32 {strides = array<i32>} : memref<288x128xf32, #tpu.memory_space<vmem>>, vector<288x128xf32>,
    %c0_41 = arith.constant 0 : index
    %c19 = arith.constant 19 : index
    %c0_42 = arith.constant 0 : index
    %34 = vector.load %arg1[%c0_41, %c19, %c0_42] : memref<1x328x128xbf16, #tpu.memory_space<vmem>>, vector<1x288x128xbf16>
    %35 = vector.shape_cast %34 : vector<1x288x128xbf16> to vector<288x128xbf16>
    %c0_43 = arith.constant 0 : index
    %c0_44 = arith.constant 0 : index
    %36 = vector.load %arg6[%c0_43, %c0_44] : memref<288x128xf32, #tpu.memory_space<vmem>>, vector<288x128xf32>
    %c4 = arith.constant 4 : index
    %c0_45 = arith.constant 0 : index
    %c0_46 = arith.constant 0 : index
    %37 = vector.load %arg2[%c4, %c0_45, %c0_46] : memref<9x128x128xbf16, #tpu.memory_space<vmem>>, vector<1x128x128xbf16>
    %38 = vector.shape_cast %37 : vector<1x128x128xbf16> to vector<128x128xbf16>
    %cst_47 = arith.constant dense<0.000000e+00> : vector<288x128xf32>
    %39 = tpu.matmul %35, %38, %cst_47 {dimension_numbers = #tpu.dot_dimension_numbers<[1], [0], [0], [1], [0, 0, 1, 1], [], []>} : vector<288x128xbf16>, vector<128x128xbf16>, vector<288x128xf32> -> vector<288x128xf32>
    %40 = arith.addf %36, %39 : vector<288x128xf32>
    %c0_48 = arith.constant 0 : index
    %c0_49 = arith.constant 0 : index
    %41 = vector.load %arg6[%c0_48, %c0_49] : memref<288x128xf32, #tpu.memory_space<vmem>>, vector<288x128xf32>
    tpu.vector_store %arg6[%c0_48, %c0_49], %40 {strides = array<i32>} : memref<288x128xf32, #tpu.memory_space<vmem>>, vector<288x128xf32>,
    %c0_50 = arith.constant 0 : index
    %c20 = arith.constant 20 : index
    %c0_51 = arith.constant 0 : index
    %42 = vector.load %arg1[%c0_50, %c20, %c0_51] : memref<1x328x128xbf16, #tpu.memory_space<vmem>>, vector<1x288x128xbf16>
    %43 = vector.shape_cast %42 : vector<1x288x128xbf16> to vector<288x128xbf16>
    %c0_52 = arith.constant 0 : index
    %c0_53 = arith.constant 0 : index
    %44 = vector.load %arg6[%c0_52, %c0_53] : memref<288x128xf32, #tpu.memory_space<vmem>>, vector<288x128xf32>
    %c5 = arith.constant 5 : index
    %c0_54 = arith.constant 0 : index
    %c0_55 = arith.constant 0 : index
    %45 = vector.load %arg2[%c5, %c0_54, %c0_55] : memref<9x128x128xbf16, #tpu.memory_space<vmem>>, vector<1x128x128xbf16>
    %46 = vector.shape_cast %45 : vector<1x128x128xbf16> to vector<128x128xbf16>
    %cst_56 = arith.constant dense<0.000000e+00> : vector<288x128xf32>
    %47 = tpu.matmul %43, %46, %cst_56 {dimension_numbers = #tpu.dot_dimension_numbers<[1], [0], [0], [1], [0, 0, 1, 1], [], []>} : vector<288x128xbf16>, vector<128x128xbf16>, vector<288x128xf32> -> vector<288x128xf32>
    %48 = arith.addf %44, %47 : vector<288x128xf32>
    %c0_57 = arith.constant 0 : index
    %c0_58 = arith.constant 0 : index
    %49 = vector.load %arg6[%c0_57, %c0_58] : memref<288x128xf32, #tpu.memory_space<vmem>>, vector<288x128xf32>
    tpu.vector_store %arg6[%c0_57, %c0_58], %48 {strides = array<i32>} : memref<288x128xf32, #tpu.memory_space<vmem>>, vector<288x128xf32>,
    %c0_59 = arith.constant 0 : index
    %c36 = arith.constant 36 : index
    %c0_60 = arith.constant 0 : index
    %50 = vector.load %arg1[%c0_59, %c36, %c0_60] : memref<1x328x128xbf16, #tpu.memory_space<vmem>>, vector<1x288x128xbf16>
    %51 = vector.shape_cast %50 : vector<1x288x128xbf16> to vector<288x128xbf16>
    %c0_61 = arith.constant 0 : index
    %c0_62 = arith.constant 0 : index
    %52 = vector.load %arg6[%c0_61, %c0_62] : memref<288x128xf32, #tpu.memory_space<vmem>>, vector<288x128xf32>
    %c6 = arith.constant 6 : index
    %c0_63 = arith.constant 0 : index
    %c0_64 = arith.constant 0 : index
    %53 = vector.load %arg2[%c6, %c0_63, %c0_64] : memref<9x128x128xbf16, #tpu.memory_space<vmem>>, vector<1x128x128xbf16>
    %54 = vector.shape_cast %53 : vector<1x128x128xbf16> to vector<128x128xbf16>
    %cst_65 = arith.constant dense<0.000000e+00> : vector<288x128xf32>
    %55 = tpu.matmul %51, %54, %cst_65 {dimension_numbers = #tpu.dot_dimension_numbers<[1], [0], [0], [1], [0, 0, 1, 1], [], []>} : vector<288x128xbf16>, vector<128x128xbf16>, vector<288x128xf32> -> vector<288x128xf32>
    %56 = arith.addf %52, %55 : vector<288x128xf32>
    %c0_66 = arith.constant 0 : index
    %c0_67 = arith.constant 0 : index
    %57 = vector.load %arg6[%c0_66, %c0_67] : memref<288x128xf32, #tpu.memory_space<vmem>>, vector<288x128xf32>
    tpu.vector_store %arg6[%c0_66, %c0_67], %56 {strides = array<i32>} : memref<288x128xf32, #tpu.memory_space<vmem>>, vector<288x128xf32>,
    %c0_68 = arith.constant 0 : index
    %c37 = arith.constant 37 : index
    %c0_69 = arith.constant 0 : index
    %58 = vector.load %arg1[%c0_68, %c37, %c0_69] : memref<1x328x128xbf16, #tpu.memory_space<vmem>>, vector<1x288x128xbf16>
    %59 = vector.shape_cast %58 : vector<1x288x128xbf16> to vector<288x128xbf16>
    %c0_70 = arith.constant 0 : index
    %c0_71 = arith.constant 0 : index
    %60 = vector.load %arg6[%c0_70, %c0_71] : memref<288x128xf32, #tpu.memory_space<vmem>>, vector<288x128xf32>
    %c7 = arith.constant 7 : index
    %c0_72 = arith.constant 0 : index
    %c0_73 = arith.constant 0 : index
    %61 = vector.load %arg2[%c7, %c0_72, %c0_73] : memref<9x128x128xbf16, #tpu.memory_space<vmem>>, vector<1x128x128xbf16>
    %62 = vector.shape_cast %61 : vector<1x128x128xbf16> to vector<128x128xbf16>
    %cst_74 = arith.constant dense<0.000000e+00> : vector<288x128xf32>
    %63 = tpu.matmul %59, %62, %cst_74 {dimension_numbers = #tpu.dot_dimension_numbers<[1], [0], [0], [1], [0, 0, 1, 1], [], []>} : vector<288x128xbf16>, vector<128x128xbf16>, vector<288x128xf32> -> vector<288x128xf32>
    %64 = arith.addf %60, %63 : vector<288x128xf32>
    %c0_75 = arith.constant 0 : index
    %c0_76 = arith.constant 0 : index
    %65 = vector.load %arg6[%c0_75, %c0_76] : memref<288x128xf32, #tpu.memory_space<vmem>>, vector<288x128xf32>
    tpu.vector_store %arg6[%c0_75, %c0_76], %64 {strides = array<i32>} : memref<288x128xf32, #tpu.memory_space<vmem>>, vector<288x128xf32>,
    %c0_77 = arith.constant 0 : index
    %c38 = arith.constant 38 : index
    %c0_78 = arith.constant 0 : index
    %66 = vector.load %arg1[%c0_77, %c38, %c0_78] : memref<1x328x128xbf16, #tpu.memory_space<vmem>>, vector<1x288x128xbf16>
    %67 = vector.shape_cast %66 : vector<1x288x128xbf16> to vector<288x128xbf16>
    %c0_79 = arith.constant 0 : index
    %c0_80 = arith.constant 0 : index
    %68 = vector.load %arg6[%c0_79, %c0_80] : memref<288x128xf32, #tpu.memory_space<vmem>>, vector<288x128xf32>
    %c8 = arith.constant 8 : index
    %c0_81 = arith.constant 0 : index
    %c0_82 = arith.constant 0 : index
    %69 = vector.load %arg2[%c8, %c0_81, %c0_82] : memref<9x128x128xbf16, #tpu.memory_space<vmem>>, vector<1x128x128xbf16>
    %70 = vector.shape_cast %69 : vector<1x128x128xbf16> to vector<128x128xbf16>
    %cst_83 = arith.constant dense<0.000000e+00> : vector<288x128xf32>
    %71 = tpu.matmul %67, %70, %cst_83 {dimension_numbers = #tpu.dot_dimension_numbers<[1], [0], [0], [1], [0, 0, 1, 1], [], []>} : vector<288x128xbf16>, vector<128x128xbf16>, vector<288x128xf32> -> vector<288x128xf32>
    %72 = arith.addf %68, %71 : vector<288x128xf32>
    %c0_84 = arith.constant 0 : index
    %c0_85 = arith.constant 0 : index
    %73 = vector.load %arg6[%c0_84, %c0_85] : memref<288x128xf32, #tpu.memory_space<vmem>>, vector<288x128xf32>
    tpu.vector_store %arg6[%c0_84, %c0_85], %72 {strides = array<i32>} : memref<288x128xf32, #tpu.memory_space<vmem>>, vector<288x128xf32>,
    %c0_86 = arith.constant 0 : index
    %c0_87 = arith.constant 0 : index
    %74 = vector.load %arg6[%c0_86, %c0_87] : memref<288x128xf32, #tpu.memory_space<vmem>>, vector<288x128xf32>
    %c0_88 = arith.constant 0 : index
    %c0_89 = arith.constant 0 : index
    %75 = vector.load %arg3[%c0_88, %c0_89] : memref<1x128xf32, #tpu.memory_space<vmem>>, vector<1x128xf32>
    %76 = vector.broadcast %75 : vector<1x128xf32> to vector<288x128xf32>
    %77 = arith.mulf %74, %76 : vector<288x128xf32>
    %c0_90 = arith.constant 0 : index
    %c0_91 = arith.constant 0 : index
    %78 = vector.load %arg4[%c0_90, %c0_91] : memref<1x128xf32, #tpu.memory_space<vmem>>, vector<1x128xf32>
    %79 = vector.broadcast %78 : vector<1x128xf32> to vector<288x128xf32>
    %80 = arith.addf %77, %79 : vector<288x128xf32>
    %cst_92 = arith.constant 0.000000e+00 : f32
    %81 = vector.broadcast %cst_92 : f32 to vector<288x128xf32>
    %82 = arith.subf %81, %80 : vector<288x128xf32>
    %83 = math.exp %82 : vector<288x128xf32>
    %cst_93 = arith.constant 1.000000e+00 : f32
    %84 = vector.broadcast %cst_93 : f32 to vector<288x128xf32>
    %85 = arith.addf %84, %83 : vector<288x128xf32>
    %86 = tpu.reciprocal %85 {approx = true} : vector<288x128xf32> -> vector<288x128xf32>
    %cst_94 = arith.constant 1.000000e+00 : f32
    %87 = vector.broadcast %cst_94 : f32 to vector<288x128xf32>
    %88 = arith.mulf %87, %86 : vector<288x128xf32>
    %cst_95 = arith.constant 0.000000e+00 : f32
    %89 = vector.broadcast %cst_95 : f32 to vector<288x128xf32>
    %90 = arith.addf %89, %88 : vector<288x128xf32>
    %91 = arith.truncf %90 : vector<288x128xf32> to vector<288x128xbf16>
    %c0_96 = arith.constant 0 : index
    %c0_97 = arith.constant 0 : index
    %c0_98 = arith.constant 0 : index
    %92 = vector.load %arg5[%c0_96, %c0_97, %c0_98] : memref<1x288x128xbf16, #tpu.memory_space<vmem>>, vector<1x288x128xbf16>
    %93 = vector.shape_cast %92 : vector<1x288x128xbf16> to vector<288x128xbf16>
    %94 = vector.shape_cast %91 : vector<288x128xbf16> to vector<1x288x128xbf16>
    tpu.vector_store %arg5[%c0_96, %c0_97, %c0_98], %94 {strides = array<i32>} : memref<1x288x128xbf16, #tpu.memory_space<vmem>>, vector<1x288x128xbf16>,
    return
  }
  func.func @transform_0(%arg0: i32) -> (i32, i32, i32) {
    %c0_i32 = arith.constant 0 : i32
    %c0_i32_0 = arith.constant 0 : i32
    %c0_i32_1 = arith.constant 0 : i32
    return %arg0, %c0_i32, %c0_i32_0 : i32, i32, i32
  }
  func.func @transform_1(%arg0: i32) -> (i32, i32, i32) {
    %c0_i32 = arith.constant 0 : i32
    %c0_i32_0 = arith.constant 0 : i32
    %c0_i32_1 = arith.constant 0 : i32
    %c0_i32_2 = arith.constant 0 : i32
    return %c0_i32, %c0_i32_0, %c0_i32_1 : i32, i32, i32
  }
  func.func @transform_2(%arg0: i32) -> (i32, i32) {
    %c0_i32 = arith.constant 0 : i32
    %c0_i32_0 = arith.constant 0 : i32
    %c0_i32_1 = arith.constant 0 : i32
    return %c0_i32, %c0_i32_0 : i32, i32
  }
  func.func @transform_3(%arg0: i32) -> (i32, i32) {
    %c0_i32 = arith.constant 0 : i32
    %c0_i32_0 = arith.constant 0 : i32
    %c0_i32_1 = arith.constant 0 : i32
    return %c0_i32, %c0_i32_0 : i32, i32
  }
  func.func @transform_4(%arg0: i32) -> (i32, i32, i32) {
    %c0_i32 = arith.constant 0 : i32
    %c0_i32_0 = arith.constant 0 : i32
    %c0_i32_1 = arith.constant 0 : i32
    return %arg0, %c0_i32, %c0_i32_0 : i32, i32, i32
  }
}

</mosaic_0001>

<bundles_post_ra>
// kernel: _lambda_.4
= control target key start
LH: loop header
LB: loop body
LE: loop exit
PB: predicated region body
PF: predicated region fallthrough
CT: control target
= control target key end

     0   :  { %8 = vsyncpa [#allocation3], 0  ;;  %s1022_s12 = smov [#allocation2]   ;;  %s1086_s0 = inlined_call_operand.vmem [shape: bf16[8,128], index: 0, kind: input, shape index: {}]   ;;  %s1087_s1 = inlined_call_operand.hbm [shape: bf16[128,1152], index: 1, kind: input, shape index: {}]   ;;  %s1088_s2 = inlined_call_operand.vmem [shape: f32[1,1152], index: 2, kind: input, shape index: {}]   ;;  %s1089_s3 = inlined_call_operand.vmem [shape: bf16[8,1152], index: 3, kind: output, shape index: {}]  }
   0x1   :  { %s16_s13 = sshll.u32 %s1022_s12, 4  ;;  %s17_s13 = int_to_ptr.vmem [resolvable:$true] %s16_s13 }
   0x2   :  { %s1008_s14 = scalar_lea.vmem %s17_s13, 9216  ;;  %p1013_p1 = scmp.lt.s32.totalorder %s17_s13, %s17_s13 }
   0x3   :  { %p1009_p0 = scmp.ne.s32.totalorder %s17_s13, %s1008_s14  ;;  %p1014_p2 = scmp.lt.s32.totalorder %s1008_s14, %s1008_s14 }
   0x5   :  { %p1015_p3 = por %p1014_p2, %p1013_p1 }
   0x7   :  { %p1016_p4 = pnand %p1015_p3, %p1009_p0 }
   0x9   :  { %1019 = shalt.err (!%p1016_p4)
}
   0xa   :  { %s1023_s15 = smov 576   ;;  %s1024_s16 = smov 36  }
   0xb   :  { %22 = dma.hbm_to_vmem [thread:$0]  %s1087_s1, 9216, %s17_s13, [#allocation3], %s1023_s15, %s1023_s15, %s1024_s16  }
   0xc   :  { %1020 = dma.done.wait [#allocation3], 9216  }
   0xd   :  { %1021 = vsyncadd [#allocation3], 4294958080  ;;  %v1025_v0 = vmov 0   ;;  %v896_v1 = vld [vmem:[#allocation2 + $0x1fc] ss:$36 sps:$4 sm:$0xff]   ;;  %vm1027_vm0 = vmmov 0  }
   0xe   :  { %559 = vmatprep.mubr.bf16.mxu0 %v1025_v0  ;;  %600 = vmatprep.mubr.bf16.mxu1 %v1025_v0  ;;  %v898_v2 = vld [vmem:[#allocation2 + $0x1f8] ss:$36 sps:$4 sm:$0xff]   ;;  %v901_v4 = vld [vmem:[#allocation2 + $0x1b0] ss:$36 sps:$4 sm:$0xff]   ;;  %v904_v6 = vld [vmem:[#allocation2 + $0x168] ss:$36 sps:$4 sm:$0xff]  }
   0xf   :  { %527 = vmatprep.subr.bf16.mxu0 %v896_v1  ;;  %v899_v3 = vld [vmem:[#allocation2 + $0x1b4] ss:$36 sps:$4 sm:$0xff]   ;;  %v902_v5 = vld [vmem:[#allocation2 + $0x16c] ss:$36 sps:$4 sm:$0xff]   ;;  %v905_v7 = vld [vmem:[#allocation2 + $0x124] ss:$36 sps:$4 sm:$0xff]  }
  0x10   :  { %528 = vmatpush1.bf16.msra.mxu0 %v898_v2  ;;  %v917_v8 = vld [vmem:[#allocation2 + $0x204] ss:$36 sps:$4 sm:$0xff]   ;;  %v908_v11 = vld [vmem:[#allocation2 + $0xdc] ss:$36 sps:$4 sm:$0xff]   ;;  %v929_v15 = vld [vmem:[#allocation2 + $0x174] ss:$36 sps:$4 sm:$0xff]  }
  0x11   :  { %529 = vmatprep.subr.bf16.mxu0 %v899_v3  ;;  %v919_v9 = vld [vmem:[#allocation2 + $0x200] ss:$36 sps:$4 sm:$0xff]   ;;  %568 = vmatprep.subr.bf16.mxu1 %v917_v8  ;;  %v925_v13 = vld [vmem:[#allocation2 + $0x1b8] ss:$36 sps:$4 sm:$0xff]   ;;  %v931_v17 = vld [vmem:[#allocation2 + $0x170] ss:$36 sps:$4 sm:$0xff]  }
  0x12   :  { %v907_v10 = vld [vmem:[#allocation2 + $0x120] ss:$36 sps:$4 sm:$0xff]   ;;  %569 = vmatpush1.bf16.msra.mxu1 %v919_v9  ;;  %v910_v14 = vld [vmem:[#allocation2 + $0xd8] ss:$36 sps:$4 sm:$0xff]   ;;  %v935_v18 = vld [vmem:[#allocation2 + $0x12c] ss:$36 sps:$4 sm:$0xff]  }
  0x13   :  { %v923_v12 = vld [vmem:[#allocation2 + $0x1bc] ss:$36 sps:$4 sm:$0xff]   ;;  %v911_v16 = vld [vmem:[#allocation2 + $0x94] ss:$36 sps:$4 sm:$0xff]   ;;  %v914_v20 = vld [vmem:[#allocation2 + $0x4c] ss:$36 sps:$4 sm:$0xff]  }
  0x14   :  { %530 = vmatpush1.bf16.msra.mxu0 %v901_v4  ;;  %570 = vmatprep.subr.bf16.mxu1 %v923_v12  ;;  %v913_v19 = vld [vmem:[#allocation2 + $0x90] ss:$36 sps:$4 sm:$0xff]   ;;  %v937_v21 = vld [vmem:[#allocation2 + $0x128] ss:$36 sps:$4 sm:$0xff]   ;;  %v943_v25 = vld [vmem:[#allocation2 + $0xe0] ss:$36 sps:$4 sm:$0xff]  }
  0x15   :  { %531 = vmatprep.subr.bf16.mxu0 %v902_v5  ;;  %v941_v22 = vld [vmem:[#allocation2 + $0xe4] ss:$36 sps:$4 sm:$0xff]   ;;  %v947_v26 = vld [vmem:[#allocation2 + $0x9c] ss:$36 sps:$4 sm:$0xff]   ;;  %v928_v28 = vld [vmem:[#allocation2 + $0x20c] ss:$36 sps:$4 sm:$0xff]  }
  0x16   :  { %571 = vmatpush1.bf16.msra.mxu1 %v925_v13  ;;  %v916_v23 = vld [vmem:[#allocation2 + $0x48] ss:$36 sps:$4 sm:$0xff]   ;;  %v922_v27 = vld [vmem:[#allocation2] ss:$36 sps:$4 sm:$0xff]   ;;  %v949_v29 = vld [vmem:[#allocation2 + $0x98] ss:$36 sps:$4 sm:$0xff]  }
  0x17   :  { %572 = vmatprep.subr.bf16.mxu1 %v929_v15  ;;  %v920_v24 = vld [vmem:[#allocation2 + $0x4] ss:$36 sps:$4 sm:$0xff]   ;;  %v1056_v30 = vld [vmem:[%s1086_s0] sm:$0xf]  ;;  %v953_v31 = vld [vmem:[#allocation2 + $0x54] ss:$36 sps:$4 sm:$0xff]  }
  0x18   :  { %532 = vmatpush1.bf16.msra.mxu0 %v904_v6  ;;  %v926_v32 = vld [vmem:[#allocation2 + $0x208] ss:$36 sps:$4 sm:$0xff]   ;;  %v955_v34 = vld [vmem:[#allocation2 + $0x50] ss:$36 sps:$4 sm:$0xff]   ;;  %v932_v36 = vld [vmem:[#allocation2 + $0x1c0] ss:$36 sps:$4 sm:$0xff]  }
  0x19   :  { %533 = vmatprep.subr.bf16.mxu0 %v905_v7  ;;  %v934_v33 = vld [vmem:[#allocation2 + $0x1c4] ss:$36 sps:$4 sm:$0xff]   ;;  %v959_v35 = vld [vmem:[#allocation2 + $0xc] ss:$36 sps:$4 sm:$0xff]   ;;  %v940_v37 = vld [vmem:[#allocation2 + $0x17c] ss:$36 sps:$4 sm:$0xff]  }
  0x1a   :  { %573 = vmatpush1.bf16.msra.mxu1 %v931_v17  ;;  %v961_v38 = vld [vmem:[#allocation2 + $0x8] ss:$36 sps:$4 sm:$0xff]   ;;  %v967_v39 = vld [vmem:[#allocation2 + $0x214] ss:$36 sps:$4 sm:$0xff]   ;;  %v974_v50 = vld [vmem:[#allocation2 + $0x180] ss:$36 sps:$4 sm:$0xff]  }
  0x1b   :  { %574 = vmatprep.subr.bf16.mxu1 %v935_v18  ;;  %v938_v40 = vld [vmem:[#allocation2 + $0x178] ss:$36 sps:$4 sm:$0xff]   ;;  %v965_v42 = vld [vmem:[#allocation2 + $0x210] ss:$36 sps:$4 sm:$0xff]   ;;  %v971_v46 = vld [vmem:[#allocation2 + $0x1c8] ss:$36 sps:$4 sm:$0xff]  }
  0x1c   :  { %534 = vmatpush1.bf16.msra.mxu0 %v907_v10  ;;  %v946_v41 = vld [vmem:[#allocation2 + $0x134] ss:$36 sps:$4 sm:$0xff]   ;;  %v973_v43 = vld [vmem:[#allocation2 + $0x1cc] ss:$36 sps:$4 sm:$0xff]   ;;  %v976_v47 = vld [vmem:[#allocation2 + $0x184] ss:$36 sps:$4 sm:$0xff]  }
  0x1d   :  { %535 = vmatprep.subr.bf16.mxu0 %v908_v11  ;;  %v944_v44 = vld [vmem:[#allocation2 + $0x130] ss:$36 sps:$4 sm:$0xff]   ;;  %v950_v48 = vld [vmem:[#allocation2 + $0xe8] ss:$36 sps:$4 sm:$0xff]   ;;  %v980_v51 = vld [vmem:[#allocation2 + $0x13c] ss:$36 sps:$4 sm:$0xff]   ;;  %v114_v11 = vlaneseq }
  0x1e   :  { %575 = vmatpush1.bf16.msra.mxu1 %v937_v21  ;;  %v952_v45 = vld [vmem:[#allocation2 + $0xec] ss:$36 sps:$4 sm:$0xff]   ;;  %v958_v49 = vld [vmem:[#allocation2 + $0xa4] ss:$36 sps:$4 sm:$0xff]   ;;  %v964_v53 = vld [vmem:[#allocation2 + $0x5c] ss:$36 sps:$4 sm:$0xff]  }
  0x1f   :  { %576 = vmatprep.subr.bf16.mxu1 %v941_v22  ;;  %v956_v52 = vld [vmem:[#allocation2 + $0xa0] ss:$36 sps:$4 sm:$0xff]   ;;  %v978_v54 = vld [vmem:[#allocation2 + $0x138] ss:$36 sps:$4 sm:$0xff]   ;;  %v982_v58 = vld [vmem:[#allocation2 + $0xf0] ss:$36 sps:$4 sm:$0xff]  }
  0x20   :  { %536 = vmatpush1.bf16.msra.mxu0 %v910_v14  ;;  %v984_v55 = vld [vmem:[#allocation2 + $0xf4] ss:$36 sps:$4 sm:$0xff]   ;;  %v988_v59 = vld [vmem:[#allocation2 + $0xac] ss:$36 sps:$4 sm:$0xff]   ;;  %v992_v62 = vld [vmem:[#allocation2 + $0x64] ss:$36 sps:$4 sm:$0xff]  }
  0x21   :  { %537 = vmatprep.subr.bf16.mxu0 %v911_v16  ;;  %v962_v56 = vld [vmem:[#allocation2 + $0x58] ss:$36 sps:$4 sm:$0xff]   ;;  %v968_v60 = vld [vmem:[#allocation2 + $0x10] ss:$36 sps:$4 sm:$0xff]   ;;  %v986_v61 = vld [vmem:[#allocation2 + $0xa8] ss:$36 sps:$4 sm:$0xff]  }
  0x22   :  { %577 = vmatpush1.bf16.msra.mxu1 %v943_v25  ;;  %v970_v57 = vld [vmem:[#allocation2 + $0x14] ss:$36 sps:$4 sm:$0xff]   ;;  %v990_v1 = vld [vmem:[#allocation2 + $0x60] ss:$36 sps:$4 sm:$0xff]   ;;  %v985_v5 = vld [vmem:[#allocation2 + $0x188] ss:$36 sps:$4 sm:$0xff]  }
  0x23   :  { %578 = vmatprep.subr.bf16.mxu1 %v947_v26  ;;  %v977_v63 = vld [vmem:[#allocation2 + $0x218] ss:$36 sps:$4 sm:$0xff]   ;;  %v981_v3 = vld [vmem:[#allocation2 + $0x1d0] ss:$36 sps:$4 sm:$0xff]   ;;  %v989_v6 = vld [vmem:[#allocation2 + $0x140] ss:$36 sps:$4 sm:$0xff]  }
  0x24   :  { %538 = vmatpush1.bf16.msra.mxu0 %v913_v19  ;;  %v996_v2 = vld [vmem:[#allocation2 + $0x1c] ss:$36 sps:$4 sm:$0xff]   ;;  %v997_v8 = vld [vmem:[#allocation2 + $0xb0] ss:$36 sps:$4 sm:$0xff]   ;;  %v998_v9 = vld [vmem:[#allocation2 + $0x68] ss:$36 sps:$4 sm:$0xff]  }
  0x25   :  { %539 = vmatprep.subr.bf16.mxu0 %v914_v20  ;;  %v994_v4 = vld [vmem:[#allocation2 + $0x18] ss:$36 sps:$4 sm:$0xff]   ;;  %v999_v10 = vld [vmem:[#allocation2 + $0x20] ss:$36 sps:$4 sm:$0xff]   ;;  %v115_v12 = vshrl.u32 %v114_v11, 7 }
  0x26   :  { %579 = vmatpush1.bf16.msra.mxu1 %v949_v29  ;;  %v993_v7 = vld [vmem:[#allocation2 + $0xf8] ss:$36 sps:$4 sm:$0xff]   ;;  %v110_v14 = vld [vmem:[%s1088_s2] sm:$0xff] }
  0x27   :  { %580 = vmatprep.subr.bf16.mxu1 %v953_v31  ;;  %v116_v13 = vsub.s32 0, %v115_v12  ;;  %v120_v15 = vsub.s32 1, %v115_v12  ;;  %v124_v22 = vsub.s32 2, %v115_v12  ;;  %v128_v25 = vsub.s32 3, %v115_v12 }
  0x28   :  { %540 = vmatpush1.bf16.msra.mxu0 %v916_v23 }
  0x29   :  { %541 = vmatprep.subr.bf16.mxu0 %v920_v24  ;;  %v117_v16 = vrot.slane %v110_v14, %v116_v13  ;;  %v121_v17 = vrot.slane %v110_v14, %v120_v15 }
  0x2a   :  { %581 = vmatpush1.bf16.msra.mxu1 %v955_v34 }
  0x2b   :  { %582 = vmatprep.subr.bf16.mxu1 %v959_v35 }
  0x2c   :  { %542 = vmatpush1.bf16.msra.mxu0 %v922_v27  ;;  %v125_v27 = vrot.slane %v110_v14, %v124_v22 }
  0x2d   :  { %609 = vmatprep.subr.bf16.mxu0 %v928_v28  ;;  %v129_v28 = vrot.slane %v110_v14, %v128_v25 }
  0x2e   :  { %583 = vmatpush1.bf16.msra.mxu1 %v961_v38 }
  0x2f   :  { %560 = vmatmul.mubr.bf16.vlgmr.msra.gmra.mxu0 %v1056_v30  ;;  %650 = vmatprep.subr.bf16.mxu1 %v967_v39 }
  0x30   :  { %610 = vmatpush1.bf16.msra.mxu0 %v926_v32  ;;  %641 = vmatprep.mubr.bf16.mxu0 %v1025_v0 }
  0x31   :  { %611 = vmatprep.subr.bf16.mxu0 %v934_v33  ;;  %601 = vmatmul.mubr.bf16.vlgmr.msra.gmra.mxu1 %v1056_v30 }
  0x32   :  { %651 = vmatpush1.bf16.msra.mxu1 %v965_v42  ;;  %682 = vmatprep.mubr.bf16.mxu1 %v1025_v0  ;;  %v1026_v0 = vmov 0.0  }
  0x33   :  { %652 = vmatprep.subr.bf16.mxu1 %v973_v43 }
  0x34   :  { %612 = vmatpush1.bf16.msra.mxu0 %v932_v36  ;;  %v132_v36 = vsub.s32 4, %v115_v12 }
  0x35   :  { %613 = vmatprep.subr.bf16.mxu0 %v940_v37  ;;  %v136_v37 = vsub.s32 5, %v115_v12 }
  0x36   :  { %653 = vmatpush1.bf16.msra.mxu1 %v971_v46  ;;  %v133_v38 = vrot.slane %v110_v14, %v132_v36 }
  0x37   :  { %654 = vmatprep.subr.bf16.mxu1 %v976_v47  ;;  %v137_v39 = vrot.slane %v110_v14, %v136_v37  ;;  %v144_v47 = vsub.s32 7, %v115_v12 }
  0x38   :  { %614 = vmatpush1.bf16.msra.mxu0 %v938_v40 }
  0x39   :  { %615 = vmatprep.subr.bf16.mxu0 %v946_v41 }
  0x3a   :  { %655 = vmatpush1.bf16.msra.mxu1 %v974_v50  ;;  %v145_v50 = vrot.slane %v110_v14, %v144_v47 }
  0x3b   :  { %656 = vmatprep.subr.bf16.mxu1 %v980_v51 }
  0x3c   :  { %616 = vmatpush1.bf16.msra.mxu0 %v944_v44  ;;  %v140_v44 = vsub.s32 6, %v115_v12 }
  0x3d   :  { %617 = vmatprep.subr.bf16.mxu0 %v952_v45 }
  0x3e   :  { %657 = vmatpush1.bf16.msra.mxu1 %v978_v54 }
  0x3f   :  { %658 = vmatprep.subr.bf16.mxu1 %v984_v55 }
  0x40   :  { %618 = vmatpush1.bf16.msra.mxu0 %v950_v48 }
  0x41   :  { %619 = vmatprep.subr.bf16.mxu0 %v958_v49  ;;  %v141_v49 = vrot.slane %v110_v14, %v140_v44 }
  0x42   :  { %659 = vmatpush1.bf16.msra.mxu1 %v982_v58  ;;  %v778_v58 = vld [vmem:[%s1088_s2 + $0x8] ss:$0 sm:$0xff] }
  0x43   :  { %660 = vmatprep.subr.bf16.mxu1 %v988_v59 }
  0x44   :  { %620 = vmatpush1.bf16.msra.mxu0 %v956_v52 }
  0x45   :  { %621 = vmatprep.subr.bf16.mxu0 %v964_v53 }
  0x46   :  { %661 = vmatpush1.bf16.msra.mxu1 %v986_v61 }
  0x47   :  { %662 = vmatprep.subr.bf16.mxu1 %v992_v62 }
  0x48   :  { %622 = vmatpush1.bf16.msra.mxu0 %v962_v56 }
  0x49   :  { %623 = vmatprep.subr.bf16.mxu0 %v970_v57 }
  0x4a   :  { %663 = vmatpush1.bf16.msra.mxu1 %v990_v1 }
  0x4b   :  { %664 = vmatprep.subr.bf16.mxu1 %v996_v2 }
  0x4c   :  { %624 = vmatpush1.bf16.msra.mxu0 %v968_v60 }
  0x4d   :  { %870 = vmatprep.subr.bf16.mxu0 %v1026_v0 }
  0x4e   :  { %665 = vmatpush1.bf16.msra.mxu1 %v994_v4 }
  0x4f   :  { %642 = vmatmul.mubr.bf16.vlgmr.msra.gmra.mxu0 %v1056_v30 }
  0x50   :  { %871 = vmatpush3.bf16.msra.mxu0 %v977_v63  ;;  %886 = vmatprep.mubr.msk.bf16.mxu0 %vm1027_vm0, %v1026_v0 }
  0x51   :  { %872 = vmatprep.subr.bf16.mxu0 %v1026_v0  ;;  %683 = vmatmul.mubr.bf16.vlgmr.msra.gmra.mxu1 %v1056_v30 }
  0x54   :  { %873 = vmatpush3.bf16.msra.mxu0 %v981_v3 }
  0x55   :  { %874 = vmatprep.subr.bf16.mxu0 %v1026_v0 }
  0x58   :  { %875 = vmatpush3.bf16.msra.mxu0 %v985_v5 }
  0x59   :  { %876 = vmatprep.subr.bf16.mxu0 %v1026_v0 }
  0x5c   :  { %877 = vmatpush3.bf16.msra.mxu0 %v989_v6 }
  0x5d   :  { %878 = vmatprep.subr.bf16.mxu0 %v1026_v0 }
  0x60   :  { %879 = vmatpush3.bf16.msra.mxu0 %v993_v7 }
  0x61   :  { %880 = vmatprep.subr.bf16.mxu0 %v1026_v0 }
  0x64   :  { %881 = vmatpush3.bf16.msra.mxu0 %v997_v8 }
  0x65   :  { %882 = vmatprep.subr.bf16.mxu0 %v1026_v0 }
  0x68   :  { %883 = vmatpush3.bf16.msra.mxu0 %v998_v9 }
  0x69   :  { %884 = vmatprep.subr.bf16.mxu0 %v1026_v0 }
  0x6c   :  { %885 = vmatpush3.bf16.msra.mxu0 %v999_v10 }
  0x6f   :  { %887 = vmatmul.mubr.bf16.vlgmr.msra.gmra.mxu0 %v1056_v30 }
  0xef   :  { %v561_v18 = vpop.f32.mrf.mxu0 }
  0xf0   :  { %v562_v19 = vadd.f32 %v561_v18, %v117_v16 }
  0xf1   :  { %v563_v20 = vpop.f32.mrf.mxu0  ;;  %v602_v29 = vpop.f32.mrf.mxu1 }
  0xf2   :  { %v564_v21 = vadd.f32 %v563_v20, %v121_v17  ;;  %v603_v30 = vadd.f32 %v602_v29, %v125_v27 }
  0xf3   :  { %v565_v23 = vpop.f32.mrf.mxu0  ;;  %v604_v31 = vpop.f32.mrf.mxu1 }
  0xf4   :  { %v856_v24 = vpack.c.bf16 %v564_v21, %v562_v19  ;;  %v605_v32 = vadd.f32 %v604_v31, %v129_v28 }
  0xf5   :  { %v566_v26 = vpop.f32.mrf.mxu0  ;;  %v606_v33 = vpop.f32.mrf.mxu1 }
  0xf6   :  { %768 = vst [vmem:[%s1089_s3] sm:$0xff] %v856_v24  ;;  %v857_v34 = vpack.c.bf16 %v605_v32, %v603_v30 }
  0xf7   :  { %v607_v35 = vpop.f32.mrf.mxu1 }
  0xf8   :  { %769 = vst [vmem:[%s1089_s3 + $0x8] sm:$0xff] %v857_v34 }
 0x10f   :  { %v643_v40 = vpop.f32.mrf.mxu0 }
 0x110   :  { %v644_v41 = vadd.f32 %v643_v40, %v133_v38 }
 0x111   :  { %v645_v42 = vpop.f32.mrf.mxu0  ;;  %v684_v51 = vpop.f32.mrf.mxu1 }
 0x112   :  { %v646_v43 = vadd.f32 %v645_v42, %v137_v39  ;;  %v685_v52 = vadd.f32 %v684_v51, %v141_v49 }
 0x113   :  { %v647_v45 = vpop.f32.mrf.mxu0  ;;  %v686_v53 = vpop.f32.mrf.mxu1 }
 0x114   :  { %v858_v46 = vpack.c.bf16 %v646_v43, %v644_v41  ;;  %v687_v54 = vadd.f32 %v686_v53, %v145_v50 }
 0x115   :  { %v648_v48 = vpop.f32.mrf.mxu0  ;;  %v688_v55 = vpop.f32.mrf.mxu1 }
 0x116   :  { %770 = vst [vmem:[%s1089_s3 + $0x10] sm:$0xff] %v858_v46  ;;  %v859_v56 = vpack.c.bf16 %v687_v54, %v685_v52 }
 0x117   :  { %v689_v57 = vpop.f32.mrf.mxu1 }
 0x118   :  { %771 = vst [vmem:[%s1089_s3 + $0x18] sm:$0xff] %v859_v56 }
 0x12f   :  { %v725_v59 = vpop.f32.mrf.mxu0 }
 0x130   :  { %v726_v60 = vadd.f32 %v778_v58, %v725_v59 }
 0x131   :  { %v888_v61 = vpop.f32.mrf.mxu0 }
 0x132   :  { %v860_v62 = vpack.c.bf16 %v726_v60, %v726_v60 }
 0x133   :  { %v728_v63 = vpop.f32.mrf.mxu0 }
 0x134   :  { %772 = vst [vmem:[%s1089_s3 + $0x20] sm:$0xf] %v860_v62 }
 0x135   :  { %v889_v0 = vpop.f32.mrf.mxu0 }
 0x136   :  { %777 = vsyncpa [#allocation3], 1 }

// kernel: _lambda_.5
= control target key start
LH: loop header
LB: loop body
LE: loop exit
PB: predicated region body
PF: predicated region fallthrough
CT: control target
= control target key end

     0   :  { %s3047_s15 = smov 0   ;;  %s3394_s0 = inlined_call_operand.vmem [shape: bf16[4,88,128], index: 0, kind: input, shape index: {}]   ;;  %s3395_s1 = inlined_call_operand.vmem [shape: bf16[9,128,128], index: 1, kind: input, shape index: {}]   ;;  %s3396_s2 = inlined_call_operand.vmem [shape: f32[1,128], index: 2, kind: input, shape index: {}]   ;;  %s3397_s3 = inlined_call_operand.vmem [shape: f32[1,128], index: 3, kind: input, shape index: {}]   ;;  %s3398_s4 = inlined_call_operand.vmem [shape: bf16[4,64,128], index: 4, kind: output, shape index: {}]  }
   0x1 LB: > { %s2253_s16 = sadd.s32 4294967295, %s3020_s15   ;;  %p2257_p0 = scmp.ge.s32.totalorder %s3020_s15, 1  ;;  %s3020_s15 = sphi %s3047_s15, %s14_s15  }
   0x2   : > { %p162_p1 = scmp.lt.s32.totalorder %s3020_s15, 5 }
   0x4   : > { %p163_p2 = pnand %p2257_p0, %p162_p1 }
   0x6   : > { %166 = sbr.rel (%p163_p2) target bundleno = 383 (0x17f), region = 36 }
   0xb   : > { %v2898_v0 = vld [vmem:[%s3395_s1 + $0x38] sm:$0xff]   ;;  %v2900_v2 = vld [vmem:[%s3395_s1 + $0x30] sm:$0xff]   ;;  %p188_p3 = scmp.lt.s32.totalorder %s2253_s16, 3  ;;  %v2902_v4 = vld [vmem:[%s3395_s1 + $0x28] sm:$0xff]   ;;  %vm449_vm0 = vsmask.f32 7424 }
   0xc   : > { %v2899_v1 = vld [vmem:[%s3395_s1 + $0x78] sm:$0xff]   ;;  %2657 = vmatprep.subr.bf16.mxu0 %v2898_v0  ;;  %v2901_v3 = vld [vmem:[%s3395_s1 + $0x70] sm:$0xff]   ;;  %v2903_v5 = vld [vmem:[%s3395_s1 + $0x68] sm:$0xff]   ;;  %vm676_vm1 = vcmask 1046528   ;;  %vm1301_vm2 = vsmask.f32 6400 }
   0xd   : > { %2681 = vmatprep.subr.bf16.mxu1 %v2899_v1  ;;  %2658 = vmatpush3.bf16.msra.mxu0 %v2898_v0  ;;  %s3408_s16 = smov (!%p188_p3, %s2253_s16), 3  ;;  %v2904_v6 = vld [vmem:[%s3395_s1 + $0x20] sm:$0xff]   ;;  %v2906_v8 = vld [vmem:[%s3395_s1 + $0x18] sm:$0xff]   ;;  %v2908_v10 = vld [vmem:[%s3395_s1 + $0x10] sm:$0xff]   ;;  %vm1969_vm3 = vcmask 1045504  }
   0xe   : > { %2682 = vmatpush3.bf16.msra.mxu1 %v2899_v1  ;;  %2659 = vmatprep.subr.bf16.mxu0 %v2900_v2  ;;  %v2905_v7 = vld [vmem:[%s3395_s1 + $0x60] sm:$0xff]   ;;  %s2889_s7 = smul.u32 44, %s3408_s16  ;;  %v2907_v9 = vld [vmem:[%s3395_s1 + $0x58] sm:$0xff]   ;;  %v2909_v11 = vld [vmem:[%s3395_s1 + $0x50] sm:$0xff]   ;;  %s2517_s29 = sshll.u32 %s3408_s16, 5 }
   0xf   : > { %2683 = vmatprep.subr.bf16.mxu1 %v2901_v3  ;;  %v2910_v15 = vld [vmem:[%s3395_s1 + $0x8] sm:$0xff]   ;;  %v2912_v21 = vld [vmem:[%s3395_s1] sm:$0xff]   ;;  %v2919_v32 = vld [vmem:[%s3395_s1 + $0xb8] sm:$0xff]   ;;  %s197_s6 = scalar_lea.vmem %s3398_s4, %s2517_s29 }
  0x10   : > { %s3097_s20 = scalar_lea.vmem %s3394_s0, %s2889_s7  ;;  %v2911_v20 = vld [vmem:[%s3395_s1 + $0x48] sm:$0xff]   ;;  %v2913_v27 = vld [vmem:[%s3395_s1 + $0x40] sm:$0xff]   ;;  %v2920_v33 = vld [vmem:[%s3395_s1 + $0xf8] sm:$0xff]  }
  0x11   : > { %2660 = vmatpush3.bf16.msra.mxu0 %v2900_v2  ;;  %v2914_v12 = vld [vmem:[%s3097_s20] sm:$0xff]   ;;  %v2916_v14 = vld [vmem:[%s3097_s20 + $0x8] sm:$0xff]   ;;  %v2918_v19 = vld [vmem:[%s3097_s20 + $0x10] sm:$0xff]  }
  0x12   : > { %2684 = vmatpush3.bf16.msra.mxu1 %v2901_v3  ;;  %2661 = vmatprep.subr.bf16.mxu0 %v2902_v4  ;;  %v2915_v13 = vld [vmem:[%s3097_s20] sm:$0xff]   ;;  %v458_v18 = vshll.u32 %v2916_v14, 16  ;;  %v462_v25 = vshrl.u32 %v2916_v14, 16  ;;  %v466_v26 = vshll.u32 %v2918_v19, 16  ;;  %v2917_v29 = vld [vmem:[%s3097_s20 + $0x8] sm:$0xff]   ;;  %v2921_v34 = vld [vmem:[%s3395_s1 + $0xb0] sm:$0xff]  }
  0x13   : > { %2685 = vmatprep.subr.bf16.mxu1 %v2903_v5  ;;  %2673 = vmatprep.mubr.bf16.mxu0 %v2914_v12  ;;  %v451_v16 = vshrl.u32 %v2915_v13, 16  ;;  %v453_v17 = vshll.u32 %v2915_v13, 16  ;;  %v2922_v35 = vld [vmem:[%s3395_s1 + $0xf0] sm:$0xff]   ;;  %v470_v36 = vshrl.u32 %v2918_v19, 16  ;;  %v2930_v39 = vld [vmem:[%s3097_s20 + $0x18] sm:$0xff]   ;;  %v2923_v40 = vld [vmem:[%s3395_s1 + $0xa8] sm:$0xff]  }
  0x14   : > { %v460_v23 = vrot.slane %v458_v18, 1  ;;  %v468_v31 = vrot.slane %v466_v26, 1  ;;  %v2929_v38 = vld [vmem:[%s3097_s20 + $0x10] sm:$0xff]   ;;  %v474_v42 = vshll.u32 %v2930_v39, 16  ;;  %v478_v44 = vshrl.u32 %v2930_v39, 16  ;;  %v2924_v45 = vld [vmem:[%s3395_s1 + $0xe8] sm:$0xff]  }
  0x15   : > { %2662 = vmatpush3.bf16.msra.mxu0 %v2902_v4  ;;  %v455_v22 = vrot.slane %v453_v17, 1  ;;  %v2932_v43 = vld [vmem:[%s3097_s20 + $0x20] ss:$0 sps:$4 sm:$0x11]   ;;  %v2931_v47 = vld [vmem:[%s3097_s20 + $0x18] sm:$0xff]   ;;  %v2940_v58 = vld [vmem:[%s3097_s20 + $0x8] sm:$0xff]  }
  0x16   : > { %2686 = vmatpush3.bf16.msra.mxu1 %v2903_v5  ;;  %2663 = vmatprep.subr.bf16.mxu0 %v2904_v6  ;;  %v464_v30 = vor.u32 %v462_v25, %v460_v23  ;;  %v472_v41 = vor.u32 %v470_v36, %v468_v31  ;;  %v476_v46 = vrot.slane %v474_v42, 1  ;;  %v482_v48 = vshll.u32 %v2932_v43, 16  ;;  %v2925_v52 = vld [vmem:[%s3395_s1 + $0xa0] sm:$0xff]   ;;  %v2927_v55 = vld [vmem:[%s3395_s1 + $0x98] sm:$0xff]   ;;  %v2942_v62 = vld [vmem:[%s3097_s20 + $0xc] sm:$0xff]  }
  0x17   : > { %2687 = vmatprep.subr.bf16.mxu1 %v2905_v7  ;;  %v456_v24 = vor.u32 %v455_v22, %v451_v16  ;;  %v2926_v53 = vld [vmem:[%s3395_s1 + $0xe0] sm:$0xff]   ;;  %v2928_v56 = vld [vmem:[%s3395_s1 + $0xd8] sm:$0xff]   ;;  %v678_v60 = vrot.slane %v2940_v58, 1  ;;  %v884_v2 = vshll.u32 %v2942_v62, 16  ;;  %v2933_v3 = vld [vmem:[%s3395_s1 + $0x90] sm:$0xff]  }
  0x18   : > { %v469_v37 = vsel %vm449_vm0, %v464_v30, %v468_v31  ;;  %v477_v49 = vsel %vm449_vm0, %v472_v41, %v476_v46  ;;  %v480_v50 = vor.u32 %v478_v44, %v476_v46  ;;  %v484_v51 = vrot.slane %v482_v48, 1  ;;  %v2939_v57 = vld [vmem:[%s3097_s20] sm:$0xfe]   ;;  %v2934_v4 = vld [vmem:[%s3395_s1 + $0xd0] sm:$0xff]   ;;  %v2945_v19 = vld [vmem:[%s3395_s1 + $0x138] sm:$0xff]  }
  0x19   : > { %2664 = vmatpush3.bf16.msra.mxu0 %v2904_v6  ;;  %v461_v28 = vsel %vm449_vm0, %v456_v24, %v460_v23  ;;  %v677_v59 = vrot.slane %v2939_v57, 1  ;;  %v2941_v61 = vld [vmem:[%s3097_s20 + $0x4] sm:$0xff]   ;;  %v886_v6 = vrot.slane %v884_v2, 1  ;;  %v2943_v13 = vld [vmem:[%s3097_s20 + $0x10] sm:$0xff]   ;;  %v2953_v17 = vld [vmem:[%s3097_s20 + $0x1c] sm:$0xff]  }
  0x1a   : > { %2688 = vmatpush3.bf16.msra.mxu1 %v2905_v7  ;;  %2665 = vmatprep.subr.bf16.mxu0 %v2906_v8  ;;  %v485_v54 = vsel %vm449_vm0, %v480_v50, %v484_v51  ;;  %v877_v0 = vshrl.u32 %v2941_v61, 16  ;;  %v879_v1 = vshll.u32 %v2941_v61, 16  ;;  %v2935_v7 = vld [vmem:[%s3395_s1 + $0x88] sm:$0xff]   ;;  %v2937_v12 = vld [vmem:[%s3395_s1 + $0x80] sm:$0xff]   ;;  %v680_v18 = vrot.slane %v2943_v13, 1  ;;  %v2946_v23 = vld [vmem:[%s3395_s1 + $0x178] sm:$0xff]  }
  0x1b   : > { %2689 = vmatprep.subr.bf16.mxu1 %v2907_v9  ;;  %2697 = vmatprep.mubr.bf16.mxu1 %v461_v28  ;;  %v679_v63 = vsel %vm676_vm1, %v677_v59, %v678_v60  ;;  %v2938_v14 = vld [vmem:[%s3395_s1 + $0xc0] sm:$0xff]   ;;  %v900_v22 = vshll.u32 %v2953_v17, 16  ;;  %v2947_v30 = vld [vmem:[%s3395_s1 + $0x130] sm:$0xff]   ;;  %v2951_v39 = vld [vmem:[%s3395_s1 + $0x128] sm:$0xff]  }
  0x1c   : > { %v881_v5 = vrot.slane %v879_v1, 1  ;;  %v2954_v26 = vld [vmem:[%s3097_s20 + $0x24] ss:$0 sps:$4 sm:$0x11]   ;;  %v2948_v36 = vld [vmem:[%s3395_s1 + $0x170] sm:$0xff]   ;;  %v2952_v41 = vld [vmem:[%s3395_s1 + $0x168] sm:$0xff]  }
  0x1d   : > { %2666 = vmatpush3.bf16.msra.mxu0 %v2906_v8  ;;  %v2965_v44 = vld [vmem:[%s3097_s20 + $0x4] sm:$0xfe]   ;;  %v2968_v48 = vld [vmem:[%s3097_s20 + $0xc] sm:$0xff]   ;;  %v2957_v61 = vld [vmem:[%s3395_s1 + $0x118] sm:$0xff]  }
  0x1e   : > { %2690 = vmatpush3.bf16.msra.mxu1 %v2907_v9  ;;  %2667 = vmatprep.subr.bf16.mxu0 %v2908_v10  ;;  %v882_v8 = vor.u32 %v881_v5, %v877_v0  ;;  %v2944_v9 = vld [vmem:[%s3097_s20 + $0x14] sm:$0xff]   ;;  %v2955_v50 = vld [vmem:[%s3395_s1 + $0x120] sm:$0xff]  }
  0x1f   : > { %2691 = vmatprep.subr.bf16.mxu1 %v2909_v11  ;;  %v892_v16 = vshll.u32 %v2944_v9, 16  ;;  %v2956_v51 = vld [vmem:[%s3395_s1 + $0x160] sm:$0xff]  }
  0x21   : > { %2668 = vmatpush3.bf16.msra.mxu0 %v2908_v10  ;;  %v2936_v10 = vld [vmem:[%s3395_s1 + $0xc8] sm:$0xff]   ;;  %v894_v25 = vrot.slane %v892_v16, 1  ;;  %v2980_v16 = vld [vmem:[%s3097_s20 + $0x24] ss:$0 sps:$4 sm:$0x33]  }
  0x22   : > { %2692 = vmatpush3.bf16.msra.mxu1 %v2909_v11  ;;  %2669 = vmatprep.subr.bf16.mxu0 %v2910_v15  ;;  %v887_v11 = vsel %vm449_vm0, %v882_v8, %v886_v6 }
  0x23   : > { %2693 = vmatprep.subr.bf16.mxu1 %v2911_v20 }
  0x25   : > { %2670 = vmatpush3.bf16.msra.mxu0 %v2910_v15  ;;  %v888_v15 = vshrl.u32 %v2942_v62, 16  ;;  %v2958_v62 = vld [vmem:[%s3395_s1 + $0x158] sm:$0xff]  }
  0x26   : > { %2694 = vmatpush3.bf16.msra.mxu1 %v2911_v20  ;;  %2671 = vmatprep.subr.bf16.mxu0 %v2912_v21  ;;  %v2949_v20 = vld [vmem:[%s3097_s20 + $0x18] sm:$0xff]  }
  0x27   : > { %2695 = vmatprep.subr.bf16.mxu1 %v2913_v27  ;;  %v890_v24 = vor.u32 %v888_v15, %v886_v6  ;;  %v682_v28 = vrot.slane %v2949_v20, 1  ;;  %v2960_v6 = vld [vmem:[%s3395_s1 + $0x150] sm:$0xff]  }
  0x29   : > { %2672 = vmatpush3.bf16.msra.mxu0 %v2912_v21  ;;  %v896_v21 = vshrl.u32 %v2944_v9, 16 }
  0x2a   : > { %2696 = vmatpush3.bf16.msra.mxu1 %v2913_v27  ;;  %2705 = vmatprep.subr.bf16.mxu0 %v2919_v32  ;;  %v2950_v27 = vld [vmem:[%s3097_s20 + $0x20] ss:$0 sps:$4 sm:$0x11]  }
  0x2b   : > { %2729 = vmatprep.subr.bf16.mxu1 %v2920_v33  ;;  %v898_v31 = vor.u32 %v896_v21, %v894_v25  ;;  %v2975_v21 = vld [vmem:[%s3097_s20 + $0x1c] sm:$0xff]  }
  0x2c   : > { %2674 = vmatmul.mubr.bf16.vlgmr.msra.gmra.mxu0 %v2917_v29  ;;  %v681_v29 = vsel %vm676_vm1, %v678_v60, %v680_v18 }
  0x2d   : > { %2698 = vmatmul.mubr.bf16.vlgmr.msra.gmra.mxu1 %v469_v37  ;;  %2706 = vmatpush3.bf16.msra.mxu0 %v2919_v32  ;;  %v902_v32 = vrot.slane %v900_v22, 1  ;;  %v683_v37 = vsel %vm676_vm1, %v680_v18, %v682_v28  ;;  %v2971_v22 = vld [vmem:[%s3395_s1 + $0x1b8] sm:$0xff]  }
  0x2e   : > { %2730 = vmatpush3.bf16.msra.mxu1 %v2920_v33  ;;  %2707 = vmatprep.subr.bf16.mxu0 %v2921_v34  ;;  %v895_v33 = vsel %vm449_vm0, %v890_v24, %v894_v25 }
  0x2f   : > { %2731 = vmatprep.subr.bf16.mxu1 %v2922_v35  ;;  %2677 = vmatprep.mubr.bf16.mxu0 %v2929_v38  ;;  %v684_v38 = vrot.slane %v2950_v27, 1  ;;  %v1341_v27 = vshll.u32 %v2980_v16, 16 }
  0x30   : > { %2701 = vmatprep.mubr.bf16.mxu1 %v477_v49 }
  0x31   : > { %2708 = vmatpush3.bf16.msra.mxu0 %v2921_v34  ;;  %v904_v34 = vshrl.u32 %v2953_v17, 16  ;;  %v685_v46 = vsel %vm676_vm1, %v682_v28, %v684_v38  ;;  %v2972_v28 = vld [vmem:[%s3395_s1 + $0x1f8] sm:$0xff]   ;;  %v2991_v38 = vld [vmem:[%s3097_s20 + $0x8] sm:$0xfe]  }
  0x32   : > { %2732 = vmatpush3.bf16.msra.mxu1 %v2922_v35  ;;  %2709 = vmatprep.subr.bf16.mxu0 %v2923_v40  ;;  %v908_v35 = vshll.u32 %v2954_v26, 16  ;;  %v1338_v26 = vshrl.u32 %v2980_v16, 16 }
  0x33   : > { %2733 = vmatprep.subr.bf16.mxu1 %v2924_v45  ;;  %v906_v42 = vor.u32 %v904_v34, %v902_v32 }
  0x34   : > { %2678 = vmatmul.mubr.bf16.gmra.mxu0 %v2931_v47  ;;  %v910_v43 = vrot.slane %v908_v35, 1  ;;  %v1102_v47 = vrot.slane %v2965_v44, 1  ;;  %v2994_v44 = vld [vmem:[%s3097_s20 + $0x10] sm:$0xff]  }
  0x35   : > { %2710 = vmatpush3.bf16.msra.mxu0 %v2923_v40  ;;  %2702 = vmatmul.mubr.bf16.gmra.mxu1 %v485_v54  ;;  %v903_v40 = vsel %vm449_vm0, %v898_v31, %v902_v32  ;;  %v1311_v54 = vshrl.u32 %v2968_v48, 16  ;;  %v1107_v31 = vrot.slane %v2975_v21, 1 }
  0x36   : > { %2734 = vmatpush3.bf16.msra.mxu1 %v2924_v45  ;;  %2711 = vmatprep.subr.bf16.mxu0 %v2925_v52  ;;  %v3208_v45 = vld [vmem:[%s3097_s20 + $0xc] sm:$0xff]   ;;  %v911_v49 = vsel %vm449_vm0, %v906_v42, %v910_v43 }
  0x37   : > { %2735 = vmatprep.subr.bf16.mxu1 %v2926_v53  ;;  %2721 = vmatprep.mubr.bf16.mxu0 %v679_v63  ;;  %v1313_v59 = vrot.slane %v1311_v54, 1 }
  0x38   : > { %2745 = vmatprep.mubr.bf16.mxu1 %v887_v11  ;;  %v2962_v11 = vld [vmem:[%s3395_s1 + $0x148] sm:$0xff]  }
  0x39   : > { %2712 = vmatpush3.bf16.msra.mxu0 %v2925_v52  ;;  %v1103_v52 = vrot.slane %v3208_v45, 1  ;;  %v2978_v45 = vld [vmem:[%s3395_s1 + $0x1e8] sm:$0xff]  }
  0x3a   : > { %2736 = vmatpush3.bf16.msra.mxu1 %v2926_v53  ;;  %2713 = vmatprep.subr.bf16.mxu0 %v2927_v55  ;;  %v2967_v53 = vld [vmem:[%s3097_s20 + $0x4] sm:$0xfe]  }
  0x3b   : > { %2737 = vmatprep.subr.bf16.mxu1 %v2928_v56  ;;  %v1303_v57 = vshrl.u32 %v2967_v53, 16  ;;  %v1306_v58 = vshll.u32 %v2967_v53, 16 }
  0x3d   : > { %2714 = vmatpush3.bf16.msra.mxu0 %v2927_v55  ;;  %v1314_v55 = vshll.u32 %v2968_v48, 16  ;;  %v1305_v63 = vrot.slane %v1303_v57, 1  ;;  %v1308_v0 = vrot.slane %v1306_v58, 2  ;;  %v1744_v48 = vshrl.u32 %v2994_v44, 16  ;;  %v2981_v58 = vld [vmem:[%s3395_s1 + $0x1a0] sm:$0xff]  }
  0x3e   : > { %2738 = vmatpush3.bf16.msra.mxu1 %v2928_v56  ;;  %2715 = vmatprep.subr.bf16.mxu0 %v2933_v3  ;;  %v1104_v56 = vsel %vm676_vm1, %v1102_v47, %v1103_v52  ;;  %v2993_v47 = vld [vmem:[%s3097_s20 + $0x8] sm:$0xfe]  }
  0x3f   : > { %2739 = vmatprep.subr.bf16.mxu1 %v2934_v4  ;;  %v1316_v60 = vrot.slane %v1314_v55, 2  ;;  %v1309_v2 = vor.u32 %v1308_v0, %v1305_v63  ;;  %v1739_v53 = vshll.u32 %v2993_v47, 16  ;;  %v1746_v55 = vrot.slane %v1744_v48, 1 }
  0x41   : > { %2716 = vmatpush3.bf16.msra.mxu0 %v2933_v3  ;;  %v1317_v1 = vor.u32 %v1316_v60, %v1313_v59  ;;  %v2970_v3 = vld [vmem:[%s3097_s20 + $0x14] sm:$0xff]   ;;  %v1741_v60 = vrot.slane %v1739_v53, 2 }
  0x42   : > { %2740 = vmatpush3.bf16.msra.mxu1 %v2934_v4  ;;  %2717 = vmatprep.subr.bf16.mxu0 %v2935_v7  ;;  %v2959_v4 = vld [vmem:[%s3395_s1 + $0x110] sm:$0xff]   ;;  %v1320_v8 = vshrl.u32 %v2970_v3, 16  ;;  %v1323_v9 = vshll.u32 %v2970_v3, 16  ;;  %v2984_v3 = vld [vmem:[%s3395_s1 + $0x1d8] sm:$0xff]  }
  0x43   : > { %2741 = vmatprep.subr.bf16.mxu1 %v2936_v10  ;;  %v1318_v5 = vsel %vm1301_vm2, %v1309_v2, %v1317_v1 }
  0x44   : > { %v1322_v17 = vrot.slane %v1320_v8, 1  ;;  %v1325_v18 = vrot.slane %v1323_v9, 2  ;;  %v3002_v8 = vld [vmem:[%s3097_s20 + $0x20] sm:$0xff]   ;;  %v2987_v9 = vld [vmem:[%s3395_s1 + $0x188] sm:$0xff]  }
  0x45   : > { %2718 = vmatpush3.bf16.msra.mxu0 %v2935_v7  ;;  %v2961_v7 = vld [vmem:[%s3395_s1 + $0x108] sm:$0xff]   ;;  %v1765_v16 = vshll.u32 %v3002_v8, 16 }
  0x46   : > { %2742 = vmatpush3.bf16.msra.mxu1 %v2936_v10  ;;  %2719 = vmatprep.subr.bf16.mxu0 %v2937_v12  ;;  %v2979_v10 = vld [vmem:[%s3097_s20 + $0x1c] sm:$0xff]   ;;  %v1326_v25 = vor.u32 %v1325_v18, %v1322_v17  ;;  %v3003_v18 = vld [vmem:[%s3097_s20 + $0x28] ss:$0 sps:$4 sm:$0x33]  }
  0x47   : > { %2743 = vmatprep.subr.bf16.mxu1 %v2938_v14  ;;  %v1329_v13 = vshrl.u32 %v2979_v10, 16  ;;  %v1332_v15 = vshll.u32 %v2979_v10, 16 }
  0x48   : > { %v1327_v35 = vsel %vm1301_vm2, %v1317_v1, %v1326_v25  ;;  %v2983_v1 = vld [vmem:[%s3395_s1 + $0x198] sm:$0xff]  }
  0x49   : > { %2720 = vmatpush3.bf16.msra.mxu0 %v2937_v12  ;;  %v2969_v12 = vld [vmem:[%s3097_s20 + $0x14] sm:$0xff]   ;;  %v1334_v24 = vrot.slane %v1332_v15, 2  ;;  %v1762_v15 = vshrl.u32 %v3002_v8, 16 }
  0x4a   : > { %2744 = vmatpush3.bf16.msra.mxu1 %v2938_v14  ;;  %2753 = vmatprep.subr.bf16.mxu0 %v2945_v19  ;;  %v2963_v14 = vld [vmem:[%s3395_s1 + $0x100] sm:$0xff]   ;;  %v1105_v20 = vrot.slane %v2969_v12, 1 }
  0x4b   : > { %2777 = vmatprep.subr.bf16.mxu1 %v2946_v23  ;;  %v2989_v12 = vld [vmem:[%s3395_s1 + $0x180] sm:$0xff]  }
  0x4c   : > { %2722 = vmatmul.mubr.bf16.vlgmr.msra.gmra.mxu0 %v681_v29  ;;  %v2976_v29 = vld [vmem:[%s3097_s20 + $0x24] ss:$0 sps:$4 sm:$0x11]   ;;  %v1106_v32 = vsel %vm676_vm1, %v1103_v52, %v1105_v20  ;;  %v1736_v52 = vshrl.u32 %v2993_v47, 16 }
  0x4d   : > { %2746 = vmatmul.mubr.bf16.vlgmr.msra.gmra.mxu1 %v895_v33  ;;  %2754 = vmatpush3.bf16.msra.mxu0 %v2945_v19  ;;  %v2964_v19 = vld [vmem:[%s3395_s1 + $0x140] sm:$0xff]   ;;  %v2974_v33 = vld [vmem:[%s3395_s1 + $0x1f0] sm:$0xff]   ;;  %v1109_v42 = vrot.slane %v2976_v29, 1 }
  0x4e   : > { %2778 = vmatpush3.bf16.msra.mxu1 %v2946_v23  ;;  %2755 = vmatprep.subr.bf16.mxu0 %v2947_v30  ;;  %v1331_v23 = vrot.slane %v1329_v13, 1  ;;  %v1738_v59 = vrot.slane %v1736_v52, 1  ;;  %v2995_v13 = vld [vmem:[%s3097_s20 + $0x18] sm:$0xff]  }
  0x4f   : > { %2779 = vmatprep.subr.bf16.mxu1 %v2948_v36  ;;  %2725 = vmatprep.mubr.bf16.mxu0 %v683_v37  ;;  %v1343_v37 = vrot.slane %v1341_v27, 2  ;;  %v1110_v54 = vsel %vm676_vm1, %v1107_v31, %v1109_v42  ;;  %v1539_v21 = vrot.slane %v2995_v13, 1  ;;  %v1774_v27 = vshll.u32 %v3003_v18, 16  ;;  %v3012_v42 = vld [vmem:[%s3097_s20 + $0x20] sm:$0xff]  }
  0x50   : > { %2749 = vmatprep.mubr.bf16.mxu1 %v903_v40  ;;  %v1335_v34 = vor.u32 %v1334_v24, %v1331_v23  ;;  %v2977_v40 = vld [vmem:[%s3395_s1 + $0x1a8] sm:$0xff]   ;;  %v1742_v0 = vor.u32 %v1741_v60, %v1738_v59  ;;  %v1767_v23 = vrot.slane %v1765_v16, 2 }
  0x51   : > { %2756 = vmatpush3.bf16.msra.mxu0 %v2947_v30  ;;  %v2973_v30 = vld [vmem:[%s3395_s1 + $0x1b0] sm:$0xff]  }
  0x52   : > { %2780 = vmatpush3.bf16.msra.mxu1 %v2948_v36  ;;  %2757 = vmatprep.subr.bf16.mxu0 %v2951_v39  ;;  %v1340_v36 = vrot.slane %v1338_v26, 1  ;;  %v1336_v43 = vsel %vm1301_vm2, %v1326_v25, %v1335_v34  ;;  %v2997_v25 = vld [vmem:[%s3395_s1 + $0x238] sm:$0xff]   ;;  %v1771_v26 = vshrl.u32 %v3003_v18, 16 }
  0x53   : > { %2781 = vmatprep.subr.bf16.mxu1 %v2952_v41 }
  0x54   : > { %2726 = vmatmul.mubr.bf16.gmra.mxu0 %v685_v46  ;;  %v1344_v46 = vor.u32 %v1343_v37, %v1340_v36  ;;  %v3009_v37 = vld [vmem:[%s3097_s20 + $0x8] sm:$0xfc]  }
  0x55   : > { %2758 = vmatpush3.bf16.msra.mxu0 %v2951_v39  ;;  %2750 = vmatmul.mubr.bf16.gmra.mxu1 %v911_v49  ;;  %v1108_v39 = vsel %vm676_vm1, %v1105_v20, %v1107_v31  ;;  %v1747_v49 = vshll.u32 %v2994_v44, 16  ;;  %v2999_v20 = vld [vmem:[%s3097_s20 + $0x20] sm:$0xff]  }
  0x56   : > { %2782 = vmatpush3.bf16.msra.mxu1 %v2952_v41  ;;  %2759 = vmatprep.subr.bf16.mxu0 %v2955_v50  ;;  %v3277_v41 = vld [vmem:[%s3097_s20 + $0x10] sm:$0xff]   ;;  %v1345_v57 = vsel %vm1301_vm2, %v1335_v34, %v1344_v46  ;;  %v1773_v34 = vrot.slane %v1771_v26, 1 }
  0x57   : > { %2783 = vmatprep.subr.bf16.mxu1 %v2956_v51  ;;  %2769 = vmatprep.mubr.bf16.mxu0 %v1104_v56  ;;  %v1749_v56 = vrot.slane %v1747_v49, 2  ;;  %v1975_v49 = vrot.slane %v3012_v42, 2 }
  0x58   : > { %2793 = vmatprep.mubr.bf16.mxu1 %v1318_v5  ;;  %v2985_v5 = vld [vmem:[%s3395_s1 + $0x190] sm:$0xff]  }
  0x59   : > { %2760 = vmatpush3.bf16.msra.mxu0 %v2955_v50  ;;  %v1536_v50 = vrot.slane %v2991_v38, 1  ;;  %v3010_v38 = vld [vmem:[%s3097_s20 + $0x10] sm:$0xff]  }
  0x5a   : > { %2784 = vmatpush3.bf16.msra.mxu1 %v2956_v51  ;;  %2761 = vmatprep.subr.bf16.mxu0 %v2957_v61  ;;  %v1537_v51 = vrot.slane %v3277_v41, 1  ;;  %v3011_v41 = vld [vmem:[%s3097_s20 + $0x18] sm:$0xff]   ;;  %v1971_v46 = vrot.slane %v3010_v38, 2 }
  0x5b   : > { %2785 = vmatprep.subr.bf16.mxu1 %v2958_v62  ;;  %v1973_v48 = vrot.slane %v3011_v41, 2 }
  0x5c   : > { %v1538_v63 = vsel %vm676_vm1, %v1536_v50, %v1537_v51  ;;  %v1540_v29 = vsel %vm676_vm1, %v1537_v51, %v1539_v21  ;;  %v3004_v51 = vld [vmem:[%s3395_s1 + $0x220] sm:$0xff]  }
  0x5d   : > { %2762 = vmatpush3.bf16.msra.mxu0 %v2957_v61  ;;  %v2982_v61 = vld [vmem:[%s3395_s1 + $0x1e0] sm:$0xff]   ;;  %v1976_v53 = vsel %vm1969_vm3, %v1973_v48, %v1975_v49  ;;  %v1974_v60 = vsel %vm1969_vm3, %v1971_v46, %v1973_v48 }
  0x5e   : > { %2786 = vmatpush3.bf16.msra.mxu1 %v2958_v62  ;;  %2763 = vmatprep.subr.bf16.mxu0 %v2959_v4  ;;  %v1750_v62 = vor.u32 %v1749_v56, %v1746_v55  ;;  %v3006_v55 = vld [vmem:[%s3395_s1 + $0x210] sm:$0xff]   ;;  %v3007_v56 = vld [vmem:[%s3395_s1 + $0x208] sm:$0xff]  }
  0x5f   : > { %2787 = vmatprep.subr.bf16.mxu1 %v2960_v6 }
  0x60   : > { %v1751_v2 = vsel %vm1301_vm2, %v1742_v0, %v1750_v62 }
  0x61   : > { %2764 = vmatpush3.bf16.msra.mxu0 %v2959_v4  ;;  %v2996_v4 = vld [vmem:[%s3097_s20 + $0x18] sm:$0xff]  }
  0x62   : > { %2788 = vmatpush3.bf16.msra.mxu1 %v2960_v6  ;;  %2765 = vmatprep.subr.bf16.mxu0 %v2961_v7  ;;  %v2986_v6 = vld [vmem:[%s3395_s1 + $0x1d0] sm:$0xff]   ;;  %v1756_v10 = vshll.u32 %v2996_v4, 16 }
  0x63   : > { %2789 = vmatprep.subr.bf16.mxu1 %v2962_v11 }
  0x64   : > { %v1758_v17 = vrot.slane %v1756_v10, 2 }
  0x65   : > { %2766 = vmatpush3.bf16.msra.mxu0 %v2961_v7  ;;  %v1753_v7 = vshrl.u32 %v2996_v4, 16 }
  0x66   : > { %2790 = vmatpush3.bf16.msra.mxu1 %v2962_v11  ;;  %2767 = vmatprep.subr.bf16.mxu0 %v2963_v14  ;;  %v2988_v11 = vld [vmem:[%s3395_s1 + $0x1c8] sm:$0xff]  }
  0x67   : > { %2791 = vmatprep.subr.bf16.mxu1 %v2964_v19 }
  0x69   : > { %2768 = vmatpush3.bf16.msra.mxu0 %v2963_v14  ;;  %v1755_v14 = vrot.slane %v1753_v7, 1 }
  0x6a   : > { %2792 = vmatpush3.bf16.msra.mxu1 %v2964_v19  ;;  %2801 = vmatprep.subr.bf16.mxu0 %v2971_v22  ;;  %v2990_v19 = vld [vmem:[%s3395_s1 + $0x1c0] sm:$0xff]  }
  0x6b   : > { %2825 = vmatprep.subr.bf16.mxu1 %v2972_v28  ;;  %v1759_v24 = vor.u32 %v1758_v17, %v1755_v14 }
  0x6c   : > { %2770 = vmatmul.mubr.bf16.vlgmr.msra.gmra.mxu0 %v1106_v32 }
  0x6d   : > { %2794 = vmatmul.mubr.bf16.vlgmr.msra.gmra.mxu1 %v1327_v35  ;;  %2802 = vmatpush3.bf16.msra.mxu0 %v2971_v22  ;;  %v1764_v22 = vrot.slane %v1762_v15, 1  ;;  %v1760_v32 = vsel %vm1301_vm2, %v1750_v62, %v1759_v24  ;;  %v1776_v35 = vrot.slane %v1774_v27, 2 }
  0x6e   : > { %2826 = vmatpush3.bf16.msra.mxu1 %v2972_v28  ;;  %2803 = vmatprep.subr.bf16.mxu0 %v2973_v30  ;;  %v1541_v28 = vrot.slane %v2999_v20, 1 }
  0x6f   : > { %2827 = vmatprep.subr.bf16.mxu1 %v2974_v33  ;;  %2773 = vmatprep.mubr.bf16.mxu0 %v1108_v39  ;;  %v1768_v31 = vor.u32 %v1767_v23, %v1764_v22  ;;  %v1777_v44 = vor.u32 %v1776_v35, %v1773_v34 }
  0x70   : > { %2797 = vmatprep.mubr.bf16.mxu1 %v1336_v43  ;;  %v1542_v36 = vsel %vm676_vm1, %v1539_v21, %v1541_v28  ;;  %v3001_v43 = vld [vmem:[%s3395_s1 + $0x228] sm:$0xff]  }
  0x71   : > { %2804 = vmatpush3.bf16.msra.mxu0 %v2973_v30  ;;  %v3000_v30 = vld [vmem:[%s3097_s20 + $0x28] ss:$0 sps:$4 sm:$0x11]   ;;  %v1778_v50 = vsel %vm1301_vm2, %v1768_v31, %v1777_v44 }
  0x72   : > { %2828 = vmatpush3.bf16.msra.mxu1 %v2974_v33  ;;  %2805 = vmatprep.subr.bf16.mxu0 %v2977_v40  ;;  %v2998_v33 = vld [vmem:[%s3395_s1 + $0x230] sm:$0xff]   ;;  %v1543_v39 = vrot.slane %v3000_v30, 1 }
  0x73   : > { %2829 = vmatprep.subr.bf16.mxu1 %v2978_v45 }
  0x74   : > { %2774 = vmatmul.mubr.bf16.gmra.mxu0 %v1110_v54  ;;  %v1544_v47 = vsel %vm676_vm1, %v1541_v28, %v1543_v39  ;;  %v3005_v54 = vld [vmem:[%s3395_s1 + $0x218] sm:$0xff]  }
  0x75   : > { %2806 = vmatpush3.bf16.msra.mxu0 %v2977_v40  ;;  %2798 = vmatmul.mubr.bf16.gmra.mxu1 %v1345_v57  ;;  %v1769_v40 = vsel %vm1301_vm2, %v1759_v24, %v1768_v31  ;;  %v3008_v57 = vld [vmem:[%s3395_s1 + $0x200] sm:$0xff]  }
  0x76   : > { %2830 = vmatpush3.bf16.msra.mxu1 %v2978_v45  ;;  %2807 = vmatprep.subr.bf16.mxu0 %v2981_v58  ;;  %v1970_v45 = vrot.slane %v3009_v37, 2 }
  0x77   : > { %2831 = vmatprep.subr.bf16.mxu1 %v2982_v61  ;;  %2817 = vmatprep.mubr.bf16.mxu0 %v1538_v63 }
  0x78   : > { %2841 = vmatprep.mubr.bf16.mxu1 %v1751_v2  ;;  %v1972_v52 = vsel %vm1969_vm3, %v1970_v45, %v1971_v46 }
  0x79   : > { %2808 = vmatpush3.bf16.msra.mxu0 %v2981_v58  ;;  %v3013_v58 = vld [vmem:[%s3097_s20 + $0x28] ss:$0 sps:$4 sm:$0x33]  }
  0x7a   : > { %2832 = vmatpush3.bf16.msra.mxu1 %v2982_v61  ;;  %2809 = vmatprep.subr.bf16.mxu0 %v2983_v1  ;;  %v1977_v59 = vrot.slane %v3013_v58, 2 }
  0x7b   : > { %2833 = vmatprep.subr.bf16.mxu1 %v2984_v3 }
  0x7c   : > { %v1978_v61 = vsel %vm1969_vm3, %v1975_v49, %v1977_v59 }
  0x7d   : > { %2810 = vmatpush3.bf16.msra.mxu0 %v2983_v1 }
  0x7e   : > { %2834 = vmatpush3.bf16.msra.mxu1 %v2984_v3  ;;  %2811 = vmatprep.subr.bf16.mxu0 %v2985_v5 }
  0x7f   : > { %2835 = vmatprep.subr.bf16.mxu1 %v2986_v6 }
  0x81   : > { %2812 = vmatpush3.bf16.msra.mxu0 %v2985_v5 }
  0x82   : > { %2836 = vmatpush3.bf16.msra.mxu1 %v2986_v6  ;;  %2813 = vmatprep.subr.bf16.mxu0 %v2987_v9 }
  0x83   : > { %2837 = vmatprep.subr.bf16.mxu1 %v2988_v11 }
  0x85   : > { %2814 = vmatpush3.bf16.msra.mxu0 %v2987_v9 }
  0x86   : > { %2838 = vmatpush3.bf16.msra.mxu1 %v2988_v11  ;;  %2815 = vmatprep.subr.bf16.mxu0 %v2989_v12 }
  0x87   : > { %2839 = vmatprep.subr.bf16.mxu1 %v2990_v19 }
  0x89   : > { %2816 = vmatpush3.bf16.msra.mxu0 %v2989_v12 }
  0x8a   : > { %2840 = vmatpush3.bf16.msra.mxu1 %v2990_v19  ;;  %2849 = vmatprep.subr.bf16.mxu0 %v2997_v25 }
  0x8b   : > { %2873 = vmatprep.subr.bf16.mxu1 %v2997_v25 }
  0x8c   : > { %2818 = vmatmul.mubr.bf16.vlgmr.msra.gmra.mxu0 %v1540_v29 }
  0x8d   : > { %2842 = vmatmul.mubr.bf16.vlgmr.msra.gmra.mxu1 %v1760_v32  ;;  %2850 = vmatpush3.bf16.msra.mxu0 %v2997_v25 }
  0x8e   : > { %2881 = vmatpush3.bf16.msra.mxu1 %v2997_v25  ;;  %2851 = vmatprep.subr.bf16.mxu0 %v2998_v33 }
  0x8f   : > { %2874 = vmatprep.subr.bf16.mxu1 %v2998_v33  ;;  %2821 = vmatprep.mubr.bf16.mxu0 %v1542_v36 }
  0x90   : > { %2845 = vmatprep.mubr.bf16.mxu1 %v1769_v40 }
  0x91   : > { %2852 = vmatpush3.bf16.msra.mxu0 %v2998_v33 }
  0x92   : > { %2882 = vmatpush3.bf16.msra.mxu1 %v2998_v33  ;;  %2853 = vmatprep.subr.bf16.mxu0 %v3001_v43 }
  0x93   : > { %2875 = vmatprep.subr.bf16.mxu1 %v3001_v43 }
  0x94   : > { %2822 = vmatmul.mubr.bf16.gmra.mxu0 %v1544_v47 }
  0x95   : > { %2854 = vmatpush3.bf16.msra.mxu0 %v3001_v43  ;;  %2846 = vmatmul.mubr.bf16.gmra.mxu1 %v1778_v50 }
  0x96   : > { %2883 = vmatpush3.bf16.msra.mxu1 %v3001_v43  ;;  %2855 = vmatprep.subr.bf16.mxu0 %v3004_v51 }
  0x97   : > { %2876 = vmatprep.subr.bf16.mxu1 %v3004_v51  ;;  %2865 = vmatprep.mubr.bf16.mxu0 %v1972_v52 }
  0x98   : > { %2869 = vmatprep.mubr.bf16.mxu1 %v1976_v53 }
  0x99   : > { %2856 = vmatpush3.bf16.msra.mxu0 %v3004_v51 }
  0x9a   : > { %2884 = vmatpush3.bf16.msra.mxu1 %v3004_v51  ;;  %2857 = vmatprep.subr.bf16.mxu0 %v3005_v54 }
  0x9b   : > { %2877 = vmatprep.subr.bf16.mxu1 %v3005_v54 }
  0x9d   : > { %2858 = vmatpush3.bf16.msra.mxu0 %v3005_v54 }
  0x9e   : > { %2885 = vmatpush3.bf16.msra.mxu1 %v3005_v54  ;;  %2859 = vmatprep.subr.bf16.mxu0 %v3006_v55 }
  0x9f   : > { %2878 = vmatprep.subr.bf16.mxu1 %v3006_v55 }
  0xa1   : > { %2860 = vmatpush3.bf16.msra.mxu0 %v3006_v55 }
  0xa2   : > { %2886 = vmatpush3.bf16.msra.mxu1 %v3006_v55  ;;  %2861 = vmatprep.subr.bf16.mxu0 %v3007_v56 }
  0xa3   : > { %2879 = vmatprep.subr.bf16.mxu1 %v3007_v56 }
  0xa5   : > { %2862 = vmatpush3.bf16.msra.mxu0 %v3007_v56 }
  0xa6   : > { %2887 = vmatpush3.bf16.msra.mxu1 %v3007_v56  ;;  %2863 = vmatprep.subr.bf16.mxu0 %v3008_v57 }
  0xa7   : > { %2880 = vmatprep.subr.bf16.mxu1 %v3008_v57 }
  0xa9   : > { %2864 = vmatpush3.bf16.msra.mxu0 %v3008_v57 }
  0xaa   : > { %2888 = vmatpush3.bf16.msra.mxu1 %v3008_v57 }
  0xac   : > { %2866 = vmatmul.mubr.bf16.vlgmr.msra.gmra.mxu0 %v1974_v60 }
  0xad   : > { %2870 = vmatmul.mubr.bf16.vlgmr.msra.gmra.mxu1 %v1978_v61 }
  0xec   : > { %v2675_v62 = vpop.f32.mrf.mxu0 }
  0xed   : > { %v2699_v0 = vpop.f32.mrf.mxu1 }
  0xee   : > { %v345_v63 = vpop.f32.mrf.mxu0  ;;  %v605_v51 = vadd.f32 %v2699_v0, %v2675_v62 }
  0xef   : > { %v572_v2 = vpop.f32.mrf.mxu1 }
  0xf0   : > { %v2676_v1 = vpop.f32.mrf.mxu0  ;;  %v603_v55 = vadd.f32 %v572_v2, %v345_v63 }
  0xf1   : > { %v2700_v5 = vpop.f32.mrf.mxu1 }
  0xf2   : > { %v348_v3 = vpop.f32.mrf.mxu0  ;;  %v606_v59 = vadd.f32 %v2700_v5, %v2676_v1 }
  0xf3   : > { %v575_v7 = vpop.f32.mrf.mxu1 }
  0xf4   : > { %v2679_v4 = vpop.f32.mrf.mxu0  ;;  %v604_v62 = vadd.f32 %v575_v7, %v348_v3 }
  0xf5   : > { %v2703_v8 = vpop.f32.mrf.mxu1 }
  0xf6   : > { %v361_v6 = vpop.f32.mrf.mxu0  ;;  %v609_v53 = vadd.f32 %v2703_v8, %v2679_v4 }
  0xf7   : > { %v588_v10 = vpop.f32.mrf.mxu1 }
  0xf8   : > { %v2680_v9 = vpop.f32.mrf.mxu0  ;;  %v607_v57 = vadd.f32 %v588_v10, %v361_v6 }
  0xf9   : > { %v2704_v13 = vpop.f32.mrf.mxu1 }
  0xfa   : > { %v364_v11 = vpop.f32.mrf.mxu0 }
  0xfb   : > { %v591_v15 = vpop.f32.mrf.mxu1 }
  0xfc   : > { %v608_v2 = vadd.f32 %v591_v15, %v364_v11 }
 0x10c   : > { %v2723_v12 = vpop.f32.mrf.mxu0 }
 0x10d   : > { %v2747_v16 = vpop.f32.mrf.mxu1  ;;  %v805_v56 = vadd.f32 %v2723_v12, %v605_v51 }
 0x10e   : > { %v772_v14 = vpop.f32.mrf.mxu0 }
 0x10f   : > { %v998_v18 = vpop.f32.mrf.mxu1  ;;  %v803_v60 = vadd.f32 %v772_v14, %v603_v55 }
 0x110   : > { %v2724_v17 = vpop.f32.mrf.mxu0 }
 0x111   : > { %v2748_v20 = vpop.f32.mrf.mxu1  ;;  %v806_v4 = vadd.f32 %v2724_v17, %v606_v59  ;;  %v1029_v51 = vadd.f32 %v998_v18, %v803_v60 }
 0x112   : > { %v775_v19 = vpop.f32.mrf.mxu0 }
 0x113   : > { %v1001_v22 = vpop.f32.mrf.mxu1  ;;  %v804_v6 = vadd.f32 %v775_v19, %v604_v62  ;;  %v1032_v14 = vadd.f32 %v2748_v20, %v806_v4 }
 0x114   : > { %v2727_v21 = vpop.f32.mrf.mxu0 }
 0x115   : > { %v2751_v24 = vpop.f32.mrf.mxu1  ;;  %v809_v58 = vadd.f32 %v2727_v21, %v609_v53 }
 0x116   : > { %v788_v23 = vpop.f32.mrf.mxu0 }
 0x117   : > { %v1014_v26 = vpop.f32.mrf.mxu1  ;;  %v1035_v63 = vadd.f32 %v2751_v24, %v809_v58 }
 0x118   : > { %v2728_v25 = vpop.f32.mrf.mxu0 }
 0x119   : > { %v2752_v28 = vpop.f32.mrf.mxu1 }
 0x11a   : > { %v791_v27 = vpop.f32.mrf.mxu0 }
 0x11b   : > { %v1017_v30 = vpop.f32.mrf.mxu1  ;;  %v808_v53 = vadd.f32 %v791_v27, %v608_v2 }
 0x12c   : > { %v2771_v29 = vpop.f32.mrf.mxu0 }
 0x12d   : > { %v2795_v32 = vpop.f32.mrf.mxu1 }
 0x12e   : > { %v1197_v31 = vpop.f32.mrf.mxu0 }
 0x12f   : > { %v1432_v34 = vpop.f32.mrf.mxu1  ;;  %v1228_v55 = vadd.f32 %v1197_v31, %v1029_v51 }
 0x130   : > { %v2772_v33 = vpop.f32.mrf.mxu0 }
 0x131   : > { %v2796_v36 = vpop.f32.mrf.mxu1  ;;  %v1231_v7 = vadd.f32 %v2772_v33, %v1032_v14  ;;  %v1463_v24 = vadd.f32 %v1432_v34, %v1228_v55 }
 0x132   : > { %v1200_v35 = vpop.f32.mrf.mxu0 }
 0x133   : > { %v3369_v38 = vpop.f32.mrf.mxu1 }
 0x134   : > { %v2775_v37 = vpop.f32.mrf.mxu0  ;;  %3399 = vst [vmem:[#allocation3_spill] sm:$0xff] %v3369_v38  ;;  %v610_v38 = vadd.f32 %v2704_v13, %v2680_v9 }
 0x135   : > { %v2799_v39 = vpop.f32.mrf.mxu1  ;;  %v1234_v1 = vadd.f32 %v2775_v37, %v1035_v63  ;;  %v1466_v37 = vadd.f32 %v2796_v36, %v1231_v7 }
 0x136   : > { %v1213_v40 = vpop.f32.mrf.mxu0  ;;  %v810_v12 = vadd.f32 %v2728_v25, %v610_v38 }
 0x137   : > { %v1448_v41 = vpop.f32.mrf.mxu1  ;;  %v1469_v17 = vadd.f32 %v2799_v39, %v1234_v1 }
 0x138   : > { %v2776_v42 = vpop.f32.mrf.mxu0  ;;  %v1036_v9 = vadd.f32 %v2752_v28, %v810_v12 }
 0x139   : > { %v2800_v43 = vpop.f32.mrf.mxu1 }
 0x13a   : > { %v1216_v44 = vpop.f32.mrf.mxu0  ;;  %v1235_v11 = vadd.f32 %v2776_v42, %v1036_v9 }
 0x13b   : > { %v1451_v46 = vpop.f32.mrf.mxu1 }
 0x13c   : > { %v1470_v31 = vadd.f32 %v2800_v43, %v1235_v11 }
 0x14c   : > { %v2819_v45 = vpop.f32.mrf.mxu0 }
 0x14d   : > { %v2843_v47 = vpop.f32.mrf.mxu1 }
 0x14e   : > { %v1631_v48 = vpop.f32.mrf.mxu0 }
 0x14f   : > { %v3371_v49 = vpop.f32.mrf.mxu1  ;;  %v1662_v20 = vadd.f32 %v1631_v48, %v1463_v24 }
 0x150   : > { %3400 = vst [vmem:[#allocation4_spill] sm:$0xff] %v3371_v49  ;;  %v2820_v50 = vpop.f32.mrf.mxu0  ;;  %v807_v49 = vadd.f32 %v788_v23, %v607_v57  ;;  %v1030_v23 = vadd.f32 %v1001_v22, %v804_v6 }
 0x151   : > { %v3373_v52 = vpop.f32.mrf.mxu1  ;;  %v1665_v33 = vadd.f32 %v2820_v50, %v1466_v37 }
 0x152   : > { %3401 = vst [vmem:[#allocation5_spill] sm:$0xff] %v3373_v52  ;;  %v1634_v54 = vpop.f32.mrf.mxu0  ;;  %v1031_v52 = vadd.f32 %v2747_v16, %v805_v56  ;;  %v1033_v21 = vadd.f32 %v1014_v26, %v807_v49  ;;  %v1034_v16 = vadd.f32 %v1017_v30, %v808_v53  ;;  %v1229_v18 = vadd.f32 %v1200_v35, %v1030_v23  ;;  %v2505_v35 = vld [vmem:[%s3396_s2] ss:$0 sm:$0xff] }
 0x153   : > { %v3375_v61 = vpop.f32.mrf.mxu1 }
 0x154   : > { %3402 = vst [vmem:[#allocation6_spill] sm:$0xff] %v3375_v61  ;;  %v2823_v0 = vpop.f32.mrf.mxu0  ;;  %v1230_v10 = vadd.f32 %v2771_v29, %v1031_v52  ;;  %v1232_v13 = vadd.f32 %v1213_v40, %v1033_v21  ;;  %v1233_v27 = vadd.f32 %v1216_v44, %v1034_v16  ;;  %v3403_v40 = vld [vmem:[#allocation3_spill] sm:$0xff] }
 0x155   : > { %v2847_v8 = vpop.f32.mrf.mxu1  ;;  %v1668_v29 = vadd.f32 %v2823_v0, %v1469_v17  ;;  %v1464_v22 = vadd.f32 %v3403_v40, %v1229_v18  ;;  %v2506_v0 = vld [vmem:[%s3397_s3] ss:$0 sm:$0xff] }
 0x156   : > { %v1647_v5 = vpop.f32.mrf.mxu0  ;;  %v1465_v3 = vadd.f32 %v2795_v32, %v1230_v10  ;;  %v1467_v26 = vadd.f32 %v1448_v41, %v1232_v13  ;;  %v1468_v39 = vadd.f32 %v1451_v46, %v1233_v27 }
 0x157   : > { %v1881_v61 = vpop.f32.mrf.mxu1  ;;  %v1902_v42 = vadd.f32 %v2847_v8, %v1668_v29  ;;  %v3404_v41 = vld [vmem:[#allocation4_spill] sm:$0xff]  ;;  %v1663_v36 = vadd.f32 %v1634_v54, %v1464_v22 }
 0x158   : > { %v2824_v15 = vpop.f32.mrf.mxu0  ;;  %v1664_v19 = vadd.f32 %v2819_v45, %v1465_v3  ;;  %v1666_v38 = vadd.f32 %v1647_v5, %v1467_v26  ;;  %v1896_v44 = vadd.f32 %v3404_v41, %v1662_v20 }
 0x159   : > { %v2848_v25 = vpop.f32.mrf.mxu1  ;;  %v1669_v49 = vadd.f32 %v2824_v15, %v1470_v31 }
 0x15a   : > { %v1650_v28 = vpop.f32.mrf.mxu0  ;;  %v1898_v32 = vadd.f32 %v2843_v47, %v1664_v19  ;;  %v1900_v48 = vadd.f32 %v1881_v61, %v1666_v38  ;;  %v3405_v47 = vld [vmem:[#allocation5_spill] sm:$0xff] }
 0x15b   : > { %v1884_v30 = vpop.f32.mrf.mxu1  ;;  %v1667_v52 = vadd.f32 %v1650_v28, %v1468_v39  ;;  %v1899_v50 = vadd.f32 %v3405_v47, %v1665_v33  ;;  %v1903_v60 = vadd.f32 %v2848_v25, %v1669_v49  ;;  %v3406_v54 = vld [vmem:[#allocation6_spill] sm:$0xff] }
 0x15c   : > { %v1897_v2 = vadd.f32 %v3406_v54, %v1663_v36 }
 0x15d   : > { %v1901_v51 = vadd.f32 %v1884_v30, %v1667_v52 }
 0x16c   : > { %v2867_v34 = vpop.f32.mrf.mxu0 }
 0x16d   : > { %v2098_v45 = vadd.f32 %v2867_v34, %v1898_v32  ;;  %v2871_v43 = vpop.f32.mrf.mxu1 }
 0x16e   : > { %v2102_v56 = vadd.f32 %v2871_v43, %v1902_v42  ;;  %v2065_v57 = vpop.f32.mrf.mxu0 }
 0x16f   : > { %v2129_v58 = vmul.f32 %v2505_v35, %v2098_v45  ;;  %v2096_v46 = vadd.f32 %v2065_v57, %v1896_v44  ;;  %v2081_v59 = vpop.f32.mrf.mxu1 }
 0x170   : > { %v2133_v62 = vmul.f32 %v2505_v35, %v2102_v56  ;;  %v2100_v4 = vadd.f32 %v2081_v59, %v1900_v48  ;;  %v2868_v8 = vpop.f32.mrf.mxu0 }
 0x171   : > { %v2127_v61 = vmul.f32 %v2505_v35, %v2096_v46  ;;  %v2099_v63 = vadd.f32 %v2868_v8, %v1899_v50  ;;  %v2872_v12 = vpop.f32.mrf.mxu1  ;;  %v2144_v53 = vadd.f32 %v2506_v0, %v2129_v58 }
 0x172   : > { %v2131_v6 = vmul.f32 %v2505_v35, %v2100_v4  ;;  %v2103_v10 = vadd.f32 %v2872_v12, %v1903_v60  ;;  %v2068_v21 = vpop.f32.mrf.mxu0  ;;  %v2148_v55 = vadd.f32 %v2506_v0, %v2133_v62 }
 0x173   : > { %v2130_v1 = vmul.f32 %v2505_v35, %v2099_v63  ;;  %v2097_v5 = vadd.f32 %v2068_v21, %v1897_v2  ;;  %v2084_v14 = vpop.f32.mrf.mxu1  ;;  %v2142_v23 = vadd.f32 %v2506_v0, %v2127_v61  ;;  %v2152_v15 = vmax.f32 %v2144_v53, 0.0 }
 0x174   : > { %v2134_v9 = vmul.f32 %v2505_v35, %v2103_v10  ;;  %v2101_v13 = vadd.f32 %v2084_v14, %v1901_v51  ;;  %v2146_v16 = vadd.f32 %v2506_v0, %v2131_v6  ;;  %v2156_v19 = vmax.f32 %v2148_v55, 0.0 }
 0x175   : > { %v2145_v3 = vadd.f32 %v2506_v0, %v2130_v1  ;;  %v2128_v7 = vmul.f32 %v2505_v35, %v2097_v5  ;;  %v2150_v27 = vmax.f32 %v2142_v23, 0.0 }
 0x176   : > { %v2149_v17 = vadd.f32 %v2506_v0, %v2134_v9  ;;  %v2132_v11 = vmul.f32 %v2505_v35, %v2101_v13  ;;  %v2154_v20 = vmax.f32 %v2146_v16, 0.0 }
 0x177   : > { %v2153_v24 = vmax.f32 %v2145_v3, 0.0  ;;  %v2143_v18 = vadd.f32 %v2506_v0, %v2128_v7 }
 0x178   : > { %v2157_v25 = vmax.f32 %v2149_v17, 0.0  ;;  %v2147_v26 = vadd.f32 %v2506_v0, %v2132_v11 }
 0x179   : > { %v2534_v29 = vpack.c.bf16 %v2153_v24, %v2152_v15  ;;  %v2151_v37 = vmax.f32 %v2143_v18, 0.0 }
 0x17a   : > { %v2544_v31 = vpack.c.bf16 %v2157_v25, %v2156_v19  ;;  %v2155_v38 = vmax.f32 %v2147_v26, 0.0 }
 0x17b   : > { %2546 = vst [vmem:[%s197_s6 + $0x8] sm:$0xff] %v2534_v29   ;;  %v2529_v28 = vpack.c.bf16 %v2151_v37, %v2150_v27 }
 0x17c   : > { %2548 = vst [vmem:[%s197_s6 + $0x18] sm:$0xff] %v2544_v31   ;;  %v2539_v40 = vpack.c.bf16 %v2155_v38, %v2154_v20 }
 0x17d   : > { %2530 = vst [vmem:[%s197_s6] sm:$0xff] %v2529_v28  }
 0x17e   : > { %2547 = vst [vmem:[%s197_s6 + $0x10] sm:$0xff] %v2539_v40  }
 0x17f PF: > { %s14_s15 = sadd.s32 1, %s3020_s15  }
 0x180   : > { %p11_p4 = scmp.ge.s32.totalorder %s14_s15, 6  }
 0x182   :  { %13 = sbr.rel (!%p11_p4) target bundleno = 1 (0x1), region = 74 }

// kernel: _lambda_.6
= control target key start
LH: loop header
LB: loop body
LE: loop exit
PB: predicated region body
PF: predicated region fallthrough
CT: control target
= control target key end

     0   :  { %s6827_s15 = smov 0   ;;  %s7960_s0 = inlined_call_operand.vmem [shape: bf16[4,296,128], index: 0, kind: input, shape index: {}]   ;;  %s7961_s1 = inlined_call_operand.vmem [shape: bf16[9,128,128], index: 1, kind: input, shape index: {}]   ;;  %s7962_s2 = inlined_call_operand.vmem [shape: f32[1,128], index: 2, kind: input, shape index: {}]   ;;  %s7963_s3 = inlined_call_operand.vmem [shape: f32[1,128], index: 3, kind: input, shape index: {}]   ;;  %s7964_s4 = inlined_call_operand.vmem [shape: bf16[4,256,128], index: 4, kind: output, shape index: {}]  }
   0x1 LB: > { %s5373_s16 = sadd.s32 4294967295, %s6800_s15   ;;  %p5377_p0 = scmp.ge.s32.totalorder %s6800_s15, 1  ;;  %s6800_s15 = sphi %s6827_s15, %s14_s15  }
   0x2   : > { %p162_p1 = scmp.lt.s32.totalorder %s6800_s15, 5 }
   0x4   : > { %p163_p2 = pnand %p5377_p0, %p162_p1 }
   0x6   : > { %166 = sbr.rel (%p163_p2) target bundleno = 536 (0x218), region = 36 }
   0xb   : > { %v6570_v0 = vld [vmem:[%s7961_s1 + $0x38] sm:$0xff]   ;;  %p188_p3 = scmp.lt.s32.totalorder %s5373_s16, 3  ;;  %v6571_v1 = vld [vmem:[%s7961_s1 + $0x30] sm:$0xff]   ;;  %v6572_v2 = vld [vmem:[%s7961_s1 + $0x28] sm:$0xff]   ;;  %vm1432_vm0 = vcmask 1046528   ;;  %vm4693_vm3 = vcmask 1045504  }
   0xc   : > { %6113 = vmatprep.subr.bf16.mxu0 %v6570_v0  ;;  %6545 = vmatprep.subr.bf16.mxu1 %v6570_v0  ;;  %v6573_v3 = vld [vmem:[%s7961_s1 + $0x20] sm:$0xff]   ;;  %v6574_v6 = vld [vmem:[%s7961_s1 + $0x18] sm:$0xff]   ;;  %v6575_v7 = vld [vmem:[%s7961_s1 + $0x10] sm:$0xff]   ;;  %vm845_vm1 = vsmask.f32 7424 }
   0xd   : > { %s7994_s16 = smov (!%p188_p3, %s5373_s16), 3  ;;  %6114 = vmatpush3.bf16.msra.mxu0 %v6570_v0  ;;  %6553 = vmatpush3.bf16.msra.mxu1 %v6570_v0  ;;  %v6576_v8 = vld [vmem:[%s7961_s1 + $0x8] sm:$0xff]   ;;  %v6577_v9 = vld [vmem:[%s7961_s1] sm:$0xff]   ;;  %v6582_v10 = vld [vmem:[%s7961_s1 + $0x78] sm:$0xff]   ;;  %vm2993_vm2 = vsmask.f32 6400 }
   0xe   : > { %6115 = vmatprep.subr.bf16.mxu0 %v6571_v1  ;;  %6546 = vmatprep.subr.bf16.mxu1 %v6571_v1  ;;  %s6561_s23 = smul.u32 148, %s7994_s16  ;;  %v6583_v12 = vld [vmem:[%s7961_s1 + $0xb8] sm:$0xff]   ;;  %v6584_v14 = vld [vmem:[%s7961_s1 + $0x70] sm:$0xff]   ;;  %v6590_v18 = vld [vmem:[%s7961_s1 + $0x68] sm:$0xff]   ;;  %s5769_s30 = sshll.u32 %s7994_s16, 7 }
   0xf   : > { %v6585_v15 = vld [vmem:[%s7961_s1 + $0xb0] sm:$0xff]   ;;  %v6591_v20 = vld [vmem:[%s7961_s1 + $0xa8] sm:$0xff]   ;;  %v6592_v22 = vld [vmem:[%s7961_s1 + $0x60] sm:$0xff]   ;;  %s7837_s6 = scalar_lea.vmem %s7964_s4, %s5769_s30 }
  0x10   : > { %s6850_s26 = scalar_lea.vmem %s7960_s0, %s6561_s23  ;;  %v6593_v23 = vld [vmem:[%s7961_s1 + $0xa0] sm:$0xff]   ;;  %v6598_v28 = vld [vmem:[%s7961_s1 + $0x58] sm:$0xff]   ;;  %v6600_v32 = vld [vmem:[%s7961_s1 + $0x50] sm:$0xff]  }
  0x11   : > { %6116 = vmatpush3.bf16.msra.mxu0 %v6571_v1  ;;  %6554 = vmatpush3.bf16.msra.mxu1 %v6571_v1  ;;  %v6578_v4 = vld [vmem:[%s6850_s26] sm:$0xff]   ;;  %v6580_v11 = vld [vmem:[%s6850_s26 + $0x8] sm:$0xff]   ;;  %v6586_v16 = vld [vmem:[%s6850_s26 + $0x10] sm:$0xff]  }
  0x12   : > { %6117 = vmatprep.subr.bf16.mxu0 %v6572_v2  ;;  %6547 = vmatprep.subr.bf16.mxu1 %v6572_v2  ;;  %v6579_v5 = vld [vmem:[%s6850_s26 + $0x40] sm:$0xff]   ;;  %v6581_v13 = vld [vmem:[%s6850_s26 + $0x48] sm:$0xff]   ;;  %v6587_v17 = vld [vmem:[%s6850_s26 + $0x50] sm:$0xff]  }
  0x13   : > { %6129 = vmatprep.mubr.bf16.mxu0 %v6578_v4  ;;  %6145 = vmatprep.mubr.bf16.mxu1 %v6579_v5  ;;  %v6588_v19 = vld [vmem:[%s6850_s26 + $0x18] sm:$0xff]   ;;  %v6594_v24 = vld [vmem:[%s6850_s26 + $0x20] sm:$0xff]   ;;  %v6596_v27 = vld [vmem:[%s6850_s26 + $0x28] sm:$0xff]  }
  0x14   : > { %v6589_v21 = vld [vmem:[%s6850_s26 + $0x58] sm:$0xff]   ;;  %v6595_v25 = vld [vmem:[%s6850_s26 + $0x60] sm:$0xff]   ;;  %v6597_v30 = vld [vmem:[%s6850_s26 + $0x68] sm:$0xff]  }
  0x15   : > { %6118 = vmatpush3.bf16.msra.mxu0 %v6572_v2  ;;  %6555 = vmatpush3.bf16.msra.mxu1 %v6572_v2  ;;  %v6610_v26 = vld [vmem:[%s6850_s26] sm:$0xff]   ;;  %v6599_v29 = vld [vmem:[%s7961_s1 + $0x98] sm:$0xff]   ;;  %v6611_v31 = vld [vmem:[%s6850_s26 + $0x8] sm:$0xff]  }
  0x16   : > { %6119 = vmatprep.subr.bf16.mxu0 %v6573_v3  ;;  %6548 = vmatprep.subr.bf16.mxu1 %v6573_v3  ;;  %v6601_v33 = vld [vmem:[%s7961_s1 + $0x90] sm:$0xff]   ;;  %v849_v34 = vshll.u32 %v6610_v26, 16  ;;  %v847_v37 = vshrl.u32 %v6610_v26, 16  ;;  %v6612_v38 = vld [vmem:[%s6850_s26] sm:$0xfe]   ;;  %v854_v39 = vshll.u32 %v6611_v31, 16 }
  0x17   : > { %v6602_v35 = vld [vmem:[%s6850_s26 + $0x30] sm:$0xff]   ;;  %v6613_v40 = vld [vmem:[%s6850_s26 + $0x8] sm:$0xff]   ;;  %v6604_v44 = vld [vmem:[%s6850_s26 + $0x38] sm:$0xff]   ;;  %v858_v49 = vshrl.u32 %v6611_v31, 16  ;;  %v1433_v53 = vrot.slane %v6612_v38, 1 }
  0x18   : > { %v6603_v36 = vld [vmem:[%s6850_s26 + $0x70] sm:$0xff]   ;;  %v851_v41 = vrot.slane %v849_v34, 1  ;;  %v6606_v43 = vld [vmem:[%s7961_s1 + $0x48] sm:$0xff]   ;;  %v6605_v45 = vld [vmem:[%s6850_s26 + $0x78] sm:$0xff]   ;;  %v856_v48 = vrot.slane %v854_v39, 1  ;;  %v1434_v54 = vrot.slane %v6613_v40, 1 }
  0x19   : > { %6120 = vmatpush3.bf16.msra.mxu0 %v6573_v3  ;;  %6556 = vmatpush3.bf16.msra.mxu1 %v6573_v3  ;;  %v6614_v42 = vld [vmem:[%s6850_s26 + $0x10] sm:$0xff]   ;;  %v6607_v46 = vld [vmem:[%s7961_s1 + $0x88] sm:$0xff]   ;;  %v6931_v47 = vld [vmem:[%s6850_s26 + $0x18] sm:$0xff]  }
  0x1a   : > { %6121 = vmatprep.subr.bf16.mxu0 %v6574_v6  ;;  %6549 = vmatprep.subr.bf16.mxu1 %v6574_v6  ;;  %v6608_v50 = vld [vmem:[%s7961_s1 + $0x40] sm:$0xff]   ;;  %v852_v52 = vor.u32 %v851_v41, %v847_v37  ;;  %v862_v55 = vshll.u32 %v6614_v42, 16  ;;  %v6615_v56 = vld [vmem:[%s6850_s26 + $0x10] sm:$0xff]   ;;  %v870_v57 = vshll.u32 %v6931_v47, 16  ;;  %v6619_v58 = vld [vmem:[%s6850_s26 + $0x18] sm:$0xff]   ;;  %v866_v59 = vshrl.u32 %v6614_v42, 16 }
  0x1b   : > { %v6609_v51 = vld [vmem:[%s7961_s1 + $0x80] sm:$0xff]   ;;  %v1435_v61 = vsel %vm1432_vm0, %v1433_v53, %v1434_v54  ;;  %v1436_v62 = vrot.slane %v6615_v56, 1  ;;  %v6616_v63 = vld [vmem:[%s7961_s1 + $0xf8] sm:$0xff]   ;;  %v860_v1 = vor.u32 %v858_v49, %v856_v48  ;;  %v1438_v5 = vrot.slane %v6619_v58, 1  ;;  %v6627_v31 = vld [vmem:[%s6850_s26 + $0x30] sm:$0xff]  }
  0x1c   : > { %v857_v60 = vsel %vm845_vm1, %v852_v52, %v856_v48  ;;  %v6620_v0 = vld [vmem:[%s6850_s26 + $0x20] sm:$0xff]   ;;  %v864_v2 = vrot.slane %v862_v55, 1  ;;  %v6617_v3 = vld [vmem:[%s7961_s1 + $0x138] sm:$0xff]   ;;  %v872_v4 = vrot.slane %v870_v57, 1  ;;  %v7002_v58 = vld [vmem:[%s6850_s26 + $0x48] sm:$0xff]  }
  0x1d   : > { %6122 = vmatpush3.bf16.msra.mxu0 %v6574_v6  ;;  %6557 = vmatpush3.bf16.msra.mxu1 %v6574_v6  ;;  %v874_v6 = vshrl.u32 %v6931_v47, 16  ;;  %v6634_v40 = vld [vmem:[%s7961_s1 + $0xe0] sm:$0xff]   ;;  %v6990_v47 = vld [vmem:[%s6850_s26 + $0x48] sm:$0xff]   ;;  %v6641_v52 = vld [vmem:[%s7961_s1 + $0x118] sm:$0xff]  }
  0x1e   : > { %6123 = vmatprep.subr.bf16.mxu0 %v6575_v7  ;;  %6550 = vmatprep.subr.bf16.mxu1 %v6575_v7  ;;  %v6635_v41 = vld [vmem:[%s7961_s1 + $0x120] sm:$0xff]  }
  0x21   : > { %6124 = vmatpush3.bf16.msra.mxu0 %v6575_v7  ;;  %6558 = vmatpush3.bf16.msra.mxu1 %v6575_v7  ;;  %v6624_v7 = vld [vmem:[%s6850_s26 + $0x28] sm:$0xff]  }
  0x22   : > { %6125 = vmatprep.subr.bf16.mxu0 %v6576_v8  ;;  %6551 = vmatprep.subr.bf16.mxu1 %v6576_v8  ;;  %v890_v34 = vshrl.u32 %v6624_v7, 16 }
  0x25   : > { %6126 = vmatpush3.bf16.msra.mxu0 %v6576_v8  ;;  %6559 = vmatpush3.bf16.msra.mxu1 %v6576_v8  ;;  %v868_v8 = vor.u32 %v866_v59, %v864_v2 }
  0x26   : > { %6127 = vmatprep.subr.bf16.mxu0 %v6577_v9  ;;  %6552 = vmatprep.subr.bf16.mxu1 %v6577_v9 }
  0x29   : > { %6128 = vmatpush3.bf16.msra.mxu0 %v6577_v9  ;;  %6560 = vmatpush3.bf16.msra.mxu1 %v6577_v9  ;;  %v878_v9 = vshll.u32 %v6620_v0, 16 }
  0x2a   : > { %6161 = vmatprep.subr.bf16.mxu1 %v6582_v10  ;;  %6209 = vmatprep.subr.bf16.mxu0 %v6583_v12 }
  0x2c   : > { %6130 = vmatmul.mubr.bf16.vlgmr.msra.gmra.mxu0 %v6580_v11  ;;  %6146 = vmatmul.mubr.bf16.vlgmr.msra.gmra.mxu1 %v6581_v13  ;;  %v865_v11 = vsel %vm845_vm1, %v860_v1, %v864_v2  ;;  %v6622_v13 = vld [vmem:[%s7961_s1 + $0xf0] sm:$0xff]  }
  0x2d   : > { %6162 = vmatpush3.bf16.msra.mxu1 %v6582_v10  ;;  %6210 = vmatpush3.bf16.msra.mxu0 %v6583_v12  ;;  %v6621_v10 = vld [vmem:[%s6850_s26 + $0x20] sm:$0xff]   ;;  %v1437_v12 = vsel %vm1432_vm0, %v1434_v54, %v1436_v62  ;;  %v6638_v1 = vld [vmem:[%s6850_s26 + $0x50] sm:$0xff]  }
  0x2e   : > { %6163 = vmatprep.subr.bf16.mxu1 %v6584_v14  ;;  %6211 = vmatprep.subr.bf16.mxu0 %v6585_v15  ;;  %v6633_v54 = vld [vmem:[%s6850_s26 + $0x40] sm:$0xff]  }
  0x2f   : > { %6133 = vmatprep.mubr.bf16.mxu0 %v6586_v16  ;;  %6149 = vmatprep.mubr.bf16.mxu1 %v6587_v17  ;;  %v6625_v16 = vld [vmem:[%s6850_s26 + $0x28] sm:$0xff]   ;;  %v873_v17 = vsel %vm845_vm1, %v868_v8, %v872_v4  ;;  %v6639_v8 = vld [vmem:[%s6850_s26 + $0x50] sm:$0xff]  }
  0x31   : > { %6164 = vmatpush3.bf16.msra.mxu1 %v6584_v14  ;;  %6212 = vmatpush3.bf16.msra.mxu0 %v6585_v15  ;;  %v882_v14 = vshrl.u32 %v6620_v0, 16  ;;  %v886_v15 = vshll.u32 %v6624_v7, 16  ;;  %v6642_v7 = vld [vmem:[%s6850_s26 + $0x58] sm:$0xff]  }
  0x32   : > { %6165 = vmatprep.subr.bf16.mxu1 %v6590_v18  ;;  %6213 = vmatprep.subr.bf16.mxu0 %v6591_v20 }
  0x33   : > { %v888_v26 = vrot.slane %v886_v15, 1 }
  0x34   : > { %6134 = vmatmul.mubr.bf16.gmra.mxu0 %v6588_v19  ;;  %6150 = vmatmul.mubr.bf16.gmra.mxu1 %v6589_v21  ;;  %v6623_v19 = vld [vmem:[%s7961_s1 + $0x130] sm:$0xff]   ;;  %v1440_v21 = vrot.slane %v6621_v10, 1  ;;  %v922_v10 = vshrl.u32 %v6990_v47, 16 }
  0x35   : > { %6166 = vmatpush3.bf16.msra.mxu1 %v6590_v18  ;;  %6214 = vmatpush3.bf16.msra.mxu0 %v6591_v20  ;;  %v1439_v18 = vsel %vm1432_vm0, %v1436_v62, %v1438_v5  ;;  %v880_v20 = vrot.slane %v878_v9, 1  ;;  %v6646_v62 = vld [vmem:[%s7961_s1 + $0xd0] sm:$0xff]   ;;  %v6652_v9 = vld [vmem:[%s7961_s1 + $0xc8] sm:$0xff]  }
  0x36   : > { %6167 = vmatprep.subr.bf16.mxu1 %v6592_v22  ;;  %6215 = vmatprep.subr.bf16.mxu0 %v6593_v23 }
  0x37   : > { %6137 = vmatprep.mubr.bf16.mxu0 %v6594_v24  ;;  %6153 = vmatprep.mubr.bf16.mxu1 %v6595_v25  ;;  %v876_v24 = vor.u32 %v874_v6, %v872_v4  ;;  %v884_v25 = vor.u32 %v882_v14, %v880_v20  ;;  %v1450_v6 = vrot.slane %v7002_v58, 1 }
  0x39   : > { %6168 = vmatpush3.bf16.msra.mxu1 %v6592_v22  ;;  %6216 = vmatpush3.bf16.msra.mxu0 %v6593_v23  ;;  %v6626_v22 = vld [vmem:[%s6850_s26 + $0x30] sm:$0xff]   ;;  %v6628_v23 = vld [vmem:[%s7961_s1 + $0xe8] sm:$0xff]  }
  0x3a   : > { %6169 = vmatprep.subr.bf16.mxu1 %v6598_v28  ;;  %6217 = vmatprep.subr.bf16.mxu0 %v6599_v29  ;;  %v898_v38 = vshrl.u32 %v6626_v22, 16 }
  0x3c   : > { %6138 = vmatmul.mubr.bf16.gmra.mxu0 %v6596_v27  ;;  %6154 = vmatmul.mubr.bf16.gmra.mxu1 %v6597_v30  ;;  %v1442_v27 = vrot.slane %v6625_v16, 1  ;;  %v894_v30 = vshll.u32 %v6626_v22, 16  ;;  %v6658_v22 = vld [vmem:[%s7961_s1 + $0xc0] sm:$0xff]  }
  0x3d   : > { %6170 = vmatpush3.bf16.msra.mxu1 %v6598_v28  ;;  %6218 = vmatpush3.bf16.msra.mxu0 %v6599_v29  ;;  %v6629_v28 = vld [vmem:[%s7961_s1 + $0x128] sm:$0xff]   ;;  %v6630_v29 = vld [vmem:[%s6850_s26 + $0x38] sm:$0xff]  }
  0x3e   : > { %6171 = vmatprep.subr.bf16.mxu1 %v6600_v32  ;;  %6219 = vmatprep.subr.bf16.mxu0 %v6601_v33  ;;  %v1443_v37 = vsel %vm1432_vm0, %v1440_v21, %v1442_v27  ;;  %v902_v39 = vshll.u32 %v6630_v29, 16  ;;  %v896_v42 = vrot.slane %v894_v30, 1  ;;  %v938_v30 = vshrl.u32 %v6642_v7, 16 }
  0x3f   : > { %6141 = vmatprep.mubr.bf16.mxu0 %v6602_v35  ;;  %6157 = vmatprep.mubr.bf16.mxu1 %v6603_v36  ;;  %v6977_v35 = vld [vmem:[%s6850_s26 + $0x38] sm:$0xff]   ;;  %v889_v36 = vsel %vm845_vm1, %v884_v25, %v888_v26 }
  0x40   : > { %v900_v48 = vor.u32 %v898_v38, %v896_v42  ;;  %v904_v49 = vrot.slane %v902_v39, 1  ;;  %v6649_v39 = vld [vmem:[%s6850_s26 + $0x68] sm:$0xff]  }
  0x41   : > { %6172 = vmatpush3.bf16.msra.mxu1 %v6600_v32  ;;  %6220 = vmatpush3.bf16.msra.mxu0 %v6601_v33  ;;  %v881_v32 = vsel %vm845_vm1, %v876_v24, %v880_v20  ;;  %v1441_v33 = vsel %vm1432_vm0, %v1438_v5, %v1440_v21  ;;  %v6644_v21 = vld [vmem:[%s6850_s26 + $0x60] sm:$0xff]   ;;  %v1452_v24 = vrot.slane %v6639_v8, 1 }
  0x42   : > { %6173 = vmatprep.subr.bf16.mxu1 %v6606_v43  ;;  %6221 = vmatprep.subr.bf16.mxu0 %v6607_v46  ;;  %v905_v59 = vsel %vm845_vm1, %v900_v48, %v904_v49  ;;  %v7051_v48 = vld [vmem:[%s7961_s1 + $0x178] sm:$0xff]  }
  0x44   : > { %6142 = vmatmul.mubr.bf16.gmra.mxu0 %v6604_v44  ;;  %6158 = vmatmul.mubr.bf16.gmra.mxu1 %v6605_v45  ;;  %v6632_v44 = vld [vmem:[%s6850_s26 + $0x40] sm:$0xff]   ;;  %v892_v45 = vor.u32 %v890_v34, %v888_v26 }
  0x45   : > { %6174 = vmatpush3.bf16.msra.mxu1 %v6606_v43  ;;  %6222 = vmatpush3.bf16.msra.mxu0 %v6607_v46  ;;  %v1444_v43 = vrot.slane %v6627_v31, 1  ;;  %v1446_v46 = vrot.slane %v6977_v35, 1  ;;  %v910_v53 = vshll.u32 %v6632_v44, 16  ;;  %v914_v57 = vshrl.u32 %v6632_v44, 16  ;;  %v6645_v34 = vld [vmem:[%s6850_s26 + $0x60] sm:$0xff]  }
  0x46   : > { %6175 = vmatprep.subr.bf16.mxu1 %v6608_v50  ;;  %6223 = vmatprep.subr.bf16.mxu0 %v6609_v51  ;;  %v897_v55 = vsel %vm845_vm1, %v892_v45, %v896_v42  ;;  %v942_v31 = vshll.u32 %v6644_v21, 16  ;;  %v946_v35 = vshrl.u32 %v6644_v21, 16 }
  0x47   : > { %6177 = vmatprep.mubr.bf16.mxu1 %v857_v60  ;;  %6225 = vmatprep.mubr.bf16.mxu0 %v1435_v61  ;;  %v1445_v56 = vsel %vm1432_vm0, %v1442_v27, %v1444_v43  ;;  %v1447_v60 = vsel %vm1432_vm0, %v1444_v43, %v1446_v46  ;;  %v918_v61 = vshll.u32 %v6990_v47, 16  ;;  %v912_v0 = vrot.slane %v910_v53, 1  ;;  %v6654_v47 = vld [vmem:[%s6850_s26 + $0x78] sm:$0xff]  }
  0x48   : > { %v1456_v43 = vrot.slane %v6645_v34, 1 }
  0x49   : > { %6176 = vmatpush3.bf16.msra.mxu1 %v6608_v50  ;;  %6224 = vmatpush3.bf16.msra.mxu0 %v6609_v51  ;;  %v6640_v50 = vld [vmem:[%s7961_s1 + $0xd8] sm:$0xff]   ;;  %v906_v51 = vshrl.u32 %v6630_v29, 16  ;;  %v916_v4 = vor.u32 %v914_v57, %v912_v0  ;;  %v920_v5 = vrot.slane %v918_v61, 1  ;;  %v6659_v29 = vld [vmem:[%s7961_s1 + $0x100] sm:$0xff]   ;;  %v6660_v61 = vld [vmem:[%s6850_s26 + $0x8] sm:$0xff]  }
  0x4a   : > { %6257 = vmatprep.subr.bf16.mxu1 %v6616_v63  ;;  %6305 = vmatprep.subr.bf16.mxu0 %v6617_v3  ;;  %v6656_v57 = vld [vmem:[%s6850_s26 + $0x80] ss:$0 sps:$4 sm:$0x11]  }
  0x4b   : > { %v908_v2 = vor.u32 %v906_v51, %v904_v49  ;;  %v921_v16 = vsel %vm845_vm1, %v916_v4, %v920_v5  ;;  %v974_v8 = vshll.u32 %v6656_v57, 16 }
  0x4c   : > { %6178 = vmatmul.mubr.bf16.vlgmr.msra.gmra.mxu1 %v865_v11  ;;  %6226 = vmatmul.mubr.bf16.vlgmr.msra.gmra.mxu0 %v1437_v12  ;;  %v926_v11 = vshll.u32 %v6638_v1, 16  ;;  %v7022_v12 = vld [vmem:[%s6850_s26 + $0x58] sm:$0xff]  }
  0x4d   : > { %6258 = vmatpush3.bf16.msra.mxu1 %v6616_v63  ;;  %6306 = vmatpush3.bf16.msra.mxu0 %v6617_v3  ;;  %v6647_v63 = vld [vmem:[%s7961_s1 + $0x110] sm:$0xff]   ;;  %v1448_v3 = vrot.slane %v6633_v54, 1  ;;  %v913_v14 = vsel %vm845_vm1, %v908_v2, %v912_v0  ;;  %v1454_v25 = vrot.slane %v7022_v12, 1 }
  0x4e   : > { %6181 = vmatprep.mubr.bf16.mxu1 %v873_v17  ;;  %6229 = vmatprep.mubr.bf16.mxu0 %v1439_v18  ;;  %v930_v18 = vshrl.u32 %v6638_v1, 16  ;;  %v928_v20 = vrot.slane %v926_v11, 1 }
  0x4f   : > { %6259 = vmatprep.subr.bf16.mxu1 %v6622_v13  ;;  %6307 = vmatprep.subr.bf16.mxu0 %v6623_v19  ;;  %v1449_v15 = vsel %vm1432_vm0, %v1446_v46, %v1448_v3  ;;  %v1451_v17 = vsel %vm1432_vm0, %v1448_v3, %v1450_v6  ;;  %v1458_v46 = vrot.slane %v6649_v39, 1  ;;  %v1457_v54 = vsel %vm1432_vm0, %v1454_v25, %v1456_v43 }
  0x50   : > { %v932_v26 = vor.u32 %v930_v18, %v928_v20  ;;  %v976_v18 = vrot.slane %v974_v8, 1 }
  0x51   : > { %6260 = vmatpush3.bf16.msra.mxu1 %v6622_v13  ;;  %6308 = vmatpush3.bf16.msra.mxu0 %v6623_v19  ;;  %v6653_v13 = vld [vmem:[%s7961_s1 + $0x108] sm:$0xff]   ;;  %v934_v19 = vshll.u32 %v6642_v7, 16  ;;  %v970_v7 = vshrl.u32 %v6654_v47, 16 }
  0x52   : > { %6261 = vmatprep.subr.bf16.mxu1 %v6628_v23  ;;  %6309 = vmatprep.subr.bf16.mxu0 %v6629_v28 }
  0x53   : > { %v936_v27 = vrot.slane %v934_v19, 1 }
  0x54   : > { %6182 = vmatmul.mubr.bf16.gmra.mxu1 %v881_v32  ;;  %6230 = vmatmul.mubr.bf16.gmra.mxu0 %v1441_v33  ;;  %v1453_v33 = vsel %vm1432_vm0, %v1450_v6, %v1452_v24  ;;  %v1923_v6 = vshll.u32 %v6660_v61, 16 }
  0x55   : > { %6185 = vmatprep.mubr.bf16.mxu1 %v889_v36  ;;  %6233 = vmatprep.mubr.bf16.mxu0 %v1443_v37  ;;  %v937_v36 = vsel %vm845_vm1, %v932_v26, %v936_v27  ;;  %v1455_v37 = vsel %vm1432_vm0, %v1452_v24, %v1454_v25  ;;  %v940_v42 = vor.u32 %v938_v30, %v936_v27  ;;  %v6668_v26 = vld [vmem:[%s6850_s26 + $0x20] sm:$0xff]  }
  0x56   : > { %6262 = vmatpush3.bf16.msra.mxu1 %v6628_v23  ;;  %6310 = vmatpush3.bf16.msra.mxu0 %v6629_v28  ;;  %v924_v23 = vor.u32 %v922_v10, %v920_v5  ;;  %v6648_v28 = vld [vmem:[%s6850_s26 + $0x68] sm:$0xff]   ;;  %v6657_v5 = vld [vmem:[%s6850_s26 + $0x80] ss:$0 sps:$4 sm:$0x11]  }
  0x57   : > { %6263 = vmatprep.subr.bf16.mxu1 %v6634_v40  ;;  %6311 = vmatprep.subr.bf16.mxu0 %v6635_v41  ;;  %v950_v38 = vshll.u32 %v6648_v28, 16  ;;  %v954_v49 = vshrl.u32 %v6648_v28, 16  ;;  %v1464_v19 = vrot.slane %v6657_v5, 1  ;;  %v6677_v5 = vld [vmem:[%s6850_s26 + $0x38] sm:$0xff]  }
  0x58   : > { %v929_v32 = vsel %vm845_vm1, %v924_v23, %v928_v20 }
  0x59   : > { %v952_v45 = vrot.slane %v950_v38, 1 }
  0x5a   : > { %6264 = vmatpush3.bf16.msra.mxu1 %v6634_v40  ;;  %6312 = vmatpush3.bf16.msra.mxu0 %v6635_v41  ;;  %v944_v40 = vrot.slane %v942_v31, 1  ;;  %v6650_v41 = vld [vmem:[%s6850_s26 + $0x70] sm:$0xff]   ;;  %v6665_v31 = vld [vmem:[%s6850_s26 + $0x18] sm:$0xff]  }
  0x5b   : > { %6265 = vmatprep.subr.bf16.mxu1 %v6640_v50  ;;  %6313 = vmatprep.subr.bf16.mxu0 %v6641_v52  ;;  %v958_v51 = vshll.u32 %v6650_v41, 16  ;;  %v956_v0 = vor.u32 %v954_v49, %v952_v45 }
  0x5c   : > { %6186 = vmatmul.mubr.bf16.gmra.mxu1 %v897_v55  ;;  %6234 = vmatmul.mubr.bf16.gmra.mxu0 %v1445_v56  ;;  %v948_v44 = vor.u32 %v946_v35, %v944_v40  ;;  %v945_v53 = vsel %vm845_vm1, %v940_v42, %v944_v40  ;;  %v962_v55 = vshrl.u32 %v6650_v41, 16  ;;  %v6655_v56 = vld [vmem:[%s6850_s26 + $0x78] sm:$0xff]   ;;  %v1944_v35 = vshll.u32 %v6668_v26, 16  ;;  %v6674_v41 = vld [vmem:[%s6850_s26 + $0x30] sm:$0xff]  }
  0x5d   : > { %6189 = vmatprep.mubr.bf16.mxu1 %v905_v59  ;;  %6237 = vmatprep.mubr.bf16.mxu0 %v1447_v60  ;;  %v1459_v59 = vsel %vm1432_vm0, %v1456_v43, %v1458_v46  ;;  %v966_v60 = vshll.u32 %v6654_v47, 16  ;;  %v1462_v2 = vrot.slane %v6655_v56, 1  ;;  %v2509_v40 = vrot.slane %v6665_v31, 1  ;;  %v6675_v56 = vld [vmem:[%s6850_s26 + $0x30] sm:$0xff]  }
  0x5e   : > { %6266 = vmatpush3.bf16.msra.mxu1 %v6640_v50  ;;  %6314 = vmatpush3.bf16.msra.mxu0 %v6641_v52  ;;  %v7056_v50 = vld [vmem:[%s7961_s1 + $0x1b8] sm:$0xff]   ;;  %v6651_v52 = vld [vmem:[%s6850_s26 + $0x70] sm:$0xff]   ;;  %v953_v58 = vsel %vm845_vm1, %v948_v44, %v952_v45  ;;  %v1946_v43 = vrot.slane %v1944_v35, 1 }
  0x5f   : > { %6267 = vmatprep.subr.bf16.mxu1 %v6646_v62  ;;  %6315 = vmatprep.subr.bf16.mxu0 %v6647_v63  ;;  %v1460_v1 = vrot.slane %v6651_v52, 1  ;;  %v968_v4 = vrot.slane %v966_v60, 1  ;;  %v1465_v28 = vsel %vm1432_vm0, %v1462_v2, %v1464_v19  ;;  %v6672_v52 = vld [vmem:[%s7961_s1 + $0x170] sm:$0xff]   ;;  %v6676_v60 = vld [vmem:[%s6850_s26 + $0x38] sm:$0xff]  }
  0x60   : > { %v7142_v31 = vld [vmem:[%s6850_s26 + $0x50] sm:$0xff]  }
  0x61   : > { %v1461_v12 = vsel %vm1432_vm0, %v1458_v46, %v1460_v1  ;;  %v972_v20 = vor.u32 %v970_v7, %v968_v4  ;;  %v6671_v46 = vld [vmem:[%s6850_s26 + $0x28] sm:$0xff]   ;;  %v6696_v35 = vld [vmem:[%s7961_s1 + $0x150] sm:$0xff]  }
  0x62   : > { %6268 = vmatpush3.bf16.msra.mxu1 %v6646_v62  ;;  %6316 = vmatpush3.bf16.msra.mxu0 %v6647_v63  ;;  %v6661_v62 = vld [vmem:[%s6850_s26 + $0x10] sm:$0xff]   ;;  %v960_v63 = vrot.slane %v958_v51, 1  ;;  %v1948_v51 = vshrl.u32 %v6668_v26, 16 }
  0x63   : > { %6269 = vmatprep.subr.bf16.mxu1 %v6652_v9  ;;  %6317 = vmatprep.subr.bf16.mxu0 %v6653_v13  ;;  %v1928_v10 = vshll.u32 %v6661_v62, 16  ;;  %v977_v27 = vsel %vm845_vm1, %v972_v20, %v976_v18  ;;  %v7127_v20 = vld [vmem:[%s6850_s26 + $0x50] sm:$0xff]  }
  0x64   : > { %6190 = vmatmul.mubr.bf16.gmra.mxu1 %v913_v14  ;;  %6238 = vmatmul.mubr.bf16.gmra.mxu0 %v1449_v15  ;;  %v964_v3 = vor.u32 %v962_v55, %v960_v63  ;;  %v961_v11 = vsel %vm845_vm1, %v956_v0, %v960_v63  ;;  %v1463_v15 = vsel %vm1432_vm0, %v1460_v1, %v1462_v2  ;;  %v1960_v55 = vshll.u32 %v6674_v41, 16  ;;  %v7102_v63 = vld [vmem:[%s6850_s26 + $0x40] sm:$0xff]  }
  0x65   : > { %6193 = vmatprep.mubr.bf16.mxu1 %v921_v16  ;;  %6241 = vmatprep.mubr.bf16.mxu0 %v1451_v17  ;;  %v1925_v16 = vrot.slane %v1923_v6, 1  ;;  %v6663_v17 = vld [vmem:[%s6850_s26 + $0x10] sm:$0xff]   ;;  %v1930_v21 = vrot.slane %v1928_v10, 1  ;;  %v2515_v2 = vrot.slane %v6675_v56, 1  ;;  %v1976_v8 = vshll.u32 %v7102_v63, 16 }
  0x66   : > { %6270 = vmatpush3.bf16.msra.mxu1 %v6652_v9  ;;  %6318 = vmatpush3.bf16.msra.mxu0 %v6653_v13  ;;  %v1921_v9 = vshrl.u32 %v6660_v61, 16  ;;  %v6662_v13 = vld [vmem:[%s6850_s26 + $0x8] sm:$0xfe]   ;;  %v969_v14 = vsel %vm845_vm1, %v964_v3, %v968_v4  ;;  %v2507_v25 = vrot.slane %v6663_v17, 1  ;;  %v1950_v61 = vor.u32 %v1948_v51, %v1946_v43 }
  0x67   : > { %6271 = vmatprep.subr.bf16.mxu1 %v6658_v22  ;;  %6319 = vmatprep.subr.bf16.mxu0 %v6659_v29  ;;  %v2506_v24 = vrot.slane %v6662_v13, 1  ;;  %v1962_v1 = vrot.slane %v1960_v55, 1  ;;  %v6678_v3 = vld [vmem:[%s7961_s1 + $0x168] sm:$0xff]   ;;  %v1968_v4 = vshll.u32 %v6676_v60, 16  ;;  %v6684_v13 = vld [vmem:[%s7961_s1 + $0x160] sm:$0xff]   ;;  %v1978_v19 = vrot.slane %v1976_v8, 1 }
  0x68   : > { %v1926_v23 = vor.u32 %v1925_v16, %v1921_v9  ;;  %v2510_v49 = vsel %vm1432_vm0, %v2507_v25, %v2509_v40  ;;  %v7115_v9 = vld [vmem:[%s6850_s26 + $0x40] sm:$0xff]   ;;  %v2517_v16 = vrot.slane %v6677_v5, 1  ;;  %v6682_v17 = vld [vmem:[%s6850_s26 + $0x48] sm:$0xff]  }
  0x6a   : > { %6272 = vmatpush3.bf16.msra.mxu1 %v6658_v22  ;;  %6320 = vmatpush3.bf16.msra.mxu0 %v6659_v29  ;;  %v6664_v22 = vld [vmem:[%s6850_s26 + $0x18] sm:$0xff]   ;;  %v1932_v29 = vshrl.u32 %v6661_v62, 16  ;;  %v2513_v62 = vrot.slane %v6671_v46, 1  ;;  %v6703_v46 = vld [vmem:[%s7961_s1 + $0x188] sm:$0xff]  }
  0x6b   : > { %6353 = vmatprep.subr.bf16.mxu1 %v7051_v48  ;;  %6401 = vmatprep.subr.bf16.mxu0 %v7056_v50  ;;  %v1936_v30 = vshll.u32 %v6664_v22, 16  ;;  %v1940_v34 = vshrl.u32 %v6664_v22, 16  ;;  %v2519_v22 = vrot.slane %v7115_v9, 1 }
  0x6c   : > { %6194 = vmatmul.mubr.bf16.gmra.mxu1 %v929_v32  ;;  %6242 = vmatmul.mubr.bf16.gmra.mxu0 %v1453_v33  ;;  %v1931_v32 = vsel %vm845_vm1, %v1926_v23, %v1930_v21  ;;  %v2508_v33 = vsel %vm1432_vm0, %v2506_v24, %v2507_v25  ;;  %v1934_v38 = vor.u32 %v1932_v29, %v1930_v21  ;;  %v6690_v23 = vld [vmem:[%s7961_s1 + $0x158] sm:$0xff]   ;;  %v1984_v25 = vshll.u32 %v6682_v17, 16  ;;  %v6683_v29 = vld [vmem:[%s6850_s26 + $0x48] sm:$0xff]  }
  0x6d   : > { %6197 = vmatprep.mubr.bf16.mxu1 %v937_v36  ;;  %6245 = vmatprep.mubr.bf16.mxu0 %v1455_v37  ;;  %v6669_v36 = vld [vmem:[%s6850_s26 + $0x20] sm:$0xff]   ;;  %v6670_v37 = vld [vmem:[%s6850_s26 + $0x28] sm:$0xff]   ;;  %v1938_v39 = vrot.slane %v1936_v30, 1  ;;  %v6691_v24 = vld [vmem:[%s7961_s1 + $0x198] sm:$0xff]   ;;  %v1992_v30 = vshll.u32 %v7127_v20, 16 }
  0x6e   : > { %v2511_v44 = vrot.slane %v6669_v36, 1  ;;  %v1952_v45 = vshll.u32 %v6670_v37, 16  ;;  %v6697_v36 = vld [vmem:[%s7961_s1 + $0x190] sm:$0xff]  }
  0x6f   : > { %v1942_v42 = vor.u32 %v1940_v34, %v1938_v39  ;;  %v1939_v47 = vsel %vm845_vm1, %v1934_v38, %v1938_v39  ;;  %v1988_v34 = vshrl.u32 %v6682_v17, 16  ;;  %v6688_v38 = vld [vmem:[%s6850_s26 + $0x58] sm:$0xff]  }
  0x70   : > { %v2514_v7 = vsel %vm1432_vm0, %v2511_v44, %v2513_v62  ;;  %v2004_v56 = vshrl.u32 %v6688_v38, 16 }
  0x71   : > { %v1947_v57 = vsel %vm845_vm1, %v1942_v42, %v1946_v43  ;;  %v2523_v42 = vrot.slane %v7142_v31, 1  ;;  %v7155_v43 = vld [vmem:[%s6850_s26 + $0x60] sm:$0xff]  }
  0x72   : > { %v2012_v9 = vshrl.u32 %v7155_v43, 16 }
  0x74   : > { %6198 = vmatmul.mubr.bf16.gmra.mxu1 %v945_v53  ;;  %6246 = vmatmul.mubr.bf16.gmra.mxu0 %v1457_v54  ;;  %v6673_v53 = vld [vmem:[%s7961_s1 + $0x1b0] sm:$0xff]   ;;  %v1956_v54 = vshrl.u32 %v6670_v37, 16  ;;  %v1986_v37 = vrot.slane %v1984_v25, 1 }
  0x75   : > { %6201 = vmatprep.mubr.bf16.mxu1 %v953_v58  ;;  %6249 = vmatprep.mubr.bf16.mxu0 %v1459_v59  ;;  %v2512_v58 = vsel %vm1432_vm0, %v2509_v40, %v2511_v44  ;;  %v1954_v59 = vrot.slane %v1952_v45, 1  ;;  %v2521_v40 = vrot.slane %v6683_v29, 1  ;;  %v6702_v45 = vld [vmem:[%s7961_s1 + $0x148] sm:$0xff]  }
  0x76   : > { %v1990_v44 = vor.u32 %v1988_v34, %v1986_v37 }
  0x77   : > { %v1958_v0 = vor.u32 %v1956_v54, %v1954_v59  ;;  %v1955_v6 = vsel %vm845_vm1, %v1950_v61, %v1954_v59  ;;  %v2524_v55 = vsel %vm1432_vm0, %v2521_v40, %v2523_v42  ;;  %v6708_v59 = vld [vmem:[%s7961_s1 + $0x140] sm:$0xff]  }
  0x79   : > { %v1963_v10 = vsel %vm845_vm1, %v1958_v0, %v1962_v1  ;;  %v6698_v0 = vld [vmem:[%s6850_s26 + $0x70] sm:$0xff]  }
  0x7a   : > { %v2028_v29 = vshrl.u32 %v6698_v0, 16 }
  0x7c   : > { %6202 = vmatmul.mubr.bf16.gmra.mxu1 %v961_v11  ;;  %6250 = vmatmul.mubr.bf16.gmra.mxu0 %v1461_v12  ;;  %v2516_v11 = vsel %vm1432_vm0, %v2513_v62, %v2515_v2  ;;  %v1972_v12 = vshrl.u32 %v6676_v60, 16  ;;  %v6709_v60 = vld [vmem:[%s7961_s1 + $0x180] sm:$0xff]  }
  0x7d   : > { %6205 = vmatprep.mubr.bf16.mxu1 %v969_v14  ;;  %6253 = vmatprep.mubr.bf16.mxu0 %v1463_v15  ;;  %v6685_v14 = vld [vmem:[%s7961_s1 + $0x1a0] sm:$0xff]   ;;  %v1970_v15 = vrot.slane %v1968_v4, 1  ;;  %v7187_v4 = vld [vmem:[%s7961_s1 + $0x238] sm:$0xff]  }
  0x7f   : > { %v1974_v21 = vor.u32 %v1972_v12, %v1970_v15 }
  0x84   : > { %6206 = vmatmul.mubr.bf16.gmra.mxu1 %v977_v27  ;;  %6254 = vmatmul.mubr.bf16.gmra.mxu0 %v1465_v28  ;;  %v2518_v27 = vsel %vm1432_vm0, %v2515_v2, %v2517_v16  ;;  %v1980_v28 = vshrl.u32 %v7102_v63, 16  ;;  %v6694_v63 = vld [vmem:[%s6850_s26 + $0x68] sm:$0xff]  }
  0x85   : > { %6273 = vmatprep.mubr.bf16.mxu1 %v1931_v32  ;;  %6321 = vmatprep.mubr.bf16.mxu0 %v2508_v33  ;;  %v1979_v32 = vsel %vm845_vm1, %v1974_v21, %v1978_v19  ;;  %v2520_v33 = vsel %vm1432_vm0, %v2517_v16, %v2519_v22  ;;  %v2016_v5 = vshll.u32 %v6694_v63, 16  ;;  %v2020_v12 = vshrl.u32 %v6694_v63, 16 }
  0x86   : > { %v1982_v39 = vor.u32 %v1980_v28, %v1978_v19 }
  0x87   : > { %v2018_v16 = vrot.slane %v2016_v5, 1 }
  0x88   : > { %v1987_v51 = vsel %vm845_vm1, %v1982_v39, %v1986_v37  ;;  %v6706_v37 = vld [vmem:[%s6850_s26 + $0x88] ss:$0 sps:$4 sm:$0x11]  }
  0x89   : > { %v2022_v21 = vor.u32 %v2020_v12, %v2018_v16 }
  0x8c   : > { %6274 = vmatmul.mubr.bf16.vlgmr.msra.gmra.mxu1 %v1939_v47  ;;  %6322 = vmatmul.mubr.bf16.vlgmr.msra.gmra.mxu0 %v2510_v49  ;;  %v2000_v47 = vshll.u32 %v6688_v38, 16  ;;  %v6689_v49 = vld [vmem:[%s6850_s26 + $0x58] sm:$0xff]  }
  0x8d   : > { %6354 = vmatpush3.bf16.msra.mxu1 %v7051_v48  ;;  %6402 = vmatpush3.bf16.msra.mxu0 %v7056_v50  ;;  %v6679_v48 = vld [vmem:[%s7961_s1 + $0x1a8] sm:$0xff]   ;;  %v1964_v50 = vshrl.u32 %v6674_v41, 16  ;;  %v1994_v41 = vrot.slane %v1992_v30, 1  ;;  %v2525_v62 = vrot.slane %v6689_v49, 1  ;;  %v2048_v49 = vshll.u32 %v6706_v37, 16 }
  0x8e   : > { %6277 = vmatprep.mubr.bf16.mxu1 %v1947_v57  ;;  %6325 = vmatprep.mubr.bf16.mxu0 %v2512_v58  ;;  %v2008_v57 = vshll.u32 %v7155_v43, 16  ;;  %v6693_v58 = vld [vmem:[%s6850_s26 + $0x60] sm:$0xff]   ;;  %v2002_v61 = vrot.slane %v2000_v47, 1 }
  0x8f   : > { %6355 = vmatprep.subr.bf16.mxu1 %v6672_v52  ;;  %6403 = vmatprep.subr.bf16.mxu0 %v6673_v53  ;;  %v1966_v18 = vor.u32 %v1964_v50, %v1962_v1  ;;  %v1995_v54 = vsel %vm845_vm1, %v1990_v44, %v1994_v41  ;;  %v7182_v50 = vld [vmem:[%s7961_s1 + $0x1f8] sm:$0xff]   ;;  %v2526_v8 = vsel %vm1432_vm0, %v2523_v42, %v2525_v62  ;;  %v6707_v44 = vld [vmem:[%s6850_s26 + $0x88] ss:$0 sps:$4 sm:$0x11]   ;;  %v2050_v63 = vrot.slane %v2048_v49, 1 }
  0x90   : > { %v2006_v2 = vor.u32 %v2004_v56, %v2002_v61 }
  0x91   : > { %6356 = vmatpush3.bf16.msra.mxu1 %v6672_v52  ;;  %6404 = vmatpush3.bf16.msra.mxu0 %v6673_v53  ;;  %v1971_v26 = vsel %vm845_vm1, %v1966_v18, %v1970_v15  ;;  %v2522_v52 = vsel %vm1432_vm0, %v2519_v22, %v2521_v40  ;;  %v1996_v53 = vshrl.u32 %v7127_v20, 16  ;;  %v6700_v15 = vld [vmem:[%s6850_s26 + $0x78] sm:$0xff]   ;;  %v6704_v18 = vld [vmem:[%s6850_s26 + $0x80] sm:$0xff]  }
  0x92   : > { %6357 = vmatprep.subr.bf16.mxu1 %v6678_v3  ;;  %6405 = vmatprep.subr.bf16.mxu0 %v6679_v48  ;;  %v6701_v20 = vld [vmem:[%s6850_s26 + $0x78] sm:$0xff]   ;;  %v2036_v31 = vshrl.u32 %v6700_v15, 16  ;;  %v2044_v47 = vshrl.u32 %v6704_v18, 16 }
  0x93   : > { %v1998_v1 = vor.u32 %v1996_v53, %v1994_v41  ;;  %v2533_v30 = vrot.slane %v6701_v20, 1 }
  0x94   : > { %6278 = vmatmul.mubr.bf16.gmra.mxu1 %v1955_v6  ;;  %6326 = vmatmul.mubr.bf16.gmra.mxu0 %v2514_v7  ;;  %v6695_v6 = vld [vmem:[%s6850_s26 + $0x68] sm:$0xff]  }
  0x95   : > { %6281 = vmatprep.mubr.bf16.mxu1 %v1963_v10  ;;  %6329 = vmatprep.mubr.bf16.mxu0 %v2516_v11  ;;  %v2003_v7 = vsel %vm845_vm1, %v1998_v1, %v2002_v61  ;;  %v2529_v17 = vrot.slane %v6695_v6, 1  ;;  %v6712_v61 = vld [vmem:[%s6850_s26 + $0x10] sm:$0xfe]  }
  0x96   : > { %6358 = vmatpush3.bf16.msra.mxu1 %v6678_v3  ;;  %6406 = vmatpush3.bf16.msra.mxu0 %v6679_v48  ;;  %v2010_v3 = vrot.slane %v2008_v57, 1  ;;  %v2527_v48 = vrot.slane %v6693_v58, 1  ;;  %v3600_v6 = vrot.slane %v6712_v61, 1  ;;  %v6736_v61 = vld [vmem:[%s6850_s26 + $0x50] sm:$0xff]  }
  0x97   : > { %6359 = vmatprep.subr.bf16.mxu1 %v6684_v13  ;;  %6407 = vmatprep.subr.bf16.mxu0 %v6685_v14 }
  0x98   : > { %v2011_v10 = vsel %vm845_vm1, %v2006_v2, %v2010_v3  ;;  %v2528_v11 = vsel %vm1432_vm0, %v2525_v62, %v2527_v48  ;;  %v2014_v19 = vor.u32 %v2012_v9, %v2010_v3  ;;  %v2530_v25 = vsel %vm1432_vm0, %v2527_v48, %v2529_v17  ;;  %v6718_v62 = vld [vmem:[%s6850_s26 + $0x20] sm:$0xff]  }
  0x99   : > { %v3024_v9 = vshll.u32 %v6718_v62, 16 }
  0x9a   : > { %6360 = vmatpush3.bf16.msra.mxu1 %v6684_v13  ;;  %6408 = vmatpush3.bf16.msra.mxu0 %v6685_v14  ;;  %v2024_v13 = vshll.u32 %v6698_v0, 16  ;;  %v6699_v14 = vld [vmem:[%s6850_s26 + $0x70] sm:$0xff]   ;;  %v2019_v28 = vsel %vm845_vm1, %v2014_v19, %v2018_v16  ;;  %v2537_v0 = vrot.slane %v6707_v44, 1  ;;  %v6719_v19 = vld [vmem:[%s6850_s26 + $0x28] sm:$0xff]  }
  0x9b   : > { %6361 = vmatprep.subr.bf16.mxu1 %v6690_v23  ;;  %6409 = vmatprep.subr.bf16.mxu0 %v6691_v24  ;;  %v6724_v16 = vld [vmem:[%s6850_s26 + $0x30] sm:$0xff]  }
  0x9c   : > { %6282 = vmatmul.mubr.bf16.gmra.mxu1 %v1971_v26  ;;  %6330 = vmatmul.mubr.bf16.gmra.mxu0 %v2518_v27  ;;  %v2026_v22 = vrot.slane %v2024_v13, 1  ;;  %v2040_v26 = vshll.u32 %v6704_v18, 16  ;;  %v6705_v27 = vld [vmem:[%s6850_s26 + $0x80] sm:$0xff]  }
  0x9d   : > { %6285 = vmatprep.mubr.bf16.mxu1 %v1979_v32  ;;  %6333 = vmatprep.mubr.bf16.mxu0 %v2520_v33  ;;  %v6711_v32 = vld [vmem:[%s6850_s26 + $0x10] sm:$0xff]   ;;  %v2535_v39 = vrot.slane %v6705_v27, 1  ;;  %v3042_v27 = vshll.u32 %v6724_v16, 16 }
  0x9e   : > { %6362 = vmatpush3.bf16.msra.mxu1 %v6690_v23  ;;  %6410 = vmatpush3.bf16.msra.mxu0 %v6691_v24  ;;  %v2531_v23 = vrot.slane %v6699_v14, 1  ;;  %v2032_v24 = vshll.u32 %v6700_v15, 16  ;;  %v2027_v33 = vsel %vm845_vm1, %v2022_v21, %v2026_v22  ;;  %v2042_v38 = vrot.slane %v2040_v26, 1  ;;  %v6715_v15 = vld [vmem:[%s6850_s26 + $0x20] sm:$0xff]  }
  0x9f   : > { %6363 = vmatprep.subr.bf16.mxu1 %v6696_v35  ;;  %6411 = vmatprep.subr.bf16.mxu0 %v6697_v36  ;;  %v2030_v40 = vor.u32 %v2028_v29, %v2026_v22  ;;  %v3003_v41 = vshrl.u32 %v6711_v32, 16  ;;  %v3006_v42 = vshll.u32 %v6711_v32, 16  ;;  %v2536_v58 = vsel %vm1432_vm0, %v2533_v30, %v2535_v39  ;;  %v6721_v32 = vld [vmem:[%s6850_s26 + $0x30] sm:$0xff]  }
  0xa0   : > { %v2532_v34 = vsel %vm1432_vm0, %v2529_v17, %v2531_v23  ;;  %v2046_v1 = vor.u32 %v2044_v47, %v2042_v38  ;;  %v2538_v12 = vsel %vm1432_vm0, %v2535_v39, %v2537_v0  ;;  %v3026_v21 = vrot.slane %v3024_v9, 2 }
  0xa1   : > { %v3008_v56 = vrot.slane %v3006_v42, 2  ;;  %v3039_v26 = vshrl.u32 %v6724_v16, 16  ;;  %v3605_v29 = vrot.slane %v6719_v19, 1  ;;  %v3044_v39 = vrot.slane %v3042_v27, 2  ;;  %v6740_v16 = vld [vmem:[%s7961_s1 + $0x1d8] sm:$0xff]   ;;  %v6747_v27 = vld [vmem:[%s7961_s1 + $0x210] sm:$0xff]  }
  0xa2   : > { %6364 = vmatpush3.bf16.msra.mxu1 %v6696_v35  ;;  %6412 = vmatpush3.bf16.msra.mxu0 %v6697_v36  ;;  %v6710_v35 = vld [vmem:[%s6850_s26 + $0x8] sm:$0xfe]   ;;  %v2034_v36 = vrot.slane %v2032_v24, 1  ;;  %v3607_v44 = vrot.slane %v6721_v32, 1 }
  0xa3   : > { %6365 = vmatprep.subr.bf16.mxu1 %v6702_v45  ;;  %6413 = vmatprep.subr.bf16.mxu0 %v6703_v46  ;;  %v3041_v37 = vrot.slane %v3039_v26, 1  ;;  %v6746_v26 = vld [vmem:[%s7961_s1 + $0x1d0] sm:$0xff]  }
  0xa4   : > { %6286 = vmatmul.mubr.bf16.gmra.mxu1 %v1987_v51  ;;  %6334 = vmatmul.mubr.bf16.gmra.mxu0 %v2522_v52  ;;  %v2038_v43 = vor.u32 %v2036_v31, %v2034_v36  ;;  %v6713_v51 = vld [vmem:[%s6850_s26 + $0x18] sm:$0xff]   ;;  %v2035_v53 = vsel %vm845_vm1, %v2030_v40, %v2034_v36  ;;  %v6722_v36 = vld [vmem:[%s7961_s1 + $0x1f0] sm:$0xff]   ;;  %v6730_v40 = vld [vmem:[%s6850_s26 + $0x40] sm:$0xff]  }
  0xa5   : > { %6289 = vmatprep.mubr.bf16.mxu1 %v1995_v54  ;;  %6337 = vmatprep.mubr.bf16.mxu0 %v2524_v55  ;;  %v6714_v52 = vld [vmem:[%s6850_s26 + $0x18] sm:$0xff]   ;;  %v2534_v54 = vsel %vm1432_vm0, %v2531_v23, %v2533_v30  ;;  %v3005_v55 = vrot.slane %v3003_v41, 1 }
  0xa6   : > { %6366 = vmatpush3.bf16.msra.mxu1 %v6702_v45  ;;  %6414 = vmatpush3.bf16.msra.mxu0 %v6703_v46  ;;  %v2995_v45 = vshrl.u32 %v6710_v35, 16  ;;  %v2998_v46 = vshll.u32 %v6710_v35, 16  ;;  %v2043_v57 = vsel %vm845_vm1, %v2038_v43, %v2042_v38  ;;  %v3012_v2 = vshrl.u32 %v6714_v52, 16  ;;  %v7234_v38 = vld [vmem:[%s6850_s26 + $0x38] sm:$0xff]   ;;  %v6723_v43 = vld [vmem:[%s7961_s1 + $0x230] sm:$0xff]  }
  0xa7   : > { %6367 = vmatprep.subr.bf16.mxu1 %v6708_v59  ;;  %6415 = vmatprep.subr.bf16.mxu0 %v6709_v60  ;;  %v3015_v3 = vshll.u32 %v6714_v52, 16  ;;  %v3009_v5 = vor.u32 %v3008_v56, %v3005_v55  ;;  %v3609_v47 = vrot.slane %v7234_v38, 1  ;;  %v6729_v52 = vld [vmem:[%s7961_s1 + $0x228] sm:$0xff]  }
  0xa8   : > { %v3014_v13 = vrot.slane %v3012_v2, 1  ;;  %v6732_v55 = vld [vmem:[%s6850_s26 + $0x48] sm:$0xff]  }
  0xa9   : > { %v3017_v14 = vrot.slane %v3015_v3, 2  ;;  %v3066_v2 = vshrl.u32 %v6732_v55, 16  ;;  %v3069_v3 = vshll.u32 %v6732_v55, 16  ;;  %v6753_v38 = vld [vmem:[%s7961_s1 + $0x208] sm:$0xff]  }
  0xaa   : > { %6368 = vmatpush3.bf16.msra.mxu1 %v6708_v59  ;;  %6416 = vmatpush3.bf16.msra.mxu0 %v6709_v60  ;;  %v2997_v59 = vrot.slane %v2995_v45, 1  ;;  %v3000_v60 = vrot.slane %v2998_v46, 2 }
  0xab   : > { %6449 = vmatprep.subr.bf16.mxu1 %v7182_v50  ;;  %6497 = vmatprep.subr.bf16.mxu0 %v7187_v4  ;;  %v3018_v24 = vor.u32 %v3017_v14, %v3014_v13  ;;  %v6738_v13 = vld [vmem:[%s6850_s26 + $0x58] sm:$0xff]   ;;  %v3068_v14 = vrot.slane %v3066_v2, 1 }
  0xac   : > { %6290 = vmatmul.mubr.bf16.gmra.mxu1 %v2003_v7  ;;  %6338 = vmatmul.mubr.bf16.gmra.mxu0 %v2526_v8  ;;  %v3001_v48 = vor.u32 %v3000_v60, %v2997_v59  ;;  %v3601_v7 = vrot.slane %v6713_v51, 1  ;;  %v3021_v8 = vshrl.u32 %v6718_v62, 16  ;;  %v6728_v51 = vld [vmem:[%s7961_s1 + $0x1e8] sm:$0xff]   ;;  %v3608_v59 = vsel %vm1432_vm0, %v3605_v29, %v3607_v44  ;;  %v7319_v2 = vld [vmem:[%s6850_s26 + $0x78] sm:$0xff]  }
  0xad   : > { %6293 = vmatprep.mubr.bf16.mxu1 %v2011_v10  ;;  %6341 = vmatprep.mubr.bf16.mxu0 %v2528_v11  ;;  %v6720_v10 = vld [vmem:[%s6850_s26 + $0x28] sm:$0xff]   ;;  %v2051_v11 = vsel %vm845_vm1, %v2046_v1, %v2050_v63  ;;  %v3610_v63 = vsel %vm1432_vm0, %v3607_v44, %v3609_v47 }
  0xae   : > { %v3010_v17 = vsel %vm2993_vm2, %v3001_v48, %v3009_v5  ;;  %v3602_v18 = vsel %vm1432_vm0, %v3600_v6, %v3601_v7  ;;  %v3023_v20 = vrot.slane %v3021_v8, 1  ;;  %v3030_v22 = vshrl.u32 %v6720_v10, 16  ;;  %v6734_v48 = vld [vmem:[%s7961_s1 + $0x1e0] sm:$0xff]  }
  0xaf   : > { %v3033_v23 = vshll.u32 %v6720_v10, 16  ;;  %v3075_v8 = vshrl.u32 %v6736_v61, 16 }
  0xb0   : > { %v3032_v30 = vrot.slane %v3030_v22, 1  ;;  %v6742_v22 = vld [vmem:[%s6850_s26 + $0x60] sm:$0xff]  }
  0xb1   : > { %v3035_v31 = vrot.slane %v3033_v23, 2  ;;  %v3093_v32 = vshrl.u32 %v6742_v22, 16 }
  0xb3   : > { %v3036_v46 = vor.u32 %v3035_v31, %v3032_v30  ;;  %v3087_v31 = vshll.u32 %v6738_v13, 16  ;;  %v3095_v44 = vrot.slane %v3093_v32, 1 }
  0xb4   : > { %6294 = vmatmul.mubr.bf16.gmra.mxu1 %v2019_v28  ;;  %6342 = vmatmul.mubr.bf16.gmra.mxu0 %v2530_v25  ;;  %v3603_v25 = vrot.slane %v6715_v15, 1  ;;  %v3027_v28 = vor.u32 %v3026_v21, %v3023_v20  ;;  %v3071_v15 = vrot.slane %v3069_v3, 2  ;;  %v3077_v21 = vrot.slane %v3075_v8, 1  ;;  %v6754_v8 = vld [vmem:[%s6850_s26 + $0x80] sm:$0xff]  }
  0xb5   : > { %6297 = vmatprep.mubr.bf16.mxu1 %v2027_v33  ;;  %6345 = vmatprep.mubr.bf16.mxu0 %v2532_v34  ;;  %v6726_v33 = vld [vmem:[%s6850_s26 + $0x38] sm:$0xff]   ;;  %v3019_v34 = vsel %vm2993_vm2, %v3009_v5, %v3018_v24  ;;  %v6735_v5 = vld [vmem:[%s7961_s1 + $0x220] sm:$0xff]  }
  0xb6   : > { %v3604_v35 = vsel %vm1432_vm0, %v3601_v7, %v3603_v25  ;;  %v3028_v41 = vsel %vm2993_vm2, %v3018_v24, %v3027_v28  ;;  %v3606_v42 = vsel %vm1432_vm0, %v3603_v25, %v3605_v29  ;;  %v3048_v45 = vshrl.u32 %v6726_v33, 16 }
  0xb7   : > { %v3051_v49 = vshll.u32 %v6726_v33, 16  ;;  %v3084_v29 = vshrl.u32 %v6738_v13, 16  ;;  %v3072_v30 = vor.u32 %v3071_v15, %v3068_v14  ;;  %v3625_v14 = vrot.slane %v7319_v2, 1 }
  0xb8   : > { %v3050_v56 = vrot.slane %v3048_v45, 1  ;;  %v7302_v45 = vld [vmem:[%s6850_s26 + $0x68] sm:$0xff]  }
  0xb9   : > { %v3053_v60 = vrot.slane %v3051_v49, 2 }
  0xbb   : > { %v3054_v6 = vor.u32 %v3053_v60, %v3050_v56  ;;  %v6750_v56 = vld [vmem:[%s6850_s26 + $0x78] sm:$0xff]  }
  0xbc   : > { %6298 = vmatmul.mubr.bf16.gmra.mxu1 %v2035_v53  ;;  %6346 = vmatmul.mubr.bf16.gmra.mxu0 %v2534_v54  ;;  %v3045_v53 = vor.u32 %v3044_v39, %v3041_v37  ;;  %v3060_v54 = vshll.u32 %v6730_v40, 16  ;;  %v6739_v37 = vld [vmem:[%s6850_s26 + $0x60] sm:$0xff]   ;;  %v3120_v3 = vshrl.u32 %v6750_v56, 16 }
  0xbd   : > { %6301 = vmatprep.mubr.bf16.mxu1 %v2043_v57  ;;  %6349 = vmatprep.mubr.bf16.mxu0 %v2536_v58  ;;  %v7254_v57 = vld [vmem:[%s6850_s26 + $0x48] sm:$0xff]   ;;  %v3037_v58 = vsel %vm2993_vm2, %v3027_v28, %v3036_v46  ;;  %v3619_v55 = vrot.slane %v6739_v37, 1 }
  0xbe   : > { %v3046_v62 = vsel %vm2993_vm2, %v3036_v46, %v3045_v53  ;;  %v3062_v1 = vrot.slane %v3060_v54, 2  ;;  %v3613_v10 = vrot.slane %v7254_v57, 1  ;;  %v3055_v19 = vsel %vm2993_vm2, %v3045_v53, %v3054_v6  ;;  %v6759_v53 = vld [vmem:[%s7961_s1 + $0x200] sm:$0xff]  }
  0xbf   : > { %v3122_v15 = vrot.slane %v3120_v3, 1 }
  0xc4   : > { %6302 = vmatmul.mubr.bf16.gmra.mxu1 %v2051_v11  ;;  %6350 = vmatmul.mubr.bf16.gmra.mxu0 %v2538_v12  ;;  %v6733_v11 = vld [vmem:[%s6850_s26 + $0x50] sm:$0xff]   ;;  %v3078_v12 = vshll.u32 %v6736_v61, 16 }
  0xc5   : > { %6369 = vmatprep.mubr.bf16.mxu1 %v3010_v17  ;;  %6417 = vmatprep.mubr.bf16.mxu0 %v3602_v18  ;;  %v6741_v17 = vld [vmem:[%s7961_s1 + $0x218] sm:$0xff]   ;;  %v3615_v28 = vrot.slane %v6733_v11, 1 }
  0xc6   : > { %v7277_v18 = vld [vmem:[%s6850_s26 + $0x58] sm:$0xff]   ;;  %v3080_v25 = vrot.slane %v3078_v12, 2  ;;  %v3123_v12 = vshll.u32 %v6750_v56, 16 }
  0xc7   : > { %v3616_v39 = vsel %vm1432_vm0, %v3613_v10, %v3615_v28 }
  0xc8   : > { %v3081_v33 = vor.u32 %v3080_v25, %v3077_v21  ;;  %v6751_v21 = vld [vmem:[%s6850_s26 + $0x80] sm:$0xff]  }
  0xca   : > { %v3082_v46 = vsel %vm2993_vm2, %v3072_v30, %v3081_v33 }
  0xcc   : > { %6370 = vmatmul.mubr.bf16.vlgmr.msra.gmra.mxu1 %v3019_v34  ;;  %6418 = vmatmul.mubr.bf16.vlgmr.msra.gmra.mxu0 %v3604_v35  ;;  %v3617_v34 = vrot.slane %v7277_v18, 1  ;;  %v3096_v35 = vshll.u32 %v6742_v22, 16  ;;  %v6756_v22 = vld [vmem:[%s6850_s26 + $0x88] ss:$0 sps:$4 sm:$0x33]  }
  0xcd   : > { %6450 = vmatpush3.bf16.msra.mxu1 %v7182_v50  ;;  %6498 = vmatpush3.bf16.msra.mxu0 %v7187_v4  ;;  %v3057_v50 = vshrl.u32 %v6730_v40, 16  ;;  %v6727_v4 = vld [vmem:[%s6850_s26 + $0x40] sm:$0xff]   ;;  %v6744_v40 = vld [vmem:[%s6850_s26 + $0x68] sm:$0xff]   ;;  %v3138_v37 = vshrl.u32 %v6756_v22, 16 }
  0xce   : > { %6373 = vmatprep.mubr.bf16.mxu1 %v3028_v41  ;;  %6421 = vmatprep.mubr.bf16.mxu0 %v3606_v42  ;;  %v3611_v7 = vrot.slane %v6727_v4, 1  ;;  %v3086_v42 = vrot.slane %v3084_v29, 1  ;;  %v3098_v49 = vrot.slane %v3096_v35, 2  ;;  %v3105_v54 = vshll.u32 %v6744_v40, 16 }
  0xcf   : > { %6451 = vmatprep.subr.bf16.mxu1 %v6722_v36  ;;  %6499 = vmatprep.subr.bf16.mxu0 %v6723_v43  ;;  %v3059_v0 = vrot.slane %v3057_v50, 1  ;;  %v3102_v50 = vshrl.u32 %v6744_v40, 16 }
  0xd0   : > { %v3612_v20 = vsel %vm1432_vm0, %v3609_v47, %v3611_v7  ;;  %v3614_v24 = vsel %vm1432_vm0, %v3611_v7, %v3613_v10  ;;  %v3618_v47 = vsel %vm1432_vm0, %v3615_v28, %v3617_v34  ;;  %v3099_v57 = vor.u32 %v3098_v49, %v3095_v44 }
  0xd1   : > { %6452 = vmatpush3.bf16.msra.mxu1 %v6722_v36  ;;  %6500 = vmatpush3.bf16.msra.mxu0 %v6723_v43  ;;  %v3063_v9 = vor.u32 %v3062_v1, %v3059_v0  ;;  %v6752_v36 = vld [vmem:[%s7961_s1 + $0x1c8] sm:$0xff]   ;;  %v3089_v43 = vrot.slane %v3087_v31, 2  ;;  %v3104_v61 = vrot.slane %v3102_v50, 1  ;;  %v3620_v1 = vsel %vm1432_vm0, %v3617_v34, %v3619_v55 }
  0xd2   : > { %6453 = vmatprep.subr.bf16.mxu1 %v6728_v51  ;;  %6501 = vmatprep.subr.bf16.mxu0 %v6729_v52  ;;  %v3140_v50 = vrot.slane %v3138_v37, 1 }
  0xd3   : > { %v3064_v23 = vsel %vm2993_vm2, %v3054_v6, %v3063_v9  ;;  %v3073_v41 = vsel %vm2993_vm2, %v3063_v9, %v3072_v30  ;;  %v3090_v4 = vor.u32 %v3089_v43, %v3086_v42  ;;  %v6760_v30 = vld [vmem:[%s6850_s26 + $0x10] sm:$0xfe]   ;;  %v3627_v43 = vrot.slane %v6751_v21, 1 }
  0xd4   : > { %6374 = vmatmul.mubr.bf16.gmra.mxu1 %v3037_v58  ;;  %6422 = vmatmul.mubr.bf16.gmra.mxu0 %v3608_v59  ;;  %v3621_v58 = vrot.slane %v7302_v45, 1  ;;  %v4088_v44 = vshrl.u32 %v6760_v30, 16 }
  0xd5   : > { %6377 = vmatprep.mubr.bf16.mxu1 %v3046_v62  ;;  %6425 = vmatprep.mubr.bf16.mxu0 %v3610_v63  ;;  %v3107_v62 = vrot.slane %v3105_v54, 2  ;;  %v6745_v63 = vld [vmem:[%s6850_s26 + $0x70] sm:$0xff]   ;;  %v3091_v0 = vsel %vm2993_vm2, %v3081_v33, %v3090_v4 }
  0xd6   : > { %6454 = vmatpush3.bf16.msra.mxu1 %v6728_v51  ;;  %6502 = vmatpush3.bf16.msra.mxu0 %v6729_v52  ;;  %v6748_v51 = vld [vmem:[%s6850_s26 + $0x70] sm:$0xff]   ;;  %v6758_v52 = vld [vmem:[%s7961_s1 + $0x1c0] sm:$0xff]   ;;  %v3623_v11 = vrot.slane %v6745_v63, 1 }
  0xd7   : > { %6455 = vmatprep.subr.bf16.mxu1 %v6734_v48  ;;  %6503 = vmatprep.subr.bf16.mxu0 %v6735_v5  ;;  %v3111_v59 = vshrl.u32 %v6748_v51, 16  ;;  %v3114_v60 = vshll.u32 %v6748_v51, 16  ;;  %v3108_v13 = vor.u32 %v3107_v62, %v3104_v61  ;;  %v7370_v62 = vld [vmem:[%s6850_s26 + $0x18] sm:$0xff]   ;;  %v6764_v63 = vld [vmem:[%s6850_s26 + $0x20] sm:$0xff]  }
  0xd8   : > { %v3624_v29 = vsel %vm1432_vm0, %v3621_v58, %v3623_v11  ;;  %v3626_v34 = vsel %vm1432_vm0, %v3623_v11, %v3625_v14  ;;  %v4695_v21 = vrot.slane %v7370_v62, 2 }
  0xd9   : > { %v3113_v6 = vrot.slane %v3111_v59, 1  ;;  %v3116_v7 = vrot.slane %v3114_v60, 2  ;;  %v3109_v28 = vsel %vm2993_vm2, %v3099_v57, %v3108_v13  ;;  %v3628_v59 = vsel %vm1432_vm0, %v3625_v14, %v3627_v43 }
  0xda   : > { %6456 = vmatpush3.bf16.msra.mxu1 %v6734_v48  ;;  %6504 = vmatpush3.bf16.msra.mxu0 %v6735_v5  ;;  %v3100_v48 = vsel %vm2993_vm2, %v3090_v4, %v3099_v57  ;;  %v3622_v5 = vsel %vm1432_vm0, %v3619_v55, %v3621_v58  ;;  %v6762_v57 = vld [vmem:[%s6850_s26 + $0x10] sm:$0xfc]   ;;  %v4090_v60 = vrot.slane %v4088_v44, 1  ;;  %v4105_v14 = vshrl.u32 %v6764_v63, 16  ;;  %v7404_v44 = vld [vmem:[%s6850_s26 + $0x28] sm:$0xff]  }
  0xdb   : > { %6457 = vmatprep.subr.bf16.mxu1 %v6740_v16  ;;  %6505 = vmatprep.subr.bf16.mxu0 %v6741_v17  ;;  %v3117_v18 = vor.u32 %v3116_v7, %v3113_v6  ;;  %v4694_v11 = vrot.slane %v6762_v57, 2 }
  0xdc   : > { %6378 = vmatmul.mubr.bf16.gmra.mxu1 %v3055_v19  ;;  %6426 = vmatmul.mubr.bf16.gmra.mxu0 %v3612_v20  ;;  %v3129_v19 = vshrl.u32 %v6754_v8, 16  ;;  %v3132_v20 = vshll.u32 %v6754_v8, 16 }
  0xdd   : > { %6381 = vmatprep.mubr.bf16.mxu1 %v3064_v23  ;;  %6429 = vmatprep.mubr.bf16.mxu0 %v3614_v24  ;;  %v6761_v23 = vld [vmem:[%s6850_s26 + $0x18] sm:$0xff]   ;;  %v3118_v33 = vsel %vm2993_vm2, %v3108_v13, %v3117_v18 }
  0xde   : > { %6458 = vmatpush3.bf16.msra.mxu1 %v6740_v16  ;;  %6506 = vmatpush3.bf16.msra.mxu0 %v6741_v17  ;;  %v3131_v35 = vrot.slane %v3129_v19, 1  ;;  %v4099_v45 = vshll.u32 %v6761_v23, 16 }
  0xdf   : > { %6459 = vmatprep.subr.bf16.mxu1 %v6746_v26  ;;  %6507 = vmatprep.subr.bf16.mxu0 %v6747_v27 }
  0xe0   : > { %v4101_v61 = vrot.slane %v4099_v45, 2  ;;  %v6770_v45 = vld [vmem:[%s6850_s26 + $0x38] sm:$0xff]  }
  0xe2   : > { %6460 = vmatpush3.bf16.msra.mxu1 %v6746_v26  ;;  %6508 = vmatpush3.bf16.msra.mxu0 %v6747_v27  ;;  %v3125_v26 = vrot.slane %v3123_v12, 2  ;;  %v7341_v27 = vld [vmem:[%s6850_s26 + $0x88] sm:$0xff]  }
  0xe3   : > { %6461 = vmatprep.subr.bf16.mxu1 %v6752_v36  ;;  %6509 = vmatprep.subr.bf16.mxu0 %v6753_v38  ;;  %v3629_v51 = vrot.slane %v7341_v27, 1 }
  0xe4   : > { %6382 = vmatmul.mubr.bf16.gmra.mxu1 %v3073_v41  ;;  %6430 = vmatmul.mubr.bf16.gmra.mxu0 %v3616_v39  ;;  %v4096_v39 = vshrl.u32 %v6761_v23, 16  ;;  %v3126_v42 = vor.u32 %v3125_v26, %v3122_v15  ;;  %v4108_v15 = vshll.u32 %v6764_v63, 16 }
  0xe5   : > { %6385 = vmatprep.mubr.bf16.mxu1 %v3082_v46  ;;  %6433 = vmatprep.mubr.bf16.mxu0 %v3618_v47  ;;  %v3630_v3 = vsel %vm1432_vm0, %v3627_v43, %v3629_v51 }
  0xe6   : > { %6462 = vmatpush3.bf16.msra.mxu1 %v6752_v36  ;;  %6510 = vmatpush3.bf16.msra.mxu0 %v6753_v38  ;;  %v3134_v36 = vrot.slane %v3132_v20, 2  ;;  %v3141_v38 = vshll.u32 %v6756_v22, 16  ;;  %v4098_v4 = vrot.slane %v4096_v39, 1  ;;  %v3127_v58 = vsel %vm2993_vm2, %v3117_v18, %v3126_v42 }
  0xe7   : > { %6463 = vmatprep.subr.bf16.mxu1 %v6758_v52  ;;  %6511 = vmatprep.subr.bf16.mxu0 %v6759_v53  ;;  %v4696_v39 = vsel %vm4693_vm3, %v4694_v11, %v4695_v21  ;;  %v6769_v11 = vld [vmem:[%s6850_s26 + $0x30] sm:$0xff]  }
  0xe8   : > { %v3135_v49 = vor.u32 %v3134_v36, %v3131_v35  ;;  %v3143_v54 = vrot.slane %v3141_v38, 2  ;;  %v4102_v13 = vor.u32 %v4101_v61, %v4098_v4  ;;  %v6768_v35 = vld [vmem:[%s6850_s26 + $0x30] sm:$0xff]   ;;  %v4135_v61 = vshll.u32 %v6770_v45, 16 }
  0xea   : > { %6464 = vmatpush3.bf16.msra.mxu1 %v6758_v52  ;;  %6512 = vmatpush3.bf16.msra.mxu0 %v6759_v53  ;;  %v6757_v52 = vld [vmem:[%s6850_s26 + $0x90] ss:$0 sps:$4 sm:$0x11]   ;;  %v4091_v53 = vshll.u32 %v6760_v30, 16  ;;  %v3136_v2 = vsel %vm2993_vm2, %v3126_v42, %v3135_v49  ;;  %v3144_v12 = vor.u32 %v3143_v54, %v3140_v50  ;;  %v4107_v30 = vrot.slane %v4105_v14, 1 }
  0xeb   : > { %v3631_v8 = vrot.slane %v6757_v52, 1  ;;  %v4123_v50 = vshrl.u32 %v6768_v35, 16  ;;  %v4126_v54 = vshll.u32 %v6768_v35, 16 }
  0xec   : > { %v7324_v9 = vpop.f32.mrf.mxu0  ;;  %v7326_v10 = vpop.f32.mrf.mxu1  ;;  %6386 = vmatmul.mubr.bf16.gmra.mxu1 %v3091_v0  ;;  %6434 = vmatmul.mubr.bf16.gmra.mxu0 %v3620_v1 }
  0xed   : > { %6389 = vmatprep.mubr.bf16.mxu1 %v3100_v48  ;;  %6437 = vmatprep.mubr.bf16.mxu0 %v3622_v5  ;;  %v4093_v48 = vrot.slane %v4091_v53, 2  ;;  %v6766_v5 = vld [vmem:[%s6850_s26 + $0x28] sm:$0xff]  }
  0xee   : > { %v7329_v16 = vpop.f32.mrf.mxu0  ;;  %v7331_v17 = vpop.f32.mrf.mxu1  ;;  %v4114_v22 = vshrl.u32 %v6766_v5, 16  ;;  %v4117_v23 = vshll.u32 %v6766_v5, 16  ;;  %v4125_v5 = vrot.slane %v4123_v50, 1 }
  0xef   : > { %v4094_v20 = vor.u32 %v4093_v48, %v4090_v60  ;;  %v4132_v60 = vshrl.u32 %v6770_v45, 16 }
  0xf0   : > { %v7336_v24 = vpop.f32.mrf.mxu0  ;;  %v7338_v25 = vpop.f32.mrf.mxu1  ;;  %v4116_v42 = vrot.slane %v4114_v22, 1  ;;  %v4119_v43 = vrot.slane %v4117_v23, 2  ;;  %v4137_v23 = vrot.slane %v4135_v61, 2 }
  0xf1   : > { %v4103_v38 = vsel %vm2993_vm2, %v4094_v20, %v4102_v13  ;;  %v4134_v22 = vrot.slane %v4132_v60, 1 }
  0xf2   : > { %v7346_v31 = vpop.f32.mrf.mxu0  ;;  %v7348_v32 = vpop.f32.mrf.mxu1 }
  0xf4   : > { %v7352_v40 = vpop.f32.mrf.mxu0  ;;  %v7354_v41 = vpop.f32.mrf.mxu1  ;;  %6390 = vmatmul.mubr.bf16.gmra.mxu1 %v3109_v28  ;;  %6438 = vmatmul.mubr.bf16.gmra.mxu0 %v3624_v29  ;;  %v3145_v28 = vsel %vm2993_vm2, %v3135_v49, %v3144_v12  ;;  %v3632_v29 = vsel %vm1432_vm0, %v3629_v51, %v3631_v8  ;;  %v4128_v8 = vrot.slane %v4126_v54, 2 }
  0xf5   : > { %6393 = vmatprep.mubr.bf16.mxu1 %v3118_v33  ;;  %6441 = vmatprep.mubr.bf16.mxu0 %v3626_v34  ;;  %v4110_v33 = vrot.slane %v4108_v15, 2  ;;  %v6765_v34 = vld [vmem:[%s6850_s26 + $0x20] sm:$0xff]  }
  0xf6   : > { %v7356_v46 = vpop.f32.mrf.mxu0  ;;  %v7358_v47 = vpop.f32.mrf.mxu1  ;;  %v4697_v53 = vrot.slane %v6765_v34, 2  ;;  %v4129_v35 = vor.u32 %v4128_v8, %v4125_v5 }
  0xf7   : > { %v4111_v52 = vor.u32 %v4110_v33, %v4107_v30 }
  0xf8   : > { %v7362_v55 = vpop.f32.mrf.mxu0  ;;  %v7364_v56 = vpop.f32.mrf.mxu1  ;;  %v4698_v48 = vsel %vm4693_vm3, %v4695_v21, %v4697_v53 }
  0xfa   : > { %v7373_v0 = vpop.f32.mrf.mxu0  ;;  %v7375_v1 = vpop.f32.mrf.mxu1 }
  0xfc   : > { %v7380_v6 = vpop.f32.mrf.mxu0  ;;  %v7382_v7 = vpop.f32.mrf.mxu1  ;;  %6394 = vmatmul.mubr.bf16.gmra.mxu1 %v3127_v58  ;;  %6442 = vmatmul.mubr.bf16.gmra.mxu0 %v3628_v59  ;;  %v4120_v58 = vor.u32 %v4119_v43, %v4116_v42  ;;  %v4699_v59 = vrot.slane %v7404_v44, 2  ;;  %v4138_v43 = vor.u32 %v4137_v23, %v4134_v22 }
  0xfd   : > { %6397 = vmatprep.mubr.bf16.mxu1 %v3136_v2  ;;  %6445 = vmatprep.mubr.bf16.mxu0 %v3630_v3  ;;  %v6772_v2 = vld [vmem:[%s6850_s26 + $0x40] sm:$0xff]   ;;  %v4112_v3 = vsel %vm2993_vm2, %v4102_v13, %v4111_v52 }
  0xfe   : > { %v7384_v18 = vpop.f32.mrf.mxu0  ;;  %v7386_v19 = vpop.f32.mrf.mxu1  ;;  %v4121_v15 = vsel %vm2993_vm2, %v4111_v52, %v4120_v58  ;;  %v4700_v20 = vsel %vm4693_vm3, %v4697_v53, %v4699_v59  ;;  %v4141_v21 = vshrl.u32 %v6772_v2, 16  ;;  %v4144_v33 = vshll.u32 %v6772_v2, 16  ;;  %v6773_v2 = vld [vmem:[%s6850_s26 + $0x40] sm:$0xff]  }
  0xff   : > { %v4130_v5 = vsel %vm2993_vm2, %v4120_v58, %v4129_v35 }
 0x100   : > { %v7389_v26 = vpop.f32.mrf.mxu0  ;;  %v7391_v27 = vpop.f32.mrf.mxu1  ;;  %v4143_v60 = vrot.slane %v4141_v21, 1  ;;  %v4146_v61 = vrot.slane %v4144_v33, 2  ;;  %v4705_v33 = vrot.slane %v6773_v2, 2 }
 0x102   : > { %v7397_v36 = vpop.f32.mrf.mxu0  ;;  %v7399_v37 = vpop.f32.mrf.mxu1 }
 0x104   : > { %v7407_v49 = vpop.f32.mrf.mxu0  ;;  %v7409_v51 = vpop.f32.mrf.mxu1  ;;  %6398 = vmatmul.mubr.bf16.gmra.mxu1 %v3145_v28  ;;  %6446 = vmatmul.mubr.bf16.gmra.mxu0 %v3632_v29  ;;  %v7431_v28 = vld [vmem:[%s6850_s26 + $0x38] sm:$0xff]   ;;  %v6774_v29 = vld [vmem:[%s6850_s26 + $0x48] sm:$0xff]  }
 0x105   : > { %6465 = vmatprep.mubr.bf16.mxu1 %v4103_v38  ;;  %6513 = vmatprep.mubr.bf16.mxu0 %v4696_v39  ;;  %v4701_v38 = vrot.slane %v6769_v11, 2  ;;  %v4703_v44 = vrot.slane %v7431_v28, 2  ;;  %v4150_v45 = vshrl.u32 %v6774_v29, 16  ;;  %v4153_v52 = vshll.u32 %v6774_v29, 16  ;;  %v6776_v11 = vld [vmem:[%s6850_s26 + $0x50] sm:$0xff]   ;;  %v7449_v29 = vld [vmem:[%s6850_s26 + $0x48] sm:$0xff]  }
 0x106   : > { %v7411_v4 = vpop.f32.mrf.mxu0  ;;  %v7413_v57 = vpop.f32.mrf.mxu1 }
 0x107   : > { %v4702_v8 = vsel %vm4693_vm3, %v4699_v59, %v4701_v38  ;;  %v4704_v22 = vsel %vm4693_vm3, %v4701_v38, %v4703_v44  ;;  %v4152_v23 = vrot.slane %v4150_v45, 1  ;;  %v4155_v28 = vrot.slane %v4153_v52, 2 }
 0x108   : > { %v7416_v62 = vpop.f32.mrf.mxu0  ;;  %v7418_v63 = vpop.f32.mrf.mxu1  ;;  %v4147_v59 = vor.u32 %v4146_v61, %v4143_v60  ;;  %v4159_v38 = vshrl.u32 %v6776_v11, 16 }
 0x109   : > { %v4156_v52 = vor.u32 %v4155_v28, %v4152_v23 }
 0x10a   : > { %v7424_v12 = vpop.f32.mrf.mxu0  ;;  %v7426_v14 = vpop.f32.mrf.mxu1  ;;  %v4148_v2 = vsel %vm2993_vm2, %v4138_v43, %v4147_v59 }
 0x10c   : > { %v6179_v30 = vpop.f32.mrf.mxu1  ;;  %v6227_v13 = vpop.f32.mrf.mxu0  ;;  %6466 = vmatmul.mubr.bf16.vlgmr.msra.gmra.mxu1 %v4112_v3  ;;  %6514 = vmatmul.mubr.bf16.vlgmr.msra.gmra.mxu0 %v4698_v48 }
 0x10d   : > { %v1205_v34 = vadd.f32 %v6179_v30, %v7324_v9  ;;  %6469 = vmatprep.mubr.bf16.mxu1 %v4121_v15  ;;  %6517 = vmatprep.mubr.bf16.mxu0 %v4700_v20  ;;  %v6778_v30 = vld [vmem:[%s6850_s26 + $0x58] sm:$0xff]  }
 0x10e   : > { %v1076_v39 = vpop.f32.mrf.mxu1  ;;  %v1564_v42 = vpop.f32.mrf.mxu0 }
 0x10f   : > { %v7436_v53 = vadd.f32 %v6227_v13, %v1205_v34  ;;  %v1203_v50 = vadd.f32 %v1076_v39, %v7329_v16  ;;  %v4139_v16 = vsel %vm2993_vm2, %v4129_v35, %v4138_v43  ;;  %v4162_v39 = vshll.u32 %v6776_v11, 16  ;;  %v6782_v43 = vld [vmem:[%s6850_s26 + $0x68] sm:$0xff]  }
 0x110   : > { %v6180_v54 = vpop.f32.mrf.mxu1  ;;  %v6228_v9 = vpop.f32.mrf.mxu0 }
 0x111   : > { %v7440_v3 = vadd.f32 %v1564_v42, %v1203_v50  ;;  %v1206_v48 = vadd.f32 %v6180_v54, %v7336_v24  ;;  %v4168_v50 = vshrl.u32 %v6778_v30, 16  ;;  %v4171_v54 = vshll.u32 %v6778_v30, 16 }
 0x112   : > { %v1079_v15 = vpop.f32.mrf.mxu1  ;;  %v1567_v20 = vpop.f32.mrf.mxu0 }
 0x113   : > { %v7452_v13 = vadd.f32 %v6228_v9, %v1206_v48  ;;  %v1204_v24 = vadd.f32 %v1079_v15, %v7346_v31  ;;  %v4707_v31 = vrot.slane %v7449_v29, 2  ;;  %v4706_v48 = vsel %vm4693_vm3, %v4703_v44, %v4705_v33 }
 0x114   : > { %v6183_v21 = vpop.f32.mrf.mxu1  ;;  %v6231_v58 = vpop.f32.mrf.mxu0  ;;  %6470 = vmatmul.mubr.bf16.gmra.mxu1 %v4130_v5  ;;  %6518 = vmatmul.mubr.bf16.gmra.mxu0 %v4702_v8  ;;  %v6780_v5 = vld [vmem:[%s6850_s26 + $0x60] sm:$0xff]   ;;  %v4161_v15 = vrot.slane %v4159_v38, 1  ;;  %v4170_v29 = vrot.slane %v4168_v50, 1  ;;  %v4173_v30 = vrot.slane %v4171_v54, 2 }
 0x115   : > { %v7455_v34 = vadd.f32 %v1567_v20, %v1204_v24  ;;  %v1209_v35 = vadd.f32 %v6183_v21, %v7352_v40  ;;  %6473 = vmatprep.mubr.bf16.mxu1 %v4139_v16  ;;  %6521 = vmatprep.mubr.bf16.mxu0 %v4704_v22  ;;  %v4164_v20 = vrot.slane %v4162_v39, 2  ;;  %v6777_v16 = vld [vmem:[%s6850_s26 + $0x50] sm:$0xff]   ;;  %v4708_v28 = vsel %vm4693_vm3, %v4705_v33, %v4707_v31  ;;  %v7472_v24 = vld [vmem:[%s6850_s26 + $0x58] sm:$0xff]  }
 0x116   : > { %v1092_v42 = vpop.f32.mrf.mxu1  ;;  %v1580_v45 = vpop.f32.mrf.mxu0  ;;  %v4180_v38 = vshll.u32 %v6780_v5, 16  ;;  %v4174_v54 = vor.u32 %v4173_v30, %v4170_v29 }
 0x117   : > { %v7459_v9 = vadd.f32 %v6231_v58, %v1209_v35  ;;  %v1207_v60 = vadd.f32 %v1092_v42, %v7356_v46  ;;  %v4157_v46 = vsel %vm2993_vm2, %v4147_v59, %v4156_v52  ;;  %v4177_v35 = vshrl.u32 %v6780_v5, 16 }
 0x118   : > { %v6184_v61 = vpop.f32.mrf.mxu1  ;;  %v6232_v40 = vpop.f32.mrf.mxu0  ;;  %v4165_v33 = vor.u32 %v4164_v20, %v4161_v15  ;;  %v4709_v42 = vrot.slane %v6777_v16, 2  ;;  %v6781_v15 = vld [vmem:[%s6850_s26 + $0x60] sm:$0xff]  }
 0x119   : > { %v7465_v8 = vadd.f32 %v1580_v45, %v1207_v60  ;;  %v1210_v11 = vadd.f32 %v6184_v61, %v7362_v55  ;;  %v4186_v60 = vshrl.u32 %v6782_v43, 16  ;;  %v4189_v61 = vshll.u32 %v6782_v43, 16 }
 0x11a   : > { %v1095_v22 = vpop.f32.mrf.mxu1  ;;  %v1583_v23 = vpop.f32.mrf.mxu0  ;;  %v4179_v5 = vrot.slane %v4177_v35, 1 }
 0x11b   : > { %v7475_v44 = vadd.f32 %v6232_v40, %v1210_v11  ;;  %v1208_v21 = vadd.f32 %v1095_v22, %v7373_v0  ;;  %v4711_v0 = vrot.slane %v7472_v24, 2  ;;  %v4182_v11 = vrot.slane %v4180_v38, 2 }
 0x11c   : > { %v6187_v58 = vpop.f32.mrf.mxu1  ;;  %v6235_v55 = vpop.f32.mrf.mxu0  ;;  %6474 = vmatmul.mubr.bf16.gmra.mxu1 %v4148_v2  ;;  %6522 = vmatmul.mubr.bf16.gmra.mxu0 %v4706_v48  ;;  %v4166_v22 = vsel %vm2993_vm2, %v4156_v52, %v4165_v33  ;;  %v4188_v24 = vrot.slane %v4186_v60, 1  ;;  %v4191_v43 = vrot.slane %v4189_v61, 2  ;;  %v4713_v38 = vrot.slane %v6781_v15, 2 }
 0x11d   : > { %v7478_v39 = vadd.f32 %v1583_v23, %v1208_v21  ;;  %v1213_v59 = vadd.f32 %v6187_v58, %v7380_v6  ;;  %6477 = vmatprep.mubr.bf16.mxu1 %v4157_v46  ;;  %6525 = vmatprep.mubr.bf16.mxu0 %v4708_v28  ;;  %v4710_v23 = vsel %vm4693_vm3, %v4707_v31, %v4709_v42  ;;  %v6784_v46 = vld [vmem:[%s6850_s26 + $0x70] sm:$0xff]   ;;  %v7495_v21 = vld [vmem:[%s6850_s26 + $0x68] sm:$0xff]   ;;  %v6786_v58 = vld [vmem:[%s6850_s26 + $0x78] sm:$0xff]  }
 0x11e   : > { %v1108_v45 = vpop.f32.mrf.mxu1  ;;  %v1596_v50 = vpop.f32.mrf.mxu0  ;;  %v4712_v30 = vsel %vm4693_vm3, %v4709_v42, %v4711_v0  ;;  %v4183_v31 = vor.u32 %v4182_v11, %v4179_v5  ;;  %v4195_v42 = vshrl.u32 %v6784_v46, 16  ;;  %v4192_v61 = vor.u32 %v4191_v43, %v4188_v24 }
 0x11f   : > { %v7482_v40 = vadd.f32 %v6235_v55, %v1213_v59  ;;  %v1211_v2 = vadd.f32 %v1108_v45, %v7384_v18  ;;  %v4175_v18 = vsel %vm2993_vm2, %v4165_v33, %v4174_v54  ;;  %v4198_v45 = vshll.u32 %v6784_v46, 16 }
 0x120   : > { %v6188_v48 = vpop.f32.mrf.mxu1  ;;  %v6236_v6 = vpop.f32.mrf.mxu0  ;;  %v4184_v15 = vsel %vm2993_vm2, %v4174_v54, %v4183_v31  ;;  %v6790_v54 = vld [vmem:[%s6850_s26 + $0x88] sm:$0xff]  }
 0x121   : > { %v7486_v20 = vadd.f32 %v1596_v50, %v1211_v2  ;;  %v1214_v16 = vadd.f32 %v6188_v48, %v7389_v26  ;;  %v4204_v2 = vshrl.u32 %v6786_v58, 16  ;;  %v4207_v48 = vshll.u32 %v6786_v58, 16 }
 0x122   : > { %v1111_v28 = vpop.f32.mrf.mxu1  ;;  %v1599_v29 = vpop.f32.mrf.mxu0 }
 0x123   : > { %v7498_v55 = vadd.f32 %v6236_v6, %v1214_v16  ;;  %v1212_v26 = vadd.f32 %v1111_v28, %v7397_v36  ;;  %v4715_v36 = vrot.slane %v7495_v21, 2  ;;  %v4714_v16 = vsel %vm4693_vm3, %v4711_v0, %v4713_v38 }
 0x124   : > { %v6191_v35 = vpop.f32.mrf.mxu1  ;;  %v6239_v52 = vpop.f32.mrf.mxu0  ;;  %6478 = vmatmul.mubr.bf16.gmra.mxu1 %v4166_v22  ;;  %6526 = vmatmul.mubr.bf16.gmra.mxu0 %v4710_v23  ;;  %v6788_v22 = vld [vmem:[%s6850_s26 + $0x80] sm:$0xff]   ;;  %v4197_v28 = vrot.slane %v4195_v42, 1  ;;  %v4206_v21 = vrot.slane %v4204_v2, 1  ;;  %v4209_v58 = vrot.slane %v4207_v48, 2 }
 0x125   : > { %v7501_v59 = vadd.f32 %v1599_v29, %v1212_v26  ;;  %v1217_v33 = vadd.f32 %v6191_v35, %v7407_v49  ;;  %6481 = vmatprep.mubr.bf16.mxu1 %v4175_v18  ;;  %6529 = vmatprep.mubr.bf16.mxu0 %v4712_v30  ;;  %v4200_v29 = vrot.slane %v4198_v45, 2  ;;  %v6785_v18 = vld [vmem:[%s6850_s26 + $0x70] sm:$0xff]   ;;  %v4716_v43 = vsel %vm4693_vm3, %v4713_v38, %v4715_v36  ;;  %v7518_v26 = vld [vmem:[%s6850_s26 + $0x78] sm:$0xff]  }
 0x126   : > { %v1124_v50 = vpop.f32.mrf.mxu1  ;;  %v1612_v60 = vpop.f32.mrf.mxu0  ;;  %v4216_v42 = vshll.u32 %v6788_v22, 16  ;;  %v4210_v48 = vor.u32 %v4209_v58, %v4206_v21 }
 0x127   : > { %v7505_v6 = vadd.f32 %v6239_v52, %v1217_v33  ;;  %v1215_v5 = vadd.f32 %v1124_v50, %v7411_v4  ;;  %v4193_v4 = vsel %vm2993_vm2, %v4183_v31, %v4192_v61  ;;  %v4213_v33 = vshrl.u32 %v6788_v22, 16 }
 0x128   : > { %v6192_v11 = vpop.f32.mrf.mxu1  ;;  %v6240_v49 = vpop.f32.mrf.mxu0  ;;  %v4201_v38 = vor.u32 %v4200_v29, %v4197_v28  ;;  %v4717_v50 = vrot.slane %v6785_v18, 2 }
 0x129   : > { %v7511_v23 = vadd.f32 %v1612_v60, %v1215_v5  ;;  %v1218_v46 = vadd.f32 %v6192_v11, %v7416_v62  ;;  %v4222_v5 = vshrl.u32 %v6790_v54, 16  ;;  %v4225_v11 = vshll.u32 %v6790_v54, 16 }
 0x12a   : > { %v1127_v30 = vpop.f32.mrf.mxu1  ;;  %v1615_v24 = vpop.f32.mrf.mxu0  ;;  %v4215_v22 = vrot.slane %v4213_v33, 1  ;;  %v4202_v18 = vsel %vm2993_vm2, %v4192_v61, %v4201_v38  ;;  %v4211_v58 = vsel %vm2993_vm2, %v4201_v38, %v4210_v48 }
 0x12b   : > { %v7521_v0 = vadd.f32 %v6240_v49, %v1218_v46  ;;  %v1216_v35 = vadd.f32 %v1127_v30, %v7424_v12  ;;  %v4719_v12 = vrot.slane %v7518_v26, 2  ;;  %v4218_v46 = vrot.slane %v4216_v42, 2  ;;  %v6789_v30 = vld [vmem:[%s6850_s26 + $0x80] sm:$0xff]  }
 0x12c   : > { %v6195_v52 = vpop.f32.mrf.mxu1  ;;  %v6243_v62 = vpop.f32.mrf.mxu0  ;;  %6482 = vmatmul.mubr.bf16.gmra.mxu1 %v4184_v15  ;;  %6530 = vmatmul.mubr.bf16.gmra.mxu0 %v4714_v16  ;;  %v4224_v26 = vrot.slane %v4222_v5, 1  ;;  %v4227_v54 = vrot.slane %v4225_v11, 2 }
 0x12d   : > { %v7524_v45 = vadd.f32 %v1615_v24, %v1216_v35  ;;  %v1221_v31 = vadd.f32 %v6195_v52, %v7326_v10  ;;  %6485 = vmatprep.mubr.bf16.mxu1 %v4193_v4  ;;  %6533 = vmatprep.mubr.bf16.mxu0 %v4716_v43  ;;  %v4718_v24 = vsel %vm4693_vm3, %v4715_v36, %v4717_v50  ;;  %v6792_v4 = vld [vmem:[%s6850_s26 + $0x90] ss:$0 sps:$4 sm:$0x33]   ;;  %v6791_v35 = vld [vmem:[%s6850_s26 + $0x88] sm:$0xff]   ;;  %v4721_v36 = vrot.slane %v6789_v30, 2 }
 0x12e   : > { %v1140_v60 = vpop.f32.mrf.mxu1  ;;  %v1628_v2 = vpop.f32.mrf.mxu0  ;;  %v4219_v61 = vor.u32 %v4218_v46, %v4215_v22  ;;  %v4231_v38 = vshrl.u32 %v6792_v4, 16  ;;  %v4228_v5 = vor.u32 %v4227_v54, %v4224_v26  ;;  %v4723_v11 = vrot.slane %v6791_v35, 2 }
 0x12f   : > { %v7528_v49 = vadd.f32 %v6243_v62, %v1221_v31  ;;  %v1219_v15 = vadd.f32 %v1140_v60, %v7331_v17  ;;  %v4720_v17 = vsel %vm4693_vm3, %v4717_v50, %v4719_v12  ;;  %v4234_v50 = vshll.u32 %v6792_v4, 16 }
 0x130   : > { %v6196_v16 = vpop.f32.mrf.mxu1  ;;  %v6244_v10 = vpop.f32.mrf.mxu0  ;;  %v4220_v22 = vsel %vm2993_vm2, %v4210_v48, %v4219_v61  ;;  %v4722_v46 = vsel %vm4693_vm3, %v4719_v12, %v4721_v36 }
 0x131   : > { %v7532_v28 = vadd.f32 %v1628_v2, %v1219_v15  ;;  %v1222_v29 = vadd.f32 %v6196_v16, %v7338_v25 }
 0x132   : > { %v1143_v43 = vpop.f32.mrf.mxu1  ;;  %v1631_v21 = vpop.f32.mrf.mxu0 }
 0x133   : > { %v7541_v52 = vadd.f32 %v6244_v10, %v1222_v29  ;;  %v1220_v62 = vadd.f32 %v1143_v43, %v7348_v32  ;;  %v4233_v29 = vrot.slane %v4231_v38, 1 }
 0x134   : > { %v6199_v33 = vpop.f32.mrf.mxu1  ;;  %v6247_v25 = vpop.f32.mrf.mxu0  ;;  %6486 = vmatmul.mubr.bf16.gmra.mxu1 %v4202_v18  ;;  %6534 = vmatmul.mubr.bf16.gmra.mxu0 %v4718_v24  ;;  %v4236_v18 = vrot.slane %v4234_v50, 2  ;;  %v6793_v24 = vld [vmem:[%s6850_s26 + $0x90] ss:$0 sps:$4 sm:$0x33]  }
 0x135   : > { %v7544_v42 = vadd.f32 %v1631_v21, %v1220_v62  ;;  %v1225_v31 = vadd.f32 %v6199_v33, %v7354_v41  ;;  %6489 = vmatprep.mubr.bf16.mxu1 %v4211_v58  ;;  %6537 = vmatprep.mubr.bf16.mxu0 %v4720_v17  ;;  %v4229_v21 = vsel %vm2993_vm2, %v4219_v61, %v4228_v5  ;;  %v4725_v35 = vrot.slane %v6793_v24, 2 }
 0x136   : > { %v1156_v60 = vpop.f32.mrf.mxu1  ;;  %v1644_v2 = vpop.f32.mrf.mxu0  ;;  %v4724_v58 = vsel %vm4693_vm3, %v4721_v36, %v4723_v11  ;;  %v4237_v54 = vor.u32 %v4236_v18, %v4233_v29 }
 0x137   : > { %v7547_v32 = vadd.f32 %v6247_v25, %v1225_v31  ;;  %v1223_v15 = vadd.f32 %v1156_v60, %v7358_v47 }
 0x138   : > { %v6200_v16 = vpop.f32.mrf.mxu1  ;;  %v6248_v10 = vpop.f32.mrf.mxu0  ;;  %v4238_v50 = vsel %vm2993_vm2, %v4228_v5, %v4237_v54 }
 0x139   : > { %v7552_v41 = vadd.f32 %v1644_v2, %v1223_v15  ;;  %v1226_v30 = vadd.f32 %v6200_v16, %v7364_v56 }
 0x13a   : > { %v1159_v4 = vpop.f32.mrf.mxu1  ;;  %v1647_v43 = vpop.f32.mrf.mxu0 }
 0x13b   : > { %v7558_v47 = vadd.f32 %v6248_v10, %v1226_v30  ;;  %v1224_v17 = vadd.f32 %v1159_v4, %v7375_v1 }
 0x13c   : > { %v6203_v48 = vpop.f32.mrf.mxu1  ;;  %v6251_v26 = vpop.f32.mrf.mxu0  ;;  %6490 = vmatmul.mubr.bf16.gmra.mxu1 %v4220_v22  ;;  %6538 = vmatmul.mubr.bf16.gmra.mxu0 %v4722_v46 }
 0x13d   : > { %v7561_v12 = vadd.f32 %v1647_v43, %v1224_v17  ;;  %v1229_v56 = vadd.f32 %v6203_v48, %v7382_v7  ;;  %6493 = vmatprep.mubr.bf16.mxu1 %v4229_v21  ;;  %6541 = vmatprep.mubr.bf16.mxu0 %v4724_v58  ;;  %v4726_v7 = vsel %vm4693_vm3, %v4723_v11, %v4725_v35 }
 0x13e   : > { %v1172_v62 = vpop.f32.mrf.mxu1  ;;  %v1660_v33 = vpop.f32.mrf.mxu0 }
 0x13f   : > { %v7564_v25 = vadd.f32 %v6251_v26, %v1229_v56  ;;  %v1227_v61 = vadd.f32 %v1172_v62, %v7386_v19 }
 0x140   : > { %v6204_v36 = vpop.f32.mrf.mxu1  ;;  %v6252_v1 = vpop.f32.mrf.mxu0 }
 0x141   : > { %v7567_v31 = vadd.f32 %v1660_v33, %v1227_v61  ;;  %v1230_v38 = vadd.f32 %v6204_v36, %v7391_v27 }
 0x142   : > { %v1175_v60 = vpop.f32.mrf.mxu1  ;;  %v1663_v2 = vpop.f32.mrf.mxu0 }
 0x143   : > { %v7572_v15 = vadd.f32 %v6252_v1, %v1230_v38  ;;  %v1228_v16 = vadd.f32 %v1175_v60, %v7399_v37 }
 0x144   : > { %v6207_v10 = vpop.f32.mrf.mxu1  ;;  %v6255_v22 = vpop.f32.mrf.mxu0  ;;  %6494 = vmatmul.mubr.bf16.gmra.mxu1 %v4238_v50  ;;  %6542 = vmatmul.mubr.bf16.gmra.mxu0 %v4726_v7 }
 0x145   : > { %v7575_v19 = vadd.f32 %v1663_v2, %v1228_v16  ;;  %v1233_v46 = vadd.f32 %v6207_v10, %v7409_v51 }
 0x146   : > { %v1188_v30 = vpop.f32.mrf.mxu1  ;;  %v1676_v27 = vpop.f32.mrf.mxu0 }
 0x147   : > { %v7578_v29 = vadd.f32 %v6255_v22, %v1233_v46  ;;  %v1231_v5 = vadd.f32 %v1188_v30, %v7413_v57 }
 0x148   : > { %v6208_v11 = vpop.f32.mrf.mxu1  ;;  %v6256_v18 = vpop.f32.mrf.mxu0 }
 0x149   : > { %v7581_v24 = vadd.f32 %v1676_v27, %v1231_v5  ;;  %v1234_v37 = vadd.f32 %v6208_v11, %v7418_v63 }
 0x14a   : > { %v1191_v4 = vpop.f32.mrf.mxu1  ;;  %v1679_v43 = vpop.f32.mrf.mxu0 }
 0x14b   : > { %v7584_v21 = vadd.f32 %v6256_v18, %v1234_v37  ;;  %v1232_v58 = vadd.f32 %v1191_v4, %v7426_v14 }
 0x14c   : > { %v6275_v17 = vpop.f32.mrf.mxu1  ;;  %v6323_v51 = vpop.f32.mrf.mxu0 }
 0x14d   : > { %v7587_v48 = vadd.f32 %v1679_v43, %v1232_v58  ;;  %v2279_v26 = vadd.f32 %v6275_v17, %v7436_v53 }
 0x14e   : > { %v2150_v56 = vpop.f32.mrf.mxu1  ;;  %v2637_v57 = vpop.f32.mrf.mxu0 }
 0x14f   : > { %v7590_v54 = vadd.f32 %v6323_v51, %v2279_v26  ;;  %v2277_v35 = vadd.f32 %v2150_v56, %v7440_v3 }
 0x150   : > { %v6276_v62 = vpop.f32.mrf.mxu1  ;;  %v6324_v63 = vpop.f32.mrf.mxu0 }
 0x151   : > { %v7593_v33 = vadd.f32 %v2637_v57, %v2277_v35  ;;  %v2280_v61 = vadd.f32 %v6276_v62, %v7452_v13 }
 0x152   : > { %v2153_v36 = vpop.f32.mrf.mxu1  ;;  %v2640_v14 = vpop.f32.mrf.mxu0 }
 0x153   : > { %v7596_v1 = vadd.f32 %v6324_v63, %v2280_v61  ;;  %v2278_v38 = vadd.f32 %v2153_v36, %v7455_v34 }
 0x154   : > { %v6279_v50 = vpop.f32.mrf.mxu1  ;;  %v6327_v53 = vpop.f32.mrf.mxu0 }
 0x155   : > { %v7599_v7 = vadd.f32 %v2640_v14, %v2278_v38  ;;  %v2283_v60 = vadd.f32 %v6279_v50, %v7459_v9 }
 0x156   : > { %v2166_v2 = vpop.f32.mrf.mxu1  ;;  %v2653_v3 = vpop.f32.mrf.mxu0 }
 0x157   : > { %v7602_v16 = vadd.f32 %v6327_v53, %v2283_v60  ;;  %v2281_v10 = vadd.f32 %v2166_v2, %v7465_v8 }
 0x158   : > { %v6280_v22 = vpop.f32.mrf.mxu1  ;;  %v6328_v13 = vpop.f32.mrf.mxu0 }
 0x159   : > { %v7605_v46 = vadd.f32 %v2653_v3, %v2281_v10  ;;  %v2284_v30 = vadd.f32 %v6280_v22, %v7475_v44 }
 0x15a   : > { %v2169_v27 = vpop.f32.mrf.mxu1  ;;  %v2656_v34 = vpop.f32.mrf.mxu0 }
 0x15b   : > { %v7608_v5 = vadd.f32 %v6328_v13, %v2284_v30  ;;  %v2282_v11 = vadd.f32 %v2169_v27, %v7478_v39 }
 0x15c   : > { %v6283_v18 = vpop.f32.mrf.mxu1  ;;  %v6331_v9 = vpop.f32.mrf.mxu0 }
 0x15d   : > { %v7611_v37 = vadd.f32 %v2656_v34, %v2282_v11  ;;  %v2287_v4 = vadd.f32 %v6283_v18, %v7482_v40 }
 0x15e   : > { %v2182_v43 = vpop.f32.mrf.mxu1  ;;  %v2669_v8 = vpop.f32.mrf.mxu0 }
 0x15f   : > { %v7614_v58 = vadd.f32 %v6331_v9, %v2287_v4  ;;  %v2285_v17 = vadd.f32 %v2182_v43, %v7486_v20 }
 0x160   : > { %v6284_v51 = vpop.f32.mrf.mxu1  ;;  %v6332_v44 = vpop.f32.mrf.mxu0 }
 0x161   : > { %v7617_v26 = vadd.f32 %v2669_v8, %v2285_v17  ;;  %v2288_v56 = vadd.f32 %v6284_v51, %v7498_v55 }
 0x162   : > { %v2185_v57 = vpop.f32.mrf.mxu1  ;;  %v2672_v39 = vpop.f32.mrf.mxu0 }
 0x163   : > { %v7620_v35 = vadd.f32 %v6332_v44, %v2288_v56  ;;  %v2286_v62 = vadd.f32 %v2185_v57, %v7501_v59 }
 0x164   : > { %v6287_v63 = vpop.f32.mrf.mxu1  ;;  %v6335_v40 = vpop.f32.mrf.mxu0 }
 0x165   : > { %v7623_v61 = vadd.f32 %v2672_v39, %v2286_v62  ;;  %v2291_v36 = vadd.f32 %v6287_v63, %v7505_v6 }
 0x166   : > { %v2198_v14 = vpop.f32.mrf.mxu1  ;;  %v2685_v20 = vpop.f32.mrf.mxu0 }
 0x167   : > { %v7626_v38 = vadd.f32 %v6335_v40, %v2291_v36  ;;  %v2289_v50 = vadd.f32 %v2198_v14, %v7511_v23 }
 0x168   : > { %v6288_v53 = vpop.f32.mrf.mxu1  ;;  %v6336_v55 = vpop.f32.mrf.mxu0 }
 0x169   : > { %v7629_v60 = vadd.f32 %v2685_v20, %v2289_v50  ;;  %v2292_v2 = vadd.f32 %v6288_v53, %v7521_v0 }
 0x16a   : > { %v2201_v3 = vpop.f32.mrf.mxu1  ;;  %v2688_v59 = vpop.f32.mrf.mxu0 }
 0x16b   : > { %v7632_v10 = vadd.f32 %v6336_v55, %v2292_v2  ;;  %v2290_v22 = vadd.f32 %v2201_v3, %v7524_v45 }
 0x16c   : > { %v6291_v13 = vpop.f32.mrf.mxu1  ;;  %v6339_v6 = vpop.f32.mrf.mxu0 }
 0x16d   : > { %v7635_v30 = vadd.f32 %v2688_v59, %v2290_v22  ;;  %v2295_v27 = vadd.f32 %v6291_v13, %v7528_v49 }
 0x16e   : > { %v2214_v34 = vpop.f32.mrf.mxu1  ;;  %v2701_v23 = vpop.f32.mrf.mxu0 }
 0x16f   : > { %v7638_v11 = vadd.f32 %v6339_v6, %v2295_v27  ;;  %v2293_v18 = vadd.f32 %v2214_v34, %v7532_v28 }
 0x170   : > { %v6292_v9 = vpop.f32.mrf.mxu1  ;;  %v6340_v0 = vpop.f32.mrf.mxu0 }
 0x171   : > { %v7641_v4 = vadd.f32 %v2701_v23, %v2293_v18  ;;  %v2296_v43 = vadd.f32 %v6292_v9, %v7541_v52 }
 0x172   : > { %v2217_v8 = vpop.f32.mrf.mxu1  ;;  %v2704_v45 = vpop.f32.mrf.mxu0 }
 0x173   : > { %v7644_v17 = vadd.f32 %v6340_v0, %v2296_v43  ;;  %v2294_v51 = vadd.f32 %v2217_v8, %v7544_v42 }
 0x174   : > { %v6295_v44 = vpop.f32.mrf.mxu1  ;;  %v6343_v49 = vpop.f32.mrf.mxu0 }
 0x175   : > { %v7647_v56 = vadd.f32 %v2704_v45, %v2294_v51  ;;  %v2299_v57 = vadd.f32 %v6295_v44, %v7547_v32 }
 0x176   : > { %v2230_v39 = vpop.f32.mrf.mxu1  ;;  %v2717_v28 = vpop.f32.mrf.mxu0 }
 0x177   : > { %v7650_v62 = vadd.f32 %v6343_v49, %v2299_v57  ;;  %v2297_v63 = vadd.f32 %v2230_v39, %v7552_v41 }
 0x178   : > { %v6296_v40 = vpop.f32.mrf.mxu1  ;;  %v6344_v52 = vpop.f32.mrf.mxu0 }
 0x179   : > { %v7653_v36 = vadd.f32 %v2717_v28, %v2297_v63  ;;  %v2300_v14 = vadd.f32 %v6296_v40, %v7558_v47 }
 0x17a   : > { %v2233_v20 = vpop.f32.mrf.mxu1  ;;  %v2720_v42 = vpop.f32.mrf.mxu0 }
 0x17b   : > { %v7656_v50 = vadd.f32 %v6344_v52, %v2300_v14  ;;  %v2298_v53 = vadd.f32 %v2233_v20, %v7561_v12 }
 0x17c   : > { %v6299_v55 = vpop.f32.mrf.mxu1  ;;  %v6347_v32 = vpop.f32.mrf.mxu0 }
 0x17d   : > { %v7659_v2 = vadd.f32 %v2720_v42, %v2298_v53  ;;  %v2303_v3 = vadd.f32 %v6299_v55, %v7564_v25 }
 0x17e   : > { %v2246_v59 = vpop.f32.mrf.mxu1  ;;  %v2733_v41 = vpop.f32.mrf.mxu0 }
 0x17f   : > { %v7662_v22 = vadd.f32 %v6347_v32, %v2303_v3  ;;  %v2301_v13 = vadd.f32 %v2246_v59, %v7567_v31 }
 0x180   : > { %v6300_v6 = vpop.f32.mrf.mxu1  ;;  %v6348_v47 = vpop.f32.mrf.mxu0 }
 0x181   : > { %v7665_v27 = vadd.f32 %v2733_v41, %v2301_v13  ;;  %v2304_v34 = vadd.f32 %v6300_v6, %v7572_v15 }
 0x182   : > { %v2249_v23 = vpop.f32.mrf.mxu1  ;;  %v2736_v12 = vpop.f32.mrf.mxu0 }
 0x183   : > { %v7668_v18 = vadd.f32 %v6348_v47, %v2304_v34  ;;  %v2302_v9 = vadd.f32 %v2249_v23, %v7575_v19 }
 0x184   : > { %v6303_v0 = vpop.f32.mrf.mxu1  ;;  %v6351_v25 = vpop.f32.mrf.mxu0 }
 0x185   : > { %7965 = vst [vmem:[#allocation3_spill] sm:$0xff] %v7668_v18  ;;  %v7671_v43 = vadd.f32 %v2736_v12, %v2302_v9  ;;  %v2307_v8 = vadd.f32 %v6303_v0, %v7578_v29 }
 0x186   : > { %v2262_v45 = vpop.f32.mrf.mxu1  ;;  %v2749_v31 = vpop.f32.mrf.mxu0 }
 0x187   : > { %7966 = vst [vmem:[#allocation4_spill] sm:$0xff] %v7671_v43  ;;  %v7674_v51 = vadd.f32 %v6351_v25, %v2307_v8  ;;  %v2305_v44 = vadd.f32 %v2262_v45, %v7581_v24 }
 0x188   : > { %v6304_v49 = vpop.f32.mrf.mxu1  ;;  %v6352_v15 = vpop.f32.mrf.mxu0 }
 0x189   : > { %v7677_v57 = vadd.f32 %v2749_v31, %v2305_v44  ;;  %v2308_v39 = vadd.f32 %v6304_v49, %v7584_v21 }
 0x18a   : > { %v2265_v28 = vpop.f32.mrf.mxu1  ;;  %v2752_v19 = vpop.f32.mrf.mxu0 }
 0x18b   : > { %v7680_v63 = vadd.f32 %v6352_v15, %v2308_v39  ;;  %v2306_v40 = vadd.f32 %v2265_v28, %v7587_v48 }
 0x18c   : > { %v6371_v52 = vpop.f32.mrf.mxu1  ;;  %v6419_v29 = vpop.f32.mrf.mxu0 }
 0x18d   : > { %7967 = vst [vmem:[#allocation5_spill] sm:$0xff] %v7680_v63  ;;  %v7683_v14 = vadd.f32 %v2752_v19, %v2306_v40  ;;  %v3373_v20 = vadd.f32 %v6371_v52, %v7590_v54 }
 0x18e   : > { %v3244_v42 = vpop.f32.mrf.mxu1  ;;  %v3731_v24 = vpop.f32.mrf.mxu0 }
 0x18f   : > { %7968 = vst [vmem:[#allocation6_spill] sm:$0xff] %v7683_v14  ;;  %v7686_v53 = vadd.f32 %v6419_v29, %v3373_v20  ;;  %v3371_v55 = vadd.f32 %v3244_v42, %v7593_v33 }
 0x190   : > { %v7689_v32 = vpop.f32.mrf.mxu1  ;;  %v7691_v21 = vpop.f32.mrf.mxu0 }
 0x191   : > { %v7693_v3 = vadd.f32 %v3731_v24, %v3371_v55 }
 0x192   : > { %v7695_v59 = vpop.f32.mrf.mxu1  ;;  %v7697_v48 = vpop.f32.mrf.mxu0 }
 0x194   : > { %v6375_v41 = vpop.f32.mrf.mxu1  ;;  %v6423_v13 = vpop.f32.mrf.mxu0 }
 0x195   : > { %v3377_v54 = vadd.f32 %v6375_v41, %v7602_v16 }
 0x196   : > { %v3260_v6 = vpop.f32.mrf.mxu1  ;;  %v3747_v47 = vpop.f32.mrf.mxu0 }
 0x197   : > { %v7700_v34 = vadd.f32 %v6423_v13, %v3377_v54  ;;  %v3375_v33 = vadd.f32 %v3260_v6, %v7605_v46 }
 0x198   : > { %v7703_v23 = vpop.f32.mrf.mxu1  ;;  %v7705_v12 = vpop.f32.mrf.mxu0 }
 0x199   : > { %v7707_v9 = vadd.f32 %v3747_v47, %v3375_v33 }
 0x19a   : > { %v7709_v0 = vpop.f32.mrf.mxu1  ;;  %v7711_v25 = vpop.f32.mrf.mxu0 }
 0x19c   : > { %v6379_v8 = vpop.f32.mrf.mxu1  ;;  %v6427_v45 = vpop.f32.mrf.mxu0 }
 0x19d   : > { %v3381_v16 = vadd.f32 %v6379_v8, %v7614_v58 }
 0x19e   : > { %v3276_v31 = vpop.f32.mrf.mxu1  ;;  %v3763_v44 = vpop.f32.mrf.mxu0 }
 0x19f   : > { %v7714_v49 = vadd.f32 %v6427_v45, %v3381_v16  ;;  %v3379_v46 = vadd.f32 %v3276_v31, %v7617_v26 }
 0x1a0   : > { %v7717_v15 = vpop.f32.mrf.mxu1  ;;  %v7719_v39 = vpop.f32.mrf.mxu0 }
 0x1a1   : > { %v7721_v28 = vadd.f32 %v3763_v44, %v3379_v46 }
 0x1a2   : > { %v7723_v19 = vpop.f32.mrf.mxu1  ;;  %v7725_v40 = vpop.f32.mrf.mxu0 }
 0x1a4   : > { %v6383_v52 = vpop.f32.mrf.mxu1  ;;  %v6431_v29 = vpop.f32.mrf.mxu0 }
 0x1a5   : > { %v3385_v58 = vadd.f32 %v6383_v52, %v7626_v38 }
 0x1a6   : > { %v3292_v20 = vpop.f32.mrf.mxu1  ;;  %v3779_v42 = vpop.f32.mrf.mxu0 }
 0x1a7   : > { %v7728_v24 = vadd.f32 %v6431_v29, %v3385_v58  ;;  %v3383_v26 = vadd.f32 %v3292_v20, %v7629_v60 }
 0x1a8   : > { %v7731_v55 = vpop.f32.mrf.mxu1  ;;  %v7733_v41 = vpop.f32.mrf.mxu0 }
 0x1a9   : > { %v7735_v13 = vadd.f32 %v3779_v42, %v3383_v26 }
 0x1aa   : > { %v7737_v54 = vpop.f32.mrf.mxu1  ;;  %v7739_v6 = vpop.f32.mrf.mxu0 }
 0x1ac   : > { %v6387_v47 = vpop.f32.mrf.mxu1  ;;  %v6435_v33 = vpop.f32.mrf.mxu0 }
 0x1ad   : > { %v3389_v38 = vadd.f32 %v6387_v47, %v7638_v11 }
 0x1ae   : > { %v3308_v8 = vpop.f32.mrf.mxu1  ;;  %v3795_v45 = vpop.f32.mrf.mxu0 }
 0x1af   : > { %v7742_v16 = vadd.f32 %v6435_v33, %v3389_v38  ;;  %v3387_v60 = vadd.f32 %v3308_v8, %v7641_v4 }
 0x1b0   : > { %v7745_v31 = vpop.f32.mrf.mxu1  ;;  %v7747_v44 = vpop.f32.mrf.mxu0 }
 0x1b1   : > { %v7749_v46 = vadd.f32 %v3795_v45, %v3387_v60 }
 0x1b2   : > { %v7751_v52 = vpop.f32.mrf.mxu1  ;;  %v7753_v29 = vpop.f32.mrf.mxu0 }
 0x1b4   : > { %v6391_v58 = vpop.f32.mrf.mxu1  ;;  %v6439_v20 = vpop.f32.mrf.mxu0 }
 0x1b5   : > { %v3393_v11 = vadd.f32 %v6391_v58, %v7650_v62 }
 0x1b6   : > { %v3324_v42 = vpop.f32.mrf.mxu1  ;;  %v3811_v26 = vpop.f32.mrf.mxu0 }
 0x1b7   : > { %v7756_v47 = vadd.f32 %v6439_v20, %v3393_v11  ;;  %v3391_v4 = vadd.f32 %v3324_v42, %v7653_v36 }
 0x1b8   : > { %v7759_v33 = vpop.f32.mrf.mxu1  ;;  %v7761_v38 = vpop.f32.mrf.mxu0 }
 0x1b9   : > { %7969 = vst [vmem:[#allocation7_spill] sm:$0xff] %v7761_v38  ;;  %v7763_v8 = vadd.f32 %v3811_v26, %v3391_v4 }
 0x1ba   : > { %v7765_v45 = vpop.f32.mrf.mxu1  ;;  %v7767_v60 = vpop.f32.mrf.mxu0 }
 0x1bb   : > { %7970 = vst [vmem:[#allocation8_spill] sm:$0xff] %v7763_v8  ;;  %7971 = vst [vmem:[#allocation9_spill] sm:$0xff] %v7767_v60 }
 0x1bc   : > { %v6395_v14 = vpop.f32.mrf.mxu1  ;;  %v6443_v63 = vpop.f32.mrf.mxu0 }
 0x1bd   : > { %v3397_v62 = vadd.f32 %v6395_v14, %v7662_v22 }
 0x1be   : > { %v3340_v58 = vpop.f32.mrf.mxu1  ;;  %v3827_v43 = vpop.f32.mrf.mxu0 }
 0x1bf   : > { %v7770_v20 = vadd.f32 %v6443_v63, %v3397_v62  ;;  %v3395_v36 = vadd.f32 %v3340_v58, %v7665_v27 }
 0x1c0   : > { %v7773_v11 = vpop.f32.mrf.mxu1  ;;  %v7775_v42 = vpop.f32.mrf.mxu0 }
 0x1c1   : > { %v7777_v26 = vadd.f32 %v3827_v43, %v3395_v36 }
 0x1c2   : > { %v7779_v4 = vpop.f32.mrf.mxu1  ;;  %v7781_v18 = vpop.f32.mrf.mxu0 }
 0x1c3   : > { %7972 = vst [vmem:[#allocation10_spill] sm:$0xff] %v7777_v26  ;;  %7973 = vst [vmem:[#allocation11_spill] sm:$0xff] %v7781_v18  ;;  %v3374_v18 = vadd.f32 %v7689_v32, %v7596_v1 }
 0x1c4   : > { %v6399_v60 = vpop.f32.mrf.mxu1  ;;  %v6447_v8 = vpop.f32.mrf.mxu0 }
 0x1c5   : > { %v3401_v22 = vadd.f32 %v6399_v60, %v7674_v51 }
 0x1c6   : > { %v3356_v14 = vpop.f32.mrf.mxu1  ;;  %v3843_v38 = vpop.f32.mrf.mxu0 }
 0x1c7   : > { %v7784_v63 = vadd.f32 %v6447_v8, %v3401_v22  ;;  %v3399_v27 = vadd.f32 %v3356_v14, %v7677_v57  ;;  %v3372_v8 = vadd.f32 %v7695_v59, %v7599_v7  ;;  %v7805_v22 = vld [vmem:[%s7962_s2] ss:$0 sm:$0xff] }
 0x1c8   : > { %v7787_v62 = vpop.f32.mrf.mxu1  ;;  %v7789_v58 = vpop.f32.mrf.mxu0 }
 0x1c9   : > { %7974 = vst [vmem:[#allocation12_spill] sm:$0xff] %v7784_v63  ;;  %7975 = vst [vmem:[#allocation13_spill] sm:$0xff] %v7789_v58  ;;  %v7791_v43 = vadd.f32 %v3843_v38, %v3399_v27  ;;  %v3861_v27 = vadd.f32 %v7691_v21, %v3374_v18  ;;  %v3859_v58 = vadd.f32 %v7697_v48, %v3372_v8 }
 0x1ca   : > { %v7793_v36 = vpop.f32.mrf.mxu1  ;;  %v7795_v26 = vpop.f32.mrf.mxu0  ;;  %v3378_v18 = vadd.f32 %v7703_v23, %v7608_v5 }
 0x1cb   : > { %7976 = vst [vmem:[#allocation14_spill] sm:$0xff] %v7791_v43  ;;  %7977 = vst [vmem:[#allocation15_spill] sm:$0xff] %v7793_v36 }
 0x1cc   : > { %7978 = vst [vmem:[#allocation16_spill] sm:$0xff] %v7795_v26  ;;  %v6467_v51 = vpop.f32.mrf.mxu1  ;;  %v6515_v60 = vpop.f32.mrf.mxu0  ;;  %v3865_v23 = vadd.f32 %v7705_v12, %v3378_v18  ;;  %v3382_v12 = vadd.f32 %v7717_v15, %v7620_v35 }
 0x1cd   : > { %v4466_v57 = vadd.f32 %v6467_v51, %v7686_v53  ;;  %v7814_v53 = vld [vmem:[%s7963_s3] ss:$0 sm:$0xff] }
 0x1ce   : > { %v4337_v38 = vpop.f32.mrf.mxu1  ;;  %v4825_v14 = vpop.f32.mrf.mxu0 }
 0x1cf   : > { %v4954_v26 = vadd.f32 %v6515_v60, %v4466_v57  ;;  %v4464_v43 = vadd.f32 %v4337_v38, %v7693_v3 }
 0x1d0   : > { %v6468_v1 = vpop.f32.mrf.mxu1  ;;  %v6516_v32 = vpop.f32.mrf.mxu0 }
 0x1d1   : > { %v5057_v7 = vmul.f32 %v7805_v22, %v4954_v26  ;;  %v4952_v59 = vadd.f32 %v4825_v14, %v4464_v43  ;;  %v4467_v51 = vadd.f32 %v6468_v1, %v3861_v27  ;;  %v3376_v43 = vadd.f32 %v7709_v0, %v7611_v37 }
 0x1d2   : > { %v4340_v36 = vpop.f32.mrf.mxu1  ;;  %v4828_v63 = vpop.f32.mrf.mxu0 }
 0x1d3   : > { %v5055_v21 = vmul.f32 %v7805_v22, %v4952_v59  ;;  %v4955_v3 = vadd.f32 %v6516_v32, %v4467_v51  ;;  %v4465_v60 = vadd.f32 %v4340_v36, %v3859_v58  ;;  %v5096_v48 = vadd.f32 %v7814_v53, %v5057_v7 }
 0x1d4   : > { %v6471_v26 = vpop.f32.mrf.mxu1  ;;  %v6519_v8 = vpop.f32.mrf.mxu0 }
 0x1d5   : > { %v5058_v57 = vmul.f32 %v7805_v22, %v4955_v3  ;;  %v4953_v38 = vadd.f32 %v4828_v63, %v4465_v60  ;;  %v5094_v14 = vadd.f32 %v7814_v53, %v5055_v21  ;;  %v4470_v27 = vadd.f32 %v6471_v26, %v7700_v34 }
 0x1d6   : > { %v4353_v1 = vpop.f32.mrf.mxu1  ;;  %v4841_v5 = vpop.f32.mrf.mxu0  ;;  %v5128_v7 = vmax.f32 %v5096_v48, 0.0  ;;  %v3863_v3 = vadd.f32 %v7711_v25, %v3376_v43 }
 0x1d7   : > { %v5097_v58 = vadd.f32 %v7814_v53, %v5058_v57  ;;  %v5056_v36 = vmul.f32 %v7805_v22, %v4953_v38  ;;  %v4468_v32 = vadd.f32 %v4353_v1, %v7707_v9  ;;  %v4958_v63 = vadd.f32 %v6519_v8, %v4470_v27 }
 0x1d8   : > { %v6472_v59 = vpop.f32.mrf.mxu1  ;;  %v6520_v51 = vpop.f32.mrf.mxu0  ;;  %v5126_v18 = vmax.f32 %v5094_v14, 0.0 }
 0x1d9   : > { %v5129_v37 = vmax.f32 %v5097_v58, 0.0  ;;  %v5095_v0 = vadd.f32 %v7814_v53, %v5056_v36  ;;  %v4956_v21 = vadd.f32 %v4841_v5, %v4468_v32  ;;  %v4471_v34 = vadd.f32 %v6472_v59, %v3865_v23 }
 0x1da   : > { %v5061_v9 = vmul.f32 %v7805_v22, %v4958_v63  ;;  %v4356_v60 = vpop.f32.mrf.mxu1  ;;  %v4844_v48 = vpop.f32.mrf.mxu0  ;;  %v3869_v5 = vadd.f32 %v7719_v39, %v3382_v12  ;;  %v3380_v23 = vadd.f32 %v7723_v19, %v7623_v61 }
 0x1db   : > { %v5810_v26 = vpack.c.bf16 %v5129_v37, %v5128_v7  ;;  %v5127_v8 = vmax.f32 %v5095_v0, 0.0  ;;  %v5059_v57 = vmul.f32 %v7805_v22, %v4956_v21  ;;  %v4959_v25 = vadd.f32 %v6520_v51, %v4471_v34 }
 0x1dc   : > { %v5100_v38 = vadd.f32 %v7814_v53, %v5061_v9  ;;  %v4469_v35 = vadd.f32 %v4356_v60, %v3863_v3  ;;  %v6475_v15 = vpop.f32.mrf.mxu1  ;;  %v6523_v43 = vpop.f32.mrf.mxu0  ;;  %v3867_v3 = vadd.f32 %v7725_v40, %v3380_v23 }
 0x1dd   : > { %5882 = vst [vmem:[%s7837_s6 + $0x8] sm:$0xff] %v5810_v26   ;;  %v5805_v14 = vpack.c.bf16 %v5127_v8, %v5126_v18  ;;  %v5062_v27 = vmul.f32 %v7805_v22, %v4959_v25  ;;  %v4474_v1 = vadd.f32 %v6475_v15, %v7714_v49  ;;  %v5098_v7 = vadd.f32 %v7814_v53, %v5059_v57 }
 0x1de   : > { %v4957_v58 = vadd.f32 %v4844_v48, %v4469_v35  ;;  %v4369_v36 = vpop.f32.mrf.mxu1  ;;  %v4857_v32 = vpop.f32.mrf.mxu0  ;;  %v5132_v37 = vmax.f32 %v5100_v38, 0.0 }
 0x1df   : > { %5806 = vst [vmem:[%s7837_s6] sm:$0xff] %v5805_v14   ;;  %v5101_v63 = vadd.f32 %v7814_v53, %v5062_v27  ;;  %v4962_v59 = vadd.f32 %v6523_v43, %v4474_v1  ;;  %v4472_v51 = vadd.f32 %v4369_v36, %v7721_v28  ;;  %v3386_v28 = vadd.f32 %v7731_v55, %v7632_v10 }
 0x1e0   : > { %v5060_v0 = vmul.f32 %v7805_v22, %v4957_v58  ;;  %v6476_v49 = vpop.f32.mrf.mxu1  ;;  %v6524_v21 = vpop.f32.mrf.mxu0  ;;  %v5130_v60 = vmax.f32 %v5098_v7, 0.0  ;;  %v3384_v10 = vadd.f32 %v7737_v54, %v7635_v30 }
 0x1e1   : > { %v5133_v39 = vmax.f32 %v5101_v63, 0.0  ;;  %v5065_v34 = vmul.f32 %v7805_v22, %v4962_v59  ;;  %v4960_v61 = vadd.f32 %v4857_v32, %v4472_v51  ;;  %v4475_v19 = vadd.f32 %v6476_v49, %v3869_v5 }
 0x1e2   : > { %v5099_v12 = vadd.f32 %v7814_v53, %v5060_v0  ;;  %v4372_v18 = vpop.f32.mrf.mxu1  ;;  %v4860_v9 = vpop.f32.mrf.mxu0  ;;  %v3873_v5 = vadd.f32 %v7733_v41, %v3386_v28  ;;  %v3871_v41 = vadd.f32 %v7739_v6, %v3384_v10  ;;  %v3390_v0 = vadd.f32 %v7745_v31, %v7644_v17 }
 0x1e3   : > { %v5820_v48 = vpack.c.bf16 %v5133_v39, %v5132_v37  ;;  %v4963_v26 = vadd.f32 %v6524_v21, %v4475_v19  ;;  %v5104_v57 = vadd.f32 %v7814_v53, %v5065_v34  ;;  %v5063_v25 = vmul.f32 %v7805_v22, %v4960_v61 }
 0x1e4   : > { %v5131_v8 = vmax.f32 %v5099_v12, 0.0  ;;  %v4473_v38 = vadd.f32 %v4372_v18, %v3867_v3  ;;  %v6479_v35 = vpop.f32.mrf.mxu1  ;;  %v6527_v15 = vpop.f32.mrf.mxu0  ;;  %v3877_v31 = vadd.f32 %v7747_v44, %v3390_v0  ;;  %v7979_v0 = vld [vmem:[#allocation7_spill] sm:$0xff] }
 0x1e5   : > { %5884 = vst [vmem:[%s7837_s6 + $0x18] sm:$0xff] %v5820_v48   ;;  %v5066_v40 = vmul.f32 %v7805_v22, %v4963_v26  ;;  %v4478_v43 = vadd.f32 %v6479_v35, %v7728_v24  ;;  %v5136_v32 = vmax.f32 %v5104_v57, 0.0  ;;  %v5102_v7 = vadd.f32 %v7814_v53, %v5063_v25 }
 0x1e6   : > { %v5815_v55 = vpack.c.bf16 %v5131_v8, %v5130_v60  ;;  %v4961_v14 = vadd.f32 %v4860_v9, %v4473_v38  ;;  %v4385_v27 = vpop.f32.mrf.mxu1  ;;  %v4873_v1 = vpop.f32.mrf.mxu0  ;;  %v3388_v60 = vadd.f32 %v7751_v52, %v7647_v56 }
 0x1e7   : > { %v5105_v23 = vadd.f32 %v7814_v53, %v5066_v40  ;;  %v4966_v58 = vadd.f32 %v6527_v15, %v4478_v43  ;;  %v4476_v36 = vadd.f32 %v4385_v27, %v7735_v13  ;;  %v5134_v19 = vmax.f32 %v5102_v7, 0.0 }
 0x1e8   : > { %5883 = vst [vmem:[%s7837_s6 + $0x10] sm:$0xff] %v5815_v55   ;;  %v5064_v24 = vmul.f32 %v7805_v22, %v4961_v14  ;;  %v6480_v63 = vpop.f32.mrf.mxu1  ;;  %v6528_v59 = vpop.f32.mrf.mxu0  ;;  %v3875_v14 = vadd.f32 %v7753_v29, %v3388_v60 }
 0x1e9   : > { %v5137_v30 = vmax.f32 %v5105_v23, 0.0  ;;  %v5069_v54 = vmul.f32 %v7805_v22, %v4966_v58  ;;  %v4964_v51 = vadd.f32 %v4873_v1, %v4476_v36  ;;  %v4479_v37 = vadd.f32 %v6480_v63, %v3873_v5 }
 0x1ea   : > { %v5103_v13 = vadd.f32 %v7814_v53, %v5064_v24  ;;  %v4388_v49 = vpop.f32.mrf.mxu1  ;;  %v4876_v21 = vpop.f32.mrf.mxu0 }
 0x1eb   : > { %v5830_v39 = vpack.c.bf16 %v5137_v30, %v5136_v32  ;;  %v5067_v34 = vmul.f32 %v7805_v22, %v4964_v51  ;;  %v4967_v61 = vadd.f32 %v6528_v59, %v4479_v37  ;;  %v5108_v12 = vadd.f32 %v7814_v53, %v5069_v54 }
 0x1ec   : > { %v5135_v3 = vmax.f32 %v5103_v13, 0.0  ;;  %v4477_v18 = vadd.f32 %v4388_v49, %v3871_v41  ;;  %v6483_v9 = vpop.f32.mrf.mxu1  ;;  %v6531_v28 = vpop.f32.mrf.mxu0 }
 0x1ed   : > { %5886 = vst [vmem:[%s7837_s6 + $0x28] sm:$0xff] %v5830_v39   ;;  %v5070_v6 = vmul.f32 %v7805_v22, %v4967_v61  ;;  %v4482_v17 = vadd.f32 %v6483_v9, %v7742_v16  ;;  %v5106_v25 = vadd.f32 %v7814_v53, %v5067_v34  ;;  %v5140_v40 = vmax.f32 %v5108_v12, 0.0  ;;  %v7980_v39 = vld [vmem:[#allocation8_spill] sm:$0xff] }
 0x1ee   : > { %v5825_v48 = vpack.c.bf16 %v5135_v3, %v5134_v19  ;;  %v4965_v26 = vadd.f32 %v4876_v21, %v4477_v18  ;;  %v4401_v8 = vpop.f32.mrf.mxu1  ;;  %v4889_v57 = vpop.f32.mrf.mxu0 }
 0x1ef   : > { %v5109_v38 = vadd.f32 %v7814_v53, %v5070_v6  ;;  %v4970_v35 = vadd.f32 %v6531_v28, %v4482_v17  ;;  %v4480_v15 = vadd.f32 %v4401_v8, %v7749_v46  ;;  %v3394_v46 = vadd.f32 %v7759_v33, %v7656_v50  ;;  %v7981_v28 = vld [vmem:[#allocation9_spill] sm:$0xff]  ;;  %v7982_v17 = vld [vmem:[#allocation3_spill] sm:$0xff] }
 0x1f0   : > { %5885 = vst [vmem:[%s7837_s6 + $0x20] sm:$0xff] %v5825_v48   ;;  %v5068_v16 = vmul.f32 %v7805_v22, %v4965_v26  ;;  %v6484_v43 = vpop.f32.mrf.mxu1  ;;  %v6532_v44 = vpop.f32.mrf.mxu0  ;;  %v5138_v23 = vmax.f32 %v5106_v25, 0.0  ;;  %v3392_v50 = vadd.f32 %v7765_v45, %v7659_v2 }
 0x1f1   : > { %v5141_v10 = vmax.f32 %v5109_v38, 0.0  ;;  %v5073_v56 = vmul.f32 %v7805_v22, %v4970_v35  ;;  %v4968_v52 = vadd.f32 %v4889_v57, %v4480_v15  ;;  %v4483_v55 = vadd.f32 %v6484_v43, %v3877_v31 }
 0x1f2   : > { %v5107_v27 = vadd.f32 %v7814_v53, %v5068_v16  ;;  %v4404_v1 = vpop.f32.mrf.mxu1  ;;  %v4892_v5 = vpop.f32.mrf.mxu0  ;;  %v3881_v13 = vadd.f32 %v7979_v0, %v3394_v46  ;;  %v3879_v6 = vadd.f32 %v7981_v28, %v3392_v50  ;;  %v3398_v31 = vadd.f32 %v7773_v11, %v7982_v17  ;;  %v7990_v17 = vld [vmem:[#allocation13_spill] sm:$0xff] }
 0x1f3   : > { %v5840_v58 = vpack.c.bf16 %v5141_v10, %v5140_v40  ;;  %v4971_v36 = vadd.f32 %v6532_v44, %v4483_v55  ;;  %v5112_v7 = vadd.f32 %v7814_v53, %v5073_v56  ;;  %v5071_v24 = vmul.f32 %v7805_v22, %v4968_v52  ;;  %v7983_v56 = vld [vmem:[#allocation4_spill] sm:$0xff] }
 0x1f4   : > { %v5139_v32 = vmax.f32 %v5107_v27, 0.0  ;;  %v4481_v63 = vadd.f32 %v4404_v1, %v3875_v14  ;;  %v6487_v59 = vpop.f32.mrf.mxu1  ;;  %v6535_v30 = vpop.f32.mrf.mxu0  ;;  %v3885_v10 = vadd.f32 %v7775_v42, %v3398_v31  ;;  %v3396_v52 = vadd.f32 %v7779_v4, %v7983_v56 }
 0x1f5   : > { %5888 = vst [vmem:[%s7837_s6 + $0x38] sm:$0xff] %v5840_v58   ;;  %v5074_v29 = vmul.f32 %v7805_v22, %v4971_v36  ;;  %v4486_v54 = vadd.f32 %v6487_v59, %v7756_v47  ;;  %v5144_v61 = vmax.f32 %v5112_v7, 0.0  ;;  %v5110_v19 = vadd.f32 %v7814_v53, %v5071_v24  ;;  %v7984_v58 = vld [vmem:[#allocation10_spill] sm:$0xff] }
 0x1f6   : > { %v5835_v33 = vpack.c.bf16 %v5139_v32, %v5138_v23  ;;  %v4969_v51 = vadd.f32 %v4892_v5, %v4481_v63  ;;  %v4417_v37 = vpop.f32.mrf.mxu1  ;;  %v4905_v41 = vpop.f32.mrf.mxu0 }
 0x1f7   : > { %v5113_v49 = vadd.f32 %v7814_v53, %v5074_v29  ;;  %v4974_v21 = vadd.f32 %v6535_v30, %v4486_v54  ;;  %v4484_v34 = vadd.f32 %v4417_v37, %v7980_v39  ;;  %v5142_v38 = vmax.f32 %v5110_v19, 0.0  ;;  %v7985_v30 = vld [vmem:[#allocation11_spill] sm:$0xff] }
 0x1f8   : > { %5887 = vst [vmem:[%s7837_s6 + $0x30] sm:$0xff] %v5835_v33   ;;  %v5072_v47 = vmul.f32 %v7805_v22, %v4969_v51  ;;  %v6488_v3 = vpop.f32.mrf.mxu1  ;;  %v6536_v12 = vpop.f32.mrf.mxu0  ;;  %v3883_v29 = vadd.f32 %v7985_v30, %v3396_v52  ;;  %v7986_v51 = vld [vmem:[#allocation5_spill] sm:$0xff] }
 0x1f9   : > { %v5145_v2 = vmax.f32 %v5113_v49, 0.0  ;;  %v5077_v45 = vmul.f32 %v7805_v22, %v4974_v21  ;;  %v4972_v18 = vadd.f32 %v4905_v41, %v4484_v34  ;;  %v4487_v9 = vadd.f32 %v6488_v3, %v3881_v13  ;;  %v7987_v3 = vld [vmem:[#allocation12_spill] sm:$0xff] }
 0x1fa   : > { %v5111_v60 = vadd.f32 %v7814_v53, %v5072_v47  ;;  %v4420_v48 = vpop.f32.mrf.mxu1  ;;  %v4908_v26 = vpop.f32.mrf.mxu0  ;;  %v3402_v37 = vadd.f32 %v7787_v62, %v7986_v51 }
 0x1fb   : > { %v5850_v8 = vpack.c.bf16 %v5145_v2, %v5144_v61  ;;  %v5075_v57 = vmul.f32 %v7805_v22, %v4972_v18  ;;  %v4975_v25 = vadd.f32 %v6536_v12, %v4487_v9  ;;  %v5116_v15 = vadd.f32 %v7814_v53, %v5077_v45  ;;  %v7988_v2 = vld [vmem:[#allocation6_spill] sm:$0xff]  ;;  %v7989_v45 = vld [vmem:[#allocation15_spill] sm:$0xff] }
 0x1fc   : > { %v5143_v35 = vmax.f32 %v5111_v60, 0.0  ;;  %v4485_v40 = vadd.f32 %v4420_v48, %v3879_v6  ;;  %v6491_v16 = vpop.f32.mrf.mxu1  ;;  %v6539_v43 = vpop.f32.mrf.mxu0  ;;  %v3400_v62 = vadd.f32 %v7989_v45, %v7988_v2  ;;  %v3889_v31 = vadd.f32 %v7990_v17, %v3402_v37 }
 0x1fd   : > { %5890 = vst [vmem:[%s7837_s6 + $0x48] sm:$0xff] %v5850_v8   ;;  %v5078_v44 = vmul.f32 %v7805_v22, %v4975_v25  ;;  %v4490_v11 = vadd.f32 %v6491_v16, %v7770_v20  ;;  %v5114_v5 = vadd.f32 %v7814_v53, %v5075_v57  ;;  %v5148_v32 = vmax.f32 %v5116_v15, 0.0 }
 0x1fe   : > { %v5845_v55 = vpack.c.bf16 %v5143_v35, %v5142_v38  ;;  %v4973_v14 = vadd.f32 %v4908_v26, %v4485_v40  ;;  %v4433_v27 = vpop.f32.mrf.mxu1  ;;  %v4921_v1 = vpop.f32.mrf.mxu0  ;;  %v7991_v26 = vld [vmem:[#allocation14_spill] sm:$0xff] }
 0x1ff   : > { %v5117_v46 = vadd.f32 %v7814_v53, %v5078_v44  ;;  %v4978_v23 = vadd.f32 %v6539_v43, %v4490_v11  ;;  %v4488_v36 = vadd.f32 %v4433_v27, %v7984_v58  ;;  %v5146_v41 = vmax.f32 %v5114_v5, 0.0  ;;  %v7992_v11 = vld [vmem:[#allocation16_spill] sm:$0xff] }
 0x200   : > { %5889 = vst [vmem:[%s7837_s6 + $0x40] sm:$0xff] %v5845_v55   ;;  %v5076_v20 = vmul.f32 %v7805_v22, %v4973_v14  ;;  %v6492_v7 = vpop.f32.mrf.mxu1  ;;  %v6540_v42 = vpop.f32.mrf.mxu0 }
 0x201   : > { %v5149_v24 = vmax.f32 %v5117_v46, 0.0  ;;  %v5081_v4 = vmul.f32 %v7805_v22, %v4978_v23  ;;  %v4976_v63 = vadd.f32 %v4921_v1, %v4488_v36  ;;  %v4491_v59 = vadd.f32 %v6492_v7, %v3885_v10 }
 0x202   : > { %v5115_v54 = vadd.f32 %v7814_v53, %v5076_v20  ;;  %v4436_v50 = vpop.f32.mrf.mxu1  ;;  %v4924_v33 = vpop.f32.mrf.mxu0  ;;  %v3887_v10 = vadd.f32 %v7992_v11, %v3400_v62 }
 0x203   : > { %v5860_v0 = vpack.c.bf16 %v5149_v24, %v5148_v32  ;;  %v4979_v13 = vadd.f32 %v6540_v42, %v4491_v59  ;;  %v5120_v21 = vadd.f32 %v7814_v53, %v5081_v4  ;;  %v5079_v39 = vmul.f32 %v7805_v22, %v4976_v63 }
 0x204   : > { %v5147_v49 = vmax.f32 %v5115_v54, 0.0  ;;  %v4489_v34 = vadd.f32 %v4436_v50, %v3883_v29  ;;  %v6495_v61 = vpop.f32.mrf.mxu1  ;;  %v6543_v19 = vpop.f32.mrf.mxu0 }
 0x205   : > { %5892 = vst [vmem:[%s7837_s6 + $0x58] sm:$0xff] %v5860_v0   ;;  %v5082_v47 = vmul.f32 %v7805_v22, %v4979_v13  ;;  %v4494_v12 = vadd.f32 %v6495_v61, %v7987_v3  ;;  %v5152_v57 = vmax.f32 %v5120_v21, 0.0  ;;  %v5118_v25 = vadd.f32 %v7814_v53, %v5079_v39 }
 0x206   : > { %v5855_v18 = vpack.c.bf16 %v5147_v49, %v5146_v41  ;;  %v4977_v9 = vadd.f32 %v4924_v33, %v4489_v34  ;;  %v4449_v28 = vpop.f32.mrf.mxu1  ;;  %v4937_v6 = vpop.f32.mrf.mxu0 }
 0x207   : > { %v5121_v60 = vadd.f32 %v7814_v53, %v5082_v47  ;;  %v4982_v48 = vadd.f32 %v6543_v19, %v4494_v12  ;;  %v4492_v8 = vadd.f32 %v4449_v28, %v7991_v26  ;;  %v5150_v27 = vmax.f32 %v5118_v25, 0.0 }
 0x208   : > { %5891 = vst [vmem:[%s7837_s6 + $0x50] sm:$0xff] %v5855_v18   ;;  %v5080_v38 = vmul.f32 %v7805_v22, %v4977_v9  ;;  %v6496_v35 = vpop.f32.mrf.mxu1  ;;  %v6544_v44 = vpop.f32.mrf.mxu0 }
 0x209   : > { %v5153_v15 = vmax.f32 %v5121_v60, 0.0  ;;  %v5085_v40 = vmul.f32 %v7805_v22, %v4982_v48  ;;  %v4980_v16 = vadd.f32 %v4937_v6, %v4492_v8  ;;  %v4495_v43 = vadd.f32 %v6496_v35, %v3889_v31 }
 0x20a   : > { %v5119_v56 = vadd.f32 %v7814_v53, %v5080_v38  ;;  %v4452_v52 = vpop.f32.mrf.mxu1  ;;  %v4940_v36 = vpop.f32.mrf.mxu0 }
 0x20b   : > { %v5870_v55 = vpack.c.bf16 %v5153_v15, %v5152_v57  ;;  %v4983_v14 = vadd.f32 %v6544_v44, %v4495_v43  ;;  %v5083_v5 = vmul.f32 %v7805_v22, %v4980_v16  ;;  %v4493_v46 = vadd.f32 %v4452_v52, %v3887_v10 }
 0x20c   : > { %v5151_v1 = vmax.f32 %v5119_v56, 0.0  ;;  %v5124_v23 = vadd.f32 %v7814_v53, %v5085_v40 }
 0x20d   : > { %5894 = vst [vmem:[%s7837_s6 + $0x68] sm:$0xff] %v5870_v55   ;;  %v5086_v58 = vmul.f32 %v7805_v22, %v4983_v14  ;;  %v4981_v20 = vadd.f32 %v4940_v36, %v4493_v46  ;;  %v5122_v42 = vadd.f32 %v7814_v53, %v5083_v5 }
 0x20e   : > { %v5865_v32 = vpack.c.bf16 %v5151_v1, %v5150_v27  ;;  %v5156_v4 = vmax.f32 %v5124_v23, 0.0 }
 0x20f   : > { %v5125_v7 = vadd.f32 %v7814_v53, %v5086_v58  ;;  %v5084_v24 = vmul.f32 %v7805_v22, %v4981_v20  ;;  %v5154_v29 = vmax.f32 %v5122_v42, 0.0 }
 0x210   : > { %5893 = vst [vmem:[%s7837_s6 + $0x60] sm:$0xff] %v5865_v32  }
 0x211   : > { %v5157_v63 = vmax.f32 %v5125_v7, 0.0  ;;  %v5123_v59 = vadd.f32 %v7814_v53, %v5084_v24 }
 0x213   : > { %v5880_v30 = vpack.c.bf16 %v5157_v63, %v5156_v4  ;;  %v5155_v54 = vmax.f32 %v5123_v59, 0.0 }
 0x215   : > { %5896 = vst [vmem:[%s7837_s6 + $0x78] sm:$0xff] %v5880_v30   ;;  %v5875_v50 = vpack.c.bf16 %v5155_v54, %v5154_v29 }
 0x217   : > { %5895 = vst [vmem:[%s7837_s6 + $0x70] sm:$0xff] %v5875_v50  }
 0x218 PF: > { %s14_s15 = sadd.s32 1, %s6800_s15  }
 0x219   : > { %p11_p4 = scmp.ge.s32.totalorder %s14_s15, 6  }
 0x21b   :  { %13 = sbr.rel (!%p11_p4) target bundleno = 1 (0x1), region = 74 }

// kernel: _lambda_.7
= control target key start
LH: loop header
LB: loop body
LE: loop exit
PB: predicated region body
PF: predicated region fallthrough
CT: control target
= control target key end

     0   :  { %s7671_s15 = smov 0   ;;  %s8880_s0 = inlined_call_operand.vmem [shape: bf16[4,328,128], index: 0, kind: input, shape index: {}]   ;;  %s8881_s1 = inlined_call_operand.vmem [shape: bf16[9,128,128], index: 1, kind: input, shape index: {}]   ;;  %s8882_s2 = inlined_call_operand.vmem [shape: f32[1,128], index: 2, kind: input, shape index: {}]   ;;  %s8883_s3 = inlined_call_operand.vmem [shape: f32[1,128], index: 3, kind: input, shape index: {}]   ;;  %s8884_s4 = inlined_call_operand.vmem [shape: bf16[4,288,128], index: 4, kind: output, shape index: {}]  }
   0x1 LB: > { %s5964_s16 = sadd.s32 4294967295, %s7644_s15   ;;  %p5968_p0 = scmp.ge.s32.totalorder %s7644_s15, 1  ;;  %s7644_s15 = sphi %s7671_s15, %s14_s15  }
   0x2   : > { %p162_p1 = scmp.lt.s32.totalorder %s7644_s15, 5 }
   0x4   : > { %p163_p2 = pnand %p5968_p0, %p162_p1 }
   0x6   : > { %166 = sbr.rel (%p163_p2) target bundleno = 618 (0x26a), region = 36 }
   0xb   : > { %v7252_v0 = vld [vmem:[%s8881_s1 + $0x38] sm:$0xff]   ;;  %p188_p3 = scmp.lt.s32.totalorder %s5964_s16, 3  ;;  %v7253_v1 = vld [vmem:[%s8881_s1 + $0x30] sm:$0xff]   ;;  %v7254_v2 = vld [vmem:[%s8881_s1 + $0x28] sm:$0xff]   ;;  %vm1558_vm0 = vcmask 1046528   ;;  %vm3298_vm3 = vcmask 1045504  }
   0xc   : > { %7226 = vmatprep.subr.bf16.mxu1 %v7252_v0  ;;  %6758 = vmatprep.subr.bf16.mxu0 %v7252_v0  ;;  %v7255_v3 = vld [vmem:[%s8881_s1 + $0x20] sm:$0xff]   ;;  %v7256_v6 = vld [vmem:[%s8881_s1 + $0x18] sm:$0xff]   ;;  %v7257_v7 = vld [vmem:[%s8881_s1 + $0x10] sm:$0xff]   ;;  %vm911_vm1 = vsmask.f32 7424  ;;  %vm5038_vm4 = vcmask 1044480  }
   0xd   : > { %s8908_s16 = smov (!%p188_p3, %s5964_s16), 3  ;;  %7234 = vmatpush3.bf16.msra.mxu1 %v7252_v0  ;;  %6759 = vmatpush3.bf16.msra.mxu0 %v7252_v0  ;;  %v7258_v8 = vld [vmem:[%s8881_s1 + $0x8] sm:$0xff]   ;;  %v7259_v9 = vld [vmem:[%s8881_s1] sm:$0xff]   ;;  %v7262_v10 = vld [vmem:[%s8881_s1 + $0x78] sm:$0xff]   ;;  %vm2629_vm2 = vsmask.f32 6400 }
   0xe   : > { %7227 = vmatprep.subr.bf16.mxu1 %v7253_v1  ;;  %6760 = vmatprep.subr.bf16.mxu0 %v7253_v1  ;;  %s7242_s23 = smul.u32 164, %s8908_s16  ;;  %v7266_v12 = vld [vmem:[%s8881_s1 + $0xb8] sm:$0xff]   ;;  %v7265_v14 = vld [vmem:[%s8881_s1 + $0x70] sm:$0xff]   ;;  %v7270_v18 = vld [vmem:[%s8881_s1 + $0x68] sm:$0xff]   ;;  %vm4369_vm5 = vsmask.f32 5376 }
   0xf   : > { %v7269_v16 = vld [vmem:[%s8881_s1 + $0xb0] sm:$0xff]   ;;  %v7273_v20 = vld [vmem:[%s8881_s1 + $0xa8] sm:$0xff]   ;;  %v7275_v23 = vld [vmem:[%s8881_s1 + $0x60] sm:$0xff]   ;;  %s7243_s30 = smul.u32 144, %s8908_s16 }
  0x10   : > { %s7694_s26 = scalar_lea.vmem %s8880_s0, %s7242_s23  ;;  %v7277_v24 = vld [vmem:[%s8881_s1 + $0xa0] sm:$0xff]   ;;  %v7279_v26 = vld [vmem:[%s8881_s1 + $0x58] sm:$0xff]   ;;  %v7284_v31 = vld [vmem:[%s8881_s1 + $0x50] sm:$0xff]  }
  0x11   : > { %7235 = vmatpush3.bf16.msra.mxu1 %v7253_v1  ;;  %6761 = vmatpush3.bf16.msra.mxu0 %v7253_v1  ;;  %v7260_v4 = vld [vmem:[%s7694_s26 + $0x40] sm:$0xff]   ;;  %v7261_v11 = vld [vmem:[%s7694_s26 + $0x48] sm:$0xff]   ;;  %v7267_v15 = vld [vmem:[%s7694_s26 + $0x50] sm:$0xff]   ;;  %s8793_s6 = scalar_lea.vmem %s8884_s4, %s7243_s30 }
  0x12   : > { %7228 = vmatprep.subr.bf16.mxu1 %v7254_v2  ;;  %6762 = vmatprep.subr.bf16.mxu0 %v7254_v2  ;;  %v7263_v5 = vld [vmem:[%s7694_s26] sm:$0xff]   ;;  %v7264_v13 = vld [vmem:[%s7694_s26 + $0x8] sm:$0xff]   ;;  %v7271_v17 = vld [vmem:[%s7694_s26 + $0x10] sm:$0xff]  }
  0x13   : > { %6790 = vmatprep.mubr.bf16.mxu1 %v7260_v4  ;;  %6774 = vmatprep.mubr.bf16.mxu0 %v7263_v5  ;;  %v7268_v19 = vld [vmem:[%s7694_s26 + $0x58] sm:$0xff]   ;;  %v7274_v22 = vld [vmem:[%s7694_s26 + $0x60] sm:$0xff]   ;;  %v7276_v27 = vld [vmem:[%s7694_s26 + $0x68] sm:$0xff]  }
  0x14   : > { %v7272_v21 = vld [vmem:[%s7694_s26 + $0x18] sm:$0xff]   ;;  %v7278_v25 = vld [vmem:[%s7694_s26 + $0x20] sm:$0xff]   ;;  %v7280_v29 = vld [vmem:[%s7694_s26 + $0x28] sm:$0xff]  }
  0x15   : > { %7236 = vmatpush3.bf16.msra.mxu1 %v7254_v2  ;;  %6763 = vmatpush3.bf16.msra.mxu0 %v7254_v2  ;;  %v7281_v28 = vld [vmem:[%s8881_s1 + $0x98] sm:$0xff]   ;;  %v7282_v30 = vld [vmem:[%s7694_s26 + $0x70] sm:$0xff]   ;;  %v7297_v33 = vld [vmem:[%s7694_s26] sm:$0xff]  }
  0x16   : > { %7229 = vmatprep.subr.bf16.mxu1 %v7255_v3  ;;  %6764 = vmatprep.subr.bf16.mxu0 %v7255_v3  ;;  %v7285_v32 = vld [vmem:[%s8881_s1 + $0x90] sm:$0xff]   ;;  %v7294_v35 = vld [vmem:[%s7694_s26] sm:$0xfe]   ;;  %v7288_v36 = vld [vmem:[%s8881_s1 + $0x88] sm:$0xff]   ;;  %v915_v42 = vshll.u32 %v7297_v33, 16  ;;  %v913_v49 = vshrl.u32 %v7297_v33, 16 }
  0x17   : > { %v7286_v34 = vld [vmem:[%s7694_s26 + $0x30] sm:$0xff]   ;;  %v7295_v37 = vld [vmem:[%s7694_s26 + $0x8] sm:$0xff]   ;;  %v7283_v39 = vld [vmem:[%s7694_s26 + $0x78] sm:$0xff]   ;;  %v1559_v45 = vrot.slane %v7294_v35, 1 }
  0x18   : > { %v7289_v38 = vld [vmem:[%s8881_s1 + $0x48] sm:$0xff]   ;;  %v7287_v40 = vld [vmem:[%s7694_s26 + $0x38] sm:$0xff]   ;;  %v7290_v43 = vld [vmem:[%s7694_s26 + $0x80] sm:$0xff]   ;;  %v1560_v46 = vrot.slane %v7295_v37, 1  ;;  %v917_v50 = vrot.slane %v915_v42, 1 }
  0x19   : > { %7237 = vmatpush3.bf16.msra.mxu1 %v7255_v3  ;;  %6765 = vmatpush3.bf16.msra.mxu0 %v7255_v3  ;;  %v7298_v41 = vld [vmem:[%s7694_s26 + $0x8] sm:$0xff]   ;;  %v7292_v44 = vld [vmem:[%s8881_s1 + $0x80] sm:$0xff]   ;;  %v7296_v48 = vld [vmem:[%s7694_s26 + $0x10] sm:$0xff]  }
  0x1a   : > { %7230 = vmatprep.subr.bf16.mxu1 %v7256_v6  ;;  %6766 = vmatprep.subr.bf16.mxu0 %v7256_v6  ;;  %v7293_v47 = vld [vmem:[%s8881_s1 + $0x40] sm:$0xff]   ;;  %v920_v51 = vshll.u32 %v7298_v41, 16  ;;  %v7302_v52 = vld [vmem:[%s7694_s26 + $0x18] sm:$0xff]   ;;  %v1561_v53 = vsel %vm1558_vm0, %v1559_v45, %v1560_v46  ;;  %v7299_v54 = vld [vmem:[%s7694_s26 + $0x10] sm:$0xff]   ;;  %v1562_v55 = vrot.slane %v7296_v48, 1  ;;  %v918_v57 = vor.u32 %v917_v50, %v913_v49 }
  0x1b   : > { %v7300_v56 = vld [vmem:[%s8881_s1 + $0xf8] sm:$0xff]   ;;  %v1564_v60 = vrot.slane %v7302_v52, 1  ;;  %v7291_v62 = vld [vmem:[%s7694_s26 + $0x88] sm:$0xff]   ;;  %v928_v63 = vshll.u32 %v7299_v54, 16  ;;  %v924_v1 = vshrl.u32 %v7298_v41, 16  ;;  %v7303_v2 = vld [vmem:[%s7694_s26 + $0x20] sm:$0xff]  }
  0x1c   : > { %v922_v58 = vrot.slane %v920_v51, 1  ;;  %v7301_v59 = vld [vmem:[%s8881_s1 + $0x138] sm:$0xff]   ;;  %v1563_v0 = vsel %vm1558_vm0, %v1560_v46, %v1562_v55  ;;  %v932_v3 = vshrl.u32 %v7299_v54, 16  ;;  %v7305_v4 = vld [vmem:[%s7694_s26 + $0x20] sm:$0xff]   ;;  %v7312_v37 = vld [vmem:[%s8881_s1 + $0xe8] sm:$0xff]  }
  0x1d   : > { %7238 = vmatpush3.bf16.msra.mxu1 %v7256_v6  ;;  %6767 = vmatpush3.bf16.msra.mxu0 %v7256_v6  ;;  %v7304_v61 = vld [vmem:[%s7694_s26 + $0x18] sm:$0xff]   ;;  %v7315_v41 = vld [vmem:[%s7694_s26 + $0x40] sm:$0xff]   ;;  %v7319_v48 = vld [vmem:[%s7694_s26 + $0x48] sm:$0xff]  }
  0x1e   : > { %7231 = vmatprep.subr.bf16.mxu1 %v7257_v7  ;;  %6768 = vmatprep.subr.bf16.mxu0 %v7257_v7  ;;  %v923_v5 = vsel %vm911_vm1, %v918_v57, %v922_v58  ;;  %v936_v6 = vshll.u32 %v7304_v61, 16  ;;  %v7318_v45 = vld [vmem:[%s8881_s1 + $0xe0] sm:$0xff]   ;;  %v7327_v51 = vld [vmem:[%s8881_s1 + $0x118] sm:$0xff]   ;;  %v1574_v52 = vrot.slane %v7315_v41, 1 }
  0x21   : > { %7239 = vmatpush3.bf16.msra.mxu1 %v7257_v7  ;;  %6769 = vmatpush3.bf16.msra.mxu0 %v7257_v7  ;;  %v7307_v7 = vld [vmem:[%s8881_s1 + $0x130] sm:$0xff]  }
  0x22   : > { %7232 = vmatprep.subr.bf16.mxu1 %v7258_v8  ;;  %6770 = vmatprep.subr.bf16.mxu0 %v7258_v8 }
  0x25   : > { %7240 = vmatpush3.bf16.msra.mxu1 %v7258_v8  ;;  %6771 = vmatpush3.bf16.msra.mxu0 %v7258_v8  ;;  %v1565_v8 = vsel %vm1558_vm0, %v1562_v55, %v1564_v60 }
  0x26   : > { %7233 = vmatprep.subr.bf16.mxu1 %v7259_v9  ;;  %6772 = vmatprep.subr.bf16.mxu0 %v7259_v9 }
  0x29   : > { %7241 = vmatpush3.bf16.msra.mxu1 %v7259_v9  ;;  %6773 = vmatpush3.bf16.msra.mxu0 %v7259_v9  ;;  %v7308_v9 = vld [vmem:[%s7694_s26 + $0x28] sm:$0xff]  }
  0x2a   : > { %6810 = vmatprep.subr.bf16.mxu1 %v7262_v10  ;;  %6862 = vmatprep.subr.bf16.mxu0 %v7266_v12 }
  0x2c   : > { %6791 = vmatmul.mubr.bf16.vlgmr.msra.gmra.mxu1 %v7261_v11  ;;  %6775 = vmatmul.mubr.bf16.vlgmr.msra.gmra.mxu0 %v7264_v13  ;;  %v926_v11 = vor.u32 %v924_v1, %v922_v58  ;;  %v7310_v13 = vld [vmem:[%s7694_s26 + $0x28] sm:$0xff]   ;;  %v1576_v58 = vrot.slane %v7319_v48, 1  ;;  %v7320_v1 = vld [vmem:[%s7694_s26 + $0x50] sm:$0xff]  }
  0x2d   : > { %6811 = vmatpush3.bf16.msra.mxu1 %v7262_v10  ;;  %6863 = vmatpush3.bf16.msra.mxu0 %v7266_v12  ;;  %v930_v10 = vrot.slane %v928_v63, 1  ;;  %v1566_v12 = vrot.slane %v7303_v2, 1  ;;  %v7335_v48 = vld [vmem:[%s7694_s26 + $0x70] sm:$0xff]  }
  0x2e   : > { %6812 = vmatprep.subr.bf16.mxu1 %v7265_v14  ;;  %6794 = vmatprep.mubr.bf16.mxu1 %v7267_v15  ;;  %v938_v15 = vrot.slane %v936_v6, 1  ;;  %v1577_v6 = vsel %vm1558_vm0, %v1574_v52, %v1576_v58 }
  0x2f   : > { %6864 = vmatprep.subr.bf16.mxu0 %v7269_v16  ;;  %6778 = vmatprep.mubr.bf16.mxu0 %v7271_v17  ;;  %v944_v17 = vshll.u32 %v7305_v4, 16 }
  0x31   : > { %6813 = vmatpush3.bf16.msra.mxu1 %v7265_v14  ;;  %6865 = vmatpush3.bf16.msra.mxu0 %v7269_v16  ;;  %v934_v14 = vor.u32 %v932_v3, %v930_v10  ;;  %v7314_v16 = vld [vmem:[%s8881_s1 + $0x128] sm:$0xff]  }
  0x32   : > { %6814 = vmatprep.subr.bf16.mxu1 %v7270_v18  ;;  %6866 = vmatprep.subr.bf16.mxu0 %v7273_v20 }
  0x34   : > { %6795 = vmatmul.mubr.bf16.gmra.mxu1 %v7268_v19  ;;  %6779 = vmatmul.mubr.bf16.gmra.mxu0 %v7272_v21  ;;  %v940_v19 = vshrl.u32 %v7304_v61, 16  ;;  %v931_v21 = vsel %vm911_vm1, %v926_v11, %v930_v10  ;;  %v1578_v11 = vrot.slane %v7320_v1, 1 }
  0x35   : > { %6815 = vmatpush3.bf16.msra.mxu1 %v7270_v18  ;;  %6867 = vmatpush3.bf16.msra.mxu0 %v7273_v20  ;;  %v1568_v18 = vrot.slane %v7308_v9, 1  ;;  %v7306_v20 = vld [vmem:[%s8881_s1 + $0xf0] sm:$0xff]  }
  0x36   : > { %6798 = vmatprep.mubr.bf16.mxu1 %v7274_v22  ;;  %6816 = vmatprep.subr.bf16.mxu1 %v7275_v23  ;;  %v1567_v22 = vsel %vm1558_vm0, %v1564_v60, %v1566_v12  ;;  %v7323_v9 = vld [vmem:[%s7694_s26 + $0x50] sm:$0xff]  }
  0x37   : > { %6868 = vmatprep.subr.bf16.mxu0 %v7277_v24  ;;  %6782 = vmatprep.mubr.bf16.mxu0 %v7278_v25  ;;  %v939_v25 = vsel %vm911_vm1, %v934_v14, %v938_v15 }
  0x39   : > { %6817 = vmatpush3.bf16.msra.mxu1 %v7275_v23  ;;  %6869 = vmatpush3.bf16.msra.mxu0 %v7277_v24  ;;  %v7309_v23 = vld [vmem:[%s7694_s26 + $0x30] sm:$0xff]   ;;  %v948_v24 = vshrl.u32 %v7305_v4, 16  ;;  %v7324_v4 = vld [vmem:[%s7694_s26 + $0x58] sm:$0xff]  }
  0x3a   : > { %6818 = vmatprep.subr.bf16.mxu1 %v7279_v26  ;;  %6870 = vmatprep.subr.bf16.mxu0 %v7281_v28  ;;  %v1570_v33 = vrot.slane %v7309_v23, 1  ;;  %v1580_v14 = vrot.slane %v7324_v4, 1 }
  0x3c   : > { %6799 = vmatmul.mubr.bf16.gmra.mxu1 %v7276_v27  ;;  %6783 = vmatmul.mubr.bf16.gmra.mxu0 %v7280_v29  ;;  %v7311_v27 = vld [vmem:[%s7694_s26 + $0x30] sm:$0xff]   ;;  %v1569_v29 = vsel %vm1558_vm0, %v1566_v12, %v1568_v18 }
  0x3d   : > { %6819 = vmatpush3.bf16.msra.mxu1 %v7279_v26  ;;  %6871 = vmatpush3.bf16.msra.mxu0 %v7281_v28  ;;  %v952_v26 = vshll.u32 %v7310_v13, 16  ;;  %v946_v28 = vrot.slane %v944_v17, 1  ;;  %v7341_v17 = vld [vmem:[%s8881_s1 + $0x108] sm:$0xff]  }
  0x3e   : > { %6802 = vmatprep.mubr.bf16.mxu1 %v7282_v30  ;;  %6820 = vmatprep.subr.bf16.mxu1 %v7284_v31  ;;  %v7313_v30 = vld [vmem:[%s7694_s26 + $0x38] sm:$0xff]  }
  0x3f   : > { %6872 = vmatprep.subr.bf16.mxu0 %v7285_v32  ;;  %6786 = vmatprep.mubr.bf16.mxu0 %v7286_v34  ;;  %v7316_v34 = vld [vmem:[%s7694_s26 + $0x38] sm:$0xff]   ;;  %v950_v35 = vor.u32 %v948_v24, %v946_v28  ;;  %v1581_v24 = vsel %vm1558_vm0, %v1578_v11, %v1580_v14 }
  0x40   : > { %v972_v60 = vshrl.u32 %v7316_v34, 16 }
  0x41   : > { %6821 = vmatpush3.bf16.msra.mxu1 %v7284_v31  ;;  %6873 = vmatpush3.bf16.msra.mxu0 %v7285_v32  ;;  %v7321_v31 = vld [vmem:[%s8881_s1 + $0x120] sm:$0xff]   ;;  %v942_v32 = vor.u32 %v940_v19, %v938_v15  ;;  %v7328_v15 = vld [vmem:[%s7694_s26 + $0x58] sm:$0xff]  }
  0x42   : > { %6874 = vmatprep.subr.bf16.mxu0 %v7288_v36  ;;  %6822 = vmatprep.subr.bf16.mxu1 %v7289_v38 }
  0x43   : > { %v947_v42 = vsel %vm911_vm1, %v942_v32, %v946_v28  ;;  %v7345_v28 = vld [vmem:[%s8881_s1 + $0xc0] sm:$0xff]  }
  0x44   : > { %6803 = vmatmul.mubr.bf16.gmra.mxu1 %v7283_v39  ;;  %6787 = vmatmul.mubr.bf16.gmra.mxu0 %v7287_v40  ;;  %v1572_v39 = vrot.slane %v7313_v30, 1  ;;  %v956_v40 = vshrl.u32 %v7310_v13, 16  ;;  %v7329_v30 = vld [vmem:[%s7694_s26 + $0x60] sm:$0xff]  }
  0x45   : > { %6875 = vmatpush3.bf16.msra.mxu0 %v7288_v36  ;;  %6806 = vmatprep.mubr.bf16.mxu1 %v7290_v43  ;;  %v954_v36 = vrot.slane %v952_v26, 1  ;;  %v1571_v43 = vsel %vm1558_vm0, %v1568_v18, %v1570_v33  ;;  %v992_v18 = vshll.u32 %v7323_v9, 16  ;;  %v1000_v26 = vshll.u32 %v7328_v15, 16 }
  0x46   : > { %6823 = vmatpush3.bf16.msra.mxu1 %v7289_v38  ;;  %6876 = vmatprep.subr.bf16.mxu0 %v7292_v44  ;;  %v960_v38 = vshll.u32 %v7311_v27, 16  ;;  %v1573_v50 = vsel %vm1558_vm0, %v1570_v33, %v1572_v39 }
  0x47   : > { %6824 = vmatprep.subr.bf16.mxu1 %v7293_v47  ;;  %6878 = vmatprep.mubr.bf16.mxu0 %v1561_v53  ;;  %v955_v46 = vsel %vm911_vm1, %v950_v35, %v954_v36  ;;  %v7317_v53 = vld [vmem:[%s7694_s26 + $0x40] sm:$0xff]   ;;  %v958_v54 = vor.u32 %v956_v40, %v954_v36  ;;  %v1002_v36 = vrot.slane %v1000_v26, 1 }
  0x48   : > { %v962_v49 = vrot.slane %v960_v38, 1  ;;  %v976_v61 = vshll.u32 %v7317_v53, 16  ;;  %v980_v2 = vshrl.u32 %v7317_v53, 16  ;;  %v1008_v38 = vshll.u32 %v7329_v30, 16 }
  0x49   : > { %6877 = vmatpush3.bf16.msra.mxu0 %v7292_v44  ;;  %v968_v44 = vshll.u32 %v7316_v34, 16  ;;  %v7333_v34 = vld [vmem:[%s7694_s26 + $0x68] sm:$0xff]  }
  0x4a   : > { %6825 = vmatpush3.bf16.msra.mxu1 %v7293_v47  ;;  %6966 = vmatprep.subr.bf16.mxu0 %v7301_v59  ;;  %v964_v47 = vshrl.u32 %v7311_v27, 16  ;;  %v963_v63 = vsel %vm911_vm1, %v958_v54, %v962_v49  ;;  %v7330_v27 = vld [vmem:[%s7694_s26 + $0x68] sm:$0xff]   ;;  %v7339_v54 = vld [vmem:[%s7694_s26 + $0x78] sm:$0xff]  }
  0x4b   : > { %6914 = vmatprep.subr.bf16.mxu1 %v7300_v56  ;;  %v970_v55 = vrot.slane %v968_v44, 1  ;;  %v1032_v1 = vshll.u32 %v7339_v54, 16 }
  0x4c   : > { %6807 = vmatmul.mubr.bf16.gmra.mxu1 %v7291_v62  ;;  %6879 = vmatmul.mubr.bf16.vlgmr.msra.gmra.mxu0 %v1563_v0  ;;  %v966_v57 = vor.u32 %v964_v47, %v962_v49  ;;  %v7334_v62 = vld [vmem:[%s8881_s1 + $0x110] sm:$0xff]   ;;  %v1575_v0 = vsel %vm1558_vm0, %v1572_v39, %v1574_v52  ;;  %v7336_v47 = vld [vmem:[%s7694_s26 + $0x78] sm:$0xff]   ;;  %v1010_v49 = vrot.slane %v1008_v38, 1 }
  0x4d   : > { %6826 = vmatprep.mubr.bf16.mxu1 %v923_v5  ;;  %6967 = vmatpush3.bf16.msra.mxu0 %v7301_v59  ;;  %v7325_v59 = vld [vmem:[%s8881_s1 + $0xd8] sm:$0xff]   ;;  %v974_v10 = vor.u32 %v972_v60, %v970_v55  ;;  %v7331_v39 = vld [vmem:[%s7694_s26 + $0x70] sm:$0xff]  }
  0x4e   : > { %6882 = vmatprep.mubr.bf16.mxu0 %v1565_v8  ;;  %6968 = vmatprep.subr.bf16.mxu0 %v7307_v7  ;;  %v971_v5 = vsel %vm911_vm1, %v966_v57, %v970_v55  ;;  %v978_v8 = vrot.slane %v976_v61, 1  ;;  %v7337_v57 = vld [vmem:[%s7694_s26 + $0x80] sm:$0xff]   ;;  %v7888_v60 = vld [vmem:[%s8881_s1 + $0x178] sm:$0xff]   ;;  %v1028_v61 = vshrl.u32 %v7335_v48, 16 }
  0x50   : > { %v982_v13 = vor.u32 %v980_v2, %v978_v8  ;;  %v979_v19 = vsel %vm911_vm1, %v974_v10, %v978_v8  ;;  %v7349_v2 = vld [vmem:[%s7694_s26 + $0x10] sm:$0xff]   ;;  %v7905_v10 = vld [vmem:[%s7694_s26 + $0x88] sm:$0xff]  }
  0x51   : > { %6969 = vmatpush3.bf16.msra.mxu0 %v7307_v7  ;;  %v7332_v7 = vld [vmem:[%s8881_s1 + $0xd0] sm:$0xff]  }
  0x52   : > { %6970 = vmatprep.subr.bf16.mxu0 %v7314_v16 }
  0x54   : > { %6827 = vmatmul.mubr.bf16.vlgmr.msra.gmra.mxu1 %v931_v21  ;;  %6883 = vmatmul.mubr.bf16.gmra.mxu0 %v1567_v22  ;;  %v7326_v22 = vld [vmem:[%s7694_s26 + $0x60] sm:$0xff]  }
  0x55   : > { %6915 = vmatpush3.bf16.msra.mxu1 %v7300_v56  ;;  %6830 = vmatprep.mubr.bf16.mxu1 %v939_v25  ;;  %v7322_v56 = vld [vmem:[%s7694_s26 + $0x48] sm:$0xff]   ;;  %v996_v25 = vshrl.u32 %v7323_v9, 16  ;;  %v1582_v33 = vrot.slane %v7326_v22, 1  ;;  %v1590_v9 = vrot.slane %v7337_v57, 1  ;;  %v1048_v22 = vshll.u32 %v7905_v10, 16 }
  0x56   : > { %6916 = vmatprep.subr.bf16.mxu1 %v7306_v20  ;;  %6886 = vmatprep.mubr.bf16.mxu0 %v1569_v29  ;;  %v984_v3 = vshll.u32 %v7322_v56, 16  ;;  %v988_v21 = vshrl.u32 %v7322_v56, 16  ;;  %v994_v29 = vrot.slane %v992_v18, 1  ;;  %v1588_v56 = vrot.slane %v7336_v47, 1  ;;  %v7357_v47 = vld [vmem:[%s7694_s26 + $0x28] sm:$0xff]  }
  0x57   : > { %6971 = vmatpush3.bf16.msra.mxu0 %v7314_v16  ;;  %v7338_v16 = vld [vmem:[%s8881_s1 + $0xc8] sm:$0xff]   ;;  %v1583_v41 = vsel %vm1558_vm0, %v1580_v14, %v1582_v33  ;;  %v2639_v18 = vshrl.u32 %v7349_v2, 16 }
  0x58   : > { %6972 = vmatprep.subr.bf16.mxu0 %v7321_v31  ;;  %v986_v12 = vrot.slane %v984_v3, 1  ;;  %v998_v35 = vor.u32 %v996_v25, %v994_v29 }
  0x59   : > { %6917 = vmatpush3.bf16.msra.mxu1 %v7306_v20  ;;  %v1579_v20 = vsel %vm1558_vm0, %v1576_v58, %v1578_v11  ;;  %v1024_v58 = vshll.u32 %v7335_v48, 16  ;;  %v7352_v48 = vld [vmem:[%s7694_s26 + $0x10] sm:$0xff]  }
  0x5a   : > { %6918 = vmatprep.subr.bf16.mxu1 %v7312_v37  ;;  %v987_v23 = vsel %vm911_vm1, %v982_v13, %v986_v12  ;;  %v990_v32 = vor.u32 %v988_v21, %v986_v12  ;;  %v1003_v44 = vsel %vm911_vm1, %v998_v35, %v1002_v36  ;;  %v1034_v12 = vrot.slane %v1032_v1, 1 }
  0x5b   : > { %6973 = vmatpush3.bf16.msra.mxu0 %v7321_v31  ;;  %v7347_v31 = vld [vmem:[%s8881_s1 + $0x100] sm:$0xff]   ;;  %v1036_v13 = vshrl.u32 %v7339_v54, 16 }
  0x5c   : > { %6831 = vmatmul.mubr.bf16.gmra.mxu1 %v947_v42  ;;  %6887 = vmatmul.mubr.bf16.gmra.mxu0 %v1571_v43  ;;  %v995_v40 = vsel %vm911_vm1, %v990_v32, %v994_v29  ;;  %v1004_v42 = vshrl.u32 %v7328_v15, 16  ;;  %v1016_v43 = vshll.u32 %v7333_v34, 16  ;;  %v7343_v15 = vld [vmem:[%s7694_s26 + $0x90] ss:$0 sps:$4 sm:$0x11]  }
  0x5d   : > { %6834 = vmatprep.mubr.bf16.mxu1 %v955_v46  ;;  %6919 = vmatpush3.bf16.msra.mxu1 %v7312_v37  ;;  %v1584_v37 = vrot.slane %v7330_v27, 1  ;;  %v1012_v46 = vshrl.u32 %v7329_v30, 16  ;;  %v7346_v27 = vld [vmem:[%s7694_s26 + $0x90] ss:$0 sps:$4 sm:$0x11]   ;;  %v1594_v35 = vrot.slane %v7343_v15, 1  ;;  %v1038_v38 = vor.u32 %v1036_v13, %v1034_v12 }
  0x5e   : > { %6890 = vmatprep.mubr.bf16.mxu0 %v1573_v50  ;;  %6920 = vmatprep.subr.bf16.mxu1 %v7318_v45  ;;  %v1586_v50 = vrot.slane %v7331_v39, 1  ;;  %v1006_v52 = vor.u32 %v1004_v42, %v1002_v36  ;;  %v1018_v53 = vrot.slane %v1016_v43, 1  ;;  %v1050_v36 = vrot.slane %v1048_v22, 1  ;;  %v7363_v13 = vld [vmem:[%s7694_s26 + $0x38] sm:$0xff]   ;;  %v7361_v15 = vld [vmem:[%s8881_s1 + $0x1b0] sm:$0xff]  }
  0x5f   : > { %6974 = vmatprep.subr.bf16.mxu0 %v7327_v51  ;;  %v1014_v55 = vor.u32 %v1012_v46, %v1010_v49  ;;  %v2684_v22 = vshrl.u32 %v7363_v13, 16 }
  0x60   : > { %6975 = vmatpush3.bf16.msra.mxu0 %v7327_v51  ;;  %v1020_v51 = vshrl.u32 %v7333_v34, 16  ;;  %v1589_v4 = vsel %vm1558_vm0, %v1586_v50, %v1588_v56 }
  0x61   : > { %6921 = vmatpush3.bf16.msra.mxu1 %v7318_v45  ;;  %6976 = vmatprep.subr.bf16.mxu0 %v7334_v62  ;;  %v1585_v45 = vsel %vm1558_vm0, %v1582_v33, %v1584_v37  ;;  %v1019_v3 = vsel %vm911_vm1, %v1014_v55, %v1018_v53  ;;  %v7356_v33 = vld [vmem:[%s7694_s26 + $0x20] sm:$0xff]  }
  0x62   : > { %6922 = vmatprep.subr.bf16.mxu1 %v7325_v59  ;;  %v1022_v8 = vor.u32 %v1020_v51, %v1018_v53  ;;  %v2660_v46 = vshll.u32 %v7356_v33, 16  ;;  %v7351_v53 = vld [vmem:[%s7694_s26 + $0x8] sm:$0xfe]  }
  0x64   : > { %6835 = vmatmul.mubr.bf16.gmra.mxu1 %v963_v63  ;;  %6891 = vmatmul.mubr.bf16.gmra.mxu0 %v1575_v0  ;;  %v1011_v63 = vsel %vm911_vm1, %v1006_v52, %v1010_v49  ;;  %v1587_v0 = vsel %vm1558_vm0, %v1584_v37, %v1586_v50  ;;  %v1052_v37 = vshrl.u32 %v7905_v10, 16 }
  0x65   : > { %6838 = vmatprep.mubr.bf16.mxu1 %v971_v5  ;;  %6894 = vmatprep.mubr.bf16.mxu0 %v1577_v6  ;;  %v7348_v5 = vld [vmem:[%s7694_s26 + $0x8] sm:$0xfe]   ;;  %v1026_v6 = vrot.slane %v1024_v58, 1  ;;  %v2662_v58 = vrot.slane %v2660_v46, 2  ;;  %v7365_v46 = vld [vmem:[%s7694_s26 + $0x38] sm:$0xff]  }
  0x66   : > { %6923 = vmatpush3.bf16.msra.mxu1 %v7325_v59  ;;  %6977 = vmatpush3.bf16.msra.mxu0 %v7334_v62  ;;  %v7883_v59 = vld [vmem:[%s7694_s26 + $0x88] sm:$0xff]   ;;  %v7893_v62 = vld [vmem:[%s8881_s1 + $0x1b8] sm:$0xff]  }
  0x67   : > { %6924 = vmatprep.subr.bf16.mxu1 %v7332_v7  ;;  %6978 = vmatprep.subr.bf16.mxu0 %v7341_v17  ;;  %v1030_v11 = vor.u32 %v1028_v61, %v1026_v6  ;;  %v1592_v14 = vrot.slane %v7883_v59, 1  ;;  %v2666_v61 = vshrl.u32 %v7357_v47, 16 }
  0x69   : > { %v1593_v25 = vsel %vm1558_vm0, %v1590_v9, %v1592_v14  ;;  %v1595_v50 = vsel %vm1558_vm0, %v1592_v14, %v1594_v35  ;;  %v7373_v35 = vld [vmem:[%s7694_s26 + $0x50] sm:$0xff]  }
  0x6a   : > { %6925 = vmatpush3.bf16.msra.mxu1 %v7332_v7  ;;  %6979 = vmatpush3.bf16.msra.mxu0 %v7341_v17  ;;  %v7340_v7 = vld [vmem:[%s7694_s26 + $0x80] sm:$0xff]   ;;  %v2634_v17 = vshll.u32 %v7348_v5, 16 }
  0x6b   : > { %6926 = vmatprep.subr.bf16.mxu1 %v7338_v16  ;;  %6980 = vmatprep.subr.bf16.mxu0 %v7347_v31  ;;  %v1040_v21 = vshll.u32 %v7340_v7, 16  ;;  %v1044_v26 = vshrl.u32 %v7340_v7, 16  ;;  %v7353_v7 = vld [vmem:[%s7694_s26 + $0x18] sm:$0xff]  }
  0x6c   : > { %6839 = vmatmul.mubr.bf16.gmra.mxu1 %v979_v19  ;;  %6895 = vmatmul.mubr.bf16.gmra.mxu0 %v1579_v20  ;;  %v2642_v19 = vshll.u32 %v7349_v2, 16  ;;  %v1027_v20 = vsel %vm911_vm1, %v1022_v8, %v1026_v6  ;;  %v2636_v30 = vrot.slane %v2634_v17, 2  ;;  %v2094_v2 = vrot.slane %v7351_v53, 1 }
  0x6d   : > { %6842 = vmatprep.mubr.bf16.mxu1 %v987_v23  ;;  %6898 = vmatprep.mubr.bf16.mxu0 %v1581_v24  ;;  %v1591_v23 = vsel %vm1558_vm0, %v1588_v56, %v1590_v9  ;;  %v1035_v24 = vsel %vm911_vm1, %v1030_v11, %v1034_v12  ;;  %v1042_v34 = vrot.slane %v1040_v21, 1  ;;  %v7362_v56 = vld [vmem:[%s7694_s26 + $0x30] sm:$0xff]   ;;  %v2668_v8 = vrot.slane %v2666_v61, 1  ;;  %v7928_v9 = vld [vmem:[%s7694_s26 + $0x20] sm:$0xff]  }
  0x6e   : > { %6927 = vmatpush3.bf16.msra.mxu1 %v7338_v16  ;;  %6981 = vmatpush3.bf16.msra.mxu0 %v7347_v31  ;;  %v2631_v16 = vshrl.u32 %v7348_v5, 16  ;;  %v2641_v31 = vrot.slane %v2639_v18, 1  ;;  %v2644_v32 = vrot.slane %v2642_v19, 2  ;;  %v2678_v5 = vshll.u32 %v7362_v56, 16  ;;  %v7367_v18 = vld [vmem:[%s7694_s26 + $0x40] sm:$0xff]  }
  0x6f   : > { %6928 = vmatprep.subr.bf16.mxu1 %v7345_v28  ;;  %7070 = vmatprep.subr.bf16.mxu0 %v7893_v62  ;;  %v1043_v49 = vsel %vm911_vm1, %v1038_v38, %v1042_v34  ;;  %v7955_v38 = vld [vmem:[%s7694_s26 + $0x30] sm:$0xff]   ;;  %v7378_v61 = vld [vmem:[%s7694_s26 + $0x60] sm:$0xff]  }
  0x70   : > { %v2633_v29 = vrot.slane %v2631_v16, 1  ;;  %v2645_v43 = vor.u32 %v2644_v32, %v2641_v31  ;;  %v2680_v17 = vrot.slane %v2678_v5, 2  ;;  %v7360_v32 = vld [vmem:[%s8881_s1 + $0x170] sm:$0xff]  }
  0x72   : > { %6929 = vmatpush3.bf16.msra.mxu1 %v7345_v28  ;;  %v7350_v28 = vld [vmem:[%s7694_s26 + $0x18] sm:$0xff]   ;;  %v2637_v42 = vor.u32 %v2636_v30, %v2633_v29  ;;  %v7369_v29 = vld [vmem:[%s7694_s26 + $0x48] sm:$0xff]  }
  0x73   : > { %7018 = vmatprep.subr.bf16.mxu1 %v7888_v60  ;;  %v2648_v39 = vshrl.u32 %v7350_v28, 16  ;;  %v7359_v30 = vld [vmem:[%s7694_s26 + $0x28] sm:$0xff]  }
  0x74   : > { %6843 = vmatmul.mubr.bf16.gmra.mxu1 %v995_v40  ;;  %6899 = vmatmul.mubr.bf16.gmra.mxu0 %v1583_v41  ;;  %v2651_v40 = vshll.u32 %v7350_v28, 16  ;;  %v1046_v41 = vor.u32 %v1044_v26, %v1042_v34  ;;  %v2646_v55 = vsel %vm2629_vm2, %v2637_v42, %v2645_v43  ;;  %v2693_v26 = vshrl.u32 %v7367_v18, 16 }
  0x75   : > { %6846 = vmatprep.mubr.bf16.mxu1 %v1003_v44  ;;  %6902 = vmatprep.mubr.bf16.mxu0 %v1585_v45  ;;  %v1056_v44 = vshll.u32 %v7346_v27, 16  ;;  %v2657_v45 = vshrl.u32 %v7356_v33, 16  ;;  %v2650_v51 = vrot.slane %v2648_v39, 1  ;;  %v7368_v27 = vld [vmem:[%s8881_s1 + $0x1a8] sm:$0xff]   ;;  %v2696_v28 = vshll.u32 %v7367_v18, 16 }
  0x76   : > { %v2653_v52 = vrot.slane %v2651_v40, 2  ;;  %v1051_v54 = vsel %vm911_vm1, %v1046_v41, %v1050_v36  ;;  %v2686_v33 = vrot.slane %v2684_v22, 1  ;;  %v2695_v39 = vrot.slane %v2693_v26, 1  ;;  %v7386_v26 = vld [vmem:[%s8881_s1 + $0x150] sm:$0xff]  }
  0x77   : > { %v2659_v57 = vrot.slane %v2657_v45, 1  ;;  %v1058_v59 = vrot.slane %v1056_v44, 1  ;;  %v2698_v40 = vrot.slane %v2696_v28, 2  ;;  %v2702_v41 = vshrl.u32 %v7369_v29, 16  ;;  %v7375_v44 = vld [vmem:[%s8881_s1 + $0x1a0] sm:$0xff]  }
  0x78   : > { %v2654_v1 = vor.u32 %v2653_v52, %v2650_v51  ;;  %v2705_v42 = vshll.u32 %v7369_v29, 16  ;;  %v7967_v51 = vld [vmem:[%s7694_s26 + $0x40] sm:$0xff]  }
  0x79   : > { %v2663_v6 = vor.u32 %v2662_v58, %v2659_v57  ;;  %v2699_v52 = vor.u32 %v2698_v40, %v2695_v39  ;;  %v2704_v53 = vrot.slane %v2702_v41, 1  ;;  %v7385_v39 = vld [vmem:[%s7694_s26 + $0x78] sm:$0xff]  }
  0x7a   : > { %v2655_v11 = vsel %vm2629_vm2, %v2645_v43, %v2654_v1  ;;  %v2101_v43 = vrot.slane %v7359_v30, 1 }
  0x7b   : > { %v2664_v19 = vsel %vm2629_vm2, %v2654_v1, %v2663_v6 }
  0x7c   : > { %6847 = vmatmul.mubr.bf16.gmra.mxu1 %v1011_v63  ;;  %6903 = vmatmul.mubr.bf16.gmra.mxu0 %v1587_v0  ;;  %v2669_v63 = vshll.u32 %v7357_v47, 16  ;;  %v1054_v0 = vor.u32 %v1052_v37, %v1050_v36  ;;  %v7366_v47 = vld [vmem:[%s8881_s1 + $0x168] sm:$0xff]  }
  0x7d   : > { %6850 = vmatprep.mubr.bf16.mxu1 %v1019_v3  ;;  %6906 = vmatprep.mubr.bf16.mxu0 %v1589_v4  ;;  %v2095_v3 = vrot.slane %v7352_v48, 1  ;;  %v2675_v4 = vshrl.u32 %v7362_v56, 16  ;;  %v2711_v48 = vshrl.u32 %v7373_v35, 16 }
  0x7e   : > { %v1059_v10 = vsel %vm911_vm1, %v1054_v0, %v1058_v59  ;;  %v2671_v12 = vrot.slane %v2669_v63, 2  ;;  %v7374_v59 = vld [vmem:[%s7694_s26 + $0x58] sm:$0xff]   ;;  %v2105_v0 = vrot.slane %v7365_v46, 1 }
  0x7f   : > { %v2096_v14 = vsel %vm1558_vm0, %v2094_v2, %v2095_v3  ;;  %v2677_v16 = vrot.slane %v2675_v4, 1  ;;  %v2713_v57 = vrot.slane %v2711_v48, 1  ;;  %v7381_v2 = vld [vmem:[%s8881_s1 + $0x198] sm:$0xff]   ;;  %v7371_v4 = vld [vmem:[%s7694_s26 + $0x48] sm:$0xff]  }
  0x80   : > { %v2672_v21 = vor.u32 %v2671_v12, %v2668_v8  ;;  %v7379_v8 = vld [vmem:[%s8881_s1 + $0x158] sm:$0xff]   ;;  %v2732_v12 = vshll.u32 %v7378_v61, 16 }
  0x82   : > { %v2673_v31 = vsel %vm2629_vm2, %v2663_v6, %v2672_v21  ;;  %v2720_v6 = vshrl.u32 %v7374_v59, 16 }
  0x84   : > { %6851 = vmatmul.mubr.bf16.gmra.mxu1 %v1027_v20  ;;  %6907 = vmatmul.mubr.bf16.gmra.mxu0 %v1591_v23  ;;  %v2097_v20 = vrot.slane %v7353_v7, 1  ;;  %v2687_v23 = vshll.u32 %v7363_v13, 16  ;;  %v2723_v7 = vshll.u32 %v7374_v59, 16  ;;  %v2109_v13 = vrot.slane %v7371_v4, 1 }
  0x85   : > { %6854 = vmatprep.mubr.bf16.mxu1 %v1035_v24  ;;  %6910 = vmatprep.mubr.bf16.mxu0 %v1593_v25  ;;  %v2099_v24 = vrot.slane %v7928_v9, 1  ;;  %v2681_v25 = vor.u32 %v2680_v17, %v2677_v16  ;;  %v7388_v9 = vld [vmem:[%s8881_s1 + $0x190] sm:$0xff]  }
  0x86   : > { %v2689_v34 = vrot.slane %v2687_v23, 2  ;;  %v7384_v16 = vld [vmem:[%s7694_s26 + $0x70] sm:$0xff]  }
  0x87   : > { %v2100_v36 = vsel %vm1558_vm0, %v2097_v20, %v2099_v24  ;;  %v2682_v37 = vsel %vm2629_vm2, %v2672_v21, %v2681_v25  ;;  %v7997_v21 = vld [vmem:[%s7694_s26 + $0x58] sm:$0xff]  }
  0x88   : > { %v2690_v45 = vor.u32 %v2689_v34, %v2686_v33  ;;  %v2750_v34 = vshll.u32 %v7384_v16, 16 }
  0x8a   : > { %v2691_v56 = vsel %vm2629_vm2, %v2681_v25, %v2690_v45  ;;  %v2700_v1 = vsel %vm2629_vm2, %v2690_v45, %v2699_v52  ;;  %v2734_v25 = vrot.slane %v2732_v12, 2 }
  0x8c   : > { %6855 = vmatmul.mubr.bf16.gmra.mxu1 %v1043_v49  ;;  %6911 = vmatmul.mubr.bf16.gmra.mxu0 %v1595_v50  ;;  %v2714_v49 = vshll.u32 %v7373_v35, 16  ;;  %v2103_v50 = vrot.slane %v7955_v38, 1  ;;  %v7392_v35 = vld [vmem:[%s8881_s1 + $0x148] sm:$0xff]  }
  0x8d   : > { %6858 = vmatprep.mubr.bf16.mxu1 %v1051_v54  ;;  %6982 = vmatprep.mubr.bf16.mxu0 %v2646_v55  ;;  %v7372_v54 = vld [vmem:[%s8881_s1 + $0x160] sm:$0xff]   ;;  %v2102_v55 = vsel %vm1558_vm0, %v2099_v24, %v2101_v43 }
  0x8e   : > { %v2716_v58 = vrot.slane %v2714_v49, 2  ;;  %v2104_v63 = vsel %vm1558_vm0, %v2101_v43, %v2103_v50  ;;  %v2106_v17 = vsel %vm1558_vm0, %v2103_v50, %v2105_v0  ;;  %v7390_v43 = vld [vmem:[%s7694_s26 + $0x80] sm:$0xff]   ;;  %v2756_v50 = vshrl.u32 %v7385_v39, 16 }
  0x8f   : > { %v7399_v49 = vld [vmem:[%s8881_s1 + $0x140] sm:$0xff]  }
  0x90   : > { %v2758_v59 = vrot.slane %v2756_v50, 1  ;;  %v7406_v50 = vld [vmem:[%s7694_s26 + $0x10] sm:$0xff]  }
  0x94   : > { %6859 = vmatmul.mubr.bf16.gmra.mxu1 %v1059_v10  ;;  %6983 = vmatmul.mubr.bf16.vlgmr.msra.gmra.mxu0 %v2655_v11  ;;  %v2717_v10 = vor.u32 %v2716_v58, %v2713_v57  ;;  %v2729_v11 = vshrl.u32 %v7378_v61, 16  ;;  %v2768_v57 = vshll.u32 %v7390_v43, 16  ;;  %v8038_v58 = vld [vmem:[%s8881_s1 + $0x1f8] sm:$0xff]  }
  0x95   : > { %6930 = vmatprep.mubr.bf16.mxu1 %v2096_v14  ;;  %7071 = vmatpush3.bf16.msra.mxu0 %v7893_v62  ;;  %v2098_v62 = vsel %vm1558_vm0, %v2095_v3, %v2097_v20  ;;  %v2107_v3 = vrot.slane %v7967_v51, 1  ;;  %v7990_v14 = vld [vmem:[%s7694_s26 + $0x50] sm:$0xff]   ;;  %v2725_v20 = vrot.slane %v2723_v7, 2  ;;  %v2759_v51 = vshll.u32 %v7385_v39, 16 }
  0x96   : > { %6986 = vmatprep.mubr.bf16.mxu0 %v2664_v19  ;;  %7072 = vmatprep.subr.bf16.mxu0 %v7361_v15  ;;  %v2722_v19 = vrot.slane %v2720_v6, 1  ;;  %v2731_v24 = vrot.slane %v2729_v11, 1  ;;  %v2111_v28 = vrot.slane %v7990_v14, 1  ;;  %v7396_v6 = vld [vmem:[%s7694_s26 + $0x90] sm:$0xff]  }
  0x97   : > { %v2108_v22 = vsel %vm1558_vm0, %v2105_v0, %v2107_v3  ;;  %v2110_v40 = vsel %vm1558_vm0, %v2107_v3, %v2109_v13  ;;  %v2761_v61 = vrot.slane %v2759_v51, 2  ;;  %v2786_v14 = vshll.u32 %v7396_v6, 16 }
  0x98   : > { %v2735_v33 = vor.u32 %v2734_v25, %v2731_v24 }
  0x99   : > { %7073 = vmatpush3.bf16.msra.mxu0 %v7361_v15  ;;  %v7380_v15 = vld [vmem:[%s7694_s26 + $0x68] sm:$0xff]   ;;  %v2788_v25 = vrot.slane %v2786_v14, 2  ;;  %v7414_v14 = vld [vmem:[%s8881_s1 + $0x1f0] sm:$0xff]  }
  0x9a   : > { %7074 = vmatprep.subr.bf16.mxu0 %v7368_v27  ;;  %v2738_v29 = vshrl.u32 %v7380_v15, 16  ;;  %v2741_v30 = vshll.u32 %v7380_v15, 16  ;;  %v7397_v15 = vld [vmem:[%s7694_s26 + $0x98] ss:$0 sps:$4 sm:$0x33]  }
  0x9c   : > { %6931 = vmatmul.mubr.bf16.vlgmr.msra.gmra.mxu1 %v2098_v62  ;;  %6987 = vmatmul.mubr.bf16.gmra.mxu0 %v2673_v31  ;;  %v2747_v62 = vshrl.u32 %v7384_v16, 16  ;;  %v2726_v31 = vor.u32 %v2725_v20, %v2722_v19  ;;  %v2740_v38 = vrot.slane %v2738_v29, 1  ;;  %v7389_v16 = vld [vmem:[%s7694_s26 + $0x78] sm:$0xff]   ;;  %v2795_v29 = vshll.u32 %v7397_v15, 16 }
  0x9d   : > { %7019 = vmatpush3.bf16.msra.mxu1 %v7888_v60  ;;  %6934 = vmatprep.mubr.bf16.mxu1 %v2100_v36  ;;  %v2707_v60 = vrot.slane %v2705_v42, 2  ;;  %v2113_v36 = vrot.slane %v7997_v21, 1  ;;  %v2743_v42 = vrot.slane %v2741_v30, 2 }
  0x9e   : > { %7020 = vmatprep.subr.bf16.mxu1 %v7360_v32  ;;  %6990 = vmatprep.mubr.bf16.mxu0 %v2682_v37  ;;  %v7401_v37 = vld [vmem:[%s8881_s1 + $0x180] sm:$0xff]   ;;  %v2727_v41 = vsel %vm2629_vm2, %v2717_v10, %v2726_v31  ;;  %v2736_v45 = vsel %vm2629_vm2, %v2726_v31, %v2735_v33  ;;  %v2749_v46 = vrot.slane %v2747_v62, 1  ;;  %v7394_v31 = vld [vmem:[%s7694_s26 + $0x88] sm:$0xff]  }
  0x9f   : > { %7075 = vmatpush3.bf16.msra.mxu0 %v7368_v27  ;;  %v2708_v5 = vor.u32 %v2707_v60, %v2704_v53  ;;  %v7395_v27 = vld [vmem:[%s8881_s1 + $0x188] sm:$0xff]   ;;  %v2765_v53 = vshrl.u32 %v7390_v43, 16  ;;  %v8031_v60 = vld [vmem:[%s8881_s1 + $0x238] sm:$0xff]  }
  0xa0   : > { %7076 = vmatprep.subr.bf16.mxu0 %v7375_v44 }
  0xa1   : > { %7021 = vmatpush3.bf16.msra.mxu1 %v7360_v32  ;;  %v2709_v18 = vsel %vm2629_vm2, %v2699_v52, %v2708_v5  ;;  %v2718_v23 = vsel %vm2629_vm2, %v2708_v5, %v2717_v10  ;;  %v8009_v32 = vld [vmem:[%s7694_s26 + $0x60] sm:$0xff]   ;;  %v2744_v52 = vor.u32 %v2743_v42, %v2740_v38  ;;  %v2770_v5 = vrot.slane %v2768_v57, 2 }
  0xa2   : > { %7022 = vmatprep.subr.bf16.mxu1 %v7366_v47  ;;  %v2115_v48 = vrot.slane %v8009_v32, 1 }
  0xa3   : > { %7077 = vmatpush3.bf16.msra.mxu0 %v7375_v44  ;;  %v2112_v44 = vsel %vm1558_vm0, %v2109_v13, %v2111_v28  ;;  %v2745_v0 = vsel %vm2629_vm2, %v2735_v33, %v2744_v52  ;;  %v2783_v13 = vshrl.u32 %v7396_v6, 16  ;;  %v7398_v33 = vld [vmem:[%s7694_s26 + $0x90] sm:$0xff]  }
  0xa4   : > { %6935 = vmatmul.mubr.bf16.gmra.mxu1 %v2102_v55  ;;  %6991 = vmatmul.mubr.bf16.gmra.mxu0 %v2691_v56  ;;  %v7387_v56 = vld [vmem:[%s7694_s26 + $0x70] sm:$0xff]   ;;  %v2116_v3 = vsel %vm1558_vm0, %v2113_v36, %v2115_v48  ;;  %v2127_v43 = vrot.slane %v7398_v33, 1 }
  0xa5   : > { %6938 = vmatprep.mubr.bf16.mxu1 %v2104_v63  ;;  %7023 = vmatpush3.bf16.msra.mxu1 %v7366_v47  ;;  %v2752_v47 = vrot.slane %v2750_v34, 2  ;;  %v2114_v63 = vsel %vm1558_vm0, %v2111_v28, %v2113_v36  ;;  %v2785_v24 = vrot.slane %v2783_v13, 1  ;;  %v2797_v36 = vrot.slane %v2795_v29, 2 }
  0xa6   : > { %6994 = vmatprep.mubr.bf16.mxu0 %v2700_v1  ;;  %7024 = vmatprep.subr.bf16.mxu1 %v7372_v54  ;;  %v2767_v1 = vrot.slane %v2765_v53, 1  ;;  %v7405_v53 = vld [vmem:[%s7694_s26 + $0x8] sm:$0xfc]  }
  0xa7   : > { %7078 = vmatprep.subr.bf16.mxu0 %v7381_v2  ;;  %v2753_v55 = vor.u32 %v2752_v47, %v2749_v46  ;;  %v2789_v62 = vor.u32 %v2788_v25, %v2785_v24  ;;  %v7400_v46 = vld [vmem:[%s7694_s26 + $0x98] ss:$0 sps:$4 sm:$0x11]   ;;  %v7404_v47 = vld [vmem:[%s7694_s26 + $0x20] sm:$0xff]   ;;  %v3299_v57 = vrot.slane %v7405_v53, 2  ;;  %v7420_v25 = vld [vmem:[%s8881_s1 + $0x1e8] sm:$0xff]  }
  0xa8   : > { %7079 = vmatpush3.bf16.msra.mxu0 %v7381_v2  ;;  %v7391_v2 = vld [vmem:[%s7694_s26 + $0x88] sm:$0xff]   ;;  %v2771_v12 = vor.u32 %v2770_v5, %v2767_v1  ;;  %v7415_v5 = vld [vmem:[%s8881_s1 + $0x230] sm:$0xff]  }
  0xa9   : > { %7025 = vmatpush3.bf16.msra.mxu1 %v7372_v54  ;;  %7080 = vmatprep.subr.bf16.mxu0 %v7388_v9  ;;  %v7383_v54 = vld [vmem:[%s7694_s26 + $0x68] sm:$0xff]   ;;  %v2754_v4 = vsel %vm2629_vm2, %v2744_v52, %v2753_v55  ;;  %v2774_v10 = vshrl.u32 %v7391_v2, 16  ;;  %v2777_v11 = vshll.u32 %v7391_v2, 16 }
  0xaa   : > { %7026 = vmatprep.subr.bf16.mxu1 %v7379_v8  ;;  %v2117_v7 = vrot.slane %v7383_v54, 1  ;;  %v7410_v54 = vld [vmem:[%s7694_s26 + $0x28] sm:$0xff]  }
  0xab   : > { %v2776_v20 = vrot.slane %v2774_v10, 1  ;;  %v2779_v21 = vrot.slane %v2777_v11, 2  ;;  %v7422_v11 = vld [vmem:[%s8881_s1 + $0x228] sm:$0xff]  }
  0xac   : > { %6939 = vmatmul.mubr.bf16.gmra.mxu1 %v2106_v17  ;;  %6995 = vmatmul.mubr.bf16.gmra.mxu0 %v2709_v18  ;;  %v7393_v17 = vld [vmem:[%s7694_s26 + $0x80] sm:$0xff]   ;;  %v2118_v18 = vsel %vm1558_vm0, %v2115_v48, %v2117_v7 }
  0xad   : > { %6942 = vmatprep.mubr.bf16.mxu1 %v2108_v22  ;;  %6998 = vmatprep.mubr.bf16.mxu0 %v2718_v23  ;;  %v2780_v28 = vor.u32 %v2779_v21, %v2776_v20  ;;  %v2123_v30 = vrot.slane %v7393_v17, 1  ;;  %v7429_v21 = vld [vmem:[%s8881_s1 + $0x220] sm:$0xff]  }
  0xae   : > { %7027 = vmatpush3.bf16.msra.mxu1 %v7379_v8  ;;  %7081 = vmatpush3.bf16.msra.mxu0 %v7388_v9  ;;  %v2119_v8 = vrot.slane %v7387_v56, 1  ;;  %v2762_v9 = vor.u32 %v2761_v61, %v2758_v59  ;;  %v3837_v56 = vrot.slane %v7404_v47, 2  ;;  %v3300_v59 = vrot.slane %v7406_v50, 2  ;;  %v7407_v61 = vld [vmem:[%s7694_s26 + $0x18] sm:$0xff]   ;;  %v7425_v47 = vld [vmem:[%s7694_s26 + $0x48] sm:$0xff]   ;;  %v7428_v50 = vld [vmem:[%s7694_s26 + $0x60] sm:$0xff]  }
  0xaf   : > { %7028 = vmatprep.subr.bf16.mxu1 %v7386_v26  ;;  %7082 = vmatprep.subr.bf16.mxu0 %v7395_v27  ;;  %v2790_v39 = vsel %vm2629_vm2, %v2780_v28, %v2789_v62 }
  0xb0   : > { %v2763_v19 = vsel %vm2629_vm2, %v2753_v55, %v2762_v9  ;;  %v2120_v22 = vsel %vm1558_vm0, %v2117_v7, %v2119_v8  ;;  %v2772_v23 = vsel %vm2629_vm2, %v2762_v9, %v2771_v12  ;;  %v2129_v55 = vrot.slane %v7400_v46, 1  ;;  %v7416_v7 = vld [vmem:[%s7694_s26 + $0x38] sm:$0xff]  }
  0xb1   : > { %v3843_v13 = vrot.slane %v7416_v7, 2  ;;  %v7446_v7 = vld [vmem:[%s8881_s1 + $0x1c8] sm:$0xff]  }
  0xb2   : > { %7029 = vmatpush3.bf16.msra.mxu1 %v7386_v26  ;;  %7083 = vmatpush3.bf16.msra.mxu0 %v7395_v27  ;;  %v2792_v26 = vshrl.u32 %v7397_v15, 16  ;;  %v2121_v27 = vrot.slane %v7389_v16, 1  ;;  %v2130_v1 = vsel %vm1558_vm0, %v2127_v43, %v2129_v55  ;;  %v7430_v55 = vld [vmem:[%s7694_s26 + $0x50] sm:$0xff]  }
  0xb3   : > { %7030 = vmatprep.subr.bf16.mxu1 %v7392_v35  ;;  %7084 = vmatprep.subr.bf16.mxu0 %v7401_v37 }
  0xb4   : > { %6943 = vmatmul.mubr.bf16.gmra.mxu1 %v2110_v40  ;;  %6999 = vmatmul.mubr.bf16.gmra.mxu0 %v2727_v41  ;;  %v2794_v32 = vrot.slane %v2792_v26, 1  ;;  %v2122_v34 = vsel %vm1558_vm0, %v2119_v8, %v2121_v27  ;;  %v2124_v38 = vsel %vm1558_vm0, %v2121_v27, %v2123_v30  ;;  %v7402_v40 = vld [vmem:[%s7694_s26 + $0x10] sm:$0xfc]   ;;  %v2125_v41 = vrot.slane %v7394_v31, 1  ;;  %v7419_v27 = vld [vmem:[%s7694_s26 + $0x38] sm:$0xff]   ;;  %v7426_v31 = vld [vmem:[%s8881_s1 + $0x1e0] sm:$0xff]  }
  0xb5   : > { %6946 = vmatprep.mubr.bf16.mxu1 %v2112_v44  ;;  %7002 = vmatprep.mubr.bf16.mxu0 %v2736_v45  ;;  %v3834_v44 = vrot.slane %v7402_v40, 2  ;;  %v3302_v8 = vrot.slane %v7407_v61, 2  ;;  %v7442_v40 = vld [vmem:[%s8881_s1 + $0x210] sm:$0xff]  }
  0xb6   : > { %7031 = vmatpush3.bf16.msra.mxu1 %v7392_v35  ;;  %7085 = vmatpush3.bf16.msra.mxu0 %v7401_v37  ;;  %v2781_v35 = vsel %vm2629_vm2, %v2771_v12, %v2780_v28  ;;  %v7403_v37 = vld [vmem:[%s7694_s26 + $0x18] sm:$0xff]   ;;  %v2798_v42 = vor.u32 %v2797_v36, %v2794_v32  ;;  %v2126_v48 = vsel %vm1558_vm0, %v2123_v30, %v2125_v41  ;;  %v7413_v12 = vld [vmem:[%s7694_s26 + $0x28] sm:$0xff]   ;;  %v7423_v28 = vld [vmem:[%s7694_s26 + $0x50] sm:$0xff]  }
  0xb7   : > { %7032 = vmatprep.subr.bf16.mxu1 %v7399_v49  ;;  %7174 = vmatprep.subr.bf16.mxu0 %v8031_v60  ;;  %v3835_v45 = vrot.slane %v7403_v37, 2  ;;  %v2128_v51 = vsel %vm1558_vm0, %v2125_v41, %v2127_v43  ;;  %v3303_v15 = vsel %vm3298_vm3, %v3300_v59, %v3302_v8  ;;  %v8110_v30 = vld [vmem:[%s7694_s26 + $0x40] sm:$0xff]   ;;  %v8117_v32 = vld [vmem:[%s7694_s26 + $0x58] sm:$0xff]   ;;  %v3310_v37 = vrot.slane %v7419_v27, 2 }
  0xb8   : > { %v3851_v43 = vrot.slane %v8117_v32, 2 }
  0xb9   : > { %v3836_v52 = vsel %vm3298_vm3, %v3834_v44, %v3835_v45  ;;  %v3838_v2 = vsel %vm3298_vm3, %v3835_v45, %v3837_v56  ;;  %v7433_v44 = vld [vmem:[%s8881_s1 + $0x1d8] sm:$0xff]  }
  0xba   : > { %7033 = vmatpush3.bf16.msra.mxu1 %v7399_v49  ;;  %v2799_v49 = vsel %vm2629_vm2, %v2789_v62, %v2798_v42 }
  0xbb   : > { %7122 = vmatprep.subr.bf16.mxu1 %v8038_v58 }
  0xbc   : > { %6947 = vmatmul.mubr.bf16.gmra.mxu1 %v2114_v63  ;;  %7003 = vmatmul.mubr.bf16.gmra.mxu0 %v2745_v0  ;;  %v3839_v63 = vrot.slane %v7410_v54, 2  ;;  %v7411_v0 = vld [vmem:[%s7694_s26 + $0x30] sm:$0xff]  }
  0xbd   : > { %6950 = vmatprep.mubr.bf16.mxu1 %v2116_v3  ;;  %7006 = vmatprep.mubr.bf16.mxu0 %v2754_v4  ;;  %v7412_v3 = vld [vmem:[%s7694_s26 + $0x20] sm:$0xff]   ;;  %v3301_v4 = vsel %vm3298_vm3, %v3299_v57, %v3300_v59  ;;  %v3841_v9 = vrot.slane %v7411_v0, 2  ;;  %v7440_v57 = vld [vmem:[%s8881_s1 + $0x1d0] sm:$0xff]   ;;  %v7449_v59 = vld [vmem:[%s8881_s1 + $0x208] sm:$0xff]   ;;  %v3314_v0 = vrot.slane %v7425_v47, 2 }
  0xbe   : > { %v3840_v6 = vsel %vm3298_vm3, %v3837_v56, %v3839_v63  ;;  %v3304_v10 = vrot.slane %v7412_v3, 2  ;;  %v7432_v56 = vld [vmem:[%s7694_s26 + $0x68] sm:$0xff]  }
  0xbf   : > { %v3842_v16 = vsel %vm3298_vm3, %v3839_v63, %v3841_v9  ;;  %v3844_v20 = vsel %vm3298_vm3, %v3841_v9, %v3843_v13 }
  0xc0   : > { %v3305_v17 = vsel %vm3298_vm3, %v3302_v8, %v3304_v10  ;;  %v7455_v8 = vld [vmem:[%s8881_s1 + $0x200] sm:$0xff]  }
  0xc4   : > { %6951 = vmatmul.mubr.bf16.gmra.mxu1 %v2118_v18  ;;  %7007 = vmatmul.mubr.bf16.gmra.mxu0 %v2763_v19  ;;  %v7418_v18 = vld [vmem:[%s7694_s26 + $0x30] sm:$0xff]   ;;  %v7421_v19 = vld [vmem:[%s7694_s26 + $0x48] sm:$0xff]  }
  0xc5   : > { %6954 = vmatprep.mubr.bf16.mxu1 %v2120_v22  ;;  %7010 = vmatprep.mubr.bf16.mxu0 %v2772_v23  ;;  %v3306_v22 = vrot.slane %v7413_v12, 2  ;;  %v3308_v24 = vrot.slane %v7418_v18, 2  ;;  %v3847_v26 = vrot.slane %v7421_v19, 2  ;;  %v7436_v12 = vld [vmem:[%s7694_s26 + $0x60] sm:$0xff]  }
  0xc6   : > { %v7453_v19 = vld [vmem:[%s8881_s1 + $0x1c0] sm:$0xff]  }
  0xc7   : > { %v3307_v29 = vsel %vm3298_vm3, %v3304_v10, %v3306_v22  ;;  %v3309_v62 = vsel %vm3298_vm3, %v3306_v22, %v3308_v24 }
  0xcc   : > { %6955 = vmatmul.mubr.bf16.gmra.mxu1 %v2122_v34  ;;  %7011 = vmatmul.mubr.bf16.gmra.mxu0 %v2781_v35  ;;  %v7435_v34 = vld [vmem:[%s8881_s1 + $0x218] sm:$0xff]  }
  0xcd   : > { %6958 = vmatprep.mubr.bf16.mxu1 %v2124_v38  ;;  %7014 = vmatprep.mubr.bf16.mxu0 %v2790_v39  ;;  %v3849_v38 = vrot.slane %v7423_v28, 2  ;;  %v3312_v39 = vrot.slane %v8110_v30, 2 }
  0xcf   : > { %v3313_v53 = vsel %vm3298_vm3, %v3310_v37, %v3312_v39  ;;  %v3852_v54 = vsel %vm3298_vm3, %v3849_v38, %v3851_v43 }
  0xd4   : > { %6959 = vmatmul.mubr.bf16.gmra.mxu1 %v2126_v48  ;;  %7015 = vmatmul.mubr.bf16.gmra.mxu0 %v2799_v49  ;;  %v3311_v48 = vsel %vm3298_vm3, %v3308_v24, %v3310_v37  ;;  %v3850_v49 = vsel %vm3298_vm3, %v3847_v26, %v3849_v38  ;;  %v3320_v24 = vrot.slane %v7436_v12, 2  ;;  %v7441_v38 = vld [vmem:[%s7694_s26 + $0x70] sm:$0xff]  }
  0xd5   : > { %6962 = vmatprep.mubr.bf16.mxu1 %v2128_v51  ;;  %7086 = vmatprep.mubr.bf16.mxu0 %v3836_v52 }
  0xdc   : > { %6963 = vmatmul.mubr.bf16.gmra.mxu1 %v2130_v1  ;;  %7087 = vmatmul.mubr.bf16.vlgmr.msra.gmra.mxu0 %v3838_v2  ;;  %v3853_v1 = vrot.slane %v7428_v50, 2  ;;  %v3324_v50 = vrot.slane %v7441_v38, 2 }
  0xdd   : > { %7034 = vmatprep.mubr.bf16.mxu1 %v3301_v4  ;;  %7175 = vmatpush3.bf16.msra.mxu0 %v8031_v60  ;;  %v7417_v60 = vld [vmem:[%s7694_s26 + $0x40] sm:$0xff]   ;;  %v3316_v4 = vrot.slane %v7430_v55, 2  ;;  %v7445_v55 = vld [vmem:[%s7694_s26 + $0x90] sm:$0xff]  }
  0xde   : > { %7090 = vmatprep.mubr.bf16.mxu0 %v3840_v6  ;;  %7176 = vmatprep.subr.bf16.mxu0 %v7415_v5  ;;  %v3845_v23 = vrot.slane %v7417_v60, 2  ;;  %v7431_v6 = vld [vmem:[%s7694_s26 + $0x58] sm:$0xff]  }
  0xdf   : > { %v3318_v22 = vrot.slane %v7431_v6, 2 }
  0xe0   : > { %v3848_v33 = vsel %vm3298_vm3, %v3845_v23, %v3847_v26 }
  0xe1   : > { %7177 = vmatpush3.bf16.msra.mxu0 %v7415_v5  ;;  %v3855_v5 = vrot.slane %v7432_v56, 2  ;;  %v3319_v30 = vsel %vm3298_vm3, %v3316_v4, %v3318_v22 }
  0xe2   : > { %7178 = vmatprep.subr.bf16.mxu0 %v7422_v11 }
  0xe3   : > { %v3856_v18 = vsel %vm3298_vm3, %v3853_v1, %v3855_v5 }
  0xe4   : > { %7035 = vmatmul.mubr.bf16.vlgmr.msra.gmra.mxu1 %v3303_v15  ;;  %7091 = vmatmul.mubr.bf16.gmra.mxu0 %v3842_v16  ;;  %v7438_v15 = vld [vmem:[%s7694_s26 + $0x78] sm:$0xff]  }
  0xe5   : > { %7123 = vmatpush3.bf16.msra.mxu1 %v8038_v58  ;;  %7038 = vmatprep.mubr.bf16.mxu1 %v3305_v17  ;;  %v3846_v58 = vsel %vm3298_vm3, %v3843_v13, %v3845_v23  ;;  %v3315_v13 = vsel %vm3298_vm3, %v3312_v39, %v3314_v0  ;;  %v3317_v17 = vsel %vm3298_vm3, %v3314_v0, %v3316_v4  ;;  %v7444_v39 = vld [vmem:[%s7694_s26 + $0x88] sm:$0xff]  }
  0xe6   : > { %7124 = vmatprep.subr.bf16.mxu1 %v7414_v14  ;;  %7094 = vmatprep.mubr.bf16.mxu0 %v3844_v20 }
  0xe7   : > { %7179 = vmatpush3.bf16.msra.mxu0 %v7422_v11  ;;  %v7434_v11 = vld [vmem:[%s7694_s26 + $0x70] sm:$0xff]  }
  0xe8   : > { %7180 = vmatprep.subr.bf16.mxu0 %v7429_v21  ;;  %v3857_v23 = vrot.slane %v7434_v11, 2 }
  0xe9   : > { %7125 = vmatpush3.bf16.msra.mxu1 %v7414_v14  ;;  %v3854_v14 = vsel %vm3298_vm3, %v3851_v43, %v3853_v1 }
  0xea   : > { %7126 = vmatprep.subr.bf16.mxu1 %v7420_v25 }
  0xeb   : > { %7181 = vmatpush3.bf16.msra.mxu0 %v7429_v21 }
  0xec   : > { %v8123_v35 = vpop.f32.mrf.mxu1  ;;  %7039 = vmatmul.mubr.bf16.gmra.mxu1 %v3307_v29  ;;  %v8125_v36 = vpop.f32.mrf.mxu0  ;;  %7095 = vmatmul.mubr.bf16.gmra.mxu0 %v3846_v58  ;;  %v7437_v58 = vld [vmem:[%s7694_s26 + $0x68] sm:$0xff]  }
  0xed   : > { %7042 = vmatprep.mubr.bf16.mxu1 %v3309_v62  ;;  %7127 = vmatpush3.bf16.msra.mxu1 %v7420_v25  ;;  %v3859_v25 = vrot.slane %v7438_v15, 2  ;;  %v3858_v62 = vsel %vm3298_vm3, %v3855_v5, %v3857_v23 }
  0xee   : > { %v8131_v41 = vpop.f32.mrf.mxu1  ;;  %v8133_v42 = vpop.f32.mrf.mxu0  ;;  %7098 = vmatprep.mubr.bf16.mxu0 %v3848_v33  ;;  %7128 = vmatprep.subr.bf16.mxu1 %v7426_v31 }
  0xef   : > { %7182 = vmatprep.subr.bf16.mxu0 %v7435_v34  ;;  %v3860_v37 = vsel %vm3298_vm3, %v3857_v23, %v3859_v25 }
  0xf0   : > { %v8139_v45 = vpop.f32.mrf.mxu1  ;;  %v8141_v46 = vpop.f32.mrf.mxu0  ;;  %7183 = vmatpush3.bf16.msra.mxu0 %v7435_v34  ;;  %v3321_v34 = vsel %vm3298_vm3, %v3318_v22, %v3320_v24  ;;  %v7451_v22 = vld [vmem:[%s7694_s26 + $0xa0] ss:$0 sps:$4 sm:$0x33]  }
  0xf1   : > { %7129 = vmatpush3.bf16.msra.mxu1 %v7426_v31  ;;  %7184 = vmatprep.subr.bf16.mxu0 %v7442_v40  ;;  %v7439_v31 = vld [vmem:[%s7694_s26 + $0x80] sm:$0xff]  }
  0xf2   : > { %v8147_v51 = vpop.f32.mrf.mxu1  ;;  %v8149_v52 = vpop.f32.mrf.mxu0  ;;  %7130 = vmatprep.subr.bf16.mxu1 %v7433_v44  ;;  %v3861_v47 = vrot.slane %v7439_v31, 2  ;;  %v7456_v31 = vld [vmem:[%s7694_s26 + $0x10] sm:$0xf8]  }
  0xf4   : > { %v8161_v61 = vpop.f32.mrf.mxu1  ;;  %7043 = vmatmul.mubr.bf16.gmra.mxu1 %v3311_v48  ;;  %v8163_v63 = vpop.f32.mrf.mxu0  ;;  %7099 = vmatmul.mubr.bf16.gmra.mxu0 %v3850_v49  ;;  %v3862_v0 = vsel %vm3298_vm3, %v3859_v25, %v3861_v47  ;;  %v7448_v25 = vld [vmem:[%s7694_s26 + $0x88] sm:$0xff]  }
  0xf5   : > { %7046 = vmatprep.mubr.bf16.mxu1 %v3313_v53  ;;  %7102 = vmatprep.mubr.bf16.mxu0 %v3852_v54  ;;  %v3863_v53 = vrot.slane %v7444_v39, 2  ;;  %v7443_v54 = vld [vmem:[%s7694_s26 + $0x78] sm:$0xff]  }
  0xf6   : > { %v8165_v2 = vpop.f32.mrf.mxu1  ;;  %v8167_v3 = vpop.f32.mrf.mxu0  ;;  %7131 = vmatpush3.bf16.msra.mxu1 %v7433_v44  ;;  %7185 = vmatpush3.bf16.msra.mxu0 %v7442_v40  ;;  %v3322_v44 = vrot.slane %v7437_v58, 2 }
  0xf7   : > { %7132 = vmatprep.subr.bf16.mxu1 %v7440_v57  ;;  %7186 = vmatprep.subr.bf16.mxu0 %v7449_v59  ;;  %v3864_v6 = vsel %vm3298_vm3, %v3861_v47, %v3863_v53  ;;  %v7459_v47 = vld [vmem:[%s7694_s26 + $0x10] sm:$0xfc]  }
  0xf8   : > { %v8176_v9 = vpop.f32.mrf.mxu1  ;;  %v8178_v10 = vpop.f32.mrf.mxu0  ;;  %v3325_v5 = vsel %vm3298_vm3, %v3322_v44, %v3324_v50 }
  0xfa   : > { %v8185_v16 = vpop.f32.mrf.mxu1  ;;  %v8187_v60 = vpop.f32.mrf.mxu0  ;;  %7133 = vmatpush3.bf16.msra.mxu1 %v7440_v57  ;;  %7187 = vmatpush3.bf16.msra.mxu0 %v7449_v59  ;;  %v3323_v59 = vsel %vm3298_vm3, %v3320_v24, %v3322_v44 }
  0xfb   : > { %7134 = vmatprep.subr.bf16.mxu1 %v7446_v7  ;;  %7188 = vmatprep.subr.bf16.mxu0 %v7455_v8 }
  0xfc   : > { %v8194_v20 = vpop.f32.mrf.mxu1  ;;  %7047 = vmatmul.mubr.bf16.gmra.mxu1 %v3315_v13  ;;  %v8196_v21 = vpop.f32.mrf.mxu0  ;;  %7103 = vmatmul.mubr.bf16.gmra.mxu0 %v3854_v14  ;;  %v3326_v13 = vrot.slane %v7443_v54, 2  ;;  %v3865_v14 = vrot.slane %v7445_v55, 2  ;;  %v7460_v54 = vld [vmem:[%s7694_s26 + $0x18] sm:$0xff]  }
  0xfd   : > { %7050 = vmatprep.mubr.bf16.mxu1 %v3317_v17  ;;  %7106 = vmatprep.mubr.bf16.mxu0 %v3856_v18 }
  0xfe   : > { %v8198_v26 = vpop.f32.mrf.mxu1  ;;  %v8200_v27 = vpop.f32.mrf.mxu0  ;;  %7135 = vmatpush3.bf16.msra.mxu1 %v7446_v7  ;;  %7189 = vmatpush3.bf16.msra.mxu0 %v7455_v8  ;;  %v7447_v7 = vld [vmem:[%s7694_s26 + $0x80] sm:$0xff]   ;;  %v7450_v8 = vld [vmem:[%s7694_s26 + $0x98] sm:$0xff]   ;;  %v3327_v58 = vsel %vm3298_vm3, %v3324_v50, %v3326_v13  ;;  %v3330_v50 = vrot.slane %v7448_v25, 2  ;;  %v4379_v25 = vshrl.u32 %v7460_v54, 16 }
  0xff   : > { %7136 = vmatprep.subr.bf16.mxu1 %v7453_v19  ;;  %v3328_v18 = vrot.slane %v7447_v7, 2 }
 0x100   : > { %v8202_v28 = vpop.f32.mrf.mxu1  ;;  %v8204_v29 = vpop.f32.mrf.mxu0 }
 0x101   : > { %v3329_v39 = vsel %vm3298_vm3, %v3326_v13, %v3328_v18 }
 0x102   : > { %v8210_v32 = vpop.f32.mrf.mxu1  ;;  %v8212_v33 = vpop.f32.mrf.mxu0  ;;  %7137 = vmatpush3.bf16.msra.mxu1 %v7453_v19  ;;  %v3867_v19 = vrot.slane %v7450_v8, 2 }
 0x104   : > { %v8218_v40 = vpop.f32.mrf.mxu1  ;;  %7051 = vmatmul.mubr.bf16.gmra.mxu1 %v3319_v30  ;;  %v8220_v43 = vpop.f32.mrf.mxu0  ;;  %7107 = vmatmul.mubr.bf16.gmra.mxu0 %v3858_v62  ;;  %v3866_v30 = vsel %vm3298_vm3, %v3863_v53, %v3865_v14  ;;  %v8253_v62 = vld [vmem:[%s7694_s26 + $0x90] sm:$0xff]   ;;  %v3868_v44 = vsel %vm3298_vm3, %v3865_v14, %v3867_v19  ;;  %v3869_v53 = vrot.slane %v7451_v22, 2  ;;  %v4371_v14 = vshrl.u32 %v7459_v47, 16 }
 0x105   : > { %7054 = vmatprep.mubr.bf16.mxu1 %v3321_v34  ;;  %7110 = vmatprep.mubr.bf16.mxu0 %v3860_v37  ;;  %v8257_v34 = vld [vmem:[%s7694_s26 + $0x18] sm:$0xff]   ;;  %v4382_v22 = vshll.u32 %v7460_v54, 16 }
 0x106   : > { %v8222_v48 = vpop.f32.mrf.mxu1  ;;  %v8224_v49 = vpop.f32.mrf.mxu0  ;;  %v5040_v7 = vrot.slane %v8257_v34, 3  ;;  %v7458_v34 = vld [vmem:[%s7694_s26 + $0x20] sm:$0xff]  }
 0x108   : > { %v8228_v56 = vpop.f32.mrf.mxu1  ;;  %v8230_v57 = vpop.f32.mrf.mxu0 }
 0x109   : > { %8885 = vst [vmem:[#allocation3_spill] sm:$0xff] %v8228_v56 }
 0x10a   : > { %v8234_v1 = vpop.f32.mrf.mxu1  ;;  %v8236_v4 = vpop.f32.mrf.mxu0 }
 0x10b   : > { %8886 = vst [vmem:[#allocation4_spill] sm:$0xff] %v8234_v1 }
 0x10c   : > { %v8242_v11 = vpop.f32.mrf.mxu1  ;;  %7055 = vmatmul.mubr.bf16.gmra.mxu1 %v3323_v59  ;;  %v6880_v12 = vpop.f32.mrf.mxu0  ;;  %7111 = vmatmul.mubr.bf16.gmra.mxu0 %v3862_v0 }
 0x10d   : > { %8887 = vst [vmem:[#allocation5_spill] sm:$0xff] %v8242_v11  ;;  %7058 = vmatprep.mubr.bf16.mxu1 %v3325_v5  ;;  %7114 = vmatprep.mubr.bf16.mxu0 %v3864_v6  ;;  %v3332_v5 = vrot.slane %v8253_v62, 2  ;;  %v5039_v6 = vrot.slane %v7456_v31, 3  ;;  %v3870_v31 = vsel %vm3298_vm3, %v3867_v19, %v3869_v53  ;;  %v4384_v11 = vrot.slane %v4382_v22, 3  ;;  %v7464_v19 = vld [vmem:[%s7694_s26 + $0x28] sm:$0xff]  }
 0x10e   : > { %v8244_v15 = vpop.f32.mrf.mxu1  ;;  %v1696_v17 = vpop.f32.mrf.mxu0 }
 0x10f   : > { %8888 = vst [vmem:[#allocation6_spill] sm:$0xff] %v8244_v15  ;;  %v5041_v54 = vsel %vm5038_vm4, %v5039_v6, %v5040_v7  ;;  %v8280_v15 = vld [vmem:[%s7694_s26 + $0x28] sm:$0xff]  }
 0x110   : > { %v8247_v23 = vpop.f32.mrf.mxu1  ;;  %v6881_v24 = vpop.f32.mrf.mxu0 }
 0x111   : > { %8889 = vst [vmem:[#allocation7_spill] sm:$0xff] %v8247_v23 }
 0x112   : > { %v8259_v37 = vpop.f32.mrf.mxu1  ;;  %v1699_v38 = vpop.f32.mrf.mxu0 }
 0x113   : > { %8890 = vst [vmem:[#allocation8_spill] sm:$0xff] %v8259_v37  ;;  %v7461_v37 = vld [vmem:[%s7694_s26 + $0x20] sm:$0xff]  }
 0x114   : > { %v6828_v55 = vpop.f32.mrf.mxu1  ;;  %7059 = vmatmul.mubr.bf16.gmra.mxu1 %v3327_v58  ;;  %v6884_v59 = vpop.f32.mrf.mxu0  ;;  %7115 = vmatmul.mubr.bf16.gmra.mxu0 %v3866_v30  ;;  %v4374_v58 = vshll.u32 %v7459_v47, 16  ;;  %v3333_v47 = vsel %vm3298_vm3, %v3330_v50, %v3332_v5  ;;  %v4388_v56 = vshrl.u32 %v7461_v37, 16 }
 0x115   : > { %v1305_v0 = vadd.f32 %v6828_v55, %v8125_v36  ;;  %7062 = vmatprep.mubr.bf16.mxu1 %v3329_v39  ;;  %7118 = vmatprep.mubr.bf16.mxu0 %v3868_v44  ;;  %v3331_v44 = vsel %vm3298_vm3, %v3328_v18, %v3330_v50  ;;  %v7454_v55 = vld [vmem:[%s7694_s26 + $0x98] ss:$0 sps:$4 sm:$0x33]   ;;  %v4373_v18 = vrot.slane %v4371_v14, 2  ;;  %v4391_v14 = vshll.u32 %v7461_v37, 16 }
 0x116   : > { %v1160_v8 = vpop.f32.mrf.mxu1  ;;  %v1712_v13 = vpop.f32.mrf.mxu0  ;;  %v3334_v6 = vrot.slane %v7454_v55, 2 }
 0x117   : > { %v1303_v30 = vadd.f32 %v1160_v8, %v8133_v42  ;;  %v8269_v36 = vadd.f32 %v6880_v12, %v1305_v0  ;;  %v4376_v8 = vrot.slane %v4374_v58, 3  ;;  %v5044_v58 = vrot.slane %v8280_v15, 3 }
 0x118   : > { %v6829_v39 = vpop.f32.mrf.mxu1  ;;  %v6885_v62 = vpop.f32.mrf.mxu0  ;;  %v3335_v37 = vsel %vm3298_vm3, %v3332_v5, %v3334_v6 }
 0x119   : > { %8891 = vst [vmem:[#allocation9_spill] sm:$0xff] %v8269_v36  ;;  %v1306_v23 = vadd.f32 %v6829_v39, %v8141_v46  ;;  %v8282_v42 = vadd.f32 %v1696_v17, %v1303_v30  ;;  %v4381_v36 = vrot.slane %v4379_v25, 2  ;;  %v5042_v39 = vrot.slane %v7458_v34, 3  ;;  %v7465_v34 = vld [vmem:[%s7694_s26 + $0x30] sm:$0xff]  }
 0x11a   : > { %v1163_v12 = vpop.f32.mrf.mxu1  ;;  %v1715_v0 = vpop.f32.mrf.mxu0  ;;  %v4397_v30 = vshrl.u32 %v7464_v19, 16 }
 0x11b   : > { %v1304_v53 = vadd.f32 %v1163_v12, %v8149_v52  ;;  %v8286_v1 = vadd.f32 %v6881_v24, %v1306_v23  ;;  %v4377_v24 = vor.u32 %v4376_v8, %v4373_v18  ;;  %v4385_v22 = vor.u32 %v4384_v11, %v4381_v36  ;;  %v7463_v36 = vld [vmem:[%s7694_s26 + $0x30] sm:$0xff]  }
 0x11c   : > { %v6832_v46 = vpop.f32.mrf.mxu1  ;;  %7063 = vmatmul.mubr.bf16.gmra.mxu1 %v3331_v44  ;;  %v6888_v50 = vpop.f32.mrf.mxu0  ;;  %7119 = vmatmul.mubr.bf16.gmra.mxu0 %v3870_v31  ;;  %v4400_v44 = vshll.u32 %v7464_v19, 16  ;;  %v4393_v11 = vrot.slane %v4391_v14, 3  ;;  %v5045_v8 = vsel %vm5038_vm4, %v5042_v39, %v5044_v58  ;;  %v4399_v19 = vrot.slane %v4397_v30, 2 }
 0x11d   : > { %v1309_v17 = vadd.f32 %v6832_v46, %v8163_v63  ;;  %7066 = vmatprep.mubr.bf16.mxu1 %v3333_v47  ;;  %7190 = vmatprep.mubr.bf16.mxu0 %v5041_v54  ;;  %v8290_v25 = vadd.f32 %v1699_v38, %v1304_v53  ;;  %v5043_v38 = vsel %vm5038_vm4, %v5040_v7, %v5042_v39  ;;  %v4390_v54 = vrot.slane %v4388_v56, 2  ;;  %v8305_v53 = vld [vmem:[%s7694_s26 + $0x38] sm:$0xff]  }
 0x11e   : > { %v1176_v52 = vpop.f32.mrf.mxu1  ;;  %v1728_v23 = vpop.f32.mrf.mxu0  ;;  %v4402_v5 = vrot.slane %v4400_v44, 3  ;;  %v7468_v46 = vld [vmem:[%s7694_s26 + $0x38] sm:$0xff]   ;;  %v5046_v39 = vrot.slane %v7463_v36, 3  ;;  %v5048_v44 = vrot.slane %v8305_v53, 3 }
 0x11f   : > { %v1307_v31 = vadd.f32 %v1176_v52, %v8167_v3  ;;  %v8293_v55 = vadd.f32 %v6884_v59, %v1309_v17  ;;  %v4386_v59 = vsel %vm4369_vm5, %v4377_v24, %v4385_v22  ;;  %v4409_v17 = vshll.u32 %v7465_v34, 16 }
 0x120   : > { %v6833_v63 = vpop.f32.mrf.mxu1  ;;  %v6889_v15 = vpop.f32.mrf.mxu0  ;;  %v4394_v52 = vor.u32 %v4393_v11, %v4390_v54 }
 0x121   : > { %v1310_v47 = vadd.f32 %v6833_v63, %v8178_v10  ;;  %v8300_v12 = vadd.f32 %v1712_v13, %v1307_v31  ;;  %v4406_v13 = vshrl.u32 %v7465_v34, 16  ;;  %v4415_v31 = vshrl.u32 %v7468_v46, 16 }
 0x122   : > { %v1179_v3 = vpop.f32.mrf.mxu1  ;;  %v1731_v18 = vpop.f32.mrf.mxu0  ;;  %v4418_v63 = vshll.u32 %v7468_v46, 16  ;;  %v4411_v54 = vrot.slane %v4409_v17, 3  ;;  %v4395_v36 = vsel %vm4369_vm5, %v4385_v22, %v4394_v52 }
 0x123   : > { %v1308_v7 = vadd.f32 %v1179_v3, %v8187_v60  ;;  %v8309_v6 = vadd.f32 %v6885_v62, %v1310_v47  ;;  %v4403_v62 = vor.u32 %v4402_v5, %v4399_v19  ;;  %v4408_v47 = vrot.slane %v4406_v13, 2 }
 0x124   : > { %v6836_v10 = vpop.f32.mrf.mxu1  ;;  %7067 = vmatmul.mubr.bf16.gmra.mxu1 %v3335_v37  ;;  %v6892_v56 = vpop.f32.mrf.mxu0  ;;  %7191 = vmatmul.mubr.bf16.vlgmr.msra.gmra.mxu0 %v5043_v38  ;;  %v5047_v3 = vsel %vm5038_vm4, %v5044_v58, %v5046_v39  ;;  %v5049_v5 = vsel %vm5038_vm4, %v5046_v39, %v5048_v44  ;;  %v4417_v53 = vrot.slane %v4415_v31, 2  ;;  %v4420_v46 = vrot.slane %v4418_v63, 3 }
 0x125   : > { %v1313_v14 = vadd.f32 %v6836_v10, %v8196_v21  ;;  %7138 = vmatprep.mubr.bf16.mxu1 %v4386_v59  ;;  %7194 = vmatprep.mubr.bf16.mxu0 %v5045_v8  ;;  %v8312_v24 = vadd.f32 %v1715_v0, %v1308_v7  ;;  %v7467_v0 = vld [vmem:[%s7694_s26 + $0x40] sm:$0xff]   ;;  %v8328_v7 = vld [vmem:[%s7694_s26 + $0x48] sm:$0xff]  }
 0x126   : > { %v1192_v30 = vpop.f32.mrf.mxu1  ;;  %v1744_v60 = vpop.f32.mrf.mxu0  ;;  %v7469_v59 = vld [vmem:[%s7694_s26 + $0x40] sm:$0xff]   ;;  %v7472_v10 = vld [vmem:[%s7694_s26 + $0x48] sm:$0xff]   ;;  %v5050_v17 = vrot.slane %v7467_v0, 3  ;;  %v5052_v63 = vrot.slane %v8328_v7, 3 }
 0x127   : > { %v1311_v37 = vadd.f32 %v1192_v30, %v8200_v27  ;;  %v8316_v38 = vadd.f32 %v6888_v50, %v1313_v14  ;;  %v4404_v50 = vsel %vm4369_vm5, %v4394_v52, %v4403_v62  ;;  %v4424_v52 = vshrl.u32 %v7469_v59, 16 }
 0x128   : > { %v6837_v21 = vpop.f32.mrf.mxu1  ;;  %v6893_v34 = vpop.f32.mrf.mxu0  ;;  %v4427_v39 = vshll.u32 %v7469_v59, 16 }
 0x129   : > { %v1314_v11 = vadd.f32 %v6837_v21, %v8204_v29  ;;  %v8323_v8 = vadd.f32 %v1728_v23, %v1311_v37  ;;  %v4412_v23 = vor.u32 %v4411_v54, %v4408_v47  ;;  %v4433_v37 = vshrl.u32 %v7472_v10, 16 }
 0x12a   : > { %v1195_v19 = vpop.f32.mrf.mxu1  ;;  %v1747_v27 = vpop.f32.mrf.mxu0  ;;  %v4436_v21 = vshll.u32 %v7472_v10, 16  ;;  %v4426_v59 = vrot.slane %v4424_v52, 2  ;;  %v8351_v10 = vld [vmem:[%s7694_s26 + $0x58] sm:$0xff]  }
 0x12b   : > { %v1312_v29 = vadd.f32 %v1195_v19, %v8212_v33  ;;  %v8332_v13 = vadd.f32 %v6889_v15, %v1314_v11  ;;  %v4421_v15 = vor.u32 %v4420_v46, %v4417_v53  ;;  %v4413_v0 = vsel %vm4369_vm5, %v4403_v62, %v4412_v23 }
 0x12c   : > { %v6840_v22 = vpop.f32.mrf.mxu1  ;;  %7139 = vmatmul.mubr.bf16.vlgmr.msra.gmra.mxu1 %v4395_v36  ;;  %v6896_v58 = vpop.f32.mrf.mxu0  ;;  %7195 = vmatmul.mubr.bf16.gmra.mxu0 %v5047_v3  ;;  %v7473_v36 = vld [vmem:[%s7694_s26 + $0x50] sm:$0xff]   ;;  %v4429_v19 = vrot.slane %v4427_v39, 3  ;;  %v5053_v46 = vsel %vm5038_vm4, %v5050_v17, %v5052_v63  ;;  %v4435_v7 = vrot.slane %v4433_v37, 2  ;;  %v4438_v62 = vrot.slane %v4436_v21, 3 }
 0x12d   : > { %v1317_v14 = vadd.f32 %v6840_v22, %v8220_v43  ;;  %7142 = vmatprep.mubr.bf16.mxu1 %v4404_v50  ;;  %7198 = vmatprep.mubr.bf16.mxu0 %v5049_v5  ;;  %v8335_v30 = vadd.f32 %v1731_v18, %v1312_v29  ;;  %v5051_v18 = vsel %vm5038_vm4, %v5048_v44, %v5050_v17  ;;  %v7471_v50 = vld [vmem:[%s7694_s26 + $0x50] sm:$0xff]   ;;  %v7476_v29 = vld [vmem:[%s7694_s26 + $0x58] sm:$0xff]   ;;  %v4445_v52 = vshll.u32 %v7473_v36, 16 }
 0x12e   : > { %v1208_v31 = vpop.f32.mrf.mxu1  ;;  %v1760_v33 = vpop.f32.mrf.mxu0  ;;  %v5054_v17 = vrot.slane %v7471_v50, 3  ;;  %v5056_v21 = vrot.slane %v8351_v10, 3 }
 0x12f   : > { %v1315_v47 = vadd.f32 %v1208_v31, %v8224_v49  ;;  %v8339_v54 = vadd.f32 %v6892_v56, %v1317_v14  ;;  %v4422_v56 = vsel %vm4369_vm5, %v4412_v23, %v4421_v15  ;;  %v4430_v23 = vor.u32 %v4429_v19, %v4426_v59 }
 0x130   : > { %v6841_v43 = vpop.f32.mrf.mxu1  ;;  %v6897_v11 = vpop.f32.mrf.mxu0  ;;  %v4447_v59 = vrot.slane %v4445_v52, 3 }
 0x131   : > { %v1318_v3 = vadd.f32 %v6841_v43, %v8230_v57  ;;  %v8346_v5 = vadd.f32 %v1744_v60, %v1315_v47  ;;  %v4442_v60 = vshrl.u32 %v7473_v36, 16  ;;  %v4451_v47 = vshrl.u32 %v7476_v29, 16 }
 0x132   : > { %v1211_v53 = vpop.f32.mrf.mxu1  ;;  %v1763_v49 = vpop.f32.mrf.mxu0  ;;  %v4454_v43 = vshll.u32 %v7476_v29, 16  ;;  %v4431_v50 = vsel %vm4369_vm5, %v4421_v15, %v4430_v23 }
 0x133   : > { %v1316_v44 = vadd.f32 %v1211_v53, %v8236_v4  ;;  %v8355_v22 = vadd.f32 %v6893_v34, %v1318_v3  ;;  %v4439_v34 = vor.u32 %v4438_v62, %v4435_v7  ;;  %v4444_v3 = vrot.slane %v4442_v60, 2 }
 0x134   : > { %v6844_v57 = vpop.f32.mrf.mxu1  ;;  %7143 = vmatmul.mubr.bf16.gmra.mxu1 %v4413_v0  ;;  %v6900_v14 = vpop.f32.mrf.mxu0  ;;  %7199 = vmatmul.mubr.bf16.gmra.mxu0 %v5051_v18  ;;  %v5055_v53 = vsel %vm5038_vm4, %v5052_v63, %v5054_v17  ;;  %v5057_v62 = vsel %vm5038_vm4, %v5054_v17, %v5056_v21  ;;  %v4453_v10 = vrot.slane %v4451_v47, 2  ;;  %v4456_v29 = vrot.slane %v4454_v43, 3 }
 0x135   : > { %v1321_v39 = vadd.f32 %v6844_v57, %v8123_v35  ;;  %7146 = vmatprep.mubr.bf16.mxu1 %v4422_v56  ;;  %7202 = vmatprep.mubr.bf16.mxu0 %v5053_v46  ;;  %v8358_v31 = vadd.f32 %v1747_v27, %v1316_v44  ;;  %v7475_v27 = vld [vmem:[%s7694_s26 + $0x60] sm:$0xff]   ;;  %v8374_v44 = vld [vmem:[%s7694_s26 + $0x68] sm:$0xff]  }
 0x136   : > { %v1224_v37 = vpop.f32.mrf.mxu1  ;;  %v1776_v4 = vpop.f32.mrf.mxu0  ;;  %v7477_v56 = vld [vmem:[%s7694_s26 + $0x60] sm:$0xff]   ;;  %v7480_v57 = vld [vmem:[%s7694_s26 + $0x68] sm:$0xff]   ;;  %v5058_v52 = vrot.slane %v7475_v27, 3  ;;  %v5060_v43 = vrot.slane %v8374_v44, 3 }
 0x137   : > { %v1319_v0 = vadd.f32 %v1224_v37, %v8131_v41  ;;  %v8362_v18 = vadd.f32 %v6896_v58, %v1321_v39  ;;  %v4440_v58 = vsel %vm4369_vm5, %v4430_v23, %v4439_v34  ;;  %v4460_v23 = vshrl.u32 %v7477_v56, 16 }
 0x138   : > { %v6845_v35 = vpop.f32.mrf.mxu1  ;;  %v6901_v36 = vpop.f32.mrf.mxu0  ;;  %v4463_v17 = vshll.u32 %v7477_v56, 16 }
 0x139   : > { %v1322_v19 = vadd.f32 %v6845_v35, %v8139_v45  ;;  %v8369_v46 = vadd.f32 %v1760_v33, %v1319_v0  ;;  %v4448_v33 = vor.u32 %v4447_v59, %v4444_v3  ;;  %v4469_v0 = vshrl.u32 %v7480_v57, 16 }
 0x13a   : > { %v1227_v7 = vpop.f32.mrf.mxu1  ;;  %v1779_v41 = vpop.f32.mrf.mxu0  ;;  %v4472_v35 = vshll.u32 %v7480_v57, 16  ;;  %v4462_v56 = vrot.slane %v4460_v23, 2  ;;  %v8397_v57 = vld [vmem:[%s7694_s26 + $0x78] sm:$0xff]  }
 0x13b   : > { %v1320_v45 = vadd.f32 %v1227_v7, %v8147_v51  ;;  %v8378_v60 = vadd.f32 %v6897_v11, %v1322_v19  ;;  %v4457_v11 = vor.u32 %v4456_v29, %v4453_v10  ;;  %v4449_v27 = vsel %vm4369_vm5, %v4439_v34, %v4448_v33 }
 0x13c   : > { %v6848_v15 = vpop.f32.mrf.mxu1  ;;  %7147 = vmatmul.mubr.bf16.gmra.mxu1 %v4431_v50  ;;  %v6904_v63 = vpop.f32.mrf.mxu0  ;;  %7203 = vmatmul.mubr.bf16.gmra.mxu0 %v5055_v53  ;;  %v7481_v50 = vld [vmem:[%s7694_s26 + $0x70] sm:$0xff]   ;;  %v4465_v7 = vrot.slane %v4463_v17, 3  ;;  %v5061_v29 = vsel %vm5038_vm4, %v5058_v52, %v5060_v43  ;;  %v4471_v44 = vrot.slane %v4469_v0, 2  ;;  %v4474_v34 = vrot.slane %v4472_v35, 3 }
 0x13d   : > { %v1325_v39 = vadd.f32 %v6848_v15, %v8161_v61  ;;  %7150 = vmatprep.mubr.bf16.mxu1 %v4440_v58  ;;  %7206 = vmatprep.mubr.bf16.mxu0 %v5057_v62  ;;  %v8381_v37 = vadd.f32 %v1763_v49, %v1320_v45  ;;  %v5059_v49 = vsel %vm5038_vm4, %v5056_v21, %v5058_v52  ;;  %v7479_v58 = vld [vmem:[%s7694_s26 + $0x70] sm:$0xff]   ;;  %v7484_v45 = vld [vmem:[%s7694_s26 + $0x78] sm:$0xff]   ;;  %v4481_v23 = vshll.u32 %v7481_v50, 16 }
 0x13e   : > { %v1240_v47 = vpop.f32.mrf.mxu1  ;;  %v1792_v51 = vpop.f32.mrf.mxu0  ;;  %v5062_v52 = vrot.slane %v7479_v58, 3  ;;  %v5064_v35 = vrot.slane %v8397_v57, 3 }
 0x13f   : > { %v1323_v3 = vadd.f32 %v1240_v47, %v8165_v2  ;;  %v8385_v59 = vadd.f32 %v6900_v14, %v1325_v39  ;;  %v4458_v14 = vsel %vm4369_vm5, %v4448_v33, %v4457_v11  ;;  %v4466_v33 = vor.u32 %v4465_v7, %v4462_v56 }
 0x140   : > { %v6849_v61 = vpop.f32.mrf.mxu1  ;;  %v6905_v19 = vpop.f32.mrf.mxu0  ;;  %v4483_v56 = vrot.slane %v4481_v23, 3 }
 0x141   : > { %v1326_v53 = vadd.f32 %v6849_v61, %v8176_v9  ;;  %v8392_v62 = vadd.f32 %v1776_v4, %v1323_v3  ;;  %v4478_v4 = vshrl.u32 %v7481_v50, 16  ;;  %v4487_v3 = vshrl.u32 %v7484_v45, 16 }
 0x142   : > { %v1243_v10 = vpop.f32.mrf.mxu1  ;;  %v1795_v2 = vpop.f32.mrf.mxu0  ;;  %v4490_v61 = vshll.u32 %v7484_v45, 16  ;;  %v4467_v58 = vsel %vm4369_vm5, %v4457_v11, %v4466_v33 }
 0x143   : > { %v1324_v21 = vadd.f32 %v1243_v10, %v8185_v16  ;;  %v8401_v15 = vadd.f32 %v6901_v36, %v1326_v53  ;;  %v4475_v36 = vor.u32 %v4474_v34, %v4471_v44  ;;  %v4480_v53 = vrot.slane %v4478_v4, 2 }
 0x144   : > { %v6852_v9 = vpop.f32.mrf.mxu1  ;;  %7151 = vmatmul.mubr.bf16.gmra.mxu1 %v4449_v27  ;;  %v6908_v39 = vpop.f32.mrf.mxu0  ;;  %7207 = vmatmul.mubr.bf16.gmra.mxu0 %v5059_v49  ;;  %v5063_v10 = vsel %vm5038_vm4, %v5060_v43, %v5062_v52  ;;  %v5065_v34 = vsel %vm5038_vm4, %v5062_v52, %v5064_v35  ;;  %v4489_v57 = vrot.slane %v4487_v3, 2  ;;  %v4492_v45 = vrot.slane %v4490_v61, 3 }
 0x145   : > { %v1329_v17 = vadd.f32 %v6852_v9, %v8194_v20  ;;  %7154 = vmatprep.mubr.bf16.mxu1 %v4458_v14  ;;  %7210 = vmatprep.mubr.bf16.mxu0 %v5061_v29  ;;  %v8404_v47 = vadd.f32 %v1779_v41, %v1324_v21  ;;  %v7483_v41 = vld [vmem:[%s7694_s26 + $0x80] sm:$0xff]   ;;  %v8420_v21 = vld [vmem:[%s7694_s26 + $0x88] sm:$0xff]  }
 0x146   : > { %v1256_v0 = vpop.f32.mrf.mxu1  ;;  %v1808_v16 = vpop.f32.mrf.mxu0  ;;  %v7485_v14 = vld [vmem:[%s7694_s26 + $0x80] sm:$0xff]   ;;  %v7488_v9 = vld [vmem:[%s7694_s26 + $0x88] sm:$0xff]   ;;  %v5066_v23 = vrot.slane %v7483_v41, 3  ;;  %v5068_v61 = vrot.slane %v8420_v21, 3 }
 0x147   : > { %v1327_v27 = vadd.f32 %v1256_v0, %v8198_v26  ;;  %v8408_v49 = vadd.f32 %v6904_v63, %v1329_v17  ;;  %v4476_v63 = vsel %vm4369_vm5, %v4466_v33, %v4475_v36  ;;  %v4496_v33 = vshrl.u32 %v7485_v14, 16 }
 0x148   : > { %v6853_v20 = vpop.f32.mrf.mxu1  ;;  %v6909_v50 = vpop.f32.mrf.mxu0  ;;  %v4499_v52 = vshll.u32 %v7485_v14, 16  ;;  %v5069_v21 = vsel %vm5038_vm4, %v5066_v23, %v5068_v61 }
 0x149   : > { %v1330_v7 = vadd.f32 %v6853_v20, %v8202_v28  ;;  %v8415_v29 = vadd.f32 %v1792_v51, %v1327_v27  ;;  %v4484_v51 = vor.u32 %v4483_v56, %v4480_v53  ;;  %v4505_v27 = vshrl.u32 %v7488_v9, 16 }
 0x14a   : > { %v1259_v44 = vpop.f32.mrf.mxu1  ;;  %v1811_v26 = vpop.f32.mrf.mxu0  ;;  %v4508_v20 = vshll.u32 %v7488_v9, 16 }
 0x14b   : > { %v1328_v28 = vadd.f32 %v1259_v44, %v8210_v32  ;;  %v8424_v4 = vadd.f32 %v6905_v19, %v1330_v7  ;;  %v4493_v19 = vor.u32 %v4492_v45, %v4489_v57  ;;  %v4485_v41 = vsel %vm4369_vm5, %v4475_v36, %v4484_v51 }
 0x14c   : > { %v6856_v11 = vpop.f32.mrf.mxu1  ;;  %7155 = vmatmul.mubr.bf16.gmra.mxu1 %v4467_v58  ;;  %v6912_v43 = vpop.f32.mrf.mxu0  ;;  %7211 = vmatmul.mubr.bf16.gmra.mxu0 %v5063_v10  ;;  %v7489_v58 = vld [vmem:[%s7694_s26 + $0x90] sm:$0xff]   ;;  %v8892_v10 = vld [vmem:[#allocation3_spill] sm:$0xff]  ;;  %v4498_v44 = vrot.slane %v4496_v33, 2  ;;  %v4507_v9 = vrot.slane %v4505_v27, 2  ;;  %v4510_v36 = vrot.slane %v4508_v20, 3 }
 0x14d   : > { %v1333_v17 = vadd.f32 %v6856_v11, %v8218_v40  ;;  %7158 = vmatprep.mubr.bf16.mxu1 %v4476_v63  ;;  %7214 = vmatprep.mubr.bf16.mxu0 %v5065_v34  ;;  %v8427_v0 = vadd.f32 %v1795_v2, %v1328_v28  ;;  %v5067_v2 = vsel %vm5038_vm4, %v5064_v35, %v5066_v23  ;;  %v4501_v63 = vrot.slane %v4499_v52, 3  ;;  %v7487_v34 = vld [vmem:[%s7694_s26 + $0x90] sm:$0xff]   ;;  %v8443_v28 = vld [vmem:[%s7694_s26 + $0x98] sm:$0xff]   ;;  %v8893_v35 = vld [vmem:[#allocation4_spill] sm:$0xff] }
 0x14e   : > { %v1272_v3 = vpop.f32.mrf.mxu1  ;;  %v1824_v32 = vpop.f32.mrf.mxu0  ;;  %v7492_v11 = vld [vmem:[%s7694_s26 + $0x98] sm:$0xff]   ;;  %v5070_v23 = vrot.slane %v7487_v34, 3  ;;  %v8899_v34 = vld [vmem:[#allocation7_spill] sm:$0xff] }
 0x14f   : > { %v1331_v53 = vadd.f32 %v1272_v3, %v8222_v48  ;;  %v8431_v56 = vadd.f32 %v6908_v39, %v1333_v17  ;;  %v4494_v39 = vsel %vm4369_vm5, %v4484_v51, %v4493_v19  ;;  %v4502_v51 = vor.u32 %v4501_v63, %v4498_v44 }
 0x150   : > { %v6857_v40 = vpop.f32.mrf.mxu1  ;;  %v6913_v7 = vpop.f32.mrf.mxu0 }
 0x151   : > { %v1334_v14 = vadd.f32 %v6857_v40, %v8892_v10  ;;  %v8438_v57 = vadd.f32 %v1808_v16, %v1331_v53  ;;  %v4514_v16 = vshrl.u32 %v7489_v58, 16  ;;  %v4517_v53 = vshll.u32 %v7489_v58, 16  ;;  %v8895_v40 = vld [vmem:[#allocation5_spill] sm:$0xff] }
 0x152   : > { %v1275_v45 = vpop.f32.mrf.mxu1  ;;  %v1827_v48 = vpop.f32.mrf.mxu0 }
 0x153   : > { %v1332_v17 = vadd.f32 %v1275_v45, %v8893_v35  ;;  %v8447_v3 = vadd.f32 %v6909_v50, %v1334_v14  ;;  %v4511_v50 = vor.u32 %v4510_v36, %v4507_v9  ;;  %v5072_v14 = vrot.slane %v8443_v28, 3  ;;  %v7493_v9 = vld [vmem:[%s7694_s26 + $0xa0] ss:$0 sps:$4 sm:$0x77]  }
 0x154   : > { %v6860_v33 = vpop.f32.mrf.mxu1  ;;  %7159 = vmatmul.mubr.bf16.gmra.mxu1 %v4485_v41  ;;  %v6984_v52 = vpop.f32.mrf.mxu0  ;;  %7215 = vmatmul.mubr.bf16.gmra.mxu0 %v5067_v2  ;;  %v4523_v41 = vshrl.u32 %v7492_v11, 16  ;;  %v4526_v35 = vshll.u32 %v7492_v11, 16  ;;  %v8897_v2 = vld [vmem:[#allocation6_spill] sm:$0xff]  ;;  %v4516_v44 = vrot.slane %v4514_v16, 2  ;;  %v4519_v63 = vrot.slane %v4517_v53, 3  ;;  %v8901_v16 = vld [vmem:[#allocation8_spill] sm:$0xff] }
 0x155   : > { %8894 = vst [vmem:[#allocation3_spill] sm:$0xff] %v8447_v3  ;;  %v1337_v10 = vadd.f32 %v6860_v33, %v8895_v40  ;;  %7162 = vmatprep.mubr.bf16.mxu1 %v4494_v39  ;;  %7218 = vmatprep.mubr.bf16.mxu0 %v5069_v21  ;;  %v8450_v27 = vadd.f32 %v1811_v26, %v1332_v17  ;;  %v7491_v21 = vld [vmem:[%s7694_s26 + $0xa0] ss:$0 sps:$4 sm:$0x77]  }
 0x156   : > { %v1288_v20 = vpop.f32.mrf.mxu1  ;;  %v2900_v45 = vpop.f32.mrf.mxu0  ;;  %v4503_v17 = vsel %vm4369_vm5, %v4493_v19, %v4502_v51  ;;  %v5071_v40 = vsel %vm5038_vm4, %v5068_v61, %v5070_v23  ;;  %v4520_v61 = vor.u32 %v4519_v63, %v4516_v44 }
 0x157   : > { %8896 = vst [vmem:[#allocation4_spill] sm:$0xff] %v8450_v27  ;;  %v1335_v3 = vadd.f32 %v1288_v20, %v8897_v2  ;;  %v8454_v58 = vadd.f32 %v6912_v43, %v1337_v10  ;;  %v4512_v20 = vsel %vm4369_vm5, %v4502_v51, %v4511_v50  ;;  %v5073_v43 = vsel %vm5038_vm4, %v5070_v23, %v5072_v14 }
 0x158   : > { %v6861_v33 = vpop.f32.mrf.mxu1  ;;  %v6985_v39 = vpop.f32.mrf.mxu0  ;;  %v4525_v10 = vrot.slane %v4523_v41, 2  ;;  %v4528_v2 = vrot.slane %v4526_v35, 3  ;;  %v4535_v51 = vshll.u32 %v7493_v9, 16 }
 0x159   : > { %8898 = vst [vmem:[#allocation5_spill] sm:$0xff] %v8454_v58  ;;  %v1338_v26 = vadd.f32 %v6861_v33, %v8899_v34  ;;  %v8461_v36 = vadd.f32 %v1824_v32, %v1335_v3  ;;  %v5074_v34 = vrot.slane %v7491_v21, 3  ;;  %v8902_v32 = vld [vmem:[#allocation9_spill] sm:$0xff] }
 0x15a   : > { %v1291_v28 = vpop.f32.mrf.mxu1  ;;  %v2903_v11 = vpop.f32.mrf.mxu0  ;;  %v4529_v35 = vor.u32 %v4528_v2, %v4525_v10 }
 0x15b   : > { %8900 = vst [vmem:[#allocation6_spill] sm:$0xff] %v8461_v36  ;;  %v1336_v53 = vadd.f32 %v1291_v28, %v8901_v16  ;;  %v8466_v58 = vadd.f32 %v6913_v7, %v1338_v26  ;;  %v4532_v36 = vshrl.u32 %v7493_v9, 16  ;;  %v5075_v63 = vsel %vm5038_vm4, %v5072_v14, %v5074_v34 }
 0x15c   : > { %v6932_v33 = vpop.f32.mrf.mxu1  ;;  %7163 = vmatmul.mubr.bf16.gmra.mxu1 %v4503_v17  ;;  %v6988_v19 = vpop.f32.mrf.mxu0  ;;  %7219 = vmatmul.mubr.bf16.gmra.mxu0 %v5071_v40  ;;  %v4521_v40 = vsel %vm4369_vm5, %v4511_v50, %v4520_v61  ;;  %v4530_v10 = vsel %vm4369_vm5, %v4520_v61, %v4529_v35 }
 0x15d   : > { %v2376_v3 = vadd.f32 %v6932_v33, %v8902_v32  ;;  %7166 = vmatprep.mubr.bf16.mxu1 %v4512_v20  ;;  %7222 = vmatprep.mubr.bf16.mxu0 %v5073_v43  ;;  %v8469_v27 = vadd.f32 %v1827_v48, %v1336_v53  ;;  %v4534_v28 = vrot.slane %v4532_v36, 2  ;;  %v4537_v20 = vrot.slane %v4535_v51, 3 }
 0x15e   : > { %v2231_v23 = vpop.f32.mrf.mxu1  ;;  %v2916_v41 = vpop.f32.mrf.mxu0 }
 0x15f   : > { %v2374_v7 = vadd.f32 %v2231_v23, %v8282_v42  ;;  %v8472_v26 = vadd.f32 %v6984_v52, %v2376_v3 }
 0x160   : > { %v6933_v17 = vpop.f32.mrf.mxu1  ;;  %v6989_v44 = vpop.f32.mrf.mxu0 }
 0x161   : > { %v2377_v21 = vadd.f32 %v6933_v17, %v8286_v1  ;;  %v8477_v9 = vadd.f32 %v2900_v45, %v2374_v7  ;;  %v4538_v1 = vor.u32 %v4537_v20, %v4534_v28 }
 0x162   : > { %v2234_v48 = vpop.f32.mrf.mxu1  ;;  %v2919_v43 = vpop.f32.mrf.mxu0 }
 0x163   : > { %v2375_v42 = vadd.f32 %v2234_v48, %v8290_v25  ;;  %v8481_v52 = vadd.f32 %v6985_v39, %v2377_v21  ;;  %v4539_v34 = vsel %vm4369_vm5, %v4529_v35, %v4538_v1 }
 0x164   : > { %v6936_v2 = vpop.f32.mrf.mxu1  ;;  %7167 = vmatmul.mubr.bf16.gmra.mxu1 %v4521_v40  ;;  %v6992_v50 = vpop.f32.mrf.mxu0  ;;  %7223 = vmatmul.mubr.bf16.gmra.mxu0 %v5075_v63 }
 0x165   : > { %v2380_v14 = vadd.f32 %v6936_v2, %v8293_v55  ;;  %7170 = vmatprep.mubr.bf16.mxu1 %v4530_v10  ;;  %v8484_v36 = vadd.f32 %v2903_v11, %v2375_v42 }
 0x166   : > { %v2247_v45 = vpop.f32.mrf.mxu1  ;;  %v2932_v16 = vpop.f32.mrf.mxu0 }
 0x167   : > { %v2378_v53 = vadd.f32 %v2247_v45, %v8300_v12  ;;  %v8487_v33 = vadd.f32 %v6988_v19, %v2380_v14 }
 0x168   : > { %v6937_v61 = vpop.f32.mrf.mxu1  ;;  %v6993_v25 = vpop.f32.mrf.mxu0 }
 0x169   : > { %v2381_v39 = vadd.f32 %v6937_v61, %v8309_v6  ;;  %v8491_v32 = vadd.f32 %v2916_v41, %v2378_v53 }
 0x16a   : > { %v2250_v3 = vpop.f32.mrf.mxu1  ;;  %v2935_v55 = vpop.f32.mrf.mxu0 }
 0x16b   : > { %v2379_v51 = vadd.f32 %v2250_v3, %v8312_v24  ;;  %v8494_v11 = vadd.f32 %v6989_v44, %v2381_v39 }
 0x16c   : > { %v6940_v23 = vpop.f32.mrf.mxu1  ;;  %7171 = vmatmul.mubr.bf16.gmra.mxu1 %v4539_v34  ;;  %v6996_v7 = vpop.f32.mrf.mxu0 }
 0x16d   : > { %v2384_v12 = vadd.f32 %v6940_v23, %v8316_v38  ;;  %v8497_v19 = vadd.f32 %v2919_v43, %v2379_v51 }
 0x16e   : > { %v2263_v17 = vpop.f32.mrf.mxu1  ;;  %v2948_v40 = vpop.f32.mrf.mxu0 }
 0x16f   : > { %v2382_v6 = vadd.f32 %v2263_v17, %v8323_v8  ;;  %v8500_v35 = vadd.f32 %v6992_v50, %v2384_v12 }
 0x170   : > { %v6941_v41 = vpop.f32.mrf.mxu1  ;;  %v6997_v63 = vpop.f32.mrf.mxu0 }
 0x171   : > { %v2385_v21 = vadd.f32 %v6941_v41, %v8332_v13  ;;  %v8503_v24 = vadd.f32 %v2932_v16, %v2382_v6 }
 0x172   : > { %v2266_v44 = vpop.f32.mrf.mxu1  ;;  %v2951_v28 = vpop.f32.mrf.mxu0 }
 0x173   : > { %v2383_v20 = vadd.f32 %v2266_v44, %v8335_v30  ;;  %v8506_v48 = vadd.f32 %v6993_v25, %v2385_v21 }
 0x174   : > { %v6944_v38 = vpop.f32.mrf.mxu1  ;;  %v7000_v43 = vpop.f32.mrf.mxu0 }
 0x175   : > { %v2388_v10 = vadd.f32 %v6944_v38, %v8339_v54  ;;  %v8509_v42 = vadd.f32 %v2935_v55, %v2383_v20 }
 0x176   : > { %v2279_v8 = vpop.f32.mrf.mxu1  ;;  %v2964_v2 = vpop.f32.mrf.mxu0 }
 0x177   : > { %v2386_v50 = vadd.f32 %v2279_v8, %v8346_v5  ;;  %v8512_v14 = vadd.f32 %v6996_v7, %v2388_v10 }
 0x178   : > { %v6945_v13 = vpop.f32.mrf.mxu1  ;;  %v7001_v1 = vpop.f32.mrf.mxu0 }
 0x179   : > { %v2389_v45 = vadd.f32 %v6945_v13, %v8355_v22  ;;  %v8515_v16 = vadd.f32 %v2948_v40, %v2386_v50 }
 0x17a   : > { %v2282_v30 = vpop.f32.mrf.mxu1  ;;  %v2967_v53 = vpop.f32.mrf.mxu0 }
 0x17b   : > { %v2387_v61 = vadd.f32 %v2282_v30, %v8358_v31  ;;  %v8518_v25 = vadd.f32 %v6997_v63, %v2389_v45 }
 0x17c   : > { %v6948_v54 = vpop.f32.mrf.mxu1  ;;  %v7004_v39 = vpop.f32.mrf.mxu0 }
 0x17d   : > { %v2392_v34 = vadd.f32 %v6948_v54, %v8362_v18  ;;  %v8521_v3 = vadd.f32 %v2951_v28, %v2387_v61 }
 0x17e   : > { %v2295_v5 = vpop.f32.mrf.mxu1  ;;  %v2980_v55 = vpop.f32.mrf.mxu0 }
 0x17f   : > { %v2390_v51 = vadd.f32 %v2295_v5, %v8369_v46  ;;  %v8524_v23 = vadd.f32 %v7000_v43, %v2392_v34 }
 0x180   : > { %v6949_v22 = vpop.f32.mrf.mxu1  ;;  %v7005_v7 = vpop.f32.mrf.mxu0 }
 0x181   : > { %v2393_v12 = vadd.f32 %v6949_v22, %v8378_v60  ;;  %v8527_v17 = vadd.f32 %v2964_v2, %v2390_v51 }
 0x182   : > { %v2298_v31 = vpop.f32.mrf.mxu1  ;;  %v2983_v40 = vpop.f32.mrf.mxu0 }
 0x183   : > { %v2391_v6 = vadd.f32 %v2298_v31, %v8381_v37  ;;  %v8530_v41 = vadd.f32 %v7001_v1, %v2393_v12 }
 0x184   : > { %v6952_v18 = vpop.f32.mrf.mxu1  ;;  %v7008_v63 = vpop.f32.mrf.mxu0 }
 0x185   : > { %v2396_v21 = vadd.f32 %v6952_v18, %v8385_v59  ;;  %v8533_v44 = vadd.f32 %v2967_v53, %v2391_v6 }
 0x186   : > { %v2311_v46 = vpop.f32.mrf.mxu1  ;;  %v2996_v28 = vpop.f32.mrf.mxu0 }
 0x187   : > { %v2394_v20 = vadd.f32 %v2311_v46, %v8392_v62  ;;  %v8536_v38 = vadd.f32 %v7004_v39, %v2396_v21  ;;  %v8903_v21 = vld [vmem:[#allocation3_spill] sm:$0xff] }
 0x188   : > { %v6953_v60 = vpop.f32.mrf.mxu1  ;;  %v7009_v43 = vpop.f32.mrf.mxu0 }
 0x189   : > { %v2397_v10 = vadd.f32 %v6953_v60, %v8401_v15  ;;  %v8539_v8 = vadd.f32 %v2980_v55, %v2394_v20  ;;  %v8904_v60 = vld [vmem:[#allocation4_spill] sm:$0xff] }
 0x18a   : > { %v2314_v37 = vpop.f32.mrf.mxu1  ;;  %v2999_v2 = vpop.f32.mrf.mxu0 }
 0x18b   : > { %v2395_v50 = vadd.f32 %v2314_v37, %v8404_v47  ;;  %v8542_v13 = vadd.f32 %v7005_v7, %v2397_v10 }
 0x18c   : > { %v6956_v59 = vpop.f32.mrf.mxu1  ;;  %v7012_v1 = vpop.f32.mrf.mxu0 }
 0x18d   : > { %v2400_v45 = vadd.f32 %v6956_v59, %v8408_v49  ;;  %v8545_v30 = vadd.f32 %v2983_v40, %v2395_v50 }
 0x18e   : > { %v2327_v62 = vpop.f32.mrf.mxu1  ;;  %v3012_v53 = vpop.f32.mrf.mxu0 }
 0x18f   : > { %v2398_v61 = vadd.f32 %v2327_v62, %v8415_v29  ;;  %v8548_v54 = vadd.f32 %v7008_v63, %v2400_v45  ;;  %v8906_v45 = vld [vmem:[#allocation6_spill] sm:$0xff] }
 0x190   : > { %v6957_v15 = vpop.f32.mrf.mxu1  ;;  %v7013_v39 = vpop.f32.mrf.mxu0 }
 0x191   : > { %v2401_v34 = vadd.f32 %v6957_v15, %v8424_v4  ;;  %v8551_v5 = vadd.f32 %v2996_v28, %v2398_v61 }
 0x192   : > { %v2330_v47 = vpop.f32.mrf.mxu1  ;;  %v3015_v55 = vpop.f32.mrf.mxu0 }
 0x193   : > { %v2399_v51 = vadd.f32 %v2330_v47, %v8427_v0  ;;  %v8554_v22 = vadd.f32 %v7009_v43, %v2401_v34 }
 0x194   : > { %v6960_v49 = vpop.f32.mrf.mxu1  ;;  %v7016_v7 = vpop.f32.mrf.mxu0 }
 0x195   : > { %v2404_v12 = vadd.f32 %v6960_v49, %v8431_v56  ;;  %v8557_v31 = vadd.f32 %v2999_v2, %v2399_v51  ;;  %v8905_v2 = vld [vmem:[#allocation5_spill] sm:$0xff] }
 0x196   : > { %v2343_v29 = vpop.f32.mrf.mxu1  ;;  %v3028_v40 = vpop.f32.mrf.mxu0 }
 0x197   : > { %v2402_v6 = vadd.f32 %v2343_v29, %v8438_v57  ;;  %v8560_v18 = vadd.f32 %v7012_v1, %v2404_v12 }
 0x198   : > { %v6961_v4 = vpop.f32.mrf.mxu1  ;;  %v7017_v63 = vpop.f32.mrf.mxu0 }
 0x199   : > { %v2405_v46 = vadd.f32 %v6961_v4, %v8903_v21  ;;  %v8563_v28 = vadd.f32 %v3012_v53, %v2402_v6 }
 0x19a   : > { %v2346_v0 = vpop.f32.mrf.mxu1  ;;  %v3031_v20 = vpop.f32.mrf.mxu0 }
 0x19b   : > { %v2403_v43 = vadd.f32 %v2346_v0, %v8904_v60  ;;  %v8566_v10 = vadd.f32 %v7013_v39, %v2405_v46 }
 0x19c   : > { %v6964_v56 = vpop.f32.mrf.mxu1  ;;  %v7088_v37 = vpop.f32.mrf.mxu0 }
 0x19d   : > { %v2408_v50 = vadd.f32 %v6964_v56, %v8905_v2  ;;  %v8569_v59 = vadd.f32 %v3015_v55, %v2403_v43 }
 0x19e   : > { %v2359_v57 = vpop.f32.mrf.mxu1  ;;  %v3971_v1 = vpop.f32.mrf.mxu0 }
 0x19f   : > { %v2406_v62 = vadd.f32 %v2359_v57, %v8906_v45  ;;  %v8572_v61 = vadd.f32 %v7016_v7, %v2408_v50 }
 0x1a0   : > { %v6965_v53 = vpop.f32.mrf.mxu1  ;;  %v7089_v15 = vpop.f32.mrf.mxu0 }
 0x1a1   : > { %v2409_v34 = vadd.f32 %v6965_v53, %v8466_v58  ;;  %v8575_v47 = vadd.f32 %v3028_v40, %v2406_v62 }
 0x1a2   : > { %v2362_v39 = vpop.f32.mrf.mxu1  ;;  %v3974_v51 = vpop.f32.mrf.mxu0 }
 0x1a3   : > { %v2407_v49 = vadd.f32 %v2362_v39, %v8469_v27  ;;  %v8578_v12 = vadd.f32 %v7017_v63, %v2409_v34 }
 0x1a4   : > { %v7036_v55 = vpop.f32.mrf.mxu1  ;;  %v7092_v29 = vpop.f32.mrf.mxu0 }
 0x1a5   : > { %v3581_v6 = vadd.f32 %v7036_v55, %v8472_v26  ;;  %v8581_v4 = vadd.f32 %v3031_v20, %v2407_v49 }
 0x1a6   : > { %v3436_v7 = vpop.f32.mrf.mxu1  ;;  %v3987_v21 = vpop.f32.mrf.mxu0 }
 0x1a7   : > { %v3579_v46 = vadd.f32 %v3436_v7, %v8477_v9  ;;  %v8584_v0 = vadd.f32 %v7088_v37, %v3581_v6 }
 0x1a8   : > { %v7037_v58 = vpop.f32.mrf.mxu1  ;;  %v7093_v40 = vpop.f32.mrf.mxu0 }
 0x1a9   : > { %v3582_v60 = vadd.f32 %v7037_v58, %v8481_v52  ;;  %v8587_v43 = vadd.f32 %v3971_v1, %v3579_v46 }
 0x1aa   : > { %v3439_v27 = vpop.f32.mrf.mxu1  ;;  %v3990_v63 = vpop.f32.mrf.mxu0 }
 0x1ab   : > { %v3580_v56 = vadd.f32 %v3439_v27, %v8484_v36  ;;  %v8590_v2 = vadd.f32 %v7089_v15, %v3582_v60 }
 0x1ac   : > { %v7040_v26 = vpop.f32.mrf.mxu1  ;;  %v7096_v20 = vpop.f32.mrf.mxu0 }
 0x1ad   : > { %v3585_v50 = vadd.f32 %v7040_v26, %v8487_v33  ;;  %v8593_v57 = vadd.f32 %v3974_v51, %v3580_v56 }
 0x1ae   : > { %v3452_v9 = vpop.f32.mrf.mxu1  ;;  %v4003_v37 = vpop.f32.mrf.mxu0 }
 0x1af   : > { %v3583_v45 = vadd.f32 %v3452_v9, %v8491_v32  ;;  %v8596_v62 = vadd.f32 %v7092_v29, %v3585_v50 }
 0x1b0   : > { %v7041_v52 = vpop.f32.mrf.mxu1  ;;  %v7097_v1 = vpop.f32.mrf.mxu0 }
 0x1b1   : > { %v3586_v53 = vadd.f32 %v7041_v52, %v8494_v11  ;;  %v8599_v34 = vadd.f32 %v3987_v21, %v3583_v45 }
 0x1b2   : > { %v3455_v36 = vpop.f32.mrf.mxu1  ;;  %v4006_v15 = vpop.f32.mrf.mxu0 }
 0x1b3   : > { %v3584_v39 = vadd.f32 %v3455_v36, %v8497_v19  ;;  %v8602_v49 = vadd.f32 %v7093_v40, %v3586_v53 }
 0x1b4   : > { %v7044_v33 = vpop.f32.mrf.mxu1  ;;  %v7100_v51 = vpop.f32.mrf.mxu0 }
 0x1b5   : > { %v3589_v55 = vadd.f32 %v7044_v33, %v8500_v35  ;;  %v8605_v6 = vadd.f32 %v3990_v63, %v3584_v39 }
 0x1b6   : > { %v3468_v32 = vpop.f32.mrf.mxu1  ;;  %v4019_v29 = vpop.f32.mrf.mxu0 }
 0x1b7   : > { %v3587_v7 = vadd.f32 %v3468_v32, %v8503_v24  ;;  %v8608_v46 = vadd.f32 %v7096_v20, %v3589_v55 }
 0x1b8   : > { %v7045_v11 = vpop.f32.mrf.mxu1  ;;  %v7101_v21 = vpop.f32.mrf.mxu0 }
 0x1b9   : > { %v3590_v58 = vadd.f32 %v7045_v11, %v8506_v48  ;;  %v8611_v60 = vadd.f32 %v4003_v37, %v3587_v7 }
 0x1ba   : > { %v3471_v19 = vpop.f32.mrf.mxu1  ;;  %v4022_v40 = vpop.f32.mrf.mxu0 }
 0x1bb   : > { %v3588_v27 = vadd.f32 %v3471_v19, %v8509_v42  ;;  %v8614_v56 = vadd.f32 %v7097_v1, %v3590_v58 }
 0x1bc   : > { %v7048_v35 = vpop.f32.mrf.mxu1  ;;  %v7104_v63 = vpop.f32.mrf.mxu0 }
 0x1bd   : > { %v3593_v26 = vadd.f32 %v7048_v35, %v8512_v14  ;;  %v8617_v50 = vadd.f32 %v4006_v15, %v3588_v27 }
 0x1be   : > { %v3484_v24 = vpop.f32.mrf.mxu1  ;;  %v4035_v20 = vpop.f32.mrf.mxu0 }
 0x1bf   : > { %v3591_v9 = vadd.f32 %v3484_v24, %v8515_v16  ;;  %v8620_v45 = vadd.f32 %v7100_v51, %v3593_v26 }
 0x1c0   : > { %v7049_v48 = vpop.f32.mrf.mxu1  ;;  %v7105_v37 = vpop.f32.mrf.mxu0 }
 0x1c1   : > { %v3594_v52 = vadd.f32 %v7049_v48, %v8518_v25  ;;  %v8623_v53 = vadd.f32 %v4019_v29, %v3591_v9 }
 0x1c2   : > { %v3487_v42 = vpop.f32.mrf.mxu1  ;;  %v4038_v1 = vpop.f32.mrf.mxu0 }
 0x1c3   : > { %v3592_v36 = vadd.f32 %v3487_v42, %v8521_v3  ;;  %v8626_v39 = vadd.f32 %v7101_v21, %v3594_v52 }
 0x1c4   : > { %v7052_v14 = vpop.f32.mrf.mxu1  ;;  %v7108_v15 = vpop.f32.mrf.mxu0 }
 0x1c5   : > { %v3597_v33 = vadd.f32 %v7052_v14, %v8524_v23  ;;  %v8629_v55 = vadd.f32 %v4022_v40, %v3592_v36 }
 0x1c6   : > { %v3500_v16 = vpop.f32.mrf.mxu1  ;;  %v4051_v51 = vpop.f32.mrf.mxu0 }
 0x1c7   : > { %v3595_v32 = vadd.f32 %v3500_v16, %v8527_v17  ;;  %v8632_v7 = vadd.f32 %v7104_v63, %v3597_v33 }
 0x1c8   : > { %v7053_v25 = vpop.f32.mrf.mxu1  ;;  %v7109_v29 = vpop.f32.mrf.mxu0 }
 0x1c9   : > { %v3598_v11 = vadd.f32 %v7053_v25, %v8530_v41  ;;  %v8635_v58 = vadd.f32 %v4035_v20, %v3595_v32 }
 0x1ca   : > { %v3503_v3 = vpop.f32.mrf.mxu1  ;;  %v4054_v21 = vpop.f32.mrf.mxu0 }
 0x1cb   : > { %v3596_v19 = vadd.f32 %v3503_v3, %v8533_v44  ;;  %v8638_v27 = vadd.f32 %v7105_v37, %v3598_v11 }
 0x1cc   : > { %v7056_v23 = vpop.f32.mrf.mxu1  ;;  %v7112_v40 = vpop.f32.mrf.mxu0 }
 0x1cd   : > { %v3601_v35 = vadd.f32 %v7056_v23, %v8536_v38  ;;  %v8641_v26 = vadd.f32 %v4038_v1, %v3596_v19 }
 0x1ce   : > { %v3516_v17 = vpop.f32.mrf.mxu1  ;;  %v4067_v63 = vpop.f32.mrf.mxu0 }
 0x1cf   : > { %v3599_v24 = vadd.f32 %v3516_v17, %v8539_v8  ;;  %v8644_v9 = vadd.f32 %v7108_v15, %v3601_v35 }
 0x1d0   : > { %v7057_v41 = vpop.f32.mrf.mxu1  ;;  %v7113_v20 = vpop.f32.mrf.mxu0 }
 0x1d1   : > { %v3602_v48 = vadd.f32 %v7057_v41, %v8542_v13  ;;  %v8647_v52 = vadd.f32 %v4051_v51, %v3599_v24 }
 0x1d2   : > { %v3519_v44 = vpop.f32.mrf.mxu1  ;;  %v4070_v37 = vpop.f32.mrf.mxu0 }
 0x1d3   : > { %v3600_v42 = vadd.f32 %v3519_v44, %v8545_v30  ;;  %v8650_v36 = vadd.f32 %v7109_v29, %v3602_v48 }
 0x1d4   : > { %v7060_v38 = vpop.f32.mrf.mxu1  ;;  %v7116_v1 = vpop.f32.mrf.mxu0 }
 0x1d5   : > { %v3605_v14 = vadd.f32 %v7060_v38, %v8548_v54  ;;  %v8653_v33 = vadd.f32 %v4054_v21, %v3600_v42 }
 0x1d6   : > { %v3532_v8 = vpop.f32.mrf.mxu1  ;;  %v4083_v15 = vpop.f32.mrf.mxu0 }
 0x1d7   : > { %v3603_v16 = vadd.f32 %v3532_v8, %v8551_v5  ;;  %v8656_v32 = vadd.f32 %v7112_v40, %v3605_v14 }
 0x1d8   : > { %v7061_v13 = vpop.f32.mrf.mxu1  ;;  %v7117_v51 = vpop.f32.mrf.mxu0 }
 0x1d9   : > { %v3606_v25 = vadd.f32 %v7061_v13, %v8554_v22  ;;  %v8659_v11 = vadd.f32 %v4067_v63, %v3603_v16 }
 0x1da   : > { %v3535_v30 = vpop.f32.mrf.mxu1  ;;  %v4086_v29 = vpop.f32.mrf.mxu0 }
 0x1db   : > { %v3604_v3 = vadd.f32 %v3535_v30, %v8557_v31  ;;  %v8662_v19 = vadd.f32 %v7113_v20, %v3606_v25 }
 0x1dc   : > { %v7064_v54 = vpop.f32.mrf.mxu1  ;;  %v7120_v21 = vpop.f32.mrf.mxu0 }
 0x1dd   : > { %v3609_v23 = vadd.f32 %v7064_v54, %v8560_v18  ;;  %v8665_v35 = vadd.f32 %v4070_v37, %v3604_v3 }
 0x1de   : > { %v3548_v5 = vpop.f32.mrf.mxu1  ;;  %v4099_v40 = vpop.f32.mrf.mxu0 }
 0x1df   : > { %v3607_v17 = vadd.f32 %v3548_v5, %v8563_v28  ;;  %v8668_v24 = vadd.f32 %v7116_v1, %v3609_v23 }
 0x1e0   : > { %v7065_v22 = vpop.f32.mrf.mxu1  ;;  %v7121_v63 = vpop.f32.mrf.mxu0 }
 0x1e1   : > { %v3610_v41 = vadd.f32 %v7065_v22, %v8566_v10  ;;  %v8671_v48 = vadd.f32 %v4083_v15, %v3607_v17 }
 0x1e2   : > { %v3551_v31 = vpop.f32.mrf.mxu1  ;;  %v4102_v20 = vpop.f32.mrf.mxu0 }
 0x1e3   : > { %v3608_v44 = vadd.f32 %v3551_v31, %v8569_v59  ;;  %v8674_v42 = vadd.f32 %v7117_v51, %v3610_v41 }
 0x1e4   : > { %v7068_v18 = vpop.f32.mrf.mxu1  ;;  %v7192_v37 = vpop.f32.mrf.mxu0 }
 0x1e5   : > { %v3613_v38 = vadd.f32 %v7068_v18, %v8572_v61  ;;  %v8677_v14 = vadd.f32 %v4086_v29, %v3608_v44 }
 0x1e6   : > { %v3564_v28 = vpop.f32.mrf.mxu1  ;;  %v5176_v1 = vpop.f32.mrf.mxu0 }
 0x1e7   : > { %v3611_v8 = vadd.f32 %v3564_v28, %v8575_v47  ;;  %v8680_v16 = vadd.f32 %v7120_v21, %v3613_v38  ;;  %v8694_v47 = vld [vmem:[%s8882_s2] ss:$0 sm:$0xff] }
 0x1e8   : > { %v7069_v10 = vpop.f32.mrf.mxu1  ;;  %v7193_v15 = vpop.f32.mrf.mxu0 }
 0x1e9   : > { %v3614_v13 = vadd.f32 %v7069_v10, %v8578_v12  ;;  %v8683_v25 = vadd.f32 %v4099_v40, %v3611_v8 }
 0x1ea   : > { %v3567_v59 = vpop.f32.mrf.mxu1  ;;  %v5179_v51 = vpop.f32.mrf.mxu0 }
 0x1eb   : > { %v3612_v30 = vadd.f32 %v3567_v59, %v8581_v4  ;;  %v8686_v3 = vadd.f32 %v7121_v63, %v3614_v13  ;;  %v8700_v4 = vld [vmem:[%s8883_s3] ss:$0 sm:$0xff] }
 0x1ec   : > { %v7140_v61 = vpop.f32.mrf.mxu1  ;;  %v7196_v29 = vpop.f32.mrf.mxu0 }
 0x1ed   : > { %v4785_v54 = vadd.f32 %v7140_v61, %v8584_v0  ;;  %v8689_v23 = vadd.f32 %v4102_v20, %v3612_v30 }
 0x1ee   : > { %v4640_v12 = vpop.f32.mrf.mxu1  ;;  %v5192_v21 = vpop.f32.mrf.mxu0 }
 0x1ef   : > { %v5321_v5 = vadd.f32 %v7192_v37, %v4785_v54  ;;  %v4783_v40 = vadd.f32 %v4640_v12, %v8587_v43 }
 0x1f0   : > { %v7141_v17 = vpop.f32.mrf.mxu1  ;;  %v7197_v22 = vpop.f32.mrf.mxu0 }
 0x1f1   : > { %v5436_v0 = vmul.f32 %v8694_v47, %v5321_v5  ;;  %v5319_v63 = vadd.f32 %v5176_v1, %v4783_v40  ;;  %v4786_v41 = vadd.f32 %v7141_v17, %v8590_v2 }
 0x1f2   : > { %v4643_v31 = vpop.f32.mrf.mxu1  ;;  %v5195_v20 = vpop.f32.mrf.mxu0 }
 0x1f3   : > { %v5479_v44 = vadd.f32 %v8700_v4, %v5436_v0  ;;  %v5434_v18 = vmul.f32 %v8694_v47, %v5319_v63  ;;  %v5322_v37 = vadd.f32 %v7193_v15, %v4786_v41  ;;  %v4784_v43 = vadd.f32 %v4643_v31, %v8593_v57 }
 0x1f4   : > { %v7144_v38 = vpop.f32.mrf.mxu1  ;;  %v7200_v28 = vpop.f32.mrf.mxu0 }
 0x1f5   : > { %v5515_v8 = vsub.f32 0.0, %v5479_v44  ;;  %v5477_v10 = vadd.f32 %v8700_v4, %v5434_v18  ;;  %v5437_v13 = vmul.f32 %v8694_v47, %v5322_v37  ;;  %v5320_v59 = vadd.f32 %v5179_v51, %v4784_v43 }
 0x1f6   : > { %v4789_v1 = vadd.f32 %v7144_v38, %v8596_v62  ;;  %v4656_v2 = vpop.f32.mrf.mxu1  ;;  %v5208_v30 = vpop.f32.mrf.mxu0 }
 0x1f7   : > { %v5553_v61 = vmul.f32 1.442695, %v5515_v8  ;;  %v5513_v54 = vsub.f32 0.0, %v5477_v10  ;;  %v5480_v12 = vadd.f32 %v8700_v4, %v5437_v13  ;;  %v5435_v15 = vmul.f32 %v8694_v47, %v5320_v59 }
 0x1f8   : > { %v5325_v5 = vadd.f32 %v7196_v29, %v4789_v1  ;;  %v4787_v57 = vadd.f32 %v4656_v2, %v8599_v34  ;;  %v7145_v40 = vpop.f32.mrf.mxu1  ;;  %v7201_v17 = vpop.f32.mrf.mxu0 }
 0x1f9   : > { %7494 = vpow2.f32 %v5553_v61  ;;  %v5549_v0 = vmul.f32 1.442695, %v5513_v54  ;;  %v5516_v63 = vsub.f32 0.0, %v5480_v12  ;;  %v5478_v51 = vadd.f32 %v8700_v4, %v5435_v15 }
 0x1fa   : > { %v5440_v62 = vmul.f32 %v8694_v47, %v5325_v5  ;;  %v5323_v41 = vadd.f32 %v5192_v21, %v4787_v57  ;;  %v4790_v31 = vadd.f32 %v7145_v40, %v8602_v49  ;;  %v4659_v44 = vpop.f32.mrf.mxu1  ;;  %v5211_v18 = vpop.f32.mrf.mxu0 }
 0x1fb   : > { %7496 = vpow2.f32 %v5549_v0  ;;  %v5555_v37 = vmul.f32 1.442695, %v5516_v63  ;;  %v5514_v43 = vsub.f32 0.0, %v5478_v51  ;;  %v4788_v29 = vadd.f32 %v4659_v44, %v8605_v6 }
 0x1fc   : > { %v5483_v34 = vadd.f32 %v8700_v4, %v5440_v62  ;;  %v5438_v38 = vmul.f32 %v8694_v47, %v5323_v41  ;;  %v5326_v8 = vadd.f32 %v7197_v22, %v4790_v31  ;;  %v7148_v10 = vpop.f32.mrf.mxu1  ;;  %v7204_v13 = vpop.f32.mrf.mxu0 }
 0x1fd   : > { %7498 = vpow2.f32 %v5555_v37  ;;  %v5551_v59 = vmul.f32 1.442695, %v5514_v43  ;;  %v5324_v1 = vadd.f32 %v5195_v20, %v4788_v29  ;;  %v4793_v21 = vadd.f32 %v7148_v10, %v8608_v46 }
 0x1fe   : > { %v5519_v49 = vsub.f32 0.0, %v5483_v34  ;;  %v5481_v2 = vadd.f32 %v8700_v4, %v5438_v38  ;;  %v5441_v61 = vmul.f32 %v8694_v47, %v5326_v8  ;;  %v4672_v54 = vpop.f32.mrf.mxu1  ;;  %v5224_v12 = vpop.f32.mrf.mxu0 }
 0x1ff   : > { %7500 = vpow2.f32 %v5551_v59  ;;  %v5439_v6 = vmul.f32 %v8694_v47, %v5324_v1  ;;  %v5329_v15 = vadd.f32 %v7200_v28, %v4793_v21  ;;  %v4791_v22 = vadd.f32 %v4672_v54, %v8611_v60 }
 0x200   : > { %v5561_v5 = vmul.f32 1.442695, %v5519_v49  ;;  %v5517_v57 = vsub.f32 0.0, %v5481_v2  ;;  %v5484_v40 = vadd.f32 %v8700_v4, %v5441_v61  ;;  %v7149_v20 = vpop.f32.mrf.mxu1  ;;  %v7205_v0 = vpop.f32.mrf.mxu0 }
 0x201   : > { %v5482_v46 = vadd.f32 %v8700_v4, %v5439_v6  ;;  %v5444_v63 = vmul.f32 %v8694_v47, %v5329_v15  ;;  %v5327_v51 = vadd.f32 %v5208_v30, %v4791_v22  ;;  %v4794_v62 = vadd.f32 %v7149_v20, %v8614_v56 }
 0x202   : > { %7502 = vpow2.f32 %v5561_v5  ;;  %v5557_v41 = vmul.f32 1.442695, %v5517_v57  ;;  %v5520_v31 = vsub.f32 0.0, %v5484_v40  ;;  %v4675_v44 = vpop.f32.mrf.mxu1  ;;  %v8728_v28 = vpop.f32.mrf.mxu0 }
 0x203   : > { %v5518_v60 = vsub.f32 0.0, %v5482_v46  ;;  %v5487_v37 = vadd.f32 %v8700_v4, %v5444_v63  ;;  %v5442_v43 = vmul.f32 %v8694_v47, %v5327_v51  ;;  %v5330_v29 = vadd.f32 %v7201_v17, %v4794_v62 }
 0x204   : > { %7504 = vpow2.f32 %v5557_v41  ;;  %v5563_v34 = vmul.f32 1.442695, %v5520_v31  ;;  %v4792_v38 = vadd.f32 %v4675_v44, %v8617_v50  ;;  %v7152_v8 = vpop.f32.mrf.mxu1  ;;  %v8733_v30 = vpop.f32.mrf.mxu0 }
 0x205   : > { %v5559_v56 = vmul.f32 1.442695, %v5518_v60  ;;  %v5523_v10 = vsub.f32 0.0, %v5487_v37  ;;  %v5485_v59 = vadd.f32 %v8700_v4, %v5442_v43  ;;  %v5445_v1 = vmul.f32 %v8694_v47, %v5330_v29 }
 0x206   : > { %v7495_v21 = vpop.eup %7494  ;;  %7506 = vpow2.f32 %v5563_v34  ;;  %v5328_v49 = vadd.f32 %v5211_v18, %v4792_v38  ;;  %v4797_v2 = vadd.f32 %v7152_v8, %v8620_v45  ;;  %v4688_v61 = vpop.f32.mrf.mxu1 }
 0x207   : > { %v8738_v17 = vpop.f32.mrf.mxu0  ;;  %v5623_v54 = vadd.f32 1.0, %v7495_v21  ;;  %7508 = vpow2.f32 %v5559_v56  ;;  %v5569_v50 = vmul.f32 1.442695, %v5523_v10  ;;  %v5521_v6 = vsub.f32 0.0, %v5485_v59 }
 0x208   : > { %v7497_v15 = vpop.eup %7496  ;;  %v5488_v22 = vadd.f32 %v8700_v4, %v5445_v1  ;;  %v5443_v5 = vmul.f32 %v8694_v47, %v5328_v49  ;;  %v5333_v57 = vadd.f32 %v7204_v13, %v4797_v2  ;;  %v4795_v40 = vadd.f32 %v4688_v61, %v8623_v53  ;;  %v7153_v20 = vpop.f32.mrf.mxu1 }
 0x209   : > { %v8743_v46 = vpop.f32.mrf.mxu0  ;;  %7510 = vrcp.f32 %v5623_v54  ;;  %v5621_v45 = vadd.f32 1.0, %v7497_v15  ;;  %v5565_v18 = vmul.f32 1.442695, %v5521_v6  ;;  %v4798_v63 = vadd.f32 %v7153_v20, %v8626_v39 }
 0x20a   : > { %v7499_v51 = vpop.eup %7498  ;;  %7512 = vpow2.f32 %v5569_v50  ;;  %v5524_v62 = vsub.f32 0.0, %v5488_v22  ;;  %v5486_v41 = vadd.f32 %v8700_v4, %v5443_v5  ;;  %v5448_v31 = vmul.f32 %v8694_v47, %v5333_v57  ;;  %v4691_v44 = vpop.f32.mrf.mxu1 }
 0x20b   : > { %v8748_v60 = vpop.f32.mrf.mxu0  ;;  %7514 = vrcp.f32 %v5621_v45  ;;  %v5624_v53 = vadd.f32 1.0, %v7499_v51  ;;  %v5331_v13 = vadd.f32 %v5224_v12, %v4795_v40  ;;  %v5334_v37 = vadd.f32 %v7205_v0, %v4798_v63 }
 0x20c   : > { %v7501_v43 = vpop.eup %7500  ;;  %7516 = vpow2.f32 %v5565_v18  ;;  %v5571_v29 = vmul.f32 1.442695, %v5524_v62  ;;  %v5522_v34 = vsub.f32 0.0, %v5486_v41  ;;  %v5491_v39 = vadd.f32 %v8700_v4, %v5448_v31  ;;  %v7156_v38 = vpop.f32.mrf.mxu1 }
 0x20d   : > { %v8751_v8 = vpop.f32.mrf.mxu0  ;;  %7518 = vrcp.f32 %v5624_v53  ;;  %v5622_v56 = vadd.f32 1.0, %v7501_v43  ;;  %v5446_v10 = vmul.f32 %v8694_v47, %v5331_v13  ;;  %v5449_v59 = vmul.f32 %v8694_v47, %v5334_v37 }
 0x20e   : > { %7520 = vpow2.f32 %v5571_v29  ;;  %v5567_v1 = vmul.f32 1.442695, %v5522_v34  ;;  %v5527_v21 = vsub.f32 0.0, %v5491_v39  ;;  %v4796_v12 = vadd.f32 %v4691_v44, %v8629_v55  ;;  %v4704_v0 = vpop.f32.mrf.mxu1 }
 0x20f   : > { %v8756_v49 = vpop.f32.mrf.mxu0  ;;  %v7503_v2 = vpop.eup %7502  ;;  %7522 = vrcp.f32 %v5622_v56  ;;  %v5489_v61 = vadd.f32 %v8700_v4, %v5446_v10  ;;  %v5492_v54 = vadd.f32 %v8700_v4, %v5449_v59  ;;  %v4801_v50 = vadd.f32 %v7156_v38, %v8632_v7 }
 0x210   : > { %v5627_v6 = vadd.f32 1.0, %v7503_v2  ;;  %7524 = vpow2.f32 %v5567_v1  ;;  %v5577_v15 = vmul.f32 1.442695, %v5527_v21  ;;  %v5332_v22 = vadd.f32 %v8728_v28, %v4796_v12  ;;  %v7157_v5 = vpop.f32.mrf.mxu1 }
 0x211   : > { %v8762_v57 = vpop.f32.mrf.mxu0  ;;  %v7505_v55 = vpop.eup %7504  ;;  %v5525_v40 = vsub.f32 0.0, %v5489_v61  ;;  %v5528_v20 = vsub.f32 0.0, %v5492_v54  ;;  %v5337_v45 = vadd.f32 %v8733_v30, %v4801_v50  ;;  %v4799_v18 = vadd.f32 %v4704_v0, %v8635_v58 }
 0x212   : > { %7526 = vrcp.f32 %v5627_v6  ;;  %v5625_v63 = vadd.f32 1.0, %v7505_v55  ;;  %v5447_v51 = vmul.f32 %v8694_v47, %v5332_v22  ;;  %v4802_v7 = vadd.f32 %v7157_v5, %v8638_v27  ;;  %v4707_v62 = vpop.f32.mrf.mxu1 }
 0x213   : > { %v8768_v41 = vpop.f32.mrf.mxu0  ;;  %v7507_v28 = vpop.eup %7506  ;;  %7528 = vpow2.f32 %v5577_v15  ;;  %v5573_v31 = vmul.f32 1.442695, %v5525_v40  ;;  %v5579_v44 = vmul.f32 1.442695, %v5528_v20  ;;  %v5452_v53 = vmul.f32 %v8694_v47, %v5337_v45 }
 0x214   : > { %v7509_v13 = vpop.eup %7508  ;;  %7530 = vrcp.f32 %v5625_v63  ;;  %v5628_v30 = vadd.f32 1.0, %v7507_v28  ;;  %v5490_v58 = vadd.f32 %v8700_v4, %v5447_v51  ;;  %v5335_v37 = vadd.f32 %v8738_v17, %v4799_v18  ;;  %v7160_v43 = vpop.f32.mrf.mxu1 }
 0x215   : > { %v8773_v29 = vpop.f32.mrf.mxu0  ;;  %v5626_v27 = vadd.f32 1.0, %v7509_v13  ;;  %7532 = vpow2.f32 %v5573_v31  ;;  %v5495_v34 = vadd.f32 %v8700_v4, %v5452_v53  ;;  %v5338_v39 = vadd.f32 %v8743_v46, %v4802_v7 }
 0x216   : > { %v7511_v38 = vpop.eup %7510  ;;  %7534 = vrcp.f32 %v5628_v30  ;;  %v5526_v56 = vsub.f32 0.0, %v5490_v58  ;;  %v5450_v10 = vmul.f32 %v8694_v47, %v5335_v37  ;;  %v4800_v59 = vadd.f32 %v4707_v62, %v8641_v26  ;;  %v4720_v1 = vpop.f32.mrf.mxu1 }
 0x217   : > { %v8780_v21 = vpop.f32.mrf.mxu0  ;;  %v7513_v17 = vpop.eup %7512  ;;  %7536 = vrcp.f32 %v5626_v27  ;;  %v5531_v12 = vsub.f32 0.0, %v5495_v34  ;;  %v5453_v0 = vmul.f32 %v8694_v47, %v5338_v39  ;;  %v4805_v2 = vadd.f32 %v7160_v43, %v8644_v9 }
 0x218   : > { %v7515_v61 = vpop.eup %7514  ;;  %v5631_v46 = vadd.f32 1.0, %v7513_v17  ;;  %7538 = vpow2.f32 %v5579_v44  ;;  %v5575_v54 = vmul.f32 1.442695, %v5526_v56  ;;  %v5493_v50 = vadd.f32 %v8700_v4, %v5450_v10  ;;  %v7161_v6 = vpop.f32.mrf.mxu1 }
 0x219   : > { %v8785_v15 = vpop.f32.mrf.mxu0  ;;  %v7517_v26 = vpop.eup %7516  ;;  %v5585_v22 = vmul.f32 1.442695, %v5531_v12  ;;  %v5496_v5 = vadd.f32 %v8700_v4, %v5453_v0  ;;  %v5336_v55 = vadd.f32 %v8748_v60, %v4800_v59  ;;  %v5341_v40 = vadd.f32 %v8751_v8, %v4805_v2 }
 0x21a   : > { %v7519_v20 = vpop.eup %7518  ;;  %7540 = vrcp.f32 %v5631_v46  ;;  %v5629_v9 = vadd.f32 1.0, %v7517_v26  ;;  %v5529_v45 = vsub.f32 0.0, %v5493_v50  ;;  %v4803_v18 = vadd.f32 %v4720_v1, %v8647_v52  ;;  %v4723_v63 = vpop.f32.mrf.mxu1 }
 0x21b   : > { %v7521_v51 = vpop.eup %7520  ;;  %v6425_v7 = vpack.c.bf16 %v7519_v20, %v7511_v38  ;;  %7542 = vpow2.f32 %v5575_v54  ;;  %v5532_v62 = vsub.f32 0.0, %v5496_v5  ;;  %v5451_v60 = vmul.f32 %v8694_v47, %v5336_v55  ;;  %v8798_v13 = vpop.f32.mrf.mxu0 }
 0x21c   : > { %v7523_v8 = vpop.eup %7522  ;;  %7544 = vrcp.f32 %v5629_v9  ;;  %v5632_v28 = vadd.f32 1.0, %v7521_v51  ;;  %v5581_v31 = vmul.f32 1.442695, %v5529_v45  ;;  %v5456_v44 = vmul.f32 %v8694_v47, %v5341_v40  ;;  %v7164_v53 = vpop.f32.mrf.mxu1 }
 0x21d   : > { %v7525_v30 = vpop.eup %7524  ;;  %6507 = vst [vmem:[%s8793_s6 + $0x8] sm:$0xff] %v6425_v7   ;;  %v6420_v52 = vpack.c.bf16 %v7523_v8, %v7515_v61  ;;  %7546 = vpow2.f32 %v5585_v22  ;;  %v5587_v58 = vmul.f32 1.442695, %v5532_v62  ;;  %v5494_v37 = vadd.f32 %v8700_v4, %v5451_v60  ;;  %v8809_v61 = vpop.f32.mrf.mxu0 }
 0x21e   : > { %7548 = vrcp.f32 %v5632_v28  ;;  %v5630_v43 = vadd.f32 1.0, %v7525_v30  ;;  %v5499_v27 = vadd.f32 %v8700_v4, %v5456_v44  ;;  %v5339_v34 = vadd.f32 %v8756_v49, %v4803_v18  ;;  %v4736_v39 = vpop.f32.mrf.mxu1 }
 0x21f   : > { %v7527_v38 = vpop.eup %7526  ;;  %6421 = vst [vmem:[%s8793_s6] sm:$0xff] %v6420_v52   ;;  %7550 = vpow2.f32 %v5581_v31  ;;  %v5530_v56 = vsub.f32 0.0, %v5494_v37  ;;  %v4806_v10 = vadd.f32 %v7161_v6, %v8650_v36  ;;  %v4804_v59 = vadd.f32 %v4723_v63, %v8653_v33  ;;  %v8818_v63 = vpop.f32.mrf.mxu0 }
 0x220   : > { %v7529_v1 = vpop.eup %7528  ;;  %7552 = vrcp.f32 %v5630_v43  ;;  %v5535_v17 = vsub.f32 0.0, %v5499_v27  ;;  %v5454_v12 = vmul.f32 %v8694_v47, %v5339_v34  ;;  %v4809_v0 = vadd.f32 %v7164_v53, %v8656_v32  ;;  %v7165_v2 = vpop.f32.mrf.mxu1 }
 0x221   : > { %v7531_v49 = vpop.eup %7530  ;;  %v5635_v46 = vadd.f32 1.0, %v7529_v1  ;;  %7554 = vpow2.f32 %v5587_v58  ;;  %v5583_v54 = vmul.f32 1.442695, %v5530_v56  ;;  %v5342_v50 = vadd.f32 %v8762_v57, %v4806_v10  ;;  %v7221_v34 = vpop.f32.mrf.mxu0 }
 0x222   : > { %v7533_v26 = vpop.eup %7532  ;;  %v5593_v36 = vmul.f32 1.442695, %v5535_v17  ;;  %v5497_v33 = vadd.f32 %v8700_v4, %v5454_v12  ;;  %v5340_v6 = vadd.f32 %v8768_v41, %v4804_v59  ;;  %v5345_v22 = vadd.f32 %v8773_v29, %v4809_v0  ;;  %v4739_v5 = vpop.f32.mrf.mxu1 }
 0x223   : > { %v7535_v55 = vpop.eup %7534  ;;  %7556 = vrcp.f32 %v5635_v46  ;;  %v5633_v32 = vadd.f32 1.0, %v7533_v26  ;;  %v5457_v40 = vmul.f32 %v8694_v47, %v5342_v50  ;;  %v4807_v20 = vadd.f32 %v4736_v39, %v8659_v11 }
 0x224   : > { %v7537_v9 = vpop.eup %7536  ;;  %v6435_v45 = vpack.c.bf16 %v7535_v55, %v7527_v38  ;;  %7558 = vpow2.f32 %v5583_v54  ;;  %v5533_v57 = vsub.f32 0.0, %v5497_v33  ;;  %v5455_v18 = vmul.f32 %v8694_v47, %v5340_v6  ;;  %v7168_v41 = vpop.f32.mrf.mxu1 }
 0x225   : > { %v7539_v29 = vpop.eup %7538  ;;  %v6430_v51 = vpack.c.bf16 %v7537_v9, %v7531_v49  ;;  %7560 = vrcp.f32 %v5633_v32  ;;  %v5500_v7 = vadd.f32 %v8700_v4, %v5457_v40  ;;  %v5460_v62 = vmul.f32 %v8694_v47, %v5345_v22 }
 0x226   : > { %6509 = vst [vmem:[%s8793_s6 + $0x18] sm:$0xff] %v6435_v45   ;;  %v5636_v60 = vadd.f32 1.0, %v7539_v29  ;;  %7562 = vpow2.f32 %v5593_v36  ;;  %v5589_v11 = vmul.f32 1.442695, %v5533_v57  ;;  %v5498_v8 = vadd.f32 %v8700_v4, %v5455_v18  ;;  %v4752_v28 = vpop.f32.mrf.mxu1  ;;  %v5291_v36 = vpop.f32.mrf.mxu0 }
 0x227   : > { %v7541_v31 = vpop.eup %7540  ;;  %6508 = vst [vmem:[%s8793_s6 + $0x10] sm:$0xff] %v6430_v51   ;;  %v5536_v44 = vsub.f32 0.0, %v5500_v7  ;;  %v5503_v53 = vadd.f32 %v8700_v4, %v5460_v62  ;;  %v5343_v30 = vadd.f32 %v8780_v21, %v4807_v20  ;;  %v4810_v52 = vadd.f32 %v7165_v2, %v8662_v19 }
 0x228   : > { %v7543_v58 = vpop.eup %7542  ;;  %7564 = vrcp.f32 %v5636_v60  ;;  %v5534_v37 = vsub.f32 0.0, %v5498_v8  ;;  %v4808_v43 = vadd.f32 %v4739_v5, %v8665_v35  ;;  %v4813_v27 = vadd.f32 %v7168_v41, %v8668_v24  ;;  %v7169_v39 = vpop.f32.mrf.mxu1 }
 0x229   : > { %v7545_v38 = vpop.eup %7544  ;;  %v5634_v56 = vadd.f32 1.0, %v7543_v58  ;;  %7566 = vpow2.f32 %v5589_v11  ;;  %v5595_v10 = vmul.f32 1.442695, %v5536_v44  ;;  %v5539_v59 = vsub.f32 0.0, %v5503_v53  ;;  %v7224_v29 = vpop.f32.mrf.mxu0 }
 0x22a   : > { %v7547_v1 = vpop.eup %7546  ;;  %v5591_v17 = vmul.f32 1.442695, %v5534_v37  ;;  %v5458_v21 = vmul.f32 %v8694_v47, %v5343_v30  ;;  %v5346_v19 = vadd.f32 %v8785_v15, %v4810_v52  ;;  %v5344_v12 = vadd.f32 %v8798_v13, %v4808_v43  ;;  %v4755_v0 = vpop.f32.mrf.mxu1 }
 0x22b   : > { %v7549_v2 = vpop.eup %7548  ;;  %7568 = vrcp.f32 %v5634_v56  ;;  %v5639_v35 = vadd.f32 1.0, %v7547_v1  ;;  %v5601_v24 = vmul.f32 1.442695, %v5539_v59  ;;  %v5349_v49 = vadd.f32 %v8809_v61, %v4813_v27  ;;  %v5304_v27 = vpop.f32.mrf.mxu0 }
 0x22c   : > { %v7551_v46 = vpop.eup %7550  ;;  %v6445_v54 = vpack.c.bf16 %v7549_v2, %v7541_v31  ;;  %7570 = vpow2.f32 %v5595_v10  ;;  %v5501_v50 = vadd.f32 %v8700_v4, %v5458_v21  ;;  %v5461_v26 = vmul.f32 %v8694_v47, %v5346_v19  ;;  %v7172_v33 = vpop.f32.mrf.mxu1 }
 0x22d   : > { %v7553_v15 = vpop.eup %7552  ;;  %7572 = vrcp.f32 %v5639_v35  ;;  %v5637_v13 = vadd.f32 1.0, %v7551_v46  ;;  %v5459_v6 = vmul.f32 %v8694_v47, %v5344_v12  ;;  %v5464_v22 = vmul.f32 %v8694_v47, %v5349_v49 }
 0x22e   : > { %v7555_v5 = vpop.eup %7554  ;;  %6511 = vst [vmem:[%s8793_s6 + $0x28] sm:$0xff] %v6445_v54   ;;  %v6440_v61 = vpack.c.bf16 %v7553_v15, %v7545_v38  ;;  %7574 = vpow2.f32 %v5591_v17  ;;  %v5537_v55 = vsub.f32 0.0, %v5501_v50  ;;  %v5504_v32 = vadd.f32 %v8700_v4, %v5461_v26  ;;  %v4768_v51 = vpop.f32.mrf.mxu1 }
 0x22f   : > { %7576 = vrcp.f32 %v5637_v13  ;;  %v5640_v40 = vadd.f32 1.0, %v7555_v5  ;;  %v5502_v20 = vadd.f32 %v8700_v4, %v5459_v6  ;;  %v5507_v9 = vadd.f32 %v8700_v4, %v5464_v22 }
 0x230   : > { %v7557_v45 = vpop.eup %7556  ;;  %6510 = vst [vmem:[%s8793_s6 + $0x20] sm:$0xff] %v6440_v61   ;;  %7578 = vpow2.f32 %v5601_v24  ;;  %v5597_v57 = vmul.f32 1.442695, %v5537_v55  ;;  %v5540_v18 = vsub.f32 0.0, %v5504_v32  ;;  %v4811_v41 = vadd.f32 %v4752_v28, %v8671_v48 }
 0x231   : > { %v7559_v7 = vpop.eup %7558  ;;  %7580 = vrcp.f32 %v5640_v40  ;;  %v5538_v62 = vsub.f32 0.0, %v5502_v20  ;;  %v5543_v60 = vsub.f32 0.0, %v5507_v9  ;;  %v4814_v11 = vadd.f32 %v7169_v39, %v8674_v42  ;;  %v7173_v42 = vpop.f32.mrf.mxu1 }
 0x232   : > { %v7561_v8 = vpop.eup %7560  ;;  %v5638_v31 = vadd.f32 1.0, %v7559_v7  ;;  %7582 = vpow2.f32 %v5597_v57  ;;  %v5603_v44 = vmul.f32 1.442695, %v5540_v18  ;;  %v5347_v53 = vadd.f32 %v8818_v63, %v4811_v41 }
 0x233   : > { %v7563_v30 = vpop.eup %7562  ;;  %v5599_v52 = vmul.f32 1.442695, %v5538_v62  ;;  %v5609_v58 = vmul.f32 1.442695, %v5543_v60  ;;  %v5350_v37 = vadd.f32 %v7221_v34, %v4814_v11  ;;  %v4812_v48 = vadd.f32 %v4755_v0, %v8677_v14  ;;  %v4771_v35 = vpop.f32.mrf.mxu1 }
 0x234   : > { %7584 = vrcp.f32 %v5638_v31  ;;  %v5643_v28 = vadd.f32 1.0, %v7563_v30  ;;  %v5462_v43 = vmul.f32 %v8694_v47, %v5347_v53  ;;  %v4817_v38 = vadd.f32 %v7172_v33, %v8680_v16 }
 0x235   : > { %v7565_v39 = vpop.eup %7564  ;;  %7586 = vpow2.f32 %v5603_v44  ;;  %v5465_v56 = vmul.f32 %v8694_v47, %v5350_v37  ;;  %v5348_v63 = vadd.f32 %v5291_v36, %v4812_v48  ;;  %v4815_v10 = vadd.f32 %v4768_v51, %v8683_v25  ;;  %v7225_v25 = vpop.f32.mrf.mxu0 }
 0x236   : > { %v7567_v59 = vpop.eup %7566  ;;  %v6455_v34 = vpack.c.bf16 %v7565_v39, %v7557_v45  ;;  %7588 = vrcp.f32 %v5643_v28  ;;  %v5505_v14 = vadd.f32 %v8700_v4, %v5462_v43  ;;  %v5353_v1 = vadd.f32 %v7224_v29, %v4817_v38 }
 0x237   : > { %v5641_v17 = vadd.f32 1.0, %v7567_v59  ;;  %7590 = vpow2.f32 %v5599_v52  ;;  %v5508_v21 = vadd.f32 %v8700_v4, %v5465_v56  ;;  %v5463_v16 = vmul.f32 %v8694_v47, %v5348_v63  ;;  %v5307_v9 = vpop.f32.mrf.mxu0 }
 0x238   : > { %v7569_v19 = vpop.eup %7568  ;;  %6513 = vst [vmem:[%s8793_s6 + $0x38] sm:$0xff] %v6455_v34   ;;  %7592 = vpow2.f32 %v5609_v58  ;;  %v5541_v12 = vsub.f32 0.0, %v5505_v14  ;;  %v5468_v0 = vmul.f32 %v8694_v47, %v5353_v1  ;;  %v5351_v2 = vadd.f32 %v5304_v27, %v4815_v10 }
 0x239   : > { %v7571_v24 = vpop.eup %7570  ;;  %v6450_v49 = vpack.c.bf16 %v7569_v19, %v7561_v8  ;;  %7594 = vrcp.f32 %v5641_v17  ;;  %v5544_v46 = vsub.f32 0.0, %v5508_v21  ;;  %v5506_v54 = vadd.f32 %v8700_v4, %v5463_v16 }
 0x23a   : > { %v7573_v50 = vpop.eup %7572  ;;  %v5644_v26 = vadd.f32 1.0, %v7571_v24  ;;  %v5605_v36 = vmul.f32 1.442695, %v5541_v12  ;;  %v5511_v33 = vadd.f32 %v8700_v4, %v5468_v0  ;;  %v5466_v15 = vmul.f32 %v8694_v47, %v5351_v2 }
 0x23b   : > { %v7575_v13 = vpop.eup %7574  ;;  %6512 = vst [vmem:[%s8793_s6 + $0x30] sm:$0xff] %v6450_v49   ;;  %v5611_v6 = vmul.f32 1.442695, %v5544_v46  ;;  %v5542_v22 = vsub.f32 0.0, %v5506_v54  ;;  %v4818_v5 = vadd.f32 %v7173_v42, %v8686_v3  ;;  %v4816_v61 = vadd.f32 %v4771_v35, %v8689_v23 }
 0x23c   : > { %v7577_v55 = vpop.eup %7576  ;;  %7596 = vrcp.f32 %v5644_v26  ;;  %v5642_v32 = vadd.f32 1.0, %v7575_v13  ;;  %v5547_v40 = vsub.f32 0.0, %v5511_v33  ;;  %v5509_v20 = vadd.f32 %v8700_v4, %v5466_v15 }
 0x23d   : > { %v7579_v45 = vpop.eup %7578  ;;  %7598 = vpow2.f32 %v5605_v36  ;;  %v5607_v57 = vmul.f32 1.442695, %v5542_v22  ;;  %v5354_v18 = vadd.f32 %v7225_v25, %v4818_v5  ;;  %v5352_v41 = vadd.f32 %v5307_v9, %v4816_v61 }
 0x23e   : > { %v7581_v29 = vpop.eup %7580  ;;  %7600 = vrcp.f32 %v5642_v32  ;;  %v5647_v51 = vadd.f32 1.0, %v7579_v45  ;;  %v5617_v7 = vmul.f32 1.442695, %v5547_v40  ;;  %v5545_v3 = vsub.f32 0.0, %v5509_v20 }
 0x23f   : > { %v7583_v62 = vpop.eup %7582  ;;  %v6465_v23 = vpack.c.bf16 %v7581_v29, %v7573_v50  ;;  %7602 = vpow2.f32 %v5611_v6  ;;  %v5469_v60 = vmul.f32 %v8694_v47, %v5354_v18  ;;  %v5467_v11 = vmul.f32 %v8694_v47, %v5352_v41 }
 0x240   : > { %v5613_v8 = vmul.f32 1.442695, %v5545_v3  ;;  %7604 = vpow2.f32 %v5607_v57  ;;  %v5645_v58 = vadd.f32 1.0, %v7583_v62 }
 0x241   : > { %v7585_v31 = vpop.eup %7584  ;;  %6515 = vst [vmem:[%s8793_s6 + $0x48] sm:$0xff] %v6465_v23   ;;  %v5512_v44 = vadd.f32 %v8700_v4, %v5469_v60  ;;  %v5510_v53 = vadd.f32 %v8700_v4, %v5467_v11  ;;  %7606 = vrcp.f32 %v5647_v51 }
 0x242   : > { %v7587_v30 = vpop.eup %7586  ;;  %v6460_v52 = vpack.c.bf16 %v7585_v31, %v7577_v55  ;;  %7608 = vpow2.f32 %v5617_v7 }
 0x243   : > { %v7589_v37 = vpop.eup %7588  ;;  %v5648_v48 = vadd.f32 1.0, %v7587_v30  ;;  %v5548_v28 = vsub.f32 0.0, %v5512_v44  ;;  %v5546_v43 = vsub.f32 0.0, %v5510_v53  ;;  %7610 = vpow2.f32 %v5613_v8 }
 0x244   : > { %v7591_v27 = vpop.eup %7590  ;;  %6514 = vst [vmem:[%s8793_s6 + $0x40] sm:$0xff] %v6460_v52  }
 0x245   : > { %v7593_v47 = vpop.eup %7592  ;;  %7612 = vrcp.f32 %v5648_v48  ;;  %v5646_v38 = vadd.f32 1.0, %v7591_v27  ;;  %v5619_v42 = vmul.f32 1.442695, %v5548_v28  ;;  %v5615_v4 = vmul.f32 1.442695, %v5546_v43 }
 0x246   : > { %v7595_v39 = vpop.eup %7594  ;;  %7614 = vrcp.f32 %v5645_v58  ;;  %v5651_v59 = vadd.f32 1.0, %v7593_v47 }
 0x247   : > { %7616 = vrcp.f32 %v5646_v38 }
 0x248   : > { %7618 = vpow2.f32 %v5619_v42 }
 0x249   : > { %v7597_v56 = vpop.eup %7596  ;;  %7620 = vpow2.f32 %v5615_v4 }
 0x24a   : > { %v7599_v63 = vpop.eup %7598  ;;  %v6475_v10 = vpack.c.bf16 %v7597_v56, %v7589_v37  ;;  %7622 = vrcp.f32 %v5651_v59 }
 0x24b   : > { %v7601_v34 = vpop.eup %7600  ;;  %v5649_v17 = vadd.f32 1.0, %v7599_v63 }
 0x24c   : > { %v7603_v14 = vpop.eup %7602  ;;  %6517 = vst [vmem:[%s8793_s6 + $0x58] sm:$0xff] %v6475_v10   ;;  %v6470_v1 = vpack.c.bf16 %v7601_v34, %v7595_v39 }
 0x24d   : > { %v5652_v21 = vadd.f32 1.0, %v7603_v14  ;;  %v7605_v16 = vpop.eup %7604 }
 0x24e   : > { %6516 = vst [vmem:[%s8793_s6 + $0x50] sm:$0xff] %v6470_v1   ;;  %v7607_v19 = vpop.eup %7606  ;;  %v5650_v12 = vadd.f32 1.0, %v7605_v16 }
 0x24f   : > { %7624 = vrcp.f32 %v5652_v21  ;;  %v7609_v0 = vpop.eup %7608 }
 0x250   : > { %7626 = vrcp.f32 %v5649_v17  ;;  %v7611_v25 = vpop.eup %7610  ;;  %v5655_v49 = vadd.f32 1.0, %v7609_v0 }
 0x251   : > { %7628 = vrcp.f32 %v5650_v12  ;;  %v5653_v54 = vadd.f32 1.0, %v7611_v25 }
 0x252   : > { %v7613_v2 = vpop.eup %7612  ;;  %7630 = vrcp.f32 %v5655_v49 }
 0x253   : > { %v7615_v35 = vpop.eup %7614  ;;  %v6485_v24 = vpack.c.bf16 %v7613_v2, %v7607_v19  ;;  %7632 = vrcp.f32 %v5653_v54 }
 0x254   : > { %v7617_v46 = vpop.eup %7616 }
 0x255   : > { %6519 = vst [vmem:[%s8793_s6 + $0x68] sm:$0xff] %v6485_v24   ;;  %v6480_v50 = vpack.c.bf16 %v7617_v46, %v7615_v35  ;;  %v7619_v26 = vpop.eup %7618 }
 0x256   : > { %v7621_v36 = vpop.eup %7620  ;;  %v5656_v33 = vadd.f32 1.0, %v7619_v26 }
 0x257   : > { %6518 = vst [vmem:[%s8793_s6 + $0x60] sm:$0xff] %v6480_v50   ;;  %v5654_v15 = vadd.f32 1.0, %v7621_v36  ;;  %v7623_v13 = vpop.eup %7622 }
 0x258   : > { %7634 = vrcp.f32 %v5656_v33 }
 0x259   : > { %7636 = vrcp.f32 %v5654_v15 }
 0x25c   : > { %v7625_v6 = vpop.eup %7624 }
 0x25d   : > { %v7627_v22 = vpop.eup %7626  ;;  %v6495_v5 = vpack.c.bf16 %v7625_v6, %v7623_v13 }
 0x25e   : > { %v7629_v61 = vpop.eup %7628 }
 0x25f   : > { %6521 = vst [vmem:[%s8793_s6 + $0x78] sm:$0xff] %v6495_v5   ;;  %v6490_v55 = vpack.c.bf16 %v7629_v61, %v7627_v22  ;;  %v7631_v32 = vpop.eup %7630 }
 0x260   : > { %v7633_v40 = vpop.eup %7632 }
 0x261   : > { %6520 = vst [vmem:[%s8793_s6 + $0x70] sm:$0xff] %v6490_v55  }
 0x265   : > { %v7635_v20 = vpop.eup %7634 }
 0x266   : > { %v7637_v9 = vpop.eup %7636  ;;  %v6505_v45 = vpack.c.bf16 %v7635_v20, %v7631_v32 }
 0x267   : > { %v6500_v57 = vpack.c.bf16 %v7637_v9, %v7633_v40 }
 0x268   : > { %6523 = vst [vmem:[%s8793_s6 + $0x88] sm:$0xff] %v6505_v45  }
 0x269   : > { %6522 = vst [vmem:[%s8793_s6 + $0x80] sm:$0xff] %v6500_v57  }
 0x26a PF: > { %s14_s15 = sadd.s32 1, %s7644_s15  }
 0x26b   : > { %p11_p4 = scmp.ge.s32.totalorder %s14_s15, 6  }
 0x26d   :  { %13 = sbr.rel (!%p11_p4) target bundleno = 1 (0x1), region = 74 }

</bundles_post_ra>
